<compile_context>
chip_gen: v5e
topology: v5e:2x2
jax: 0.10.0
libtpu: 0.0.40
codegen_flags: <defaults>
</compile_context>

<pallas_src>
import numpy as np
import jax
import jax.numpy as jnp
from jax.experimental import pallas as pl
from jax.experimental.pallas import tpu as pltpu

BN_EPS = 1e-5

_VMEM = pl.BlockSpec(memory_space=pltpu.MemorySpace.VMEM)
_SMEM = pl.BlockSpec(memory_space=pltpu.MemorySpace.SMEM)


# ----------------------------------------------------------------------------
# Kernel 1: fused LFLB cell
#   Conv2d(3x3, stride 1, 'same' zero pad) + bias + BatchNorm2d(train) + ReLU + MaxPool 2x2/2
#   Single grid-less invocation, whole batch; conv activations never leave vregs/VMEM.
# ----------------------------------------------------------------------------
def make_lflb_kernel(B, Cin, Cout, F, T, KH, KW, ph, pw):
    Fo, To = F + 2 * ph - KH + 1, T + 2 * pw - KW + 1
    Fp_, Tp_ = Fo // 2, To // 2
    inv_n = 1.0 / float(B * Fo * To)

    def kernel(x_ref, w_ref, b_ref, gamma_ref, beta_ref, out_ref, xp_scr):
        # x_ref   : (B, Cin, F, T)          VMEM, NCHW (time = lane axis)
        # w_ref   : (Cout*Cin*KH*KW,)       SMEM scalar taps, row-major (Cout, Cin, KH, KW)
        # b/gamma/beta : (Cout,)            SMEM per-channel scalars
        # out_ref : (B, Cout, Fp_, Tp_)     VMEM
        # xp_scr  : (B, Cin, F+2ph, T+2pw)  VMEM zero-padded copy (padding folded in-kernel)

        # Fold the zero padding in-kernel: no padded HBM copy of the input.
        xp_scr[...] = jnp.zeros_like(xp_scr)
        xp_scr[:, :, ph:ph + F, pw:pw + T] = x_ref[...]

        # Hoist the Cin*KH*KW shifted input slabs; reused for every output channel.
        slabs = []
        for ci in range(Cin):
            for kh in range(KH):
                for kw in range(KW):
                    slabs.append(xp_scr[:, ci, kh:kh + Fo, kw:kw + To])  # (B, Fo, To)

        for co in range(Cout):
            # Conv: channel/window mixing as VPU FMAs (Cout <= 8 would starve the MXU).
            acc = jnp.zeros((B, Fo, To), jnp.float32)
            base = co * Cin * KH * KW
            for idx, slab in enumerate(slabs):
                acc = acc + w_ref[base + idx] * slab
            acc = acc + b_ref[co]

            # Training-mode BatchNorm2d statistics over (B, Fo, To) -- two-pass mean/var.
            mean = jnp.sum(acc) * inv_n
            d = acc - mean
            var = jnp.sum(d * d) * inv_n
            scale = gamma_ref[co] * jax.lax.rsqrt(var + BN_EPS)
            y = jnp.maximum(d * scale + beta_ref[co], 0.0)            # (B, Fo, To)

            # MaxPool 2x2 / stride 2, fully in-register (no scratch round-trip, no per-row
            # Python store loop): frequency pairs via a sublane split, time pairs via a
            # lane split, each followed by a max-reduce over the size-2 axis.
            yf = jnp.max(y.reshape(B, Fp_, 2, To), axis=2)            # (B, Fp_, To)
            pooled = jnp.max(yf.reshape(B, Fp_, Tp_, 2), axis=3)      # (B, Fp_, Tp_)
            out_ref[:, co] = pooled

    return kernel


def lflb_forward(x, lp):
    """One LFLB cell, NCHW in / NCHW out: (B, Cin, F, T) -> (B, Cout, F//2, T//2)."""
    B, Cin, F, T = x.shape
    w = lp["w"]                                   # (Cout, Cin, KH, KW) -- torch OIHW layout
    Cout, _, KH, KW = w.shape
    ph, pw = (KH - 1) // 2, (KW - 1) // 2         # padding_cnn (stride 1)
    Fo, To = F + 2 * ph - KH + 1, T + 2 * pw - KW + 1
    Fp_, Tp_ = Fo // 2, To // 2                   # MaxPool floor mode (even here)

    return pl.pallas_call(
        make_lflb_kernel(B, Cin, Cout, F, T, KH, KW, ph, pw),
        out_shape=jax.ShapeDtypeStruct((B, Cout, Fp_, Tp_), jnp.float32),
        in_specs=[_VMEM, _SMEM, _SMEM, _SMEM, _SMEM],
        out_specs=_VMEM,
        scratch_shapes=[pltpu.VMEM((B, Cin, F + 2 * ph, T + 2 * pw), jnp.float32)],
    )(x, w.reshape(-1), lp["b"], lp["gamma"], lp["beta"])


# ----------------------------------------------------------------------------
# Kernel 2: LSTM (single layer, unidirectional, zero initial state) in ONE kernel.
#   - hoisted input projection for all steps: one (T*B, Din) @ (Din, 4H=128) MXU matmul
#   - lax.fori_loop recurrence over time (no per-step grid launch / DMA)
# ----------------------------------------------------------------------------
def _sigmoid(z):
    # exp and the reciprocal both land on the EUP slot (approx rcp ~2^-12 rel err; use
    # approx=False if bit-closeness to the framework reference matters).
    return pl.reciprocal(1.0 + jnp.exp(-z), approx=True)


def lstm_kernel(x_ref, wih_ref, whh_ref, b_ref, out_ref, xg_scr):
    # x_ref  : (T, B, Din)   time-major features
    # wih_ref: (Din, 4H), whh_ref: (H, 4H), b_ref: (1, 4H)   gates stacked [i | f | g | o]
    # out_ref: (T, B, H)     VMEM-resident; written back to HBM once at kernel end
    # xg_scr : (T, B, 4H)    VMEM scratch holding x_t @ Wih + b for every step
    T, B, _ = x_ref.shape
    H = whh_ref.shape[0]
    G = 4 * H

    # Hoisted input projection: one lane-dense matmul for all time steps.
    xg = jnp.dot(x_ref[...].reshape(T * B, x_ref.shape[2]), wih_ref[...],
                 preferred_element_type=jnp.float32) + b_ref[...]
    xg_scr[...] = xg.reshape(T, B, G)

    def step(t, carry):
        h, c = carry
        g = xg_scr[t] + jnp.dot(h, whh_ref[...],
                                preferred_element_type=jnp.float32)   # (B, 4H)
        i = _sigmoid(g[:, 0:H])
        f = _sigmoid(g[:, H:2 * H])
        gg = jnp.tanh(g[:, 2 * H:3 * H])
        o = _sigmoid(g[:, 3 * H:4 * H])
        c_new = f * c + i * gg
        h_new = o * jnp.tanh(c_new)
        out_ref[t] = h_new
        return h_new, c_new

    z = jnp.zeros((B, H), jnp.float32)
    jax.lax.fori_loop(0, T, step, (z, z), unroll=True)


def lstm_forward(feat_tbd, lstm_p):
    """feat_tbd: (T, B, Din) -> (T, B, H)."""
    T, B, _ = feat_tbd.shape
    wih, whh, b = lstm_p["wih"], lstm_p["whh"], lstm_p["b"]   # (Din,4H), (H,4H), (1,4H)
    H = whh.shape[0]
    return pl.pallas_call(
        lstm_kernel,
        out_shape=jax.ShapeDtypeStruct((T, B, H), jnp.float32),
        in_specs=[_VMEM, _VMEM, _VMEM, _VMEM],
        out_specs=_VMEM,
        scratch_shapes=[pltpu.VMEM((T, B, 4 * H), jnp.float32)],
    )(feat_tbd, wih, whh, b)


# ----------------------------------------------------------------------------
# Full model forward (NCHW end-to-end; only two tiny XLA permutes around the LSTM)
# ----------------------------------------------------------------------------
def spectrogram_model_forward(x_nchw, params):
    """SpectrogramModel.forward: (B, Cin, F, T) -> (B, hidden_dim, T_out)."""
    x = x_nchw.astype(jnp.float32)                 # stays NCHW, no layout transpose
    for lp in params["lflb"]:
        x = lflb_forward(x, lp)
    B, C, F, T = x.shape
    # torch.flatten(x, 1, 2).permute(0, 2, 1): feature index = c*F + f.  Presented to the
    # LSTM kernel time-major so the in-kernel gate projection needs no further transpose.
    feat = jnp.transpose(x.reshape(B, C * F, T), (2, 0, 1))      # (T, B, C*F)
    out_tbh = lstm_forward(feat, params["lstm"])                 # (T, B, H)
    return jnp.transpose(out_tbh, (1, 2, 0))                     # (B, H, T)


# ----------------------------------------------------------------------------
# Deterministic parameter init + pure-JAX reference for verification
# ----------------------------------------------------------------------------
def init_params(key, in_channels=1, out_channels=(4, 8), hidden_dim=32, strideF_final=4):
    in_chs = [in_channels] + list(out_channels)
    lflb = []
    for i, cout in enumerate(out_channels):
        key, k1, k2, k3, k4 = jax.random.split(key, 5)
        cin = in_chs[i]
        lflb.append(dict(
            w=0.3 * jax.random.normal(k1, (cout, cin, 3, 3), jnp.float32),   # OIHW
            b=0.1 * jax.random.normal(k2, (cout,), jnp.float32),
            gamma=1.0 + 0.1 * jax.random.normal(k3, (cout,), jnp.float32),
            beta=0.1 * jax.random.normal(k4, (cout,), jnp.float32),
        ))
    din = out_channels[-1] * strideF_final
    H = hidden_dim
    key, k1, k2, k3 = jax.random.split(key, 4)
    lstm = dict(                                   # stacked gate blocks [i | f | g | o]
        wih=0.2 * jax.random.normal(k1, (din, 4 * H), jnp.float32),
        whh=0.2 * jax.random.normal(k2, (H, 4 * H), jnp.float32),
        b=0.1 * jax.random.normal(k3, (1, 4 * H), jnp.float32),
    )
    return dict(lflb=lflb, lstm=lstm)


def reference_forward(x_nchw, params):
    x = x_nchw.astype(jnp.float32)
    for lp in params["lflb"]:
        kh, kw = lp["w"].shape[2], lp["w"].shape[3]
        ph, pw = (kh - 1) // 2, (kw - 1) // 2
        x = jax.lax.conv_general_dilated(
            x, lp["w"], window_strides=(1, 1), padding=[(ph, ph), (pw, pw)],
            dimension_numbers=("NCHW", "OIHW", "NCHW"))
        x = x + lp["b"][None, :, None, None]
        mean = jnp.mean(x, axis=(0, 2, 3))
        var = jnp.mean((x - mean[None, :, None, None]) ** 2, axis=(0, 2, 3))
        x = (x - mean[None, :, None, None]) / jnp.sqrt(var[None, :, None, None] + BN_EPS)
        x = x * lp["gamma"][None, :, None, None] + lp["beta"][None, :, None, None]
        x = jnp.maximum(x, 0.0)
        b_, c_, f_, t_ = x.shape
        x = x.reshape(b_, c_, f_ // 2, 2, t_ // 2, 2).max(axis=(3, 5))
    b_, c_, f_, t_ = x.shape
    feat = x.reshape(b_, c_ * f_, t_).transpose(0, 2, 1)          # (B, T, C*F)
    wih, whh, bias = params["lstm"]["wih"], params["lstm"]["whh"], params["lstm"]["b"]
    H = whh.shape[0]
    h = jnp.zeros((b_, H), jnp.float32)
    c = jnp.zeros((b_, H), jnp.float32)

    def sig(z):
        return 1.0 / (1.0 + jnp.exp(-z))

    outs = []
    for t in range(t_):
        g = feat[:, t, :] @ wih + h @ whh + bias
        i = sig(g[:, 0:H])
        f = sig(g[:, H:2 * H])
        gg = jnp.tanh(g[:, 2 * H:3 * H])
        o = sig(g[:, 3 * H:4 * H])
        c = f * c + i * gg
        h = o * jnp.tanh(c)
        outs.append(h)
    out = jnp.stack(outs, axis=1)                                 # (B, T, H)
    return jnp.transpose(out, (0, 2, 1))                          # (B, H, T)


if __name__ == "__main__":
    key = jax.random.PRNGKey(0)
    pkey, xkey = jax.random.split(key)

    # Config: in_channels=1, out_channels=[4, 8], kernel_cnn=(3,3) stride 1, pool 2x2/2,
    #         hidden_dim=32, num_layers=1 (no dropout), nfft=64 -> freq dim = nfft//4 = 16.
    nfft = 64
    B, Cin, F, T = 2, 1, nfft // 4, 16
    hidden_dim = 32

    params = init_params(pkey, in_channels=Cin, out_channels=(4, 8),
                         hidden_dim=hidden_dim, strideF_final=4)
    x = jax.random.normal(xkey, (B, Cin, F, T), jnp.float32)

    out = spectrogram_model_forward(x, params)
    out = jax.block_until_ready(out)

    assert out.shape == (B, hidden_dim, 4), out.shape
    ref = reference_forward(x, params)
    np.testing.assert_allclose(np.asarray(out), np.asarray(ref), rtol=2e-3, atol=2e-3)
    print("KERNEL_OK")
</pallas_src>

<mosaic_0001>
module attributes {stable_mosaic.version = 11 : i64} {
  func.func @kernel(%arg0: memref<2x1x16x16xf32, #tpu.memory_space<vmem>>, %arg1: memref<36xf32, #tpu.memory_space<smem>>, %arg2: memref<4xf32, #tpu.memory_space<smem>>, %arg3: memref<4xf32, #tpu.memory_space<smem>>, %arg4: memref<4xf32, #tpu.memory_space<smem>>, %arg5: memref<2x4x8x8xf32, #tpu.memory_space<vmem>>, %arg6: memref<2x1x18x18xf32, #tpu.memory_space<vmem>>) attributes {dimension_semantics = [], scalar_prefetch = 0 : i64, scratch_operands = 1 : i64, tpu.core_type = #tpu.core_type<tc>} {
    %cst = arith.constant 0.000000e+00 : f32
    %0 = vector.broadcast %cst : f32 to vector<2x1x18x18xf32>
    %c0 = arith.constant 0 : index
    %c0_0 = arith.constant 0 : index
    %c0_1 = arith.constant 0 : index
    %c0_2 = arith.constant 0 : index
    %1 = vector.load %arg6[%c0, %c0_0, %c0_1, %c0_2] : memref<2x1x18x18xf32, #tpu.memory_space<vmem>>, vector<2x1x18x18xf32>
    tpu.vector_store %arg6[%c0, %c0_0, %c0_1, %c0_2], %0 {strides = array<i32>} : memref<2x1x18x18xf32, #tpu.memory_space<vmem>>, vector<2x1x18x18xf32>,
    %c0_3 = arith.constant 0 : index
    %c0_4 = arith.constant 0 : index
    %c0_5 = arith.constant 0 : index
    %c0_6 = arith.constant 0 : index
    %2 = vector.load %arg0[%c0_3, %c0_4, %c0_5, %c0_6] : memref<2x1x16x16xf32, #tpu.memory_space<vmem>>, vector<2x1x16x16xf32>
    %c0_7 = arith.constant 0 : index
    %c0_8 = arith.constant 0 : index
    %c1 = arith.constant 1 : index
    %c1_9 = arith.constant 1 : index
    %3 = vector.load %arg6[%c0_7, %c0_8, %c1, %c1_9] : memref<2x1x18x18xf32, #tpu.memory_space<vmem>>, vector<2x1x16x16xf32>
    tpu.vector_store %arg6[%c0_7, %c0_8, %c1, %c1_9], %2 {strides = array<i32>} : memref<2x1x18x18xf32, #tpu.memory_space<vmem>>, vector<2x1x16x16xf32>,
    %c0_10 = arith.constant 0 : index
    %c0_11 = arith.constant 0 : index
    %c0_12 = arith.constant 0 : index
    %c0_13 = arith.constant 0 : index
    %4 = vector.load %arg6[%c0_10, %c0_11, %c0_12, %c0_13] : memref<2x1x18x18xf32, #tpu.memory_space<vmem>>, vector<2x1x16x16xf32>
    %5 = vector.shape_cast %4 : vector<2x1x16x16xf32> to vector<2x16x16xf32>
    %c0_14 = arith.constant 0 : index
    %c0_15 = arith.constant 0 : index
    %c0_16 = arith.constant 0 : index
    %c1_17 = arith.constant 1 : index
    %6 = vector.load %arg6[%c0_14, %c0_15, %c0_16, %c1_17] : memref<2x1x18x18xf32, #tpu.memory_space<vmem>>, vector<2x1x16x16xf32>
    %7 = vector.shape_cast %6 : vector<2x1x16x16xf32> to vector<2x16x16xf32>
    %c0_18 = arith.constant 0 : index
    %c0_19 = arith.constant 0 : index
    %c0_20 = arith.constant 0 : index
    %c2 = arith.constant 2 : index
    %8 = vector.load %arg6[%c0_18, %c0_19, %c0_20, %c2] : memref<2x1x18x18xf32, #tpu.memory_space<vmem>>, vector<2x1x16x16xf32>
    %9 = vector.shape_cast %8 : vector<2x1x16x16xf32> to vector<2x16x16xf32>
    %c0_21 = arith.constant 0 : index
    %c0_22 = arith.constant 0 : index
    %c1_23 = arith.constant 1 : index
    %c0_24 = arith.constant 0 : index
    %10 = vector.load %arg6[%c0_21, %c0_22, %c1_23, %c0_24] : memref<2x1x18x18xf32, #tpu.memory_space<vmem>>, vector<2x1x16x16xf32>
    %11 = vector.shape_cast %10 : vector<2x1x16x16xf32> to vector<2x16x16xf32>
    %c0_25 = arith.constant 0 : index
    %c0_26 = arith.constant 0 : index
    %c1_27 = arith.constant 1 : index
    %c1_28 = arith.constant 1 : index
    %12 = vector.load %arg6[%c0_25, %c0_26, %c1_27, %c1_28] : memref<2x1x18x18xf32, #tpu.memory_space<vmem>>, vector<2x1x16x16xf32>
    %13 = vector.shape_cast %12 : vector<2x1x16x16xf32> to vector<2x16x16xf32>
    %c0_29 = arith.constant 0 : index
    %c0_30 = arith.constant 0 : index
    %c1_31 = arith.constant 1 : index
    %c2_32 = arith.constant 2 : index
    %14 = vector.load %arg6[%c0_29, %c0_30, %c1_31, %c2_32] : memref<2x1x18x18xf32, #tpu.memory_space<vmem>>, vector<2x1x16x16xf32>
    %15 = vector.shape_cast %14 : vector<2x1x16x16xf32> to vector<2x16x16xf32>
    %c0_33 = arith.constant 0 : index
    %c0_34 = arith.constant 0 : index
    %c2_35 = arith.constant 2 : index
    %c0_36 = arith.constant 0 : index
    %16 = vector.load %arg6[%c0_33, %c0_34, %c2_35, %c0_36] : memref<2x1x18x18xf32, #tpu.memory_space<vmem>>, vector<2x1x16x16xf32>
    %17 = vector.shape_cast %16 : vector<2x1x16x16xf32> to vector<2x16x16xf32>
    %c0_37 = arith.constant 0 : index
    %c0_38 = arith.constant 0 : index
    %c2_39 = arith.constant 2 : index
    %c1_40 = arith.constant 1 : index
    %18 = vector.load %arg6[%c0_37, %c0_38, %c2_39, %c1_40] : memref<2x1x18x18xf32, #tpu.memory_space<vmem>>, vector<2x1x16x16xf32>
    %19 = vector.shape_cast %18 : vector<2x1x16x16xf32> to vector<2x16x16xf32>
    %c0_41 = arith.constant 0 : index
    %c0_42 = arith.constant 0 : index
    %c2_43 = arith.constant 2 : index
    %c2_44 = arith.constant 2 : index
    %20 = vector.load %arg6[%c0_41, %c0_42, %c2_43, %c2_44] : memref<2x1x18x18xf32, #tpu.memory_space<vmem>>, vector<2x1x16x16xf32>
    %21 = vector.shape_cast %20 : vector<2x1x16x16xf32> to vector<2x16x16xf32>
    %cst_45 = arith.constant 0.000000e+00 : f32
    %22 = vector.broadcast %cst_45 : f32 to vector<2x16x16xf32>
    %c0_46 = arith.constant 0 : index
    %23 = memref.load %arg1[%c0_46] : memref<36xf32, #tpu.memory_space<smem>>
    %24 = vector.broadcast %23 : f32 to vector<2x16x16xf32>
    %25 = arith.mulf %24, %5 : vector<2x16x16xf32>
    %26 = arith.addf %22, %25 : vector<2x16x16xf32>
    %c1_47 = arith.constant 1 : index
    %27 = memref.load %arg1[%c1_47] : memref<36xf32, #tpu.memory_space<smem>>
    %28 = vector.broadcast %27 : f32 to vector<2x16x16xf32>
    %29 = arith.mulf %28, %7 : vector<2x16x16xf32>
    %30 = arith.addf %26, %29 : vector<2x16x16xf32>
    %c2_48 = arith.constant 2 : index
    %31 = memref.load %arg1[%c2_48] : memref<36xf32, #tpu.memory_space<smem>>
    %32 = vector.broadcast %31 : f32 to vector<2x16x16xf32>
    %33 = arith.mulf %32, %9 : vector<2x16x16xf32>
    %34 = arith.addf %30, %33 : vector<2x16x16xf32>
    %c3 = arith.constant 3 : index
    %35 = memref.load %arg1[%c3] : memref<36xf32, #tpu.memory_space<smem>>
    %36 = vector.broadcast %35 : f32 to vector<2x16x16xf32>
    %37 = arith.mulf %36, %11 : vector<2x16x16xf32>
    %38 = arith.addf %34, %37 : vector<2x16x16xf32>
    %c4 = arith.constant 4 : index
    %39 = memref.load %arg1[%c4] : memref<36xf32, #tpu.memory_space<smem>>
    %40 = vector.broadcast %39 : f32 to vector<2x16x16xf32>
    %41 = arith.mulf %40, %13 : vector<2x16x16xf32>
    %42 = arith.addf %38, %41 : vector<2x16x16xf32>
    %c5 = arith.constant 5 : index
    %43 = memref.load %arg1[%c5] : memref<36xf32, #tpu.memory_space<smem>>
    %44 = vector.broadcast %43 : f32 to vector<2x16x16xf32>
    %45 = arith.mulf %44, %15 : vector<2x16x16xf32>
    %46 = arith.addf %42, %45 : vector<2x16x16xf32>
    %c6 = arith.constant 6 : index
    %47 = memref.load %arg1[%c6] : memref<36xf32, #tpu.memory_space<smem>>
    %48 = vector.broadcast %47 : f32 to vector<2x16x16xf32>
    %49 = arith.mulf %48, %17 : vector<2x16x16xf32>
    %50 = arith.addf %46, %49 : vector<2x16x16xf32>
    %c7 = arith.constant 7 : index
    %51 = memref.load %arg1[%c7] : memref<36xf32, #tpu.memory_space<smem>>
    %52 = vector.broadcast %51 : f32 to vector<2x16x16xf32>
    %53 = arith.mulf %52, %19 : vector<2x16x16xf32>
    %54 = arith.addf %50, %53 : vector<2x16x16xf32>
    %c8 = arith.constant 8 : index
    %55 = memref.load %arg1[%c8] : memref<36xf32, #tpu.memory_space<smem>>
    %56 = vector.broadcast %55 : f32 to vector<2x16x16xf32>
    %57 = arith.mulf %56, %21 : vector<2x16x16xf32>
    %58 = arith.addf %54, %57 : vector<2x16x16xf32>
    %c0_49 = arith.constant 0 : index
    %59 = memref.load %arg2[%c0_49] : memref<4xf32, #tpu.memory_space<smem>>
    %60 = vector.broadcast %59 : f32 to vector<2x16x16xf32>
    %61 = arith.addf %58, %60 : vector<2x16x16xf32>
    %62 = vector.shape_cast %61 : vector<2x16x16xf32> to vector<1x2x16x16xf32>
    %cst_50 = arith.constant dense<0.000000e+00> : vector<1xf32>
    %63 = vector.multi_reduction <add>, %62, %cst_50 [1, 2, 3] : vector<1x2x16x16xf32> to vector<1xf32>
    %64 = vector.shape_cast %63 : vector<1xf32> to vector<1x1x1x1xf32>
    %65 = vector.extract %64[0, 0, 0, 0] : f32 from vector<1x1x1x1xf32>
    %cst_51 = arith.constant 0.001953125 : f32
    %66 = arith.mulf %65, %cst_51 : f32
    %67 = vector.broadcast %66 : f32 to vector<2x16x16xf32>
    %68 = arith.subf %61, %67 : vector<2x16x16xf32>
    %69 = arith.mulf %68, %68 : vector<2x16x16xf32>
    %70 = vector.shape_cast %69 : vector<2x16x16xf32> to vector<1x2x16x16xf32>
    %cst_52 = arith.constant dense<0.000000e+00> : vector<1xf32>
    %71 = vector.multi_reduction <add>, %70, %cst_52 [1, 2, 3] : vector<1x2x16x16xf32> to vector<1xf32>
    %72 = vector.shape_cast %71 : vector<1xf32> to vector<1x1x1x1xf32>
    %73 = vector.extract %72[0, 0, 0, 0] : f32 from vector<1x1x1x1xf32>
    %cst_53 = arith.constant 0.001953125 : f32
    %74 = arith.mulf %73, %cst_53 : f32
    %c0_54 = arith.constant 0 : index
    %75 = memref.load %arg3[%c0_54] : memref<4xf32, #tpu.memory_space<smem>>
    %cst_55 = arith.constant 9.99999974E-6 : f32
    %76 = arith.addf %74, %cst_55 : f32
    %77 = math.rsqrt %76 : f32
    %78 = arith.mulf %75, %77 : f32
    %79 = vector.broadcast %78 : f32 to vector<2x16x16xf32>
    %80 = arith.mulf %68, %79 : vector<2x16x16xf32>
    %c0_56 = arith.constant 0 : index
    %81 = memref.load %arg4[%c0_56] : memref<4xf32, #tpu.memory_space<smem>>
    %82 = vector.broadcast %81 : f32 to vector<2x16x16xf32>
    %83 = arith.addf %80, %82 : vector<2x16x16xf32>
    %cst_57 = arith.constant 0.000000e+00 : f32
    %84 = vector.broadcast %cst_57 : f32 to vector<2x16x16xf32>
    %85 = arith.maximumf %83, %84 : vector<2x16x16xf32>
    %86 = vector.shape_cast %85 : vector<2x16x16xf32> to vector<2x8x2x16xf32>
    %cst_58 = arith.constant dense<0xFF800000> : vector<2x8x16xf32>
    %87 = vector.multi_reduction <maximumf>, %86, %cst_58 [2] : vector<2x8x2x16xf32> to vector<2x8x16xf32>
    %88 = vector.shape_cast %87 : vector<2x8x16xf32> to vector<2x8x8x2xf32>
    %cst_59 = arith.constant dense<0xFF800000> : vector<2x8x8xf32>
    %89 = vector.multi_reduction <maximumf>, %88, %cst_59 [3] : vector<2x8x8x2xf32> to vector<2x8x8xf32>
    %c0_60 = arith.constant 0 : index
    %c0_61 = arith.constant 0 : index
    %c0_62 = arith.constant 0 : index
    %c0_63 = arith.constant 0 : index
    %90 = vector.load %arg5[%c0_60, %c0_61, %c0_62, %c0_63] : memref<2x4x8x8xf32, #tpu.memory_space<vmem>>, vector<2x1x8x8xf32>
    %91 = vector.shape_cast %90 : vector<2x1x8x8xf32> to vector<2x8x8xf32>
    %92 = vector.shape_cast %89 : vector<2x8x8xf32> to vector<2x1x8x8xf32>
    tpu.vector_store %arg5[%c0_60, %c0_61, %c0_62, %c0_63], %92 {strides = array<i32>} : memref<2x4x8x8xf32, #tpu.memory_space<vmem>>, vector<2x1x8x8xf32>,
    %cst_64 = arith.constant 0.000000e+00 : f32
    %93 = vector.broadcast %cst_64 : f32 to vector<2x16x16xf32>
    %c9 = arith.constant 9 : index
    %94 = memref.load %arg1[%c9] : memref<36xf32, #tpu.memory_space<smem>>
    %95 = vector.broadcast %94 : f32 to vector<2x16x16xf32>
    %96 = arith.mulf %95, %5 : vector<2x16x16xf32>
    %97 = arith.addf %93, %96 : vector<2x16x16xf32>
    %c10 = arith.constant 10 : index
    %98 = memref.load %arg1[%c10] : memref<36xf32, #tpu.memory_space<smem>>
    %99 = vector.broadcast %98 : f32 to vector<2x16x16xf32>
    %100 = arith.mulf %99, %7 : vector<2x16x16xf32>
    %101 = arith.addf %97, %100 : vector<2x16x16xf32>
    %c11 = arith.constant 11 : index
    %102 = memref.load %arg1[%c11] : memref<36xf32, #tpu.memory_space<smem>>
    %103 = vector.broadcast %102 : f32 to vector<2x16x16xf32>
    %104 = arith.mulf %103, %9 : vector<2x16x16xf32>
    %105 = arith.addf %101, %104 : vector<2x16x16xf32>
    %c12 = arith.constant 12 : index
    %106 = memref.load %arg1[%c12] : memref<36xf32, #tpu.memory_space<smem>>
    %107 = vector.broadcast %106 : f32 to vector<2x16x16xf32>
    %108 = arith.mulf %107, %11 : vector<2x16x16xf32>
    %109 = arith.addf %105, %108 : vector<2x16x16xf32>
    %c13 = arith.constant 13 : index
    %110 = memref.load %arg1[%c13] : memref<36xf32, #tpu.memory_space<smem>>
    %111 = vector.broadcast %110 : f32 to vector<2x16x16xf32>
    %112 = arith.mulf %111, %13 : vector<2x16x16xf32>
    %113 = arith.addf %109, %112 : vector<2x16x16xf32>
    %c14 = arith.constant 14 : index
    %114 = memref.load %arg1[%c14] : memref<36xf32, #tpu.memory_space<smem>>
    %115 = vector.broadcast %114 : f32 to vector<2x16x16xf32>
    %116 = arith.mulf %115, %15 : vector<2x16x16xf32>
    %117 = arith.addf %113, %116 : vector<2x16x16xf32>
    %c15 = arith.constant 15 : index
    %118 = memref.load %arg1[%c15] : memref<36xf32, #tpu.memory_space<smem>>
    %119 = vector.broadcast %118 : f32 to vector<2x16x16xf32>
    %120 = arith.mulf %119, %17 : vector<2x16x16xf32>
    %121 = arith.addf %117, %120 : vector<2x16x16xf32>
    %c16 = arith.constant 16 : index
    %122 = memref.load %arg1[%c16] : memref<36xf32, #tpu.memory_space<smem>>
    %123 = vector.broadcast %122 : f32 to vector<2x16x16xf32>
    %124 = arith.mulf %123, %19 : vector<2x16x16xf32>
    %125 = arith.addf %121, %124 : vector<2x16x16xf32>
    %c17 = arith.constant 17 : index
    %126 = memref.load %arg1[%c17] : memref<36xf32, #tpu.memory_space<smem>>
    %127 = vector.broadcast %126 : f32 to vector<2x16x16xf32>
    %128 = arith.mulf %127, %21 : vector<2x16x16xf32>
    %129 = arith.addf %125, %128 : vector<2x16x16xf32>
    %c1_65 = arith.constant 1 : index
    %130 = memref.load %arg2[%c1_65] : memref<4xf32, #tpu.memory_space<smem>>
    %131 = vector.broadcast %130 : f32 to vector<2x16x16xf32>
    %132 = arith.addf %129, %131 : vector<2x16x16xf32>
    %133 = vector.shape_cast %132 : vector<2x16x16xf32> to vector<1x2x16x16xf32>
    %cst_66 = arith.constant dense<0.000000e+00> : vector<1xf32>
    %134 = vector.multi_reduction <add>, %133, %cst_66 [1, 2, 3] : vector<1x2x16x16xf32> to vector<1xf32>
    %135 = vector.shape_cast %134 : vector<1xf32> to vector<1x1x1x1xf32>
    %136 = vector.extract %135[0, 0, 0, 0] : f32 from vector<1x1x1x1xf32>
    %cst_67 = arith.constant 0.001953125 : f32
    %137 = arith.mulf %136, %cst_67 : f32
    %138 = vector.broadcast %137 : f32 to vector<2x16x16xf32>
    %139 = arith.subf %132, %138 : vector<2x16x16xf32>
    %140 = arith.mulf %139, %139 : vector<2x16x16xf32>
    %141 = vector.shape_cast %140 : vector<2x16x16xf32> to vector<1x2x16x16xf32>
    %cst_68 = arith.constant dense<0.000000e+00> : vector<1xf32>
    %142 = vector.multi_reduction <add>, %141, %cst_68 [1, 2, 3] : vector<1x2x16x16xf32> to vector<1xf32>
    %143 = vector.shape_cast %142 : vector<1xf32> to vector<1x1x1x1xf32>
    %144 = vector.extract %143[0, 0, 0, 0] : f32 from vector<1x1x1x1xf32>
    %cst_69 = arith.constant 0.001953125 : f32
    %145 = arith.mulf %144, %cst_69 : f32
    %c1_70 = arith.constant 1 : index
    %146 = memref.load %arg3[%c1_70] : memref<4xf32, #tpu.memory_space<smem>>
    %cst_71 = arith.constant 9.99999974E-6 : f32
    %147 = arith.addf %145, %cst_71 : f32
    %148 = math.rsqrt %147 : f32
    %149 = arith.mulf %146, %148 : f32
    %150 = vector.broadcast %149 : f32 to vector<2x16x16xf32>
    %151 = arith.mulf %139, %150 : vector<2x16x16xf32>
    %c1_72 = arith.constant 1 : index
    %152 = memref.load %arg4[%c1_72] : memref<4xf32, #tpu.memory_space<smem>>
    %153 = vector.broadcast %152 : f32 to vector<2x16x16xf32>
    %154 = arith.addf %151, %153 : vector<2x16x16xf32>
    %cst_73 = arith.constant 0.000000e+00 : f32
    %155 = vector.broadcast %cst_73 : f32 to vector<2x16x16xf32>
    %156 = arith.maximumf %154, %155 : vector<2x16x16xf32>
    %157 = vector.shape_cast %156 : vector<2x16x16xf32> to vector<2x8x2x16xf32>
    %cst_74 = arith.constant dense<0xFF800000> : vector<2x8x16xf32>
    %158 = vector.multi_reduction <maximumf>, %157, %cst_74 [2] : vector<2x8x2x16xf32> to vector<2x8x16xf32>
    %159 = vector.shape_cast %158 : vector<2x8x16xf32> to vector<2x8x8x2xf32>
    %cst_75 = arith.constant dense<0xFF800000> : vector<2x8x8xf32>
    %160 = vector.multi_reduction <maximumf>, %159, %cst_75 [3] : vector<2x8x8x2xf32> to vector<2x8x8xf32>
    %c0_76 = arith.constant 0 : index
    %c1_77 = arith.constant 1 : index
    %c0_78 = arith.constant 0 : index
    %c0_79 = arith.constant 0 : index
    %161 = vector.load %arg5[%c0_76, %c1_77, %c0_78, %c0_79] : memref<2x4x8x8xf32, #tpu.memory_space<vmem>>, vector<2x1x8x8xf32>
    %162 = vector.shape_cast %161 : vector<2x1x8x8xf32> to vector<2x8x8xf32>
    %163 = vector.shape_cast %160 : vector<2x8x8xf32> to vector<2x1x8x8xf32>
    tpu.vector_store %arg5[%c0_76, %c1_77, %c0_78, %c0_79], %163 {strides = array<i32>} : memref<2x4x8x8xf32, #tpu.memory_space<vmem>>, vector<2x1x8x8xf32>,
    %cst_80 = arith.constant 0.000000e+00 : f32
    %164 = vector.broadcast %cst_80 : f32 to vector<2x16x16xf32>
    %c18 = arith.constant 18 : index
    %165 = memref.load %arg1[%c18] : memref<36xf32, #tpu.memory_space<smem>>
    %166 = vector.broadcast %165 : f32 to vector<2x16x16xf32>
    %167 = arith.mulf %166, %5 : vector<2x16x16xf32>
    %168 = arith.addf %164, %167 : vector<2x16x16xf32>
    %c19 = arith.constant 19 : index
    %169 = memref.load %arg1[%c19] : memref<36xf32, #tpu.memory_space<smem>>
    %170 = vector.broadcast %169 : f32 to vector<2x16x16xf32>
    %171 = arith.mulf %170, %7 : vector<2x16x16xf32>
    %172 = arith.addf %168, %171 : vector<2x16x16xf32>
    %c20 = arith.constant 20 : index
    %173 = memref.load %arg1[%c20] : memref<36xf32, #tpu.memory_space<smem>>
    %174 = vector.broadcast %173 : f32 to vector<2x16x16xf32>
    %175 = arith.mulf %174, %9 : vector<2x16x16xf32>
    %176 = arith.addf %172, %175 : vector<2x16x16xf32>
    %c21 = arith.constant 21 : index
    %177 = memref.load %arg1[%c21] : memref<36xf32, #tpu.memory_space<smem>>
    %178 = vector.broadcast %177 : f32 to vector<2x16x16xf32>
    %179 = arith.mulf %178, %11 : vector<2x16x16xf32>
    %180 = arith.addf %176, %179 : vector<2x16x16xf32>
    %c22 = arith.constant 22 : index
    %181 = memref.load %arg1[%c22] : memref<36xf32, #tpu.memory_space<smem>>
    %182 = vector.broadcast %181 : f32 to vector<2x16x16xf32>
    %183 = arith.mulf %182, %13 : vector<2x16x16xf32>
    %184 = arith.addf %180, %183 : vector<2x16x16xf32>
    %c23 = arith.constant 23 : index
    %185 = memref.load %arg1[%c23] : memref<36xf32, #tpu.memory_space<smem>>
    %186 = vector.broadcast %185 : f32 to vector<2x16x16xf32>
    %187 = arith.mulf %186, %15 : vector<2x16x16xf32>
    %188 = arith.addf %184, %187 : vector<2x16x16xf32>
    %c24 = arith.constant 24 : index
    %189 = memref.load %arg1[%c24] : memref<36xf32, #tpu.memory_space<smem>>
    %190 = vector.broadcast %189 : f32 to vector<2x16x16xf32>
    %191 = arith.mulf %190, %17 : vector<2x16x16xf32>
    %192 = arith.addf %188, %191 : vector<2x16x16xf32>
    %c25 = arith.constant 25 : index
    %193 = memref.load %arg1[%c25] : memref<36xf32, #tpu.memory_space<smem>>
    %194 = vector.broadcast %193 : f32 to vector<2x16x16xf32>
    %195 = arith.mulf %194, %19 : vector<2x16x16xf32>
    %196 = arith.addf %192, %195 : vector<2x16x16xf32>
    %c26 = arith.constant 26 : index
    %197 = memref.load %arg1[%c26] : memref<36xf32, #tpu.memory_space<smem>>
    %198 = vector.broadcast %197 : f32 to vector<2x16x16xf32>
    %199 = arith.mulf %198, %21 : vector<2x16x16xf32>
    %200 = arith.addf %196, %199 : vector<2x16x16xf32>
    %c2_81 = arith.constant 2 : index
    %201 = memref.load %arg2[%c2_81] : memref<4xf32, #tpu.memory_space<smem>>
    %202 = vector.broadcast %201 : f32 to vector<2x16x16xf32>
    %203 = arith.addf %200, %202 : vector<2x16x16xf32>
    %204 = vector.shape_cast %203 : vector<2x16x16xf32> to vector<1x2x16x16xf32>
    %cst_82 = arith.constant dense<0.000000e+00> : vector<1xf32>
    %205 = vector.multi_reduction <add>, %204, %cst_82 [1, 2, 3] : vector<1x2x16x16xf32> to vector<1xf32>
    %206 = vector.shape_cast %205 : vector<1xf32> to vector<1x1x1x1xf32>
    %207 = vector.extract %206[0, 0, 0, 0] : f32 from vector<1x1x1x1xf32>
    %cst_83 = arith.constant 0.001953125 : f32
    %208 = arith.mulf %207, %cst_83 : f32
    %209 = vector.broadcast %208 : f32 to vector<2x16x16xf32>
    %210 = arith.subf %203, %209 : vector<2x16x16xf32>
    %211 = arith.mulf %210, %210 : vector<2x16x16xf32>
    %212 = vector.shape_cast %211 : vector<2x16x16xf32> to vector<1x2x16x16xf32>
    %cst_84 = arith.constant dense<0.000000e+00> : vector<1xf32>
    %213 = vector.multi_reduction <add>, %212, %cst_84 [1, 2, 3] : vector<1x2x16x16xf32> to vector<1xf32>
    %214 = vector.shape_cast %213 : vector<1xf32> to vector<1x1x1x1xf32>
    %215 = vector.extract %214[0, 0, 0, 0] : f32 from vector<1x1x1x1xf32>
    %cst_85 = arith.constant 0.001953125 : f32
    %216 = arith.mulf %215, %cst_85 : f32
    %c2_86 = arith.constant 2 : index
    %217 = memref.load %arg3[%c2_86] : memref<4xf32, #tpu.memory_space<smem>>
    %cst_87 = arith.constant 9.99999974E-6 : f32
    %218 = arith.addf %216, %cst_87 : f32
    %219 = math.rsqrt %218 : f32
    %220 = arith.mulf %217, %219 : f32
    %221 = vector.broadcast %220 : f32 to vector<2x16x16xf32>
    %222 = arith.mulf %210, %221 : vector<2x16x16xf32>
    %c2_88 = arith.constant 2 : index
    %223 = memref.load %arg4[%c2_88] : memref<4xf32, #tpu.memory_space<smem>>
    %224 = vector.broadcast %223 : f32 to vector<2x16x16xf32>
    %225 = arith.addf %222, %224 : vector<2x16x16xf32>
    %cst_89 = arith.constant 0.000000e+00 : f32
    %226 = vector.broadcast %cst_89 : f32 to vector<2x16x16xf32>
    %227 = arith.maximumf %225, %226 : vector<2x16x16xf32>
    %228 = vector.shape_cast %227 : vector<2x16x16xf32> to vector<2x8x2x16xf32>
    %cst_90 = arith.constant dense<0xFF800000> : vector<2x8x16xf32>
    %229 = vector.multi_reduction <maximumf>, %228, %cst_90 [2] : vector<2x8x2x16xf32> to vector<2x8x16xf32>
    %230 = vector.shape_cast %229 : vector<2x8x16xf32> to vector<2x8x8x2xf32>
    %cst_91 = arith.constant dense<0xFF800000> : vector<2x8x8xf32>
    %231 = vector.multi_reduction <maximumf>, %230, %cst_91 [3] : vector<2x8x8x2xf32> to vector<2x8x8xf32>
    %c0_92 = arith.constant 0 : index
    %c2_93 = arith.constant 2 : index
    %c0_94 = arith.constant 0 : index
    %c0_95 = arith.constant 0 : index
    %232 = vector.load %arg5[%c0_92, %c2_93, %c0_94, %c0_95] : memref<2x4x8x8xf32, #tpu.memory_space<vmem>>, vector<2x1x8x8xf32>
    %233 = vector.shape_cast %232 : vector<2x1x8x8xf32> to vector<2x8x8xf32>
    %234 = vector.shape_cast %231 : vector<2x8x8xf32> to vector<2x1x8x8xf32>
    tpu.vector_store %arg5[%c0_92, %c2_93, %c0_94, %c0_95], %234 {strides = array<i32>} : memref<2x4x8x8xf32, #tpu.memory_space<vmem>>, vector<2x1x8x8xf32>,
    %cst_96 = arith.constant 0.000000e+00 : f32
    %235 = vector.broadcast %cst_96 : f32 to vector<2x16x16xf32>
    %c27 = arith.constant 27 : index
    %236 = memref.load %arg1[%c27] : memref<36xf32, #tpu.memory_space<smem>>
    %237 = vector.broadcast %236 : f32 to vector<2x16x16xf32>
    %238 = arith.mulf %237, %5 : vector<2x16x16xf32>
    %239 = arith.addf %235, %238 : vector<2x16x16xf32>
    %c28 = arith.constant 28 : index
    %240 = memref.load %arg1[%c28] : memref<36xf32, #tpu.memory_space<smem>>
    %241 = vector.broadcast %240 : f32 to vector<2x16x16xf32>
    %242 = arith.mulf %241, %7 : vector<2x16x16xf32>
    %243 = arith.addf %239, %242 : vector<2x16x16xf32>
    %c29 = arith.constant 29 : index
    %244 = memref.load %arg1[%c29] : memref<36xf32, #tpu.memory_space<smem>>
    %245 = vector.broadcast %244 : f32 to vector<2x16x16xf32>
    %246 = arith.mulf %245, %9 : vector<2x16x16xf32>
    %247 = arith.addf %243, %246 : vector<2x16x16xf32>
    %c30 = arith.constant 30 : index
    %248 = memref.load %arg1[%c30] : memref<36xf32, #tpu.memory_space<smem>>
    %249 = vector.broadcast %248 : f32 to vector<2x16x16xf32>
    %250 = arith.mulf %249, %11 : vector<2x16x16xf32>
    %251 = arith.addf %247, %250 : vector<2x16x16xf32>
    %c31 = arith.constant 31 : index
    %252 = memref.load %arg1[%c31] : memref<36xf32, #tpu.memory_space<smem>>
    %253 = vector.broadcast %252 : f32 to vector<2x16x16xf32>
    %254 = arith.mulf %253, %13 : vector<2x16x16xf32>
    %255 = arith.addf %251, %254 : vector<2x16x16xf32>
    %c32 = arith.constant 32 : index
    %256 = memref.load %arg1[%c32] : memref<36xf32, #tpu.memory_space<smem>>
    %257 = vector.broadcast %256 : f32 to vector<2x16x16xf32>
    %258 = arith.mulf %257, %15 : vector<2x16x16xf32>
    %259 = arith.addf %255, %258 : vector<2x16x16xf32>
    %c33 = arith.constant 33 : index
    %260 = memref.load %arg1[%c33] : memref<36xf32, #tpu.memory_space<smem>>
    %261 = vector.broadcast %260 : f32 to vector<2x16x16xf32>
    %262 = arith.mulf %261, %17 : vector<2x16x16xf32>
    %263 = arith.addf %259, %262 : vector<2x16x16xf32>
    %c34 = arith.constant 34 : index
    %264 = memref.load %arg1[%c34] : memref<36xf32, #tpu.memory_space<smem>>
    %265 = vector.broadcast %264 : f32 to vector<2x16x16xf32>
    %266 = arith.mulf %265, %19 : vector<2x16x16xf32>
    %267 = arith.addf %263, %266 : vector<2x16x16xf32>
    %c35 = arith.constant 35 : index
    %268 = memref.load %arg1[%c35] : memref<36xf32, #tpu.memory_space<smem>>
    %269 = vector.broadcast %268 : f32 to vector<2x16x16xf32>
    %270 = arith.mulf %269, %21 : vector<2x16x16xf32>
    %271 = arith.addf %267, %270 : vector<2x16x16xf32>
    %c3_97 = arith.constant 3 : index
    %272 = memref.load %arg2[%c3_97] : memref<4xf32, #tpu.memory_space<smem>>
    %273 = vector.broadcast %272 : f32 to vector<2x16x16xf32>
    %274 = arith.addf %271, %273 : vector<2x16x16xf32>
    %275 = vector.shape_cast %274 : vector<2x16x16xf32> to vector<1x2x16x16xf32>
    %cst_98 = arith.constant dense<0.000000e+00> : vector<1xf32>
    %276 = vector.multi_reduction <add>, %275, %cst_98 [1, 2, 3] : vector<1x2x16x16xf32> to vector<1xf32>
    %277 = vector.shape_cast %276 : vector<1xf32> to vector<1x1x1x1xf32>
    %278 = vector.extract %277[0, 0, 0, 0] : f32 from vector<1x1x1x1xf32>
    %cst_99 = arith.constant 0.001953125 : f32
    %279 = arith.mulf %278, %cst_99 : f32
    %280 = vector.broadcast %279 : f32 to vector<2x16x16xf32>
    %281 = arith.subf %274, %280 : vector<2x16x16xf32>
    %282 = arith.mulf %281, %281 : vector<2x16x16xf32>
    %283 = vector.shape_cast %282 : vector<2x16x16xf32> to vector<1x2x16x16xf32>
    %cst_100 = arith.constant dense<0.000000e+00> : vector<1xf32>
    %284 = vector.multi_reduction <add>, %283, %cst_100 [1, 2, 3] : vector<1x2x16x16xf32> to vector<1xf32>
    %285 = vector.shape_cast %284 : vector<1xf32> to vector<1x1x1x1xf32>
    %286 = vector.extract %285[0, 0, 0, 0] : f32 from vector<1x1x1x1xf32>
    %cst_101 = arith.constant 0.001953125 : f32
    %287 = arith.mulf %286, %cst_101 : f32
    %c3_102 = arith.constant 3 : index
    %288 = memref.load %arg3[%c3_102] : memref<4xf32, #tpu.memory_space<smem>>
    %cst_103 = arith.constant 9.99999974E-6 : f32
    %289 = arith.addf %287, %cst_103 : f32
    %290 = math.rsqrt %289 : f32
    %291 = arith.mulf %288, %290 : f32
    %292 = vector.broadcast %291 : f32 to vector<2x16x16xf32>
    %293 = arith.mulf %281, %292 : vector<2x16x16xf32>
    %c3_104 = arith.constant 3 : index
    %294 = memref.load %arg4[%c3_104] : memref<4xf32, #tpu.memory_space<smem>>
    %295 = vector.broadcast %294 : f32 to vector<2x16x16xf32>
    %296 = arith.addf %293, %295 : vector<2x16x16xf32>
    %cst_105 = arith.constant 0.000000e+00 : f32
    %297 = vector.broadcast %cst_105 : f32 to vector<2x16x16xf32>
    %298 = arith.maximumf %296, %297 : vector<2x16x16xf32>
    %299 = vector.shape_cast %298 : vector<2x16x16xf32> to vector<2x8x2x16xf32>
    %cst_106 = arith.constant dense<0xFF800000> : vector<2x8x16xf32>
    %300 = vector.multi_reduction <maximumf>, %299, %cst_106 [2] : vector<2x8x2x16xf32> to vector<2x8x16xf32>
    %301 = vector.shape_cast %300 : vector<2x8x16xf32> to vector<2x8x8x2xf32>
    %cst_107 = arith.constant dense<0xFF800000> : vector<2x8x8xf32>
    %302 = vector.multi_reduction <maximumf>, %301, %cst_107 [3] : vector<2x8x8x2xf32> to vector<2x8x8xf32>
    %c0_108 = arith.constant 0 : index
    %c3_109 = arith.constant 3 : index
    %c0_110 = arith.constant 0 : index
    %c0_111 = arith.constant 0 : index
    %303 = vector.load %arg5[%c0_108, %c3_109, %c0_110, %c0_111] : memref<2x4x8x8xf32, #tpu.memory_space<vmem>>, vector<2x1x8x8xf32>
    %304 = vector.shape_cast %303 : vector<2x1x8x8xf32> to vector<2x8x8xf32>
    %305 = vector.shape_cast %302 : vector<2x8x8xf32> to vector<2x1x8x8xf32>
    tpu.vector_store %arg5[%c0_108, %c3_109, %c0_110, %c0_111], %305 {strides = array<i32>} : memref<2x4x8x8xf32, #tpu.memory_space<vmem>>, vector<2x1x8x8xf32>,
    return
  }
}

</mosaic_0001>

<bundles_post_ra>
// kernel: tpu_custom_call.1
= control target key start
LH: loop header
LB: loop body
LE: loop exit
PB: predicated region body
PF: predicated region fallthrough
CT: control target
= control target key end

     0   :  { %10 = vsyncpa [#allocation4], 0  ;;  %s9441_s0 = inlined_call_operand.hbm [shape: f32[2,1,16,16], index: 0, kind: input, shape index: {}]   ;;  %s9442_s1 = inlined_call_operand.hbm [shape: f32[36], index: 1, kind: input, shape index: {}]   ;;  %s9443_s2 = inlined_call_operand.vmem [shape: f32[4], index: 2, kind: input, shape index: {}]   ;;  %s9444_s3 = inlined_call_operand.vmem [shape: f32[4], index: 3, kind: input, shape index: {}]   ;;  %s9445_s4 = inlined_call_operand.vmem [shape: f32[4], index: 4, kind: input, shape index: {}]   ;;  %s9446_s5 = inlined_call_operand.hbm [shape: f32[2,4,8,8], index: 5, kind: output, shape index: {}]  }
   0x1   :  { %11 = vsyncpa [#allocation6], 0 }
   0x2   :  { %12 = vsyncpa [#allocation7], 0 }
   0x3   :  { %13 = vsyncpa [#allocation11], 0  ;;  %s51_s20 = sshll.u32 %s9444_s3, 4  ;;  %s52_s20 = int_to_ptr.vmem [resolvable:$true] %s51_s20 }
   0x4   :  { %14 = vsyncpa [#allocation5], 0  ;;  %s19_s23 = sshll.u32 %s9441_s0, 4  ;;  %s5211_s24 = smov [#allocation10]   ;;  %s20_s23 = int_to_ptr.hbm [resolvable:$true] %s19_s23 }
   0x5   :  { %54 = dma.vmem_to_smem %s52_s20, 16, %s5211_s24, [#allocation11]  }
   0x6   :  { %s5212_s25 = smov [#allocation3]   ;;  %s5213_s27 = smov 128  }
   0x7   :  { %s21_s26 = sshll.u32 %s5212_s25, 4  ;;  %s5214_s28 = smov 8   ;;  %s22_s26 = int_to_ptr.vmem [resolvable:$true] %s21_s26 }
   0x8   :  { %27 = dma.hbm_to_vmem [thread:$0]  %s20_s23, 512, %s22_s26, [#allocation4], %s5213_s27, %s5213_s27, %s5214_s28  }
   0x9   :  { %s33_s30 = sshll.u32 %s9442_s1, 4  ;;  %s42_s0 = sshll.u32 %s9443_s2, 4  ;;  %s34_s30 = int_to_ptr.hbm [resolvable:$true] %s33_s30  ;;  %s43_s0 = int_to_ptr.vmem [resolvable:$true] %s42_s0 }
   0xa   :  { %s5215_s8 = smov [#allocation8]   ;;  %s5216_s9 = smov [#allocation9]  }
   0xb   :  { %36 = dma.hbm_to_smem %s34_s30, 16, %s5215_s8, [#allocation6]  }
   0xc   :  { %45 = dma.vmem_to_smem %s43_s0, 16, %s5216_s9, [#allocation7]  }
   0xd   :  { %s60_s12 = sshll.u32 %s9445_s4, 4  ;;  %s5217_s13 = smov [#allocation12]   ;;  %s61_s12 = int_to_ptr.vmem [resolvable:$true] %s60_s12 }
   0xe   :  { %63 = dma.vmem_to_smem %s61_s12, 16, %s5217_s13, [#allocation11]  }
   0xf   :  { %5201 = dma.done.wait [#allocation4], 512  }
  0x10   :  { %5202 = vsyncadd [#allocation4], 4294966784 }
  0x11   :  { %5203 = dma.done.wait [#allocation6], 16  }
  0x12   :  { %5204 = vsyncadd [#allocation6], 4294967280 }
  0x13   :  { %5205 = dma.done.wait [#allocation7], 16  }
  0x14   :  { %5206 = vsyncadd [#allocation7], 4294967280 }
  0x15   :  { %5207 = dma.done.wait [#allocation11], 32  }
  0x16   :  { %5208 = vsyncadd [#allocation11], 4294967264 }
  0x17   :  { %84 = sfence }
  0x18   :  { %v95_v0 = vld [vmem:[#allocation3 + $0x10] sm:$0xff]  ;;  %v93_v1 = vld [vmem:[#allocation3] sm:$0xff]  ;;  %s5218_s1 = smov 1   ;;  %v96_v2 = vld [vmem:[#allocation3 + $0x18] sm:$0xff]  ;;  %vm85_vm0 = vcmask 146432   ;;  %v5219_v4 = vmov 0.0  }
  0x19   :  { %105 = vrot.lane.b32.xlu1 %v95_v0, %s5218_s1  ;;  %101 = vrot.lane.b32.xlu0 %v93_v1, %s5218_s1  ;;  %v94_v3 = vld [vmem:[#allocation3 + $0x8] sm:$0xff]  ;;  %90 = vst.msk [vmem:[#allocation2 + $0x18] sm:$0xff] %vm85_vm0, %v5219_v4  ;;  %vm88_vm1 = vcmask 140288   ;;  %vm113_vm2 = vcmask 138248   ;;  %s4997_s2 = sld [smem:[#allocation8 + $0x1]]  ;;  %s5220_s14 = smov 127  }
  0x1a   :  { %91 = vst.msk [vmem:[#allocation2 + $0x20] sm:$0xff] %vm85_vm0, %v5219_v4  ;;  %s4998_s4 = sld [smem:[#allocation8 + $0x2]]  ;;  %s5221_s16 = smov 126   ;;  %vm322_vm3 = vcmask 130048   ;;  %vm424_vm7 = vcmask 123904   ;;  %vm778_vm11 = vcmask 1041409  }
  0x1b   :  { %86 = vst.msk [vmem:[#allocation2] sm:$0xff] %vm85_vm0, %v5219_v4  ;;  %s5000_s15 = sld [smem:[#allocation8 + $0x4]]  ;;  %vm781_vm12 = vcmask 1042434   ;;  %vm784_vm13 = vcmask 1043459   ;;  %vm787_vm14 = vcmask 1044484   ;;  %vm790_vm15 = vcmask 1045509  }
  0x1c   :  { %87 = vst.msk [vmem:[#allocation2 + $0x8] sm:$0xff] %vm85_vm0, %v5219_v4  ;;  %s5025_s17 = sld [smem:[#allocation8 + $0x1a]]  ;;  %vm793_vm0 = vcmask 1046534  }
  0x1d   :  { %92 = vst.msk [vmem:[#allocation2 + $0x28] sm:$0x3] %vm88_vm1, %v5219_v4  ;;  %s5001_s18 = sld [smem:[#allocation8 + $0x5]] }
  0x1e   :  { %89 = vst.msk [vmem:[#allocation2 + $0x10] sm:$0x3] %vm88_vm1, %v5219_v4  ;;  %s5003_s19 = sld [smem:[#allocation8 + $0x7]]  ;;  %vm796_vm1 = vcmask 1047559  }
  0x1f   :  { %v141_v7 = vstv %s4997_s2  ;;  %s5004_s20 = sld [smem:[#allocation8 + $0x8]] }
  0x20   :  { %v167_v17 = vstv %s4998_s4  ;;  %s5006_s21 = sld [smem:[#allocation8 + $0xa]] }
  0x21   :  { %107 = vrot.lane.b32.xlu1 %v96_v2, %s5218_s1  ;;  %103 = vrot.lane.b32.xlu0 %v94_v3, %s5218_s1  ;;  %v203_v21 = vstv %s5000_s15  ;;  %s5007_s22 = sld [smem:[#allocation8 + $0xb]] }
  0x22   :  { %v5312_v29 = vstv %s5025_s17  ;;  %s5009_s23 = sld [smem:[#allocation8 + $0xd]] }
  0x23   :  { %v229_v34 = vstv %s5001_s18  ;;  %s5010_s24 = sld [smem:[#allocation8 + $0xe]] }
  0x24   :  { %v265_v40 = vstv %s5003_s19  ;;  %s5012_s25 = sld [smem:[#allocation8 + $0x10]] }
  0x25   :  { %v291_v46 = vstv %s5004_s20  ;;  %s130_s26 = sld [smem:[#allocation8]] }
  0x26   :  { %v1362_v52 = vstv %s5006_s21  ;;  %s4999_s29 = sld [smem:[#allocation8 + $0x3]] }
  0x27   :  { %v1388_v56 = vstv %s5007_s22  ;;  %s5013_s3 = sld [smem:[#allocation8 + $0x11]] }
  0x28   :  { %v1424_v63 = vstv %s5009_s23  ;;  %s5018_s30 = sld [smem:[#allocation8 + $0x13]] }
  0x29   :  { %v1450_v4 = vstv %s5010_s24  ;;  %s5019_s6 = sld [smem:[#allocation8 + $0x14]] }
  0x2a   :  { %s5002_s7 = sld [smem:[#allocation8 + $0x6]] }
  0x2b   :  { %s5021_s0 = sld [smem:[#allocation8 + $0x16]] }
  0x2c   :  { %s5022_s8 = sld [smem:[#allocation8 + $0x17]] }
  0x2d   :  { %s5024_s9 = sld [smem:[#allocation8 + $0x19]] }
  0x2e   :  { %s5005_s10 = sld [smem:[#allocation8 + $0x9]] }
  0x2f   :  { %s5008_s11 = sld [smem:[#allocation8 + $0xc]] }
  0x30   :  { %s316_s12 = sld [smem:[#allocation9]] }
  0x31   :  { %s5011_s13 = sld [smem:[#allocation8 + $0xf]] }
  0x32   :  { %s5014_s1 = sld [smem:[#allocation9 + $0x1]] }
  0x33   :  { %s5017_s2 = sld [smem:[#allocation8 + $0x12]] }
  0x34   :  { %s5020_s4 = sld [smem:[#allocation8 + $0x15]] }
  0x35   :  { %s5023_s15 = sld [smem:[#allocation8 + $0x18]] }
  0x36   :  { %s366_s22 = sld [smem:[#allocation10]] }
  0x37   :  { %s386_s23 = sld [smem:[#allocation12]] }
  0x8b   :  { %v106_v5 = vpop.permute.xlu1 %105  ;;  %v102_v6 = vpop.permute.xlu0 %101 }
  0x8c   :  { %116 = vst.msk [vmem:[#allocation2 + $0x19] sm:$0xff] %vm113_vm2, %v106_v5 }
  0x8d   :  { %114 = vst.msk [vmem:[#allocation2 + $0x1] sm:$0xff] %vm113_vm2, %v102_v6 }
  0x93   :  { %v5279_v8 = vld [vmem:[#allocation2 + $0x18] sm:$0xff]  ;;  %v108_v9 = vpop.permute.xlu1 %107  ;;  %v104_v10 = vpop.permute.xlu0 %103 }
  0x94   :  { %v5281_v11 = vld [vmem:[#allocation2] sm:$0xff]  ;;  %117 = vst.msk [vmem:[#allocation2 + $0x21] sm:$0xff] %vm113_vm2, %v108_v9  ;;  %v144_v12 = vmul.f32 %v141_v7, %v5279_v8  ;;  %v170_v24 = vmul.f32 %v167_v17, %v5279_v8  ;;  %v1365_v59 = vmul.f32 %v1362_v52, %v5279_v8  ;;  %v1391_v61 = vmul.f32 %v1388_v56, %v5279_v8 }
  0x95   :  { %115 = vst.msk [vmem:[#allocation2 + $0x9] sm:$0xff] %vm113_vm2, %v104_v10  ;;  %v142_v13 = vmul.f32 %v141_v7, %v5281_v11  ;;  %v5297_v20 = vld [vmem:[#allocation2 + $0x1] sm:$0xff]  ;;  %v168_v23 = vmul.f32 %v167_v17, %v5281_v11  ;;  %v5323_v33 = vld [vmem:[#allocation2 + $0x19] sm:$0xff]  ;;  %v1363_v53 = vmul.f32 %v1362_v52, %v5281_v11  ;;  %v1389_v57 = vmul.f32 %v1388_v56, %v5281_v11 }
  0x96   :  { %154 = vrot.lane.b32.xlu0 %v144_v12, %s5220_s14  ;;  %v204_v22 = vmul.f32 %v203_v21, %v5297_v20  ;;  %v230_v35 = vmul.f32 %v229_v34, %v5297_v20  ;;  %v232_v36 = vmul.f32 %v229_v34, %v5323_v33  ;;  %v206_v37 = vmul.f32 %v203_v21, %v5323_v33 }
  0x97   :  { %150 = vrot.lane.b32.xlu2 %v142_v13, %s5220_s14  ;;  %v1427_v0 = vmul.f32 %v1424_v63, %v5323_v33  ;;  %v1425_v2 = vmul.f32 %v1424_v63, %v5297_v20  ;;  %v1451_v6 = vmul.f32 %v1450_v4, %v5297_v20  ;;  %v1486_v10 = vstv %s5012_s25 }
  0x98   :  { %v131_v13 = vstv %s130_s26  ;;  %vm1025_vm2 = vcmask 1047556  }
  0x9b   :  { %v5287_v14 = vld [vmem:[#allocation2 + $0x20] sm:$0xff] }
  0x9c   :  { %v5289_v15 = vld [vmem:[#allocation2 + $0x8] sm:$0xff]  ;;  %v145_v16 = vmul.f32 %v141_v7, %v5287_v14  ;;  %v171_v31 = vmul.f32 %v167_v17, %v5287_v14  ;;  %v5339_v43 = vld [vmem:[#allocation2 + $0x1a] sm:$0xff]  ;;  %v1366_v58 = vmul.f32 %v1362_v52, %v5287_v14  ;;  %v1392_v60 = vmul.f32 %v1388_v56, %v5287_v14 }
  0x9d   :  { %v169_v18 = vmul.f32 %v167_v17, %v5289_v15  ;;  %v143_v19 = vmul.f32 %v141_v7, %v5289_v15  ;;  %v5303_v25 = vld [vmem:[#allocation2 + $0x9] sm:$0xff]  ;;  %v5307_v26 = vld [vmem:[#allocation2 + $0x21] sm:$0xff]  ;;  %v268_v45 = vmul.f32 %v265_v40, %v5339_v43  ;;  %v1364_v54 = vmul.f32 %v1362_v52, %v5289_v15 }
  0x9e   :  { %156 = vrot.lane.b32.xlu1 %v145_v16, %s5220_s14  ;;  %v5309_v27 = vld [vmem:[#allocation2 + $0x22] sm:$0xff]  ;;  %v205_v28 = vmul.f32 %v203_v21, %v5303_v25  ;;  %v207_v30 = vmul.f32 %v203_v21, %v5307_v26  ;;  %v5331_v38 = vld [vmem:[#allocation2 + $0xa] sm:$0xff]  ;;  %v233_v39 = vmul.f32 %v229_v34, %v5307_v26  ;;  %v231_v42 = vmul.f32 %v229_v34, %v5303_v25 }
  0x9f   :  { %178 = vrot.lane.b32.xlu0 %v169_v18, %s5221_s16  ;;  %152 = vrot.lane.b32.xlu2 %v143_v19, %s5220_s14  ;;  %v5318_v32 = vmul.f32 %v5312_v29, %v5309_v27  ;;  %v267_v41 = vmul.f32 %v265_v40, %v5331_v38  ;;  %v5341_v44 = vld [vmem:[#allocation2 + $0x2] sm:$0xff]  ;;  %v293_v49 = vmul.f32 %v291_v46, %v5331_v38  ;;  %v2570_v52 = vstv %s5018_s30  ;;  %s5223_s30 = smov 122  }
  0xa0   :  { %v292_v47 = vmul.f32 %v291_v46, %v5341_v44  ;;  %v266_v48 = vmul.f32 %v265_v40, %v5341_v44  ;;  %v295_v50 = vmul.f32 %v291_v46, %v5309_v27  ;;  %v269_v51 = vmul.f32 %v265_v40, %v5309_v27 }
  0xa1   :  { %v294_v55 = vmul.f32 %v291_v46, %v5339_v43  ;;  %v1390_v62 = vmul.f32 %v1388_v56, %v5289_v15  ;;  %v1426_v1 = vmul.f32 %v1424_v63, %v5303_v25  ;;  %v1452_v5 = vmul.f32 %v1450_v4, %v5303_v25 }
  0xa2   :  { %v1428_v7 = vmul.f32 %v1424_v63, %v5307_v26  ;;  %v1487_v12 = vmul.f32 %v1486_v10, %v5341_v44  ;;  %v1454_v16 = vmul.f32 %v1450_v4, %v5307_v26  ;;  %v1453_v17 = vmul.f32 %v1450_v4, %v5323_v33 }
  0xa3   :  { %v132_v18 = vmul.f32 %v131_v13, %v5281_v11  ;;  %v1488_v34 = vmul.f32 %v1486_v10, %v5331_v38  ;;  %v2571_v56 = vmul.f32 %v2570_v52, %v5281_v11 }
  0xa6   :  { %180 = vrot.lane.b32.xlu1 %v170_v24, %s5221_s16 }
  0xa7   :  { %212 = vrot.lane.b32.xlu0 %v204_v22, %s5220_s14  ;;  %176 = vrot.lane.b32.xlu2 %v168_v23, %s5221_s16  ;;  %v193_v22 = vstv %s4999_s29 }
  0xa8   :  { %v194_v24 = vmul.f32 %v193_v22, %v5297_v20 }
  0xae   :  { %214 = vrot.lane.b32.xlu1 %v205_v28, %s5220_s14  ;;  %v1490_v28 = vmul.f32 %v1486_v10, %v5309_v27 }
  0xaf   :  { %218 = vrot.lane.b32.xlu0 %v207_v30, %s5220_s14  ;;  %182 = vrot.lane.b32.xlu2 %v171_v31, %s5221_s16  ;;  %v1489_v31 = vmul.f32 %v1486_v10, %v5339_v43 }
  0xb6   :  { %238 = vrot.lane.b32.xlu1 %v230_v35, %s5221_s16 }
  0xb7   :  { %242 = vrot.lane.b32.xlu0 %v232_v36, %s5221_s16  ;;  %216 = vrot.lane.b32.xlu2 %v206_v37, %s5220_s14  ;;  %v1512_v37 = vstv %s5013_s3  ;;  %s5222_s3 = smov 124  }
  0xb8   :  { %v1514_v40 = vmul.f32 %v1512_v37, %v5331_v38 }
  0xbe   :  { %244 = vrot.lane.b32.xlu1 %v233_v39, %s5221_s16  ;;  %v1515_v39 = vmul.f32 %v1512_v37, %v5339_v43 }
  0xbf   :  { %276 = vrot.lane.b32.xlu0 %v267_v41, %s5220_s14  ;;  %240 = vrot.lane.b32.xlu2 %v231_v42, %s5221_s16  ;;  %v1513_v41 = vmul.f32 %v1512_v37, %v5341_v44  ;;  %v133_v42 = vmul.f32 %v131_v13, %v5289_v15 }
  0xc6   :  { %278 = vrot.lane.b32.xlu1 %v268_v45, %s5220_s14  ;;  %v135_v45 = vmul.f32 %v131_v13, %v5287_v14 }
  0xc7   :  { %300 = vrot.lane.b32.xlu0 %v292_v47, %s5221_s16  ;;  %274 = vrot.lane.b32.xlu2 %v266_v48, %s5220_s14 }
  0xce   :  { %302 = vrot.lane.b32.xlu1 %v293_v49, %s5221_s16 }
  0xcf   :  { %306 = vrot.lane.b32.xlu0 %v295_v50, %s5221_s16  ;;  %280 = vrot.lane.b32.xlu2 %v269_v51, %s5220_s14 }
  0xd6   :  { %1371 = vrot.lane.b32.xlu1 %v1363_v53, %s5220_s14  ;;  %v195_v53 = vmul.f32 %v193_v22, %v5303_v25 }
  0xd7   :  { %1373 = vrot.lane.b32.xlu0 %v1364_v54, %s5220_s14  ;;  %304 = vrot.lane.b32.xlu2 %v294_v55, %s5221_s16  ;;  %v197_v55 = vmul.f32 %v193_v22, %v5307_v26 }
  0xde   :  { %1397 = vrot.lane.b32.xlu1 %v1389_v57, %s5221_s16 }
  0xdf   :  { %1377 = vrot.lane.b32.xlu0 %v1366_v58, %s5220_s14  ;;  %1375 = vrot.lane.b32.xlu2 %v1365_v59, %s5220_s14  ;;  %v134_v58 = vmul.f32 %v131_v13, %v5279_v8  ;;  %v2573_v59 = vmul.f32 %v2570_v52, %v5279_v8 }
  0xe6   :  { %1403 = vrot.lane.b32.xlu1 %v1392_v60, %s5221_s16  ;;  %v1516_v60 = vmul.f32 %v1512_v37, %v5309_v27 }
  0xe7   :  { %1401 = vrot.lane.b32.xlu0 %v1391_v61, %s5221_s16  ;;  %1399 = vrot.lane.b32.xlu2 %v1390_v62, %s5221_s16 }
  0xee   :  { %1437 = vrot.lane.b32.xlu1 %v1427_v0, %s5220_s14  ;;  %v196_v0 = vmul.f32 %v193_v22, %v5323_v33 }
  0xef   :  { %1435 = vrot.lane.b32.xlu0 %v1426_v1, %s5220_s14  ;;  %1433 = vrot.lane.b32.xlu2 %v1425_v2, %s5220_s14 }
  0xf1   :  { %v151_v3 = vpop.permute.xlu2 %150 }
  0xf2   :  { %v162_v19 = vadd.f32 %v151_v3, %v132_v18 }
  0xf6   :  { %1461 = vrot.lane.b32.xlu1 %v1452_v5, %s5221_s16  ;;  %v2596_v5 = vstv %s5019_s6  ;;  %s5224_s6 = smov 120  }
  0xf7   :  { %1459 = vrot.lane.b32.xlu0 %v1451_v6, %s5221_s16  ;;  %1439 = vrot.lane.b32.xlu2 %v1428_v7, %s5220_s14  ;;  %v2598_v6 = vmul.f32 %v2596_v5, %v5289_v15  ;;  %v2574_v7 = vmul.f32 %v2570_v52, %v5287_v14 }
  0xf9   :  { %v153_v9 = vpop.permute.xlu2 %152 }
  0xfa   :  { %v163_v46 = vadd.f32 %v153_v9, %v133_v42  ;;  %v2572_v9 = vmul.f32 %v2570_v52, %v5289_v15 }
  0xfe   :  { %1495 = vrot.lane.b32.xlu1 %v1487_v12, %s5220_s14 }
  0xff   :  { %1465 = vrot.lane.b32.xlu0 %v1454_v16, %s5221_s16  ;;  %1463 = vrot.lane.b32.xlu2 %v1453_v17, %s5221_s16  ;;  %v255_v17 = vstv %s5002_s7  ;;  %s5225_s7 = smov 118  }
 0x100   :  { %v258_v42 = vmul.f32 %v255_v17, %v5339_v43 }
 0x101   :  { %v177_v21 = vpop.permute.xlu2 %176 }
 0x102   :  { %v188_v23 = vadd.f32 %v177_v21, %v162_v19  ;;  %v2632_v19 = vstv %s5021_s0  ;;  %v257_v21 = vmul.f32 %v255_v17, %v5331_v38  ;;  %s5226_s0 = smov 116  }
 0x103   :  { %v2633_v22 = vmul.f32 %v2632_v19, %v5297_v20 }
 0x104   :  { %v5394_v30 = vadd.f32 %v194_v24, %v188_v23  ;;  %v2599_v23 = vmul.f32 %v2596_v5, %v5279_v8  ;;  %v2597_v24 = vmul.f32 %v2596_v5, %v5281_v11 }
 0x106   :  { %1501 = vrot.lane.b32.xlu1 %v1490_v28, %s5220_s14 }
 0x107   :  { %1499 = vrot.lane.b32.xlu0 %v1489_v31, %s5220_s14  ;;  %1497 = vrot.lane.b32.xlu2 %v1488_v34, %s5220_s14 }
 0x108   :  { %v155_v35 = vpop.permute.xlu0 %154 }
 0x109   :  { %v183_v36 = vpop.permute.xlu2 %182  ;;  %v164_v62 = vadd.f32 %v155_v35, %v134_v58 }
 0x10e   :  { %1525 = vrot.lane.b32.xlu1 %v1515_v39, %s5221_s16 }
 0x10f   :  { %1523 = vrot.lane.b32.xlu0 %v1514_v40, %s5221_s16  ;;  %1521 = vrot.lane.b32.xlu2 %v1513_v41, %s5221_s16 }
 0x110   :  { %v157_v47 = vpop.permute.xlu1 %156 }
 0x111   :  { %v165_v48 = vadd.f32 %v157_v47, %v135_v45  ;;  %v179_v49 = vpop.permute.xlu0 %178  ;;  %v217_v50 = vpop.permute.xlu2 %216  ;;  %v2634_v47 = vmul.f32 %v2632_v19, %v5303_v25 }
 0x112   :  { %v189_v51 = vadd.f32 %v179_v49, %v163_v46 }
 0x113   :  { %v191_v54 = vadd.f32 %v183_v36, %v165_v48  ;;  %v256_v36 = vmul.f32 %v255_v17, %v5341_v44  ;;  %v2600_v48 = vmul.f32 %v2596_v5, %v5287_v14 }
 0x114   :  { %v199_v57 = vadd.f32 %v195_v53, %v189_v51  ;;  %v259_v51 = vmul.f32 %v255_v17, %v5309_v27 }
 0x115   :  { %v201_v61 = vadd.f32 %v197_v55, %v191_v54  ;;  %v2658_v55 = vstv %s5022_s8  ;;  %s5227_s8 = smov 114  }
 0x116   :  { %2579 = vrot.lane.b32.xlu1 %v2571_v56, %s5220_s14  ;;  %v2659_v58 = vmul.f32 %v2658_v55, %v5297_v20 }
 0x117   :  { %2583 = vrot.lane.b32.xlu0 %v2573_v59, %s5220_s14  ;;  %1527 = vrot.lane.b32.xlu2 %v1516_v60, %s5221_s16  ;;  %v2635_v59 = vmul.f32 %v2632_v19, %v5323_v33 }
 0x118   :  { %v181_v63 = vpop.permute.xlu1 %180 }
 0x119   :  { %v190_v1 = vadd.f32 %v181_v63, %v164_v62  ;;  %v213_v2 = vpop.permute.xlu0 %212  ;;  %v241_v3 = vpop.permute.xlu2 %240  ;;  %v2694_v63 = vstv %s5024_s9 }
 0x11a   :  { %v224_v31 = vadd.f32 %v213_v2, %v5394_v30  ;;  %v2636_v30 = vmul.f32 %v2632_v19, %v5307_v26  ;;  %v2660_v2 = vmul.f32 %v2658_v55, %v5303_v25 }
 0x11b   :  { %v200_v4 = vadd.f32 %v196_v0, %v190_v1  ;;  %v2696_v0 = vmul.f32 %v2694_v63, %v5331_v38  ;;  %v2662_v1 = vmul.f32 %v2658_v55, %v5307_v26 }
 0x11d   :  { %v226_v35 = vadd.f32 %v217_v50, %v200_v4 }
 0x11e   :  { %2607 = vrot.lane.b32.xlu1 %v2598_v6, %s5221_s16  ;;  %v2721_v6 = vmul.f32 %v5312_v29, %v5341_v44 }
 0x11f   :  { %2585 = vrot.lane.b32.xlu0 %v2574_v7, %s5220_s14  ;;  %2581 = vrot.lane.b32.xlu2 %v2572_v9, %s5220_s14  ;;  %v2697_v7 = vmul.f32 %v2694_v63, %v5339_v43  ;;  %v2695_v9 = vmul.f32 %v2694_v63, %v5341_v44 }
 0x120   :  { %v215_v10 = vpop.permute.xlu1 %214 }
 0x121   :  { %v225_v12 = vadd.f32 %v215_v10, %v199_v57  ;;  %v219_v13 = vpop.permute.xlu0 %218  ;;  %v5425_v16 = vpop.permute.xlu2 %274  ;;  %v2661_v57 = vmul.f32 %v2658_v55, %v5323_v33  ;;  %v1352_v10 = vstv %s5005_s10 }
 0x122   :  { %v227_v49 = vadd.f32 %v219_v13, %v201_v61 }
 0x123   :  { %v251_v18 = vadd.f32 %v241_v3, %v225_v12  ;;  %v1354_v12 = vmul.f32 %v1352_v10, %v5289_v15 }
 0x125   :  { %v5431_v28 = vadd.f32 %v257_v21, %v251_v18  ;;  %v1414_v21 = vstv %s5008_s11 }
 0x126   :  { %2641 = vrot.lane.b32.xlu1 %v2633_v22, %s5220_s14 }
 0x127   :  { %2609 = vrot.lane.b32.xlu0 %v2599_v23, %s5221_s16  ;;  %2605 = vrot.lane.b32.xlu2 %v2597_v24, %s5221_s16  ;;  %v1416_v23 = vmul.f32 %v1414_v21, %v5303_v25  ;;  %v1353_v24 = vmul.f32 %v1352_v10, %v5281_v11 }
 0x128   :  { %v239_v34 = vpop.permute.xlu1 %238 }
 0x129   :  { %v250_v37 = vadd.f32 %v239_v34, %v224_v31  ;;  %v243_v39 = vpop.permute.xlu0 %242  ;;  %v5438_v40 = vpop.permute.xlu2 %280  ;;  %v2722_v31 = vmul.f32 %v5312_v29, %v5331_v38  ;;  %v2698_v34 = vmul.f32 %v2694_v63, %v5309_v27 }
 0x12a   :  { %v252_v41 = vadd.f32 %v243_v39, %v226_v35 }
 0x12b   :  { %v5441_v45 = vadd.f32 %v256_v36, %v250_v37 }
 0x12c   :  { %v5444_v46 = vadd.f32 %v258_v42, %v252_v41  ;;  %v1415_v41 = vmul.f32 %v1414_v21, %v5297_v20 }
 0x12e   :  { %2647 = vrot.lane.b32.xlu1 %v2636_v30, %s5220_s14 }
 0x12f   :  { %2643 = vrot.lane.b32.xlu0 %v2634_v47, %s5220_s14  ;;  %2611 = vrot.lane.b32.xlu2 %v2600_v48, %s5221_s16  ;;  %v1356_v48 = vmul.f32 %v1352_v10, %v5287_v14 }
 0x130   :  { %v245_v50 = vpop.permute.xlu1 %244 }
 0x131   :  { %v253_v52 = vadd.f32 %v245_v50, %v227_v49  ;;  %v5452_v53 = vpop.permute.xlu0 %276  ;;  %v5454_v54 = vpop.permute.xlu2 %304  ;;  %v2723_v49 = vmul.f32 %v5312_v29, %v5339_v43  ;;  %v1355_v50 = vmul.f32 %v1352_v10, %v5279_v8  ;;  %v1417_v29 = vmul.f32 %v1414_v21, %v5323_v33 }
 0x133   :  { %v5456_v56 = vadd.f32 %v259_v51, %v253_v52 }
 0x136   :  { %2671 = vrot.lane.b32.xlu1 %v2661_v57, %s5221_s16  ;;  %v287_v57 = vadd.f32 %v5452_v53, %v5431_v28  ;;  %v317_v28 = vstv %s316_s12  ;;  %s6493_s12 = sld [smem:[#allocation10 + $0x1]] }
 0x137   :  { %2667 = vrot.lane.b32.xlu0 %v2659_v58, %s5221_s16  ;;  %2645 = vrot.lane.b32.xlu2 %v2635_v59, %s5220_s14  ;;  %v1418_v59 = vmul.f32 %v1414_v21, %v5307_v26 }
 0x138   :  { %v5464_v60 = vpop.permute.xlu1 %278 }
 0x139   :  { %v5466_v61 = vpop.permute.xlu0 %300  ;;  %v1376_v62 = vpop.permute.xlu2 %1375 }
 0x13a   :  { %v1385_v52 = vadd.f32 %v1376_v62, %v1355_v50  ;;  %v288_v62 = vadd.f32 %v5464_v60, %v5444_v46  ;;  %v289_v46 = vadd.f32 %v5438_v40, %v5456_v56 }
 0x13e   :  { %2705 = vrot.lane.b32.xlu1 %v2696_v0, %s5220_s14 }
 0x13f   :  { %2673 = vrot.lane.b32.xlu0 %v2662_v1, %s5221_s16  ;;  %2669 = vrot.lane.b32.xlu2 %v2660_v2, %s5221_s16  ;;  %v286_v2 = vadd.f32 %v5425_v16, %v5441_v45 }
 0x140   :  { %v303_v3 = vpop.permute.xlu1 %302 }
 0x141   :  { %v5474_v4 = vpop.permute.xlu0 %306  ;;  %v1400_v5 = vpop.permute.xlu2 %1399 }
 0x146   :  { %2729 = vrot.lane.b32.xlu1 %v2721_v6, %s5221_s16 }
 0x147   :  { %2707 = vrot.lane.b32.xlu0 %v2697_v7, %s5220_s14  ;;  %2703 = vrot.lane.b32.xlu2 %v2695_v9, %s5220_s14  ;;  %v312_v9 = vadd.f32 %v5466_v61, %v286_v2 }
 0x148   :  { %v1372_v13 = vpop.permute.xlu1 %1371 }
 0x149   :  { %v1374_v17 = vpop.permute.xlu0 %1373  ;;  %v1434_v18 = vpop.permute.xlu2 %1433  ;;  %v1383_v36 = vadd.f32 %v1372_v13, %v1353_v24  ;;  %v314_v13 = vadd.f32 %v5454_v54, %v288_v62  ;;  %v1538_v62 = vstv %s5014_s1 }
 0x14a   :  { %v1384_v19 = vadd.f32 %v1374_v17, %v1354_v12  ;;  %v1476_v12 = vstv %s5011_s13  ;;  %v5509_v17 = vadd.f32 %v317_v28, %v312_v9 }
 0x14b   :  { %v1479_v61 = vmul.f32 %v1476_v12, %v5339_v43  ;;  %v1478_v40 = vmul.f32 %v1476_v12, %v5331_v38 }
 0x14c   :  { %v1410_v22 = vadd.f32 %v1400_v5, %v1384_v19  ;;  %v313_v5 = vadd.f32 %v303_v3, %v287_v57  ;;  %v5516_v3 = vadd.f32 %v317_v28, %v314_v13  ;;  %v323_v54 = vsel %vm322_vm3, %v5509_v17, 0.0 }
 0x14e   :  { %v1420_v35 = vadd.f32 %v1416_v23, %v1410_v22  ;;  %v5506_v53 = vadd.f32 %v317_v28, %v313_v5  ;;  %v315_v22 = vadd.f32 %v5474_v4, %v289_v46 }
 0x14f   :  { %2731 = vrot.lane.b32.xlu0 %v2722_v31, %s5221_s16  ;;  %2709 = vrot.lane.b32.xlu2 %v2698_v34, %s5220_s14 }
 0x150   :  { %v1398_v37 = vpop.permute.xlu1 %1397  ;;  %v324_v45 = vsel %vm322_vm3, %v5506_v53, 0.0 }
 0x151   :  { %v1378_v39 = vpop.permute.xlu0 %1377  ;;  %v1409_v42 = vadd.f32 %v1398_v37, %v1383_v36  ;;  %v1440_v30 = vpop.permute.xlu2 %1439  ;;  %v325_v24 = vadd.f32 %v324_v45, %v323_v54  ;;  %v5521_v37 = vadd.f32 %v317_v28, %v315_v22 }
 0x152   :  { %v1386_v51 = vadd.f32 %v1378_v39, %v1356_v48 }
 0x153   :  { %v1419_v47 = vadd.f32 %v1415_v41, %v1409_v42  ;;  %v326_v42 = vsel %vm322_vm3, %v5516_v3, 0.0 }
 0x154   :  { %v327_v50 = vadd.f32 %v326_v42, %v325_v24 }
 0x155   :  { %v1445_v34 = vadd.f32 %v1434_v18, %v1419_v47  ;;  %v328_v18 = vsel %vm322_vm3, %v5521_v37, 0.0 }
 0x157   :  { %2733 = vrot.lane.b32.xlu2 %v2723_v49, %s5221_s16  ;;  %v1477_v49 = vmul.f32 %v1476_v12, %v5341_v44 }
 0x158   :  { %v1404_v55 = vpop.permute.xlu1 %1403 }
 0x159   :  { %v1402_v58 = vpop.permute.xlu0 %1401  ;;  %v1412_v63 = vadd.f32 %v1404_v55, %v1386_v51  ;;  %v1464_v0 = vpop.permute.xlu2 %1463 }
 0x15a   :  { %v1411_v1 = vadd.f32 %v1402_v58, %v1385_v52 }
 0x15b   :  { %v1422_v6 = vadd.f32 %v1418_v59, %v1412_v63  ;;  %v1480_v59 = vmul.f32 %v1476_v12, %v5309_v27 }
 0x15c   :  { %v1421_v7 = vadd.f32 %v1417_v29, %v1411_v1 }
 0x15d   :  { %v1448_v47 = vadd.f32 %v1440_v30, %v1422_v6 }
 0x160   :  { %v1438_v10 = vpop.permute.xlu1 %1437 }
 0x161   :  { %v1436_v19 = vpop.permute.xlu0 %1435  ;;  %v1447_v21 = vadd.f32 %v1438_v10, %v1421_v7  ;;  %v1498_v16 = vpop.permute.xlu2 %1497 }
 0x162   :  { %v1446_v31 = vadd.f32 %v1436_v19, %v1420_v35  ;;  %v329_v35 = vadd.f32 %v328_v18, %v327_v50 }
 0x163   :  { %v1473_v60 = vadd.f32 %v1464_v0, %v1447_v21 }
 0x165   :  { %v1483_v23 = vadd.f32 %v1479_v61, %v1473_v60  ;;  %v2560_v60 = vstv %s5017_s2  ;;  %s5016_s2 = sld [smem:[#allocation12 + $0x1]] }
 0x166   :  { %v2561_v22 = vmul.f32 %v2560_v60, %v5281_v11  ;;  %v2562_v11 = vmul.f32 %v2560_v60, %v5289_v15 }
 0x168   :  { %v1462_v36 = vpop.permute.xlu1 %1461 }
 0x169   :  { %v1460_v39 = vpop.permute.xlu0 %1459  ;;  %v1472_v56 = vadd.f32 %v1462_v36, %v1446_v31  ;;  %v1522_v41 = vpop.permute.xlu2 %1521 }
 0x16a   :  { %v1471_v48 = vadd.f32 %v1460_v39, %v1445_v34 }
 0x16b   :  { %v1482_v4 = vadd.f32 %v1478_v40, %v1472_v56  ;;  %v2622_v56 = vstv %s5020_s4  ;;  %s5026_s4 = sld [smem:[#allocation9 + $0x2]] }
 0x16c   :  { %v1481_v51 = vadd.f32 %v1477_v49, %v1471_v48  ;;  %v2623_v48 = vmul.f32 %v2622_v56, %v5297_v20  ;;  %v2563_v20 = vmul.f32 %v2560_v60, %v5279_v8 }
 0x16d   :  { %v1508_v28 = vadd.f32 %v1498_v16, %v1482_v4 }
 0x170   :  { %v1496_v52 = vpop.permute.xlu1 %1495  ;;  %330 = vadd.xlane.f32.xlu1 %v329_v35 }
 0x171   :  { %v1466_v55 = vpop.permute.xlu0 %1465  ;;  %v1528_v57 = vpop.permute.xlu2 %1527  ;;  %v1507_v29 = vadd.f32 %v1496_v52, %v1481_v51  ;;  %v2564_v51 = vmul.f32 %v2560_v60, %v5287_v14 }
 0x172   :  { %v1474_v58 = vadd.f32 %v1466_v55, %v1448_v47  ;;  %v2624_v47 = vmul.f32 %v2622_v56, %v5303_v25 }
 0x173   :  { %v1533_v5 = vadd.f32 %v1522_v41, %v1507_v29  ;;  %v2625_v29 = vmul.f32 %v2622_v56, %v5323_v33 }
 0x174   :  { %v1484_v63 = vadd.f32 %v1480_v59, %v1474_v58  ;;  %v2626_v58 = vmul.f32 %v2622_v56, %v5307_v26 }
 0x175   :  { %v5530_v13 = vadd.f32 %v1538_v62, %v1533_v5 }
 0x177   :  { %v1543_v16 = vsel %vm322_vm3, %v5530_v13, 0.0 }
 0x178   :  { %v1502_v0 = vpop.permute.xlu1 %1501 }
 0x179   :  { %v1500_v1 = vpop.permute.xlu0 %1499  ;;  %v2582_v2 = vpop.permute.xlu2 %2581  ;;  %v1510_v7 = vadd.f32 %v1502_v0, %v1484_v63 }
 0x17a   :  { %v1509_v9 = vadd.f32 %v1500_v1, %v1483_v23  ;;  %v2592_v50 = vadd.f32 %v2582_v2, %v2562_v11 }
 0x17b   :  { %v1536_v19 = vadd.f32 %v1528_v57, %v1510_v7 }
 0x17d   :  { %v5538_v54 = vadd.f32 %v1538_v62, %v1536_v19 }
 0x17f   :  { %v1548_v40 = vsel %vm322_vm3, %v5538_v54, 0.0 }
 0x180   :  { %v1526_v30 = vpop.permute.xlu1 %1525 }
 0x181   :  { %v1524_v6 = vpop.permute.xlu0 %1523  ;;  %v1535_v10 = vadd.f32 %v1526_v30, %v1509_v9  ;;  %v2606_v46 = vpop.permute.xlu2 %2605  ;;  %v2684_v9 = vstv %s5023_s15 }
 0x182   :  { %v1534_v21 = vadd.f32 %v1524_v6, %v1508_v28  ;;  %v2686_v26 = vmul.f32 %v2684_v9, %v5331_v38  ;;  %v2687_v33 = vmul.f32 %v2684_v9, %v5339_v43  ;;  %v2688_v38 = vmul.f32 %v2684_v9, %v5309_v27 }
 0x183   :  { %v5534_v45 = vadd.f32 %v1538_v62, %v1535_v10 }
 0x184   :  { %v5532_v12 = vadd.f32 %v1538_v62, %v1534_v21 }
 0x185   :  { %v1546_v31 = vsel %vm322_vm3, %v5534_v45, 0.0 }
 0x186   :  { %v1544_v61 = vsel %vm322_vm3, %v5532_v12, 0.0 }
 0x187   :  { %v1545_v23 = vadd.f32 %v1544_v61, %v1543_v16 }
 0x188   :  { %v2580_v24 = vpop.permute.xlu1 %2579 }
 0x189   :  { %v2584_v34 = vpop.permute.xlu0 %2583  ;;  %v2591_v36 = vadd.f32 %v2580_v24, %v2561_v22  ;;  %2735 = vrot.lane.b32.xlu1 %v5318_v32, %s5221_s16  ;;  %v1547_v39 = vadd.f32 %v1546_v31, %v1545_v23  ;;  %v2612_v4 = vpop.permute.xlu2 %2611 }
 0x18a   :  { %v2593_v15 = vadd.f32 %v2584_v34, %v2563_v20 }
 0x18b   :  { %v2617_v41 = vadd.f32 %v2606_v46, %v2591_v36  ;;  %v1549_v42 = vadd.f32 %v1548_v40, %v1547_v39  ;;  %v2685_v46 = vmul.f32 %v2684_v9, %v5341_v44 }
 0x18d   :  { %1550 = vadd.xlane.f32.xlu0 %v1549_v42  ;;  %v2627_v49 = vadd.f32 %v2623_v48, %v2617_v41 }
 0x190   :  { %v2608_v18 = vpop.permute.xlu1 %2607 }
 0x191   :  { %v2586_v35 = vpop.permute.xlu0 %2585  ;;  %v2618_v32 = vadd.f32 %v2608_v18, %v2592_v50  ;;  %v2646_v0 = vpop.permute.xlu2 %2645 }
 0x192   :  { %v2594_v52 = vadd.f32 %v2586_v35, %v2564_v51 }
 0x193   :  { %v2628_v55 = vadd.f32 %v2624_v47, %v2618_v32 }
 0x194   :  { %v2620_v57 = vadd.f32 %v2612_v4, %v2594_v52 }
 0x196   :  { %v2630_v59 = vadd.f32 %v2626_v58, %v2620_v57 }
 0x198   :  { %v2642_v63 = vpop.permute.xlu1 %2641 }
 0x199   :  { %v2610_v1 = vpop.permute.xlu0 %2609  ;;  %v2670_v62 = vpop.permute.xlu2 %2669  ;;  %v2653_v6 = vadd.f32 %v2642_v63, %v2627_v49 }
 0x19a   :  { %v2619_v14 = vadd.f32 %v2610_v1, %v2593_v15 }
 0x19c   :  { %v2629_v2 = vadd.f32 %v2625_v29, %v2619_v14 }
 0x19e   :  { %v2655_v8 = vadd.f32 %v2646_v0, %v2629_v2 }
 0x1a0   :  { %v2648_v5 = vpop.permute.xlu1 %2647 }
 0x1a1   :  { %v2644_v7 = vpop.permute.xlu0 %2643  ;;  %v2656_v22 = vadd.f32 %v2648_v5, %v2630_v59 }
 0x1a2   :  { %v2654_v25 = vadd.f32 %v2644_v7, %v2628_v55  ;;  %v5588_v55 = vpop.permute.xlu2 %2703 }
 0x1a3   :  { %9490 = vst [vmem:[#allocation25_spill] sm:$0xff] %v5588_v55 }
 0x1a4   :  { %v2680_v28 = vadd.f32 %v2670_v62, %v2654_v25 }
 0x1a6   :  { %v5557_v30 = vadd.f32 %v2686_v26, %v2680_v28 }
 0x1a8   :  { %9484 = vst [vmem:[#allocation19_spill] sm:$0xff] %v5557_v30  ;;  %v2672_v10 = vpop.permute.xlu1 %2671 }
 0x1a9   :  { %v2668_v19 = vpop.permute.xlu0 %2667  ;;  %v2681_v21 = vadd.f32 %v2672_v10, %v2655_v8 }
 0x1aa   :  { %v2679_v60 = vadd.f32 %v2668_v19, %v2653_v6  ;;  %v5590_v57 = vpop.permute.xlu2 %2709 }
 0x1ab   :  { %v5561_v61 = vadd.f32 %v2687_v33, %v2681_v21  ;;  %9491 = vst [vmem:[#allocation26_spill] sm:$0xff] %v5590_v57 }
 0x1ac   :  { %v5563_v16 = vadd.f32 %v2685_v46, %v2679_v60 }
 0x1ad   :  { %9485 = vst [vmem:[#allocation20_spill] sm:$0xff] %v5561_v61 }
 0x1ae   :  { %9486 = vst [vmem:[#allocation21_spill] sm:$0xff] %v5563_v16 }
 0x1b0   :  { %v5568_v34 = vpop.permute.xlu1 %2705 }
 0x1b1   :  { %v2674_v23 = vpop.permute.xlu0 %2673  ;;  %9488 = vst [vmem:[#allocation23_spill] sm:$0xff] %v5568_v34 }
 0x1b2   :  { %v2682_v24 = vadd.f32 %v2674_v23, %v2656_v22  ;;  %v5592_v58 = vpop.permute.xlu2 %2733  ;;  %v387_v23 = vstv %s386_s23 }
 0x1b3   :  { %9492 = vst [vmem:[#allocation27_spill] sm:$0xff] %v5592_v58 }
 0x1b4   :  { %v5566_v31 = vadd.f32 %v2688_v38, %v2682_v24 }
 0x1b6   :  { %9487 = vst [vmem:[#allocation22_spill] sm:$0xff] %v5566_v31 }
 0x1b8   :  { %v5570_v36 = vpop.permute.xlu1 %2729 }
 0x1b9   :  { %9489 = vst [vmem:[#allocation24_spill] sm:$0xff] %v5570_v36  ;;  %v5594_v14 = vpop.permute.xlu0 %2707 }
 0x1ba   :  { %9493 = vst [vmem:[#allocation28_spill] sm:$0xff] %v5594_v14 }
 0x1c1   :  { %v5596_v2 = vpop.permute.xlu0 %2731 }
 0x1c2   :  { %9494 = vst [vmem:[#allocation29_spill] sm:$0xff] %v5596_v2 }
 0x1e3   :  { %v331_v39 = vpop.xlane.xlu1 %330 }
 0x1e4   :  { %v332_v43 = vrot.slane %v331_v39, 4 }
 0x1e6   :  { %v333_v40 = vadd.f32 %v332_v43, %v331_v39 }
 0x1e8   :  { %v334_v44 = vrot.slane %v333_v40, 2 }
 0x1ea   :  { %v335_v56 = vadd.f32 %v334_v44, %v333_v40 }
 0x1ec   :  { %v336_v41 = vrot.slane %v335_v56, 1 }
 0x1ee   :  { %v337_v42 = vadd.f32 %v336_v41, %v335_v56 }
 0x1f0   :  { %5041 = vpush %v337_v42 }
 0x200   :  { %v1551_v5 = vpop.xlane.xlu0 %1550 }
 0x201   :  { %v1552_v7 = vrot.slane %v1551_v5, 4 }
 0x203   :  { %v1553_v62 = vadd.f32 %v1552_v7, %v1551_v5 }
 0x205   :  { %v1554_v9 = vrot.slane %v1553_v62, 2 }
 0x207   :  { %v1555_v6 = vadd.f32 %v1554_v9, %v1553_v62 }
 0x209   :  { %v1556_v21 = vrot.slane %v1555_v6, 1 }
 0x20b   :  { %v1557_v60 = vadd.f32 %v1556_v21, %v1555_v6 }
 0x221   :  { %s5042_s17 = spop %5041 }
 0x222   :  { %s339_s18 = smul.f32 0.001953125, %s5042_s17 }
 0x224   :  { %v340_v48 = vstv %s339_s18 }
 0x225   :  { %v341_v27 = vsub.f32 %v5509_v17, %v340_v48  ;;  %v342_v11 = vsub.f32 %v5506_v53, %v340_v48  ;;  %v5575_v49 = vsub.f32 %v5516_v3, %v340_v48  ;;  %v5578_v50 = vsub.f32 %v5521_v37, %v340_v48 }
 0x227   :  { %v345_v4 = vmul.f32 %v341_v27, %v341_v27  ;;  %v346_v51 = vmul.f32 %v342_v11, %v342_v11  ;;  %v347_v18 = vmul.f32 %v5575_v49, %v5575_v49  ;;  %v348_v35 = vmul.f32 %v5578_v50, %v5578_v50 }
 0x229   :  { %v349_v32 = vsel %vm322_vm3, %v345_v4, 0.0  ;;  %v350_v17 = vsel %vm322_vm3, %v346_v51, 0.0  ;;  %v352_v53 = vsel %vm322_vm3, %v347_v18, 0.0  ;;  %v354_v52 = vsel %vm322_vm3, %v348_v35, 0.0 }
 0x22a   :  { %v351_v47 = vadd.f32 %v350_v17, %v349_v32 }
 0x22c   :  { %v353_v3 = vadd.f32 %v352_v53, %v351_v47 }
 0x22e   :  { %v355_v37 = vadd.f32 %v354_v52, %v353_v3 }
 0x230   :  { %356 = vadd.xlane.f32.xlu2 %v355_v37 }
 0x2a3   :  { %v357_v20 = vpop.xlane.xlu2 %356 }
 0x2a4   :  { %v358_v59 = vrot.slane %v357_v20, 4 }
 0x2a6   :  { %v359_v15 = vadd.f32 %v358_v59, %v357_v20 }
 0x2a8   :  { %v360_v63 = vrot.slane %v359_v15, 2 }
 0x2aa   :  { %v361_v0 = vadd.f32 %v360_v63, %v359_v15 }
 0x2ac   :  { %v362_v1 = vrot.slane %v361_v0, 1 }
 0x2ae   :  { %v363_v29 = vadd.f32 %v362_v1, %v361_v0 }
 0x2b0   :  { %5043 = vpush %v363_v29 }
 0x2e1   :  { %s5044_s19 = spop %5043 }
 0x2e2   :  { %s365_s20 = smul.f32 0.001953125, %s5044_s19 }
 0x2e4   :  { %s367_s21 = sadd.f32 1e-05, %s365_s20 }
 0x2e6   :  { %v368_v25 = vstv %s367_s21  ;;  %s5027_s21 = sld [smem:[#allocation10 + $0x2]] }
 0x2e7   :  { %5085 = vrsqrt.f32 %v368_v25  ;;  %vm375_vm5 = vweird.f32 %v368_v25 }
 0x2ed   :  { %v5086_v28 = vpop.eup %5085 }
 0x2ee   :  { %v370_v26 = vmul.f32 %v5086_v28, %v368_v25  ;;  %vm376_vm4 = vweird.f32 %v5086_v28 }
 0x2ef   :  { %vm377_vm6 = vmor %vm375_vm5, %vm376_vm4  ;;  %vm1249_vm4 = vcmask 15360   ;;  %vm1348_vm5 = vcmask 64512  }
 0x2f0   :  { %v371_v8 = vmul.f32 %v5086_v28, %v370_v26 }
 0x2f2   :  { %v372_v10 = vmul.f32 0.5, %v371_v8 }
 0x2f4   :  { %v373_v19 = vsub.f32 1.5, %v372_v10 }
 0x2f6   :  { %v374_v33 = vmul.f32 %v5086_v28, %v373_v19 }
 0x2f8   :  { %v378_v46 = vsel %vm377_vm6, %v5086_v28, %v374_v33 }
 0x2f9   :  { %5045 = vpush %v378_v46 }
 0x2fa   :  { %5047 = vpush %v1557_v60 }
 0x32a   :  { %s5046_s24 = spop %5045 }
 0x32b   :  { %s380_s25 = smul.f32 %s5046_s24, %s366_s22  ;;  %s5048_s26 = spop %5047 }
 0x32c   :  { %s1559_s29 = smul.f32 0.001953125, %s5048_s26  ;;  %s5028_s22 = sld [smem:[#allocation12 + $0x2]] }
 0x32d   :  { %v381_v22 = vstv %s380_s25  ;;  %s5030_s25 = sld [smem:[#allocation8 + $0x1c]] }
 0x32e   :  { %v382_v38 = vmul.f32 %v381_v22, %v341_v27  ;;  %v383_v24 = vmul.f32 %v381_v22, %v342_v11  ;;  %v384_v41 = vmul.f32 %v381_v22, %v5575_v49  ;;  %v385_v27 = vmul.f32 %v381_v22, %v5578_v50  ;;  %s5031_s26 = sld [smem:[#allocation8 + $0x1d]] }
 0x32f   :  { %v1560_v63 = vstv %s1559_s29  ;;  %s5033_s29 = sld [smem:[#allocation8 + $0x1f]] }
 0x330   :  { %v388_v39 = vadd.f32 %v387_v23, %v382_v38  ;;  %v389_v43 = vadd.f32 %v387_v23, %v383_v24  ;;  %v390_v51 = vadd.f32 %v387_v23, %v384_v41  ;;  %v391_v17 = vadd.f32 %v387_v23, %v385_v27 }
 0x331   :  { %v5625_v7 = vsub.f32 %v5530_v13, %v1560_v63  ;;  %v5628_v25 = vsub.f32 %v5532_v12, %v1560_v63  ;;  %v5633_v26 = vsub.f32 %v5534_v45, %v1560_v63  ;;  %v5640_v12 = vsub.f32 %v5538_v54, %v1560_v63 }
 0x332   :  { %v5598_v40 = vmax.f32 %v388_v39, 0.0  ;;  %v5600_v44 = vmax.f32 %v389_v43, 0.0  ;;  %v5608_v53 = vmax.f32 %v390_v51, 0.0  ;;  %v5612_v37 = vmax.f32 %v391_v17, 0.0 }
 0x333   :  { %9495 = vst [vmem:[#allocation30_spill] sm:$0xff] %v5625_v7  ;;  %v1565_v6 = vmul.f32 %v5625_v7, %v5625_v7  ;;  %v1566_v13 = vmul.f32 %v5628_v25, %v5628_v25  ;;  %v1567_v21 = vmul.f32 %v5633_v26, %v5633_v26  ;;  %v1568_v22 = vmul.f32 %v5640_v12, %v5640_v12 }
 0x334   :  { %v425_v56 = vsel %vm424_vm7, %v5598_v40, -inf  ;;  %v453_v48 = vsel %vm424_vm7, %v5600_v44, -inf  ;;  %v481_v50 = vsel %vm424_vm7, %v5608_v53, -inf  ;;  %v509_v15 = vsel %vm424_vm7, %v5612_v37, -inf  ;;  %9496 = vst [vmem:[#allocation31_spill] sm:$0xff] %v5628_v25 }
 0x335   :  { %v426_v42 = vrot.slane %v425_v56, 4  ;;  %v454_v11 = vrot.slane %v453_v48, 4  ;;  %v482_v59 = vrot.slane %v481_v50, 4  ;;  %v510_v1 = vrot.slane %v509_v15, 4  ;;  %9497 = vst [vmem:[#allocation32_spill] sm:$0xff] %v5633_v26 }
 0x336   :  { %9498 = vst [vmem:[#allocation33_spill] sm:$0xff] %v5640_v12  ;;  %v1569_v45 = vsel %vm322_vm3, %v1565_v6, 0.0  ;;  %v1570_v46 = vsel %vm322_vm3, %v1566_v13, 0.0  ;;  %v1572_v54 = vsel %vm322_vm3, %v1567_v21, 0.0  ;;  %v1574_v24 = vsel %vm322_vm3, %v1568_v22, 0.0 }
 0x337   :  { %v427_v4 = vmax.f32 %v425_v56, %v426_v42  ;;  %v455_v35 = vmax.f32 %v453_v48, %v454_v11  ;;  %v483_v0 = vmax.f32 %v481_v50, %v482_v59  ;;  %v511_v62 = vmax.f32 %v509_v15, %v510_v1 }
 0x338   :  { %v1571_v23 = vadd.f32 %v1570_v46, %v1569_v45  ;;  %v403_v43 = vrot.slane %v5600_v44, 2  ;;  %v407_v42 = vrot.slane %v5608_v53, 4  ;;  %v409_v51 = vrot.slane %v5612_v37, 2 }
 0x339   :  { %v428_v18 = vrot.slane %v427_v4, 2  ;;  %v456_v47 = vrot.slane %v455_v35, 2  ;;  %v484_v5 = vrot.slane %v483_v0, 2  ;;  %v512_v28 = vrot.slane %v511_v62, 2 }
 0x33a   :  { %v1573_v38 = vadd.f32 %v1572_v54, %v1571_v23  ;;  %v460_v56 = vsel %vm424_vm7, %v403_v43, -inf  ;;  %v400_v17 = vrot.slane %v5598_v40, 2  ;;  %v402_v50 = vrot.slane %v5598_v40, 6 }
 0x33b   :  { %v429_v32 = vmax.f32 %v427_v4, %v428_v18  ;;  %v457_v49 = vmax.f32 %v455_v35, %v456_v47  ;;  %v485_v9 = vmax.f32 %v483_v0, %v484_v5  ;;  %v513_v10 = vmax.f32 %v511_v62, %v512_v28 }
 0x33c   :  { %v1575_v39 = vadd.f32 %v1574_v24, %v1573_v38  ;;  %v461_v41 = vrot.slane %v460_v56, 4  ;;  %v495_v4 = vsel %vm424_vm7, %v407_v42, -inf  ;;  %v446_v0 = vsel %vm424_vm7, %v402_v50, -inf }
 0x33d   :  { %v430_v3 = vrot.slane %v429_v32, 1  ;;  %v458_v20 = vrot.slane %v457_v49, 1  ;;  %v486_v8 = vrot.slane %v485_v9, 1  ;;  %v514_v19 = vrot.slane %v513_v10, 1 }
 0x33e   :  { %1576 = vadd.xlane.f32.xlu1 %v1575_v39  ;;  %v462_v48 = vmax.f32 %v460_v56, %v461_v41  ;;  %v496_v11 = vrot.slane %v495_v4, 4  ;;  %v401_v5 = vrot.slane %v5598_v40, 4  ;;  %v447_v62 = vrot.slane %v446_v0, 4 }
 0x33f   :  { %v5610_v52 = vmax.f32 %v429_v32, %v430_v3  ;;  %v5622_v29 = vmax.f32 %v457_v49, %v458_v20  ;;  %v5644_v33 = vmax.f32 %v485_v9, %v486_v8  ;;  %v5648_v60 = vmax.f32 %v513_v10, %v514_v19 }
 0x340   :  { %v463_v27 = vrot.slane %v462_v48, 2  ;;  %v497_v35 = vmax.f32 %v495_v4, %v496_v11  ;;  %v516_v32 = vsel %vm424_vm7, %v409_v51, -inf  ;;  %v432_v20 = vsel %vm424_vm7, %v400_v17, -inf }
 0x341   :  { %585 = vrot.lane.b32.xlu2 %v5610_v52, %s5222_s3  ;;  %553 = vrot.lane.b32.xlu0 %v5610_v52, %s5221_s16  ;;  %v517_v49 = vrot.slane %v516_v32, 4  ;;  %v433_v1 = vrot.slane %v432_v20, 4  ;;  %v404_v8 = vrot.slane %v5600_v44, 4  ;;  %v439_v13 = vsel %vm424_vm7, %v401_v5, -inf }
 0x342   :  { %v464_v18 = vmax.f32 %v462_v48, %v463_v27  ;;  %v498_v3 = vrot.slane %v497_v35, 2  ;;  %v448_v10 = vmax.f32 %v446_v0, %v447_v62  ;;  %v440_v46 = vrot.slane %v439_v13, 4 }
 0x343   :  { %v518_v63 = vmax.f32 %v516_v32, %v517_v49  ;;  %v434_v6 = vmax.f32 %v432_v20, %v433_v1  ;;  %v467_v45 = vsel %vm424_vm7, %v404_v8, -inf  ;;  %v406_v38 = vrot.slane %v5608_v53, 2 }
 0x344   :  { %v465_v47 = vrot.slane %v464_v18, 1  ;;  %v499_v15 = vmax.f32 %v497_v35, %v498_v3  ;;  %v449_v22 = vrot.slane %v448_v10, 2  ;;  %v468_v23 = vrot.slane %v467_v45, 4 }
 0x345   :  { %v519_v28 = vrot.slane %v518_v63, 2  ;;  %v435_v40 = vrot.slane %v434_v6, 2  ;;  %v441_v39 = vmax.f32 %v439_v13, %v440_v46  ;;  %v488_v42 = vsel %vm424_vm7, %v406_v38, -inf }
 0x346   :  { %v5697_v59 = vmax.f32 %v464_v18, %v465_v47  ;;  %v500_v9 = vrot.slane %v499_v15, 1  ;;  %v450_v43 = vmax.f32 %v448_v10, %v449_v22  ;;  %v469_v56 = vmax.f32 %v467_v45, %v468_v23 }
 0x347   :  { %v520_v21 = vmax.f32 %v518_v63, %v519_v28  ;;  %v436_v24 = vmax.f32 %v434_v6, %v435_v40  ;;  %v408_v48 = vrot.slane %v5608_v53, 6  ;;  %v442_v27 = vrot.slane %v441_v39, 2 }
 0x348   :  { %v5709_v19 = vmax.f32 %v499_v15, %v500_v9  ;;  %v405_v11 = vrot.slane %v5600_v44, 6  ;;  %v451_v51 = vrot.slane %v450_v43, 1  ;;  %v470_v18 = vrot.slane %v469_v56, 2 }
 0x349   :  { %561 = vrot.lane.b32.xlu0 %v5622_v29, %s5221_s16  ;;  %609 = vrot.lane.b32.xlu2 %v5648_v60, %s5222_s3  ;;  %v521_v54 = vrot.slane %v520_v21, 1  ;;  %v437_v4 = vrot.slane %v436_v24, 1  ;;  %v489_v35 = vrot.slane %v488_v42, 4  ;;  %v411_v32 = vrot.slane %v5612_v37, 6 }
 0x34a   :  { %v443_v47 = vmax.f32 %v441_v39, %v442_v27  ;;  %v502_v3 = vsel %vm424_vm7, %v408_v48, -inf  ;;  %v5734_v49 = vmax.f32 %v450_v43, %v451_v51  ;;  %v471_v50 = vmax.f32 %v469_v56, %v470_v18 }
 0x34b   :  { %v5719_v41 = vmax.f32 %v520_v21, %v521_v54  ;;  %v5731_v17 = vmax.f32 %v436_v24, %v437_v4  ;;  %v474_v20 = vsel %vm424_vm7, %v405_v11, -inf  ;;  %v490_v53 = vmax.f32 %v488_v42, %v489_v35 }
 0x34c   :  { %v530_v44 = vsel %vm424_vm7, %v411_v32, -inf  ;;  %v503_v15 = vrot.slane %v502_v3, 4  ;;  %v410_v63 = vrot.slane %v5612_v37, 4  ;;  %v444_v0 = vrot.slane %v443_v47, 1 }
 0x34d   :  { %v475_v1 = vrot.slane %v474_v20, 4  ;;  %v472_v5 = vrot.slane %v471_v50, 1  ;;  %v491_v62 = vrot.slane %v490_v53, 2  ;;  %v531_v9 = vrot.slane %v530_v44, 4 }
 0x34e   :  { %v504_v28 = vmax.f32 %v502_v3, %v503_v15  ;;  %v5745_v8 = vmax.f32 %v443_v47, %v444_v0  ;;  %v523_v13 = vsel %vm424_vm7, %v410_v63, -inf }
 0x34f   :  { %v476_v6 = vmax.f32 %v474_v20, %v475_v1  ;;  %v5748_v10 = vmax.f32 %v471_v50, %v472_v5  ;;  %v492_v21 = vmax.f32 %v490_v53, %v491_v62  ;;  %v532_v45 = vmax.f32 %v530_v44, %v531_v9  ;;  %v5788_v20 = vpop.permute.xlu1 %2735 }
 0x350   :  { %v505_v37 = vrot.slane %v504_v28, 2  ;;  %v524_v40 = vrot.slane %v523_v13, 4  ;;  %9499 = vst [vmem:[#allocation34_spill] sm:$0xff] %v5788_v20 }
 0x351   :  { %569 = vrot.lane.b32.xlu0 %v5644_v33, %s5221_s16  ;;  %633 = vrot.lane.b32.xlu2 %v5644_v33, %s5223_s30  ;;  %v477_v46 = vrot.slane %v476_v6, 2  ;;  %v493_v22 = vrot.slane %v492_v21, 1  ;;  %v533_v23 = vrot.slane %v532_v45, 2 }
 0x352   :  { %v506_v54 = vmax.f32 %v504_v28, %v505_v37  ;;  %v525_v38 = vmax.f32 %v523_v13, %v524_v40 }
 0x353   :  { %v478_v24 = vmax.f32 %v476_v6, %v477_v46  ;;  %v5756_v39 = vmax.f32 %v492_v21, %v493_v22  ;;  %v534_v43 = vmax.f32 %v532_v45, %v533_v23 }
 0x354   :  { %v507_v56 = vrot.slane %v506_v54, 1  ;;  %v526_v42 = vrot.slane %v525_v38, 2 }
 0x355   :  { %v479_v48 = vrot.slane %v478_v24, 1  ;;  %v535_v27 = vrot.slane %v534_v43, 1 }
 0x356   :  { %v5766_v11 = vmax.f32 %v506_v54, %v507_v56  ;;  %v527_v51 = vmax.f32 %v525_v38, %v526_v42 }
 0x357   :  { %593 = vrot.lane.b32.xlu1 %v5622_v29, %s5222_s3  ;;  %v5768_v18 = vmax.f32 %v478_v24, %v479_v48  ;;  %v5770_v35 = vmax.f32 %v534_v43, %v535_v27 }
 0x358   :  { %v528_v47 = vrot.slane %v527_v51, 1 }
 0x359   :  { %577 = vrot.lane.b32.xlu0 %v5648_v60, %s5221_s16  ;;  %657 = vrot.lane.b32.xlu2 %v5622_v29, %s5224_s6 }
 0x35a   :  { %v5782_v50 = vmax.f32 %v527_v51, %v528_v47 }
 0x35f   :  { %617 = vrot.lane.b32.xlu1 %v5610_v52, %s5223_s30 }
 0x361   :  { %601 = vrot.lane.b32.xlu0 %v5644_v33, %s5222_s3  ;;  %681 = vrot.lane.b32.xlu2 %v5610_v52, %s5225_s7 }
 0x367   :  { %641 = vrot.lane.b32.xlu1 %v5648_v60, %s5223_s30 }
 0x369   :  { %625 = vrot.lane.b32.xlu0 %v5622_v29, %s5223_s30  ;;  %705 = vrot.lane.b32.xlu2 %v5648_v60, %s5225_s7 }
 0x36f   :  { %665 = vrot.lane.b32.xlu1 %v5644_v33, %s5224_s6 }
 0x371   :  { %649 = vrot.lane.b32.xlu0 %v5610_v52, %s5224_s6  ;;  %729 = vrot.lane.b32.xlu2 %v5644_v33, %s5226_s0 }
 0x377   :  { %689 = vrot.lane.b32.xlu1 %v5622_v29, %s5225_s7 }
 0x379   :  { %673 = vrot.lane.b32.xlu0 %v5648_v60, %s5224_s6  ;;  %753 = vrot.lane.b32.xlu2 %v5622_v29, %s5227_s8 }
 0x37f   :  { %713 = vrot.lane.b32.xlu1 %v5610_v52, %s5226_s0 }
 0x381   :  { %697 = vrot.lane.b32.xlu0 %v5644_v33, %s5225_s7  ;;  %563 = vrot.lane.b32.xlu2 %v5697_v59, %s5221_s16 }
 0x387   :  { %737 = vrot.lane.b32.xlu1 %v5648_v60, %s5226_s0 }
 0x389   :  { %721 = vrot.lane.b32.xlu0 %v5622_v29, %s5226_s0  ;;  %573 = vrot.lane.b32.xlu2 %v5709_v19, %s5221_s16 }
 0x38f   :  { %761 = vrot.lane.b32.xlu1 %v5644_v33, %s5227_s8 }
 0x391   :  { %745 = vrot.lane.b32.xlu0 %v5610_v52, %s5227_s8  ;;  %579 = vrot.lane.b32.xlu2 %v5719_v41, %s5221_s16 }
 0x397   :  { %565 = vrot.lane.b32.xlu1 %v5748_v10, %s5221_s16 }
 0x399   :  { %769 = vrot.lane.b32.xlu0 %v5648_v60, %s5227_s8  ;;  %591 = vrot.lane.b32.xlu2 %v5734_v49, %s5222_s3 }
 0x39b   :  { %v5774_v32 = vpop.permute.xlu2 %585 }
 0x39f   :  { %575 = vrot.lane.b32.xlu1 %v5766_v11, %s5221_s16 }
 0x3a1   :  { %555 = vrot.lane.b32.xlu0 %v5731_v17, %s5221_s16  ;;  %597 = vrot.lane.b32.xlu2 %v5748_v10, %s5222_s3 }
 0x3a3   :  { %v5792_v53 = vpop.permute.xlu2 %609 }
 0x3a7   :  { %581 = vrot.lane.b32.xlu1 %v5782_v50, %s5221_s16 }
 0x3a9   :  { %557 = vrot.lane.b32.xlu0 %v5745_v8, %s5221_s16  ;;  %603 = vrot.lane.b32.xlu2 %v5756_v39, %s5222_s3 }
 0x3ab   :  { %v5804_v1 = vpop.permute.xlu2 %633 }
 0x3ac   :  { %9500 = vst [vmem:[#allocation35_spill] sm:$0xff] %v5804_v1 }
 0x3af   :  { %587 = vrot.lane.b32.xlu1 %v5731_v17, %s5222_s3 }
 0x3b1   :  { %559 = vrot.lane.b32.xlu0 %v5734_v49, %s5221_s16  ;;  %615 = vrot.lane.b32.xlu2 %v5770_v35, %s5222_s3  ;;  %v1577_v15 = vpop.xlane.xlu1 %1576 }
 0x3b2   :  { %v1578_v63 = vrot.slane %v1577_v15, 4 }
 0x3b3   :  { %v5764_v4 = vpop.permute.xlu0 %553  ;;  %v5814_v21 = vpop.permute.xlu2 %657 }
 0x3b4   :  { %v1579_v5 = vadd.f32 %v1578_v63, %v1577_v15 }
 0x3b6   :  { %v1580_v62 = vrot.slane %v1579_v5, 2 }
 0x3b7   :  { %599 = vrot.lane.b32.xlu1 %v5768_v18, %s5222_s3 }
 0x3b8   :  { %v1581_v9 = vadd.f32 %v1580_v62, %v1579_v5 }
 0x3b9   :  { %567 = vrot.lane.b32.xlu0 %v5768_v18, %s5221_s16  ;;  %621 = vrot.lane.b32.xlu2 %v5745_v8, %s5223_s30 }
 0x3ba   :  { %v1582_v28 = vrot.slane %v1581_v9, 1 }
 0x3bb   :  { %v5780_v3 = vpop.permute.xlu0 %561  ;;  %v5826_v37 = vpop.permute.xlu2 %681 }
 0x3bc   :  { %v1583_v13 = vadd.f32 %v1582_v28, %v1581_v9  ;;  %9501 = vst [vmem:[#allocation36_spill] sm:$0xff] %v5826_v37 }
 0x3be   :  { %5049 = vpush %v1583_v13 }
 0x3bf   :  { %605 = vrot.lane.b32.xlu1 %v5709_v19, %s5222_s3 }
 0x3c1   :  { %571 = vrot.lane.b32.xlu0 %v5756_v39, %s5221_s16  ;;  %627 = vrot.lane.b32.xlu2 %v5697_v59, %s5223_s30 }
 0x3c3   :  { %v5794_v44 = vpop.permute.xlu0 %569  ;;  %v5844_v23 = vpop.permute.xlu2 %705 }
 0x3c7   :  { %611 = vrot.lane.b32.xlu1 %v5719_v41, %s5222_s3 }
 0x3c9   :  { %583 = vrot.lane.b32.xlu0 %v5770_v35, %s5221_s16  ;;  %639 = vrot.lane.b32.xlu2 %v5766_v11, %s5223_s30  ;;  %v5830_v40 = vpop.permute.xlu1 %593 }
 0x3cb   :  { %v5802_v0 = vpop.permute.xlu0 %577  ;;  %v5856_v24 = vpop.permute.xlu2 %729 }
 0x3cc   :  { %9503 = vst [vmem:[#allocation38_spill] sm:$0xff] %v5856_v24 }
 0x3cf   :  { %623 = vrot.lane.b32.xlu1 %v5734_v49, %s5223_s30 }
 0x3d1   :  { %589 = vrot.lane.b32.xlu0 %v5745_v8, %s5222_s3  ;;  %645 = vrot.lane.b32.xlu2 %v5782_v50, %s5223_s30  ;;  %v5840_v22 = vpop.permute.xlu1 %617 }
 0x3d3   :  { %v5812_v6 = vpop.permute.xlu0 %601  ;;  %v5868_v42 = vpop.permute.xlu2 %753 }
 0x3d7   :  { %629 = vrot.lane.b32.xlu1 %v5748_v10, %s5223_s30 }
 0x3d9   :  { %595 = vrot.lane.b32.xlu0 %v5697_v59, %s5222_s3  ;;  %651 = vrot.lane.b32.xlu2 %v5731_v17, %s5224_s6  ;;  %v5852_v38 = vpop.permute.xlu1 %641 }
 0x3db   :  { %v5822_v45 = vpop.permute.xlu0 %625  ;;  %v5882_v51 = vpop.permute.xlu2 %563 }
 0x3df   :  { %635 = vrot.lane.b32.xlu1 %v5756_v39, %s5223_s30 }
 0x3e1   :  { %607 = vrot.lane.b32.xlu0 %v5766_v11, %s5222_s3  ;;  %663 = vrot.lane.b32.xlu2 %v5768_v18, %s5224_s6  ;;  %v5864_v56 = vpop.permute.xlu1 %665 }
 0x3e2   :  { %9505 = vst [vmem:[#allocation40_spill] sm:$0xff] %v5864_v56 }
 0x3e3   :  { %v5834_v46 = vpop.permute.xlu0 %649  ;;  %v5900_v62 = vpop.permute.xlu2 %573 }
 0x3e4   :  { %9502 = vst [vmem:[#allocation37_spill] sm:$0xff] %v5834_v46 }
 0x3e7   :  { %647 = vrot.lane.b32.xlu1 %v5770_v35, %s5223_s30 }
 0x3e9   :  { %613 = vrot.lane.b32.xlu0 %v5782_v50, %s5222_s3  ;;  %669 = vrot.lane.b32.xlu2 %v5709_v19, %s5224_s6  ;;  %v5876_v27 = vpop.permute.xlu1 %689 }
 0x3eb   :  { %v5846_v54 = vpop.permute.xlu0 %673  ;;  %v5912_v36 = vpop.permute.xlu2 %579 }
 0x3ef   :  { %653 = vrot.lane.b32.xlu1 %v5745_v8, %s5224_s6  ;;  %s5050_s9 = spop %5049 }
 0x3f0   :  { %s1585_s10 = smul.f32 0.001953125, %s5050_s9  ;;  %s5034_s9 = sld [smem:[#allocation8 + $0x20]] }
 0x3f1   :  { %619 = vrot.lane.b32.xlu0 %v5731_v17, %s5223_s30  ;;  %675 = vrot.lane.b32.xlu2 %v5719_v41, %s5224_s6  ;;  %v5886_v47 = vpop.permute.xlu1 %713 }
 0x3f2   :  { %9506 = vst [vmem:[#allocation41_spill] sm:$0xff] %v5886_v47  ;;  %s1587_s11 = sadd.f32 1e-05, %s1585_s10 }
 0x3f3   :  { %v5858_v43 = vpop.permute.xlu0 %697  ;;  %s5036_s10 = sld [smem:[#allocation8 + $0x22]] }
 0x3f4   :  { %9504 = vst [vmem:[#allocation39_spill] sm:$0xff] %v5858_v43  ;;  %v1588_v63 = vstv %s1587_s11  ;;  %s5037_s11 = sld [smem:[#allocation8 + $0x23]] }
 0x3f5   :  { %5087 = vrsqrt.f32 %v1588_v63  ;;  %vm1595_vm9 = vweird.f32 %v1588_v63 }
 0x3f7   :  { %659 = vrot.lane.b32.xlu1 %v5697_v59, %s5224_s6 }
 0x3f9   :  { %631 = vrot.lane.b32.xlu0 %v5768_v18, %s5223_s30  ;;  %687 = vrot.lane.b32.xlu2 %v5734_v49, %s5225_s7  ;;  %v5896_v5 = vpop.permute.xlu1 %737 }
 0x3fa   :  { %9508 = vst [vmem:[#allocation43_spill] sm:$0xff] %v5896_v5 }
 0x3fb   :  { %v5872_v48 = vpop.permute.xlu0 %721  ;;  %v5088_v9 = vpop.eup %5087 }
 0x3fc   :  { %v1590_v28 = vmul.f32 %v5088_v9, %v1588_v63  ;;  %vm1596_vm8 = vweird.f32 %v5088_v9 }
 0x3fd   :  { %vm1597_vm10 = vmor %vm1595_vm9, %vm1596_vm8 }
 0x3fe   :  { %v1591_v20 = vmul.f32 %v5088_v9, %v1590_v28 }
 0x3ff   :  { %671 = vrot.lane.b32.xlu1 %v5766_v11, %s5224_s6 }
 0x400   :  { %v1592_v58 = vmul.f32 0.5, %v1591_v20 }
 0x401   :  { %637 = vrot.lane.b32.xlu0 %v5709_v19, %s5223_s30  ;;  %693 = vrot.lane.b32.xlu2 %v5748_v10, %s5225_s7  ;;  %v5908_v57 = vpop.permute.xlu1 %761 }
 0x402   :  { %9510 = vst [vmem:[#allocation45_spill] sm:$0xff] %v5908_v57  ;;  %v1593_v31 = vsub.f32 1.5, %v1592_v58  ;;  %v5924_v58 = vpop.permute.xlu2 %591 }
 0x403   :  { %v5890_v15 = vpop.permute.xlu0 %745 }
 0x404   :  { %9507 = vst [vmem:[#allocation42_spill] sm:$0xff] %v5890_v15  ;;  %v1594_v14 = vmul.f32 %v5088_v9, %v1593_v31 }
 0x406   :  { %v1598_v28 = vsel %vm1597_vm10, %v5088_v9, %v1594_v14 }
 0x407   :  { %677 = vrot.lane.b32.xlu1 %v5782_v50, %s5224_s6  ;;  %5051 = vpush %v1598_v28 }
 0x409   :  { %643 = vrot.lane.b32.xlu0 %v5719_v41, %s5223_s30  ;;  %699 = vrot.lane.b32.xlu2 %v5756_v39, %s5225_s7  ;;  %v5920_v20 = vpop.permute.xlu1 %565 }
 0x40a   :  { %v5938_v63 = vpop.permute.xlu2 %597 }
 0x40b   :  { %v5902_v13 = vpop.permute.xlu0 %769 }
 0x40c   :  { %9509 = vst [vmem:[#allocation44_spill] sm:$0xff] %v5902_v13 }
 0x40f   :  { %683 = vrot.lane.b32.xlu1 %v5731_v17, %s5225_s7 }
 0x411   :  { %655 = vrot.lane.b32.xlu0 %v5734_v49, %s5224_s6  ;;  %711 = vrot.lane.b32.xlu2 %v5770_v35, %s5225_s7  ;;  %v5932_v14 = vpop.permute.xlu1 %575 }
 0x412   :  { %v5956_v55 = vpop.permute.xlu2 %603 }
 0x413   :  { %v5914_v61 = vpop.permute.xlu0 %555 }
 0x417   :  { %695 = vrot.lane.b32.xlu1 %v5768_v18, %s5225_s7 }
 0x419   :  { %661 = vrot.lane.b32.xlu0 %v5748_v10, %s5224_s6  ;;  %717 = vrot.lane.b32.xlu2 %v5745_v8, %s5226_s0  ;;  %v5942_v9 = vpop.permute.xlu1 %581 }
 0x41a   :  { %9511 = vst [vmem:[#allocation46_spill] sm:$0xff] %v5942_v9  ;;  %v5968_v30 = vpop.permute.xlu2 %615 }
 0x41b   :  { %v5928_v31 = vpop.permute.xlu0 %557  ;;  %9514 = vst [vmem:[#allocation49_spill] sm:$0xff] %v5968_v30 }
 0x41f   :  { %701 = vrot.lane.b32.xlu1 %v5709_v19, %s5225_s7 }
 0x421   :  { %667 = vrot.lane.b32.xlu0 %v5756_v39, %s5224_s6  ;;  %723 = vrot.lane.b32.xlu2 %v5697_v59, %s5226_s0  ;;  %v5952_v2 = vpop.permute.xlu1 %587 }
 0x422   :  { %v5980_v25 = vpop.permute.xlu2 %621 }
 0x423   :  { %v5946_v28 = vpop.permute.xlu0 %559 }
 0x427   :  { %707 = vrot.lane.b32.xlu1 %v5719_v41, %s5225_s7 }
 0x429   :  { %679 = vrot.lane.b32.xlu0 %v5770_v35, %s5224_s6  ;;  %735 = vrot.lane.b32.xlu2 %v5766_v11, %s5226_s0  ;;  %v5964_v34 = vpop.permute.xlu1 %599 }
 0x42a   :  { %9513 = vst [vmem:[#allocation48_spill] sm:$0xff] %v5964_v34  ;;  %v5994_v24 = vpop.permute.xlu2 %627 }
 0x42b   :  { %v5958_v16 = vpop.permute.xlu0 %567  ;;  %9517 = vst [vmem:[#allocation52_spill] sm:$0xff] %v5994_v24 }
 0x42c   :  { %9512 = vst [vmem:[#allocation47_spill] sm:$0xff] %v5958_v16 }
 0x42f   :  { %719 = vrot.lane.b32.xlu1 %v5734_v49, %s5226_s0 }
 0x431   :  { %685 = vrot.lane.b32.xlu0 %v5745_v8, %s5225_s7  ;;  %741 = vrot.lane.b32.xlu2 %v5782_v50, %s5226_s0  ;;  %v5976_v12 = vpop.permute.xlu1 %605 }
 0x432   :  { %v6010_v43 = vpop.permute.xlu2 %639 }
 0x433   :  { %v5970_v26 = vpop.permute.xlu0 %571  ;;  %9519 = vst [vmem:[#allocation54_spill] sm:$0xff] %v6010_v43 }
 0x437   :  { %725 = vrot.lane.b32.xlu1 %v5748_v10, %s5226_s0 }
 0x438   :  { %s5052_s13 = spop %5051 }
 0x439   :  { %691 = vrot.lane.b32.xlu0 %v5697_v59, %s5225_s7  ;;  %747 = vrot.lane.b32.xlu2 %v5731_v17, %s5227_s8  ;;  %v5988_v57 = vpop.permute.xlu1 %611  ;;  %s1600_s1 = smul.f32 %s5052_s13, %s6493_s12  ;;  %s5032_s12 = sld [smem:[#allocation8 + $0x1e]] }
 0x43a   :  { %9516 = vst [vmem:[#allocation51_spill] sm:$0xff] %v5988_v57  ;;  %v6022_v30 = vpop.permute.xlu2 %645  ;;  %s5035_s13 = sld [smem:[#allocation8 + $0x21]] }
 0x43b   :  { %v5984_v7 = vpop.permute.xlu0 %583  ;;  %9521 = vst [vmem:[#allocation56_spill] sm:$0xff] %v6022_v30 }
 0x43c   :  { %9515 = vst [vmem:[#allocation50_spill] sm:$0xff] %v5984_v7 }
 0x43f   :  { %731 = vrot.lane.b32.xlu1 %v5756_v39, %s5226_s0 }
 0x441   :  { %703 = vrot.lane.b32.xlu0 %v5766_v11, %s5225_s7  ;;  %759 = vrot.lane.b32.xlu2 %v5768_v18, %s5227_s8  ;;  %v5998_v15 = vpop.permute.xlu1 %623 }
 0x442   :  { %v6032_v5 = vpop.permute.xlu2 %651 }
 0x443   :  { %v6002_v56 = vpop.permute.xlu0 %589  ;;  %9524 = vst [vmem:[#allocation59_spill] sm:$0xff] %v6032_v5 }
 0x447   :  { %743 = vrot.lane.b32.xlu1 %v5770_v35, %s5226_s0 }
 0x449   :  { %709 = vrot.lane.b32.xlu0 %v5782_v50, %s5225_s7  ;;  %765 = vrot.lane.b32.xlu2 %v5709_v19, %s5227_s8  ;;  %v6008_v37 = vpop.permute.xlu1 %629 }
 0x44a   :  { %9518 = vst [vmem:[#allocation53_spill] sm:$0xff] %v6008_v37  ;;  %v6044_v37 = vpop.permute.xlu2 %663 }
 0x44b   :  { %v6012_v47 = vpop.permute.xlu0 %595  ;;  %9526 = vst [vmem:[#allocation61_spill] sm:$0xff] %v6044_v37 }
 0x44f   :  { %749 = vrot.lane.b32.xlu1 %v5745_v8, %s5227_s8 }
 0x451   :  { %715 = vrot.lane.b32.xlu0 %v5731_v17, %s5226_s0  ;;  %771 = vrot.lane.b32.xlu2 %v5719_v41, %s5227_s8  ;;  %v6018_v1 = vpop.permute.xlu1 %635 }
 0x452   :  { %9520 = vst [vmem:[#allocation55_spill] sm:$0xff] %v6018_v1  ;;  %v6054_v5 = vpop.permute.xlu2 %669 }
 0x453   :  { %v6020_v46 = vpop.permute.xlu0 %607  ;;  %9529 = vst [vmem:[#allocation64_spill] sm:$0xff] %v6054_v5 }
 0x457   :  { %755 = vrot.lane.b32.xlu1 %v5697_v59, %s5227_s8 }
 0x459   :  { %727 = vrot.lane.b32.xlu0 %v5768_v18, %s5226_s0  ;;  %v6028_v43 = vpop.permute.xlu1 %647 }
 0x45a   :  { %9522 = vst [vmem:[#allocation57_spill] sm:$0xff] %v6028_v43  ;;  %v6062_v16 = vpop.permute.xlu2 %675 }
 0x45b   :  { %v6030_v57 = vpop.permute.xlu0 %613  ;;  %9533 = vst [vmem:[#allocation68_spill] sm:$0xff] %v6062_v16 }
 0x45c   :  { %9523 = vst [vmem:[#allocation58_spill] sm:$0xff] %v6030_v57 }
 0x45f   :  { %767 = vrot.lane.b32.xlu1 %v5766_v11, %s5227_s8 }
 0x461   :  { %733 = vrot.lane.b32.xlu0 %v5709_v19, %s5226_s0  ;;  %v6038_v1 = vpop.permute.xlu1 %653 }
 0x462   :  { %9525 = vst [vmem:[#allocation60_spill] sm:$0xff] %v6038_v1 }
 0x463   :  { %v6040_v30 = vpop.permute.xlu0 %619 }
 0x467   :  { %773 = vrot.lane.b32.xlu1 %v5782_v50, %s5227_s8 }
 0x469   :  { %739 = vrot.lane.b32.xlu0 %v5719_v41, %s5226_s0  ;;  %v6050_v57 = vpop.permute.xlu1 %659 }
 0x46a   :  { %9528 = vst [vmem:[#allocation63_spill] sm:$0xff] %v6050_v57 }
 0x46b   :  { %v6048_v43 = vpop.permute.xlu0 %631 }
 0x46c   :  { %9527 = vst [vmem:[#allocation62_spill] sm:$0xff] %v6048_v43  ;;  %v6068_v43 = vpop.permute.xlu2 %687 }
 0x471   :  { %751 = vrot.lane.b32.xlu0 %v5734_v49, %s5227_s8  ;;  %v6058_v7 = vpop.permute.xlu1 %671 }
 0x472   :  { %9531 = vst [vmem:[#allocation66_spill] sm:$0xff] %v6058_v7 }
 0x473   :  { %v6056_v1 = vpop.permute.xlu0 %637 }
 0x474   :  { %9530 = vst [vmem:[#allocation65_spill] sm:$0xff] %v6056_v1  ;;  %v6074_v13 = vpop.permute.xlu2 %693 }
 0x475   :  { %9538 = vst [vmem:[#allocation73_spill] sm:$0xff] %v6074_v13  ;;  %v898_v13 = vrot.slane %v5709_v19, 6  ;;  %v900_v19 = vrot.slane %v5766_v11, 5  ;;  %v904_v11 = vrot.slane %v5719_v41, 3 }
 0x479   :  { %757 = vrot.lane.b32.xlu0 %v5748_v10, %s5227_s8  ;;  %v6064_v37 = vpop.permute.xlu1 %677 }
 0x47a   :  { %9534 = vst [vmem:[#allocation69_spill] sm:$0xff] %v6064_v37  ;;  %v777_v37 = vrot.slane %v5731_v17, 7 }
 0x47b   :  { %v6060_v34 = vpop.permute.xlu0 %643 }
 0x47c   :  { %9532 = vst [vmem:[#allocation67_spill] sm:$0xff] %v6060_v34  ;;  %v6080_v7 = vpop.permute.xlu2 %699 }
 0x481   :  { %763 = vrot.lane.b32.xlu0 %v5756_v39, %s5227_s8  ;;  %v6070_v57 = vpop.permute.xlu1 %683 }
 0x482   :  { %9536 = vst [vmem:[#allocation71_spill] sm:$0xff] %v6070_v57 }
 0x483   :  { %v6066_v9 = vpop.permute.xlu0 %655 }
 0x484   :  { %9535 = vst [vmem:[#allocation70_spill] sm:$0xff] %v6066_v9  ;;  %v896_v9 = vrot.slane %v5756_v39, 7 }
 0x489   :  { %775 = vrot.lane.b32.xlu0 %v5770_v35, %s5227_s8  ;;  %v6078_v1 = vpop.permute.xlu1 %695 }
 0x48a   :  { %9540 = vst [vmem:[#allocation75_spill] sm:$0xff] %v6078_v1  ;;  %v779_v1 = vsel %vm778_vm11, %v777_v37, %v5610_v52 }
 0x48b   :  { %v6072_v24 = vpop.permute.xlu0 %661 }
 0x48c   :  { %9537 = vst [vmem:[#allocation72_spill] sm:$0xff] %v6072_v24  ;;  %v780_v24 = vrot.slane %v5745_v8, 6  ;;  %v783_v8 = vrot.slane %v5734_v49, 5  ;;  %v789_v49 = vrot.slane %v5697_v59, 3 }
 0x48e   :  { %v782_v17 = vsel %vm781_vm12, %v780_v24, %v779_v1 }
 0x491   :  { %v6084_v16 = vpop.permute.xlu1 %701 }
 0x492   :  { %9542 = vst [vmem:[#allocation77_spill] sm:$0xff] %v6084_v16 }
 0x493   :  { %v6076_v5 = vpop.permute.xlu0 %667 }
 0x494   :  { %9539 = vst [vmem:[#allocation74_spill] sm:$0xff] %v6076_v5  ;;  %v6096_v5 = vpop.permute.xlu2 %711 }
 0x499   :  { %v6100_v16 = vpop.permute.xlu1 %707 }
 0x49b   :  { %v6082_v34 = vpop.permute.xlu0 %679 }
 0x49c   :  { %9541 = vst [vmem:[#allocation76_spill] sm:$0xff] %v6082_v34  ;;  %v897_v34 = vsel %vm778_vm11, %v896_v9, %v5644_v33  ;;  %v786_v33 = vrot.slane %v5622_v29, 4  ;;  %v902_v9 = vrot.slane %v5648_v60, 4  ;;  %v6114_v24 = vpop.permute.xlu2 %717  ;;  %v792_v29 = vrot.slane %v5748_v10, 2 }
 0x49d   :  { %v899_v39 = vsel %vm781_vm12, %v898_v13, %v897_v34  ;;  %v906_v60 = vrot.slane %v5782_v50, 2 }
 0x49e   :  { %v901_v52 = vsel %vm784_vm13, %v900_v19, %v899_v39  ;;  %v908_v19 = vrot.slane %v5770_v35, 1  ;;  %v826_v35 = vrot.slane %v6040_v30, 7  ;;  %v916_v30 = vrot.slane %v5802_v0, 4 }
 0x49f   :  { %v903_v1 = vsel %vm787_vm14, %v902_v9, %v901_v52  ;;  %v798_v52 = vrot.slane %v5914_v61, 7  ;;  %v812_v9 = vrot.slane %v5952_v2, 7 }
 0x4a1   :  { %v6120_v39 = vpop.permute.xlu1 %719  ;;  %v799_v61 = vsel %vm778_vm11, %v798_v52, %v5764_v4  ;;  %v828_v52 = vrot.slane %v5980_v25, 6  ;;  %v9568_v25 = vld [vmem:[#allocation60_spill] sm:$0xff] }
 0x4a3   :  { %v6088_v57 = vpop.permute.xlu0 %685 }
 0x4a4   :  { %9543 = vst [vmem:[#allocation78_spill] sm:$0xff] %v6088_v57  ;;  %v785_v57 = vsel %vm784_vm13, %v783_v8, %v782_v17  ;;  %v905_v17 = vsel %vm790_vm15, %v904_v11, %v903_v1  ;;  %v795_v8 = vrot.slane %v5768_v18, 1  ;;  %v910_v1 = vrot.slane %v5970_v26, 7 }
 0x4a5   :  { %v788_v34 = vsel %vm787_vm14, %v786_v33, %v785_v57  ;;  %v907_v41 = vsel %vm793_vm0, %v906_v60, %v905_v17  ;;  %v800_v33 = vrot.slane %v5928_v31, 6  ;;  %v814_v18 = vrot.slane %v6002_v56, 6 }
 0x4a6   :  { %v791_v13 = vsel %vm790_vm15, %v789_v49, %v788_v34  ;;  %v6134_v50 = vsel %vm796_vm1, %v908_v19, %v907_v41  ;;  %v802_v34 = vrot.slane %v5946_v28, 5  ;;  %v6141_v49 = vpop.permute.xlu2 %723  ;;  %v804_v28 = vrot.slane %v5780_v3, 4 }
 0x4a7   :  { %v794_v59 = vsel %vm793_vm0, %v792_v29, %v791_v13  ;;  %9544 = vst [vmem:[#allocation79_spill] sm:$0xff] %v6134_v50  ;;  %v1139_v11 = vrot.slane %v6134_v50, 4  ;;  %v930_v13 = vrot.slane %v5792_v53, 4  ;;  %v801_v26 = vsel %vm781_vm12, %v800_v33, %v799_v61  ;;  %v9585_v50 = vld [vmem:[#allocation36_spill] sm:$0xff] }
 0x4a8   :  { %v6131_v10 = vsel %vm796_vm1, %v795_v8, %v794_v59  ;;  %v813_v17 = vsel %vm778_vm11, %v812_v9, %v5774_v32  ;;  %v803_v4 = vsel %vm784_vm13, %v802_v34, %v801_v26  ;;  %v911_v29 = vsel %vm778_vm11, %v910_v1, %v5794_v44 }
 0x4a9   :  { %v1027_v31 = vrot.slane %v6131_v10, 4  ;;  %v6159_v60 = vpop.permute.xlu1 %725  ;;  %v912_v3 = vrot.slane %v5900_v62, 6  ;;  %v815_v41 = vsel %vm781_vm12, %v814_v18, %v813_v17  ;;  %v827_v8 = vsel %vm778_vm11, %v826_v35, %v5840_v22  ;;  %v9575_v35 = vld [vmem:[#allocation39_spill] sm:$0xff] }
 0x4aa   :  { %v832_v32 = vrot.slane %v5822_v45, 4  ;;  %v816_v19 = vrot.slane %v5924_v58, 5  ;;  %v818_v44 = vrot.slane %v5830_v40, 4  ;;  %v806_v33 = vrot.slane %v5882_v51, 3 }
 0x4ab   :  { %v6106_v37 = vpop.permute.xlu0 %691  ;;  %v805_v9 = vsel %vm787_vm14, %v804_v28, %v803_v4  ;;  %v913_v62 = vsel %vm781_vm12, %v912_v3, %v911_v29  ;;  %v914_v34 = vrot.slane %v5932_v14, 5  ;;  %v820_v1 = vrot.slane %v6012_v47, 3 }
 0x4ac   :  { %v817_v22 = vsel %vm784_vm13, %v816_v19, %v815_v41  ;;  %v829_v45 = vsel %vm781_vm12, %v828_v52, %v827_v8  ;;  %v924_v40 = vrot.slane %v5956_v55, 7  ;;  %v830_v51 = vrot.slane %v5998_v15, 5  ;;  %v9545_v41 = vld [vmem:[#allocation44_spill] sm:$0xff] }
 0x4ad   :  { %v918_v18 = vrot.slane %v5912_v36, 3  ;;  %v926_v14 = vrot.slane %v5976_v12, 6  ;;  %v915_v61 = vsel %vm784_vm13, %v914_v34, %v913_v62  ;;  %v807_v47 = vsel %vm790_vm15, %v806_v33, %v805_v9  ;;  %v9546_v19 = vld [vmem:[#allocation52_spill] sm:$0xff]  ;;  %v9548_v34 = vld [vmem:[#allocation47_spill] sm:$0xff]  ;;  %v9569_v36 = vld [vmem:[#allocation57_spill] sm:$0xff] }
 0x4ae   :  { %v819_v28 = vsel %vm787_vm14, %v818_v44, %v817_v22  ;;  %v928_v26 = vrot.slane %v6020_v46, 5  ;;  %v831_v17 = vsel %vm784_vm13, %v830_v51, %v829_v45  ;;  %v6190_v4 = vpop.permute.xlu2 %735  ;;  %v822_v15 = vrot.slane %v5938_v63, 2  ;;  %v9549_v45 = vld [vmem:[#allocation48_spill] sm:$0xff]  ;;  %v9550_v51 = vld [vmem:[#allocation50_spill] sm:$0xff] }
 0x4af   :  { %v808_v12 = vrot.slane %v5920_v20, 2  ;;  %v821_v29 = vsel %vm790_vm15, %v820_v1, %v819_v28  ;;  %v925_v3 = vsel %vm778_vm11, %v924_v40, %v5812_v6  ;;  %v917_v46 = vsel %vm787_vm14, %v916_v30, %v915_v61  ;;  %v9547_v20 = vld [vmem:[#allocation46_spill] sm:$0xff]  ;;  %v9551_v28 = vld [vmem:[#allocation59_spill] sm:$0xff] }
 0x4b0   :  { %v834_v52 = vrot.slane %v9546_v19, 3  ;;  %v927_v33 = vsel %vm781_vm12, %v926_v14, %v925_v3  ;;  %v833_v9 = vsel %vm787_vm14, %v832_v32, %v831_v17  ;;  %v920_v62 = vrot.slane %v9547_v20, 2  ;;  %v9552_v17 = vld [vmem:[#allocation53_spill] sm:$0xff]  ;;  %v9553_v19 = vld [vmem:[#allocation62_spill] sm:$0xff] }
 0x4b1   :  { %v809_v44 = vsel %vm793_vm0, %v808_v12, %v807_v47  ;;  %v6206_v63 = vpop.permute.xlu1 %731  ;;  %v810_v22 = vrot.slane %v9548_v34, 1  ;;  %v823_v6 = vsel %vm793_vm0, %v822_v15, %v821_v29  ;;  %v929_v1 = vsel %vm784_vm13, %v928_v26, %v927_v33  ;;  %v9567_v33 = vld [vmem:[#allocation68_spill] sm:$0xff] }
 0x4b2   :  { %v824_v30 = vrot.slane %v9549_v45, 1  ;;  %v919_v40 = vsel %vm790_vm15, %v918_v18, %v917_v46  ;;  %v922_v61 = vrot.slane %v9550_v51, 1  ;;  %v5228_v47 = vmov 1983009808   ;;  %v9554_v18 = vld [vmem:[#allocation58_spill] sm:$0xff]  ;;  %v9555_v46 = vld [vmem:[#allocation43_spill] sm:$0xff] }
 0x4b3   :  { %v6122_v57 = vpop.permute.xlu0 %703  ;;  %v1030_v14 = vunpack.c.l.s4 %v5228_v47  ;;  %v840_v32 = vrot.slane %v9551_v28, 7  ;;  %v836_v12 = vrot.slane %v9552_v17, 2  ;;  %v835_v3 = vsel %vm790_vm15, %v834_v52, %v833_v9  ;;  %v9556_v45 = vld [vmem:[#allocation51_spill] sm:$0xff]  ;;  %v9557_v9 = vld [vmem:[#allocation49_spill] sm:$0xff]  ;;  %v9560_v17 = vld [vmem:[#allocation56_spill] sm:$0xff] }
 0x4b4   :  { %v838_v20 = vrot.slane %v9553_v19, 1  ;;  %v825_v15 = vsel %vm796_vm1, %v824_v30, %v823_v6  ;;  %v931_v26 = vsel %vm787_vm14, %v930_v13, %v929_v1  ;;  %v934_v29 = vrot.slane %v9554_v18, 2  ;;  %v9559_v1 = vld [vmem:[#allocation54_spill] sm:$0xff]  ;;  %v9561_v18 = vld [vmem:[#allocation37_spill] sm:$0xff] }
 0x4b5   :  { %v811_v34 = vsel %vm796_vm1, %v810_v22, %v809_v44  ;;  %v932_v51 = vrot.slane %v9556_v45, 3  ;;  %v921_v47 = vsel %vm793_vm0, %v920_v62, %v919_v40  ;;  %v936_v28 = vrot.slane %v9557_v9, 1  ;;  %v9573_v19 = vld [vmem:[#allocation41_spill] sm:$0xff] }
 0x4b6   :  { %v6232_v6 = vsel %vm796_vm1, %v922_v61, %v921_v47  ;;  %v6234_v53 = vunpack.c.0.s8 %v1030_v14  ;;  %v837_v13 = vsel %vm793_vm0, %v836_v12, %v835_v3  ;;  %v942_v30 = vrot.slane %v9559_v1, 5  ;;  %v6243_v40 = vpop.permute.xlu2 %741  ;;  %v9562_v3 = vld [vmem:[#allocation61_spill] sm:$0xff] }
 0x4b7   :  { %v1028_v44 = vsel %vm1025_vm2, %v825_v15, %v1027_v31  ;;  %v933_v22 = vsel %vm790_vm15, %v932_v51, %v931_v26  ;;  %v839_v62 = vsel %vm796_vm1, %v838_v20, %v837_v13  ;;  %v1039_v61 = vrot.slane %v811_v34, 4  ;;  %v9563_v31 = vld [vmem:[#allocation64_spill] sm:$0xff]  ;;  %v9564_v20 = vld [vmem:[#allocation55_spill] sm:$0xff] }
 0x4b8   :  { %9558 = vst [vmem:[#allocation44_spill] sm:$0xff] %v6234_v53  ;;  %v841_v14 = vsel %vm778_vm11, %v840_v32, %v9561_v18  ;;  %v935_v12 = vsel %vm793_vm0, %v934_v29, %v933_v22  ;;  %v1024_v9 = vrot.slane %v825_v15, 4  ;;  %v1036_v26 = vperm.slane %v1028_v44, %v6234_v53  ;;  %v9566_v29 = vld [vmem:[#allocation65_spill] sm:$0xff] }
 0x4b9   :  { %v938_v51 = vrot.slane %v9564_v20, 7  ;;  %v1040_v13 = vsel %vm1025_vm2, %v839_v62, %v1039_v61  ;;  %v6255_v8 = vpop.permute.xlu1 %743  ;;  %v6258_v59 = vsel %vm796_vm1, %v936_v28, %v935_v12  ;;  %v1037_v32 = vrot.slane %v839_v62, 4  ;;  %v9571_v15 = vld [vmem:[#allocation73_spill] sm:$0xff]  ;;  %v9572_v61 = vld [vmem:[#allocation70_spill] sm:$0xff] }
 0x4ba   :  { %9565 = vst [vmem:[#allocation52_spill] sm:$0xff] %v6258_v59  ;;  %v940_v22 = vrot.slane %v9566_v29, 6  ;;  %v842_v44 = vrot.slane %v9568_v25, 6  ;;  %v5229_v47 = vmov 1934713408   ;;  %v966_v45 = vrot.slane %v6080_v7, 7 }
 0x4bb   :  { %v6151_v56 = vpop.permute.xlu0 %709  ;;  %v1078_v20 = vunpack.c.l.s4 %v5229_v47  ;;  %v1048_v28 = vperm.slane %v1040_v13, %v6234_v53  ;;  %v1026_v62 = vsel %vm1025_vm2, %v1024_v9, %v6131_v10  ;;  %v1140_v25 = vsel %vm1025_vm2, %v6258_v59, %v1139_v11  ;;  %v9584_v59 = vld [vmem:[#allocation66_spill] sm:$0xff] }
 0x4bc   :  { %v1087_v47 = vrot.slane %v1036_v26, 4  ;;  %v1038_v7 = vsel %vm1025_vm2, %v1037_v32, %v811_v34  ;;  %v844_v0 = vrot.slane %v9572_v61, 5  ;;  %v843_v9 = vsel %vm781_vm12, %v842_v44, %v841_v14  ;;  %v9576_v32 = vld [vmem:[#allocation63_spill] sm:$0xff] }
 0x4bd   :  { %v1032_v1 = vperm.slane %v1026_v62, %v6234_v53  ;;  %v6290_v11 = vperm.slane %v1140_v25, %v6234_v53  ;;  %v6294_v34 = vsel %vm778_vm11, %v966_v45, %v9575_v35  ;;  %v1044_v44 = vperm.slane %v1038_v7, %v6234_v53 }
 0x4be   :  { %v748_v61 = vpop.permute.xlu2 %747  ;;  %v845_v2 = vsel %vm784_vm13, %v844_v0, %v843_v9  ;;  %v872_v35 = vrot.slane %v6120_v39, 5  ;;  %v9581_v39 = vrot.slane %v5852_v38, 4  ;;  %v956_v7 = vrot.slane %v9584_v59, 5 }
 0x4c3   :  { %v6192_v55 = vpop.permute.xlu0 %715 }
 0x4c4   :  { %v868_v18 = vrot.slane %v6192_v55, 7  ;;  %v9570_v55 = vld [vmem:[#allocation35_spill] sm:$0xff] }
 0x4c5   :  { %v939_v29 = vsel %vm778_vm11, %v938_v51, %v9570_v55  ;;  %v870_v51 = vrot.slane %v6114_v24, 6  ;;  %v6286_v55 = vunpack.c.0.s8 %v1078_v20  ;;  %v9577_v20 = vld [vmem:[#allocation67_spill] sm:$0xff] }
 0x4c6   :  { %v941_v13 = vsel %vm781_vm12, %v940_v22, %v939_v29  ;;  %v869_v10 = vsel %vm778_vm11, %v868_v18, %v9573_v19  ;;  %v848_v22 = vrot.slane %v9576_v32, 3  ;;  %v1088_v19 = vsel %vm1025_vm2, %v1048_v28, %v1087_v47  ;;  %v9578_v29 = vld [vmem:[#allocation71_spill] sm:$0xff]  ;;  %v9579_v32 = vld [vmem:[#allocation78_spill] sm:$0xff]  ;;  %v750_v47 = vpop.permute.xlu1 %749 }
 0x4c7   :  { %9574 = vst [vmem:[#allocation46_spill] sm:$0xff] %v6286_v55  ;;  %v1085_v18 = vrot.slane %v1048_v28, 4  ;;  %v943_v14 = vsel %vm784_vm13, %v942_v30, %v941_v13  ;;  %v871_v24 = vsel %vm781_vm12, %v870_v51, %v869_v10  ;;  %v946_v62 = vrot.slane %v9577_v20, 3  ;;  %v9580_v10 = vld [vmem:[#allocation74_spill] sm:$0xff] }
 0x4c8   :  { %v854_v25 = vrot.slane %v9578_v29, 7  ;;  %v856_v58 = vrot.slane %v9579_v32, 6  ;;  %v6308_v28 = vperm.slane %v1088_v19, %v6286_v55  ;;  %v1075_v30 = vrot.slane %v1032_v1, 4  ;;  %v9583_v32 = vld [vmem:[#allocation72_spill] sm:$0xff] }
 0x4c9   :  { %v952_v51 = vrot.slane %v9580_v10, 7  ;;  %v873_v20 = vsel %vm784_vm13, %v872_v35, %v871_v24  ;;  %v945_v9 = vsel %vm787_vm14, %v9581_v39, %v943_v14  ;;  %v9582_v29 = vrot.slane %v5814_v21, 4 }
 0x4ca   :  { %v850_v45 = vrot.slane %v9583_v32, 2  ;;  %v1076_v13 = vsel %vm1025_vm2, %v1044_v44, %v1075_v30  ;;  %v947_v10 = vsel %vm790_vm15, %v946_v62, %v945_v9  ;;  %v855_v24 = vsel %vm778_vm11, %v854_v25, %v9585_v50  ;;  %v9591_v32 = vld [vmem:[#allocation69_spill] sm:$0xff] }
 0x4cb   :  { %v6228_v52 = vpop.permute.xlu0 %727  ;;  %v847_v19 = vsel %vm787_vm14, %v9582_v29, %v845_v2  ;;  %v1086_v35 = vsel %vm1025_vm2, %v1085_v18, %v1036_v26  ;;  %v857_v38 = vsel %vm781_vm12, %v856_v58, %v855_v24  ;;  %v9586_v14 = vrot.slane %v5872_v48, 4  ;;  %v9587_v29 = vld [vmem:[#allocation40_spill] sm:$0xff] }
 0x4cc   :  { %v1135_v2 = vrot.slane %v6308_v28, 4  ;;  %v1073_v39 = vrot.slane %v1044_v44, 4  ;;  %v876_v30 = vrot.slane %v6141_v49, 3  ;;  %v849_v59 = vsel %vm790_vm15, %v848_v22, %v847_v19  ;;  %v6348_v44 = vpop.permute.xlu2 %759 }
 0x4cd   :  { %v875_v21 = vsel %vm787_vm14, %v9586_v14, %v873_v20  ;;  %v953_v62 = vsel %vm778_vm11, %v952_v51, %v9587_v29  ;;  %v6339_v50 = vperm.slane %v1076_v13, %v6286_v55  ;;  %v9588_v26 = vrot.slane %v9560_v17, 2 }
 0x4ce   :  { %v851_v48 = vsel %vm793_vm0, %v850_v45, %v849_v59  ;;  %v882_v18 = vrot.slane %v748_v61, 7  ;;  %v6346_v25 = vperm.slane %v1086_v35, %v6286_v55  ;;  %v9589_v49 = vrot.slane %v6068_v43, 5 }
 0x4cf   :  { %v949_v58 = vsel %vm793_vm0, %v9588_v26, %v947_v10  ;;  %v862_v51 = vrot.slane %v6106_v37, 3  ;;  %v877_v13 = vsel %vm790_vm15, %v876_v30, %v875_v21  ;;  %v880_v17 = vrot.slane %v6228_v52, 1  ;;  %v9595_v21 = vld [vmem:[#allocation42_spill] sm:$0xff] }
 0x4d0   :  { %v859_v22 = vsel %vm784_vm13, %v9589_v49, %v857_v38  ;;  %v9590_v20 = vrot.slane %v9563_v31, 6  ;;  %v878_v61 = vrot.slane %v6159_v60, 2  ;;  %v980_v9 = vrot.slane %v6206_v63, 7  ;;  %v9598_v49 = vld [vmem:[#allocation77_spill] sm:$0xff] }
 0x4d1   :  { %v884_v19 = vrot.slane %v750_v47, 6  ;;  %v962_v10 = vrot.slane %v9591_v32, 2  ;;  %v9592_v43 = vrot.slane %v9569_v36, 1  ;;  %v1074_v52 = vsel %vm1025_vm2, %v1073_v39, %v1032_v1  ;;  %v756_v47 = vpop.permute.xlu1 %755  ;;  %v9597_v39 = vld [vmem:[#allocation38_spill] sm:$0xff] }
 0x4d2   :  { %v955_v45 = vsel %vm781_vm12, %v9590_v20, %v953_v62  ;;  %v9593_v31 = vrot.slane %v9562_v3, 1  ;;  %v9594_v60 = vrot.slane %v5876_v27, 4  ;;  %v879_v14 = vsel %vm793_vm0, %v878_v61, %v877_v13 }
 0x4d3   :  { %v6268_v12 = vpop.permute.xlu0 %733  ;;  %v6365_v24 = vsel %vm796_vm1, %v9592_v43, %v949_v58  ;;  %v883_v30 = vsel %vm778_vm11, %v882_v18, %v9595_v21  ;;  %v881_v1 = vsel %vm796_vm1, %v880_v17, %v879_v14  ;;  %v9596_v3 = vrot.slane %v6232_v6, 4 }
 0x4d4   :  { %v982_v37 = vrot.slane %v6268_v12, 6  ;;  %v853_v38 = vsel %vm796_vm1, %v9593_v31, %v851_v48  ;;  %v861_v63 = vsel %vm787_vm14, %v9594_v60, %v859_v22  ;;  %v957_v12 = vsel %vm784_vm13, %v956_v7, %v955_v45  ;;  %v9604_v60 = vld [vmem:[#allocation76_spill] sm:$0xff]  ;;  %v766_v14 = vpop.permute.xlu2 %765 }
 0x4d5   :  { %v863_v59 = vsel %vm790_vm15, %v862_v51, %v861_v63  ;;  %v1152_v27 = vsel %vm1025_vm2, %v6365_v24, %v9596_v3  ;;  %v981_v29 = vsel %vm778_vm11, %v980_v9, %v9597_v39  ;;  %v885_v62 = vsel %vm781_vm12, %v884_v19, %v883_v30  ;;  %v9601_v9 = vld [vmem:[#allocation75_spill] sm:$0xff] }
 0x4d6   :  { %v6389_v26 = vperm.slane %v1074_v52, %v6286_v55  ;;  %v984_v58 = vrot.slane %v6190_v4, 5  ;;  %v1051_v7 = vrot.slane %v853_v38, 4  ;;  %v983_v48 = vsel %vm781_vm12, %v982_v37, %v981_v29 }
 0x4d7   :  { %v968_v22 = vrot.slane %v9598_v49, 6  ;;  %v9599_v51 = vrot.slane %v5846_v54, 4  ;;  %v9600_v17 = vrot.slane %v9571_v15, 2  ;;  %v1049_v45 = vrot.slane %v881_v1, 4 }
 0x4d8   :  { %v1149_v61 = vrot.slane %v6365_v24, 4  ;;  %v6403_v4 = vperm.slane %v1152_v27, %v6234_v53  ;;  %v866_v19 = vrot.slane %v9601_v9, 1  ;;  %v970_v32 = vrot.slane %v6122_v57, 5 }
 0x4d9   :  { %v959_v13 = vsel %vm787_vm14, %v9599_v51, %v957_v12  ;;  %v865_v20 = vsel %vm793_vm0, %v9600_v17, %v863_v59  ;;  %v1052_v43 = vsel %vm1025_vm2, %v881_v1, %v1051_v7  ;;  %v985_v54 = vsel %vm784_vm13, %v984_v58, %v983_v48  ;;  %v768_v29 = vpop.permute.xlu1 %767 }
 0x4da   :  { %v9602_v15 = vrot.slane %v5868_v42, 4  ;;  %v9603_v52 = vrot.slane %v9567_v33, 3  ;;  %v964_v63 = vrot.slane %v9604_v60, 1  ;;  %v890_v57 = vrot.slane %v756_v47, 3 }
 0x4db   :  { %v6314_v0 = vpop.permute.xlu0 %739  ;;  %v969_v30 = vsel %vm781_vm12, %v968_v22, %v6294_v34  ;;  %v1050_v42 = vsel %vm1025_vm2, %v1049_v45, %v853_v38  ;;  %v1060_v33 = vperm.slane %v1052_v43, %v6234_v53  ;;  %v9605_v1 = vrot.slane %v9555_v46, 4 }
 0x4dc   :  { %v988_v37 = vrot.slane %v6314_v0, 3  ;;  %v961_v31 = vsel %vm790_vm15, %v9603_v52, %v959_v13  ;;  %v894_v0 = vrot.slane %v6348_v44, 1  ;;  %v971_v59 = vsel %vm784_vm13, %v970_v32, %v969_v30 }
 0x4dd   :  { %v987_v3 = vsel %vm787_vm14, %v9605_v1, %v985_v54  ;;  %v963_v47 = vsel %vm793_vm0, %v962_v10, %v961_v31  ;;  %v990_v38 = vrot.slane %v6243_v40, 2  ;;  %v1056_v58 = vperm.slane %v1050_v42, %v6234_v53 }
 0x4de   :  { %v989_v34 = vsel %vm790_vm15, %v988_v37, %v987_v3  ;;  %v974_v7 = vrot.slane %v6100_v16, 3  ;;  %v9606_v48 = vrot.slane %v5844_v23, 4  ;;  %v976_v22 = vrot.slane %v6151_v56, 2 }
 0x4df   :  { %v1111_v51 = vrot.slane %v1060_v33, 4  ;;  %v991_v40 = vsel %vm793_vm0, %v990_v38, %v989_v34  ;;  %v992_v45 = vrot.slane %v6255_v8, 1  ;;  %v1099_v43 = vrot.slane %v1056_v58, 4 }
 0x4e0   :  { %v973_v10 = vsel %vm787_vm14, %v9606_v48, %v971_v59  ;;  %v998_v60 = vrot.slane %v768_v29, 5  ;;  %v1123_v29 = vrot.slane %v6389_v26, 4 }
 0x4e1   :  { %v975_v23 = vsel %vm790_vm15, %v974_v7, %v973_v10  ;;  %v993_v56 = vsel %vm796_vm1, %v992_v45, %v991_v40  ;;  %v774_v59 = vpop.permute.xlu1 %773  ;;  %v9611_v40 = vld [vmem:[#allocation79_spill] sm:$0xff]  ;;  %v1131_v45 = vrot.slane %v6346_v25, 4 }
 0x4e2   :  { %v977_v8 = vsel %vm793_vm0, %v976_v22, %v975_v23  ;;  %v1004_v7 = vrot.slane %v774_v59, 2 }
 0x4e3   :  { %v752_v35 = vpop.permute.xlu0 %751 }
 0x4e4   :  { %v886_v36 = vrot.slane %v752_v35, 5 }
 0x4e6   :  { %v887_v18 = vsel %vm784_vm13, %v886_v36, %v885_v62  ;;  %v867_v36 = vsel %vm796_vm1, %v866_v19, %v865_v20  ;;  %v965_v62 = vsel %vm796_vm1, %v964_v63, %v963_v47  ;;  %v996_v20 = vrot.slane %v766_v14, 6  ;;  %v9607_v63 = vld [vmem:[#allocation45_spill] sm:$0xff] }
 0x4e7   :  { %v889_v35 = vsel %vm787_vm14, %v9602_v15, %v887_v18  ;;  %v1063_v39 = vrot.slane %v867_v36, 4  ;;  %v1163_v17 = vrot.slane %v965_v62, 4  ;;  %v772_v15 = vpop.permute.xlu2 %771  ;;  %v9608_v47 = vrot.slane %v9545_v41, 4 }
 0x4e8   :  { %v891_v27 = vsel %vm790_vm15, %v890_v57, %v889_v35  ;;  %v1150_v41 = vsel %vm1025_vm2, %v1149_v61, %v6232_v6 }
 0x4eb   :  { %v758_v21 = vpop.permute.xlu0 %757 }
 0x4ec   :  { %v892_v12 = vrot.slane %v758_v21, 2  ;;  %v1161_v21 = vrot.slane %v993_v56, 4 }
 0x4ee   :  { %v893_v44 = vsel %vm793_vm0, %v892_v12, %v891_v27  ;;  %v1002_v12 = vrot.slane %v772_v15, 3 }
 0x4ef   :  { %v895_v46 = vsel %vm796_vm1, %v894_v0, %v893_v44  ;;  %v9609_v44 = vrot.slane %v6096_v5, 1 }
 0x4f0   :  { %v1061_v18 = vrot.slane %v895_v46, 4  ;;  %v1064_v49 = vsel %vm1025_vm2, %v895_v46, %v1063_v39 }
 0x4f1   :  { %v1072_v13 = vperm.slane %v1064_v49, %v6234_v53  ;;  %v979_v38 = vsel %vm796_vm1, %v9609_v44, %v977_v8 }
 0x4f2   :  { %v1062_v16 = vsel %vm1025_vm2, %v1061_v18, %v867_v36  ;;  %v1162_v18 = vsel %vm1025_vm2, %v1161_v21, %v965_v62  ;;  %v1175_v61 = vrot.slane %v979_v38, 4 }
 0x4f3   :  { %v764_v9 = vpop.permute.xlu0 %763  ;;  %v1112_v19 = vsel %vm1025_vm2, %v1072_v13, %v1111_v51  ;;  %v1068_v32 = vperm.slane %v1062_v16, %v6234_v53  ;;  %v1109_v31 = vrot.slane %v1072_v13, 4  ;;  %v9612_v13 = vld [vmem:[#allocation52_spill] sm:$0xff]  ;;  %v1156_v16 = vperm.slane %v1150_v41, %v6234_v53 }
 0x4f4   :  { %v994_v54 = vrot.slane %v764_v9, 7  ;;  %v6450_v37 = vperm.slane %v1112_v19, %v6286_v55  ;;  %v1168_v23 = vperm.slane %v1162_v18, %v6234_v53 }
 0x4f5   :  { %v1100_v35 = vsel %vm1025_vm2, %v1068_v32, %v1099_v43  ;;  %v1097_v52 = vrot.slane %v1068_v32, 4  ;;  %v1110_v34 = vsel %vm1025_vm2, %v1109_v31, %v1060_v33  ;;  %v9610_v33 = vrot.slane %v6290_v11, 4 }
 0x4f6   :  { %v995_v14 = vsel %vm778_vm11, %v994_v54, %v9607_v63  ;;  %v1136_v36 = vsel %vm1025_vm2, %v6450_v37, %v1135_v2  ;;  %v6461_v57 = vperm.slane %v1100_v35, %v6286_v55  ;;  %v1164_v2 = vsel %vm1025_vm2, %v993_v56, %v1163_v17 }
 0x4f7   :  { %v997_v30 = vsel %vm781_vm12, %v996_v20, %v995_v14  ;;  %v1271_v0 = vsel %vm1249_vm4, %v1136_v36, -inf  ;;  %v1098_v42 = vsel %vm1025_vm2, %v1097_v52, %v1056_v58  ;;  %v1200_v5 = vsel %vm1025_vm2, %v6403_v4, %v9610_v33 }
 0x4f8   :  { %v999_v1 = vsel %vm784_vm13, %v998_v60, %v997_v30  ;;  %1272 = vmax.xlane.f32.xlu1 %v1271_v0  ;;  %v1125_v3 = vrot.slane %v6461_v57, 4  ;;  %v6469_v27 = vperm.slane %v1098_v42, %v6286_v55  ;;  %v6496_v49 = vperm.slane %v1164_v2, %v6234_v53 }
 0x4f9   :  { %v1001_v39 = vsel %vm787_vm14, %v9608_v47, %v999_v1  ;;  %v1116_v24 = vperm.slane %v1110_v34, %v6286_v55  ;;  %v9613_v17 = vrot.slane %v9612_v13, 4  ;;  %v6513_v43 = vperm.slane %v1200_v5, %v6286_v55 }
 0x4fa   :  { %v1003_v58 = vsel %vm790_vm15, %v1002_v12, %v1001_v39  ;;  %v1126_v46 = vsel %vm1025_vm2, %v1125_v3, %v6339_v50  ;;  %v1124_v6 = vsel %vm1025_vm2, %v6469_v27, %v1123_v29  ;;  %v1223_v15 = vrot.slane %v6496_v49, 4 }
 0x4fb   :  { %v776_v48 = vpop.permute.xlu0 %775  ;;  %v1256_v10 = vsel %vm1249_vm4, %v1126_v46, -inf  ;;  %v1005_v51 = vsel %vm793_vm0, %v1004_v7, %v1003_v58  ;;  %v1138_v62 = vsel %vm1025_vm2, %v9613_v17, %v9611_v40  ;;  %v1253_v32 = vsel %vm1249_vm4, %v1124_v6, -inf }
 0x4fc   :  { %v1006_v22 = vrot.slane %v776_v48, 1  ;;  %1257 = vmax.xlane.f32.xlu0 %v1256_v10  ;;  %v1132_v54 = vsel %vm1025_vm2, %v1116_v24, %v1131_v45  ;;  %v1129_v8 = vrot.slane %v1116_v24, 4  ;;  %v1144_v52 = vperm.slane %v1138_v62, %v6234_v53  ;;  %v9614_v10 = vld [vmem:[#allocation30_spill] sm:$0xff] }
 0x4fd   :  { %v1185_v63 = vrot.slane %v1156_v16, 4  ;;  %v1211_v14 = vrot.slane %v1168_v23, 4  ;;  %v1265_v36 = vsel %vm1249_vm4, %v1132_v54, -inf  ;;  %v1247_v30 = vrot.slane %v6513_v43, 4 }
 0x4fe   :  { %v1007_v20 = vsel %vm796_vm1, %v1006_v22, %v1005_v51  ;;  %v1130_v0 = vsel %vm1025_vm2, %v1129_v8, %v6346_v25  ;;  %v1187_v1 = vrot.slane %v1144_v52, 4  ;;  %v1197_v29 = vrot.slane %v6403_v4, 4  ;;  %v9615_v22 = vld [vmem:[#allocation31_spill] sm:$0xff] }
 0x4ff   :  { %v1173_v9 = vrot.slane %v1007_v20, 4  ;;  %v1176_v19 = vsel %vm1025_vm2, %v1007_v20, %v1175_v61  ;;  %v1186_v47 = vsel %vm1025_vm2, %v1185_v63, %v1144_v52  ;;  %v1262_v25 = vsel %vm1249_vm4, %v1130_v0, -inf  ;;  %v9617_v0 = vld [vmem:[#allocation32_spill] sm:$0xff] }
 0x500   :  { %v1184_v56 = vperm.slane %v1176_v19, %v6234_v53  ;;  %1254 = vmax.xlane.f32.xlu1 %v1253_v32  ;;  %v1121_v44 = vrot.slane %v6469_v27, 4  ;;  %v1601_v58 = vstv %s1600_s1  ;;  %v1192_v7 = vperm.slane %v1186_v47, %v6286_v55  ;;  %v9616_v32 = vld [vmem:[#allocation33_spill] sm:$0xff]  ;;  %s5038_s1 = sld [smem:[#allocation9 + $0x3]] }
 0x501   :  { %v1174_v35 = vsel %vm1025_vm2, %v1173_v9, %v979_v38  ;;  %v1188_v38 = vsel %vm1025_vm2, %v1156_v16, %v1187_v1  ;;  %v1602_v33 = vmul.f32 %v1601_v58, %v9614_v10  ;;  %v1198_v27 = vsel %vm1025_vm2, %v1197_v29, %v6290_v11 }
 0x502   :  { %v1180_v31 = vperm.slane %v1174_v35, %v6234_v53  ;;  %v1224_v60 = vsel %vm1025_vm2, %v1184_v56, %v1223_v15  ;;  %v1221_v41 = vrot.slane %v1184_v56, 4  ;;  %v1196_v4 = vperm.slane %v1188_v38, %v6286_v55 }
 0x503   :  { %v6524_v21 = vperm.slane %v1224_v60, %v6286_v55  ;;  %v1122_v18 = vsel %vm1025_vm2, %v1121_v44, %v6389_v26  ;;  %v1603_v6 = vmul.f32 %v1601_v58, %v9615_v22  ;;  %v1607_v24 = vstv %s5016_s2 }
 0x504   :  { %1266 = vmax.xlane.f32.xlu0 %v1265_v36  ;;  %v1209_v42 = vrot.slane %v1180_v31, 4  ;;  %v1212_v12 = vsel %vm1025_vm2, %v1180_v31, %v1211_v14  ;;  %v1222_v40 = vsel %vm1025_vm2, %v1221_v41, %v6496_v49  ;;  %v1250_v13 = vsel %vm1249_vm4, %v1122_v18, -inf }
 0x505   :  { %v1248_v59 = vsel %vm1025_vm2, %v6524_v21, %v1247_v30  ;;  %v1220_v3 = vperm.slane %v1212_v12, %v6286_v55  ;;  %v1204_v17 = vperm.slane %v1198_v27, %v6286_v55  ;;  %v1608_v62 = vadd.f32 %v1607_v24, %v1602_v33 }
 0x506   :  { %v1295_v2 = vsel %vm1249_vm4, %v1248_v59, -inf  ;;  %v1210_v39 = vsel %vm1025_vm2, %v1209_v42, %v1168_v23  ;;  %v1239_v11 = vrot.slane %v1196_v4, 4  ;;  %v1609_v20 = vadd.f32 %v1607_v24, %v1603_v6 }
 0x507   :  { %1296 = vmax.xlane.f32.xlu2 %v1295_v2  ;;  %v6540_v34 = vperm.slane %v1210_v39, %v6286_v55  ;;  %v1237_v46 = vrot.slane %v1220_v3, 4  ;;  %v1228_v45 = vperm.slane %v1222_v40, %v6286_v55  ;;  %v1127_v23 = vrot.slane %v6339_v50, 4 }
 0x508   :  { %1263 = vmax.xlane.f32.xlu1 %v1262_v25  ;;  %v1240_v16 = vsel %vm1025_vm2, %v1220_v3, %v1239_v11  ;;  %v1243_v9 = vrot.slane %v1204_v17, 4  ;;  %v6564_v19 = vmax.f32 %v1608_v62, 0.0  ;;  %v1605_v56 = vmul.f32 %v1601_v58, %v9616_v32 }
 0x509   :  { %v1233_v48 = vrot.slane %v6540_v34, 4  ;;  %v1238_v51 = vsel %vm1025_vm2, %v1237_v46, %v1196_v4  ;;  %v1128_v49 = vsel %vm1025_vm2, %v6461_v57, %v1127_v23  ;;  %v6569_v54 = vmax.f32 %v1609_v20, 0.0 }
 0x50a   :  { %v1280_v26 = vsel %vm1249_vm4, %v1238_v51, -inf  ;;  %v1283_v15 = vsel %vm1249_vm4, %v1240_v16, -inf  ;;  %v1244_v8 = vsel %vm1025_vm2, %v1228_v45, %v1243_v9  ;;  %v1245_v35 = vrot.slane %v6524_v21, 4 }
 0x50b   :  { %v1234_v5 = vsel %vm1025_vm2, %v1233_v48, %v1192_v7  ;;  %v1259_v52 = vsel %vm1249_vm4, %v1128_v49, -inf  ;;  %v1644_v50 = vsel %vm424_vm7, %v6564_v19, -inf  ;;  %v1289_v31 = vsel %vm1249_vm4, %v1244_v8, -inf }
 0x50c   :  { %v1274_v61 = vsel %vm1249_vm4, %v1234_v5, -inf  ;;  %v1133_v57 = vrot.slane %v6450_v37, 4  ;;  %v1611_v60 = vadd.f32 %v1607_v24, %v1605_v56  ;;  %v1672_v63 = vsel %vm424_vm7, %v6569_v54, -inf }
 0x50d   :  { %1275 = vmax.xlane.f32.xlu0 %v1274_v61  ;;  %v1246_v14 = vsel %vm1025_vm2, %v1245_v35, %v6513_v43  ;;  %v1645_v36 = vrot.slane %v1644_v50, 4  ;;  %v1673_v21 = vrot.slane %v1672_v63, 4  ;;  %v1604_v42 = vmul.f32 %v1601_v58, %v9617_v0 }
 0x50e   :  { %v1134_v30 = vsel %vm1025_vm2, %v1133_v57, %v6308_v28  ;;  %v6586_v12 = vmax.f32 %v1611_v60, 0.0  ;;  %v1292_v59 = vsel %vm1249_vm4, %v1246_v14, -inf  ;;  %v1235_v47 = vrot.slane %v1192_v7, 4 }
 0x50f   :  { %1251 = vmax.xlane.f32.xlu2 %v1250_v13  ;;  %v1646_v37 = vmax.f32 %v1644_v50, %v1645_v36  ;;  %v1268_v1 = vsel %vm1249_vm4, %v1134_v30, -inf  ;;  %v1674_v3 = vmax.f32 %v1672_v63, %v1673_v21  ;;  %v1610_v2 = vadd.f32 %v1607_v24, %v1604_v42 }
 0x510   :  { %1281 = vmax.xlane.f32.xlu1 %v1280_v26  ;;  %v1728_v43 = vsel %vm424_vm7, %v6586_v12, -inf  ;;  %v1236_v25 = vsel %vm1025_vm2, %v6540_v34, %v1235_v47  ;;  %v1241_v48 = vrot.slane %v1228_v45, 4  ;;  %v1623_v26 = vrot.slane %v6569_v54, 2 }
 0x511   :  { %v1647_v39 = vrot.slane %v1646_v37, 2  ;;  %v1675_v29 = vrot.slane %v1674_v3, 2  ;;  %v1729_v28 = vrot.slane %v1728_v43, 4  ;;  %v6594_v44 = vmax.f32 %v1610_v2, 0.0 }
 0x512   :  { %v1277_v58 = vsel %vm1249_vm4, %v1236_v25, -inf  ;;  %v1242_v18 = vsel %vm1025_vm2, %v1241_v48, %v1204_v17  ;;  %v1624_v11 = vrot.slane %v6569_v54, 4  ;;  %v1679_v20 = vsel %vm424_vm7, %v1623_v26, -inf }
 0x513   :  { %v1648_v38 = vmax.f32 %v1646_v37, %v1647_v39  ;;  %v1676_v46 = vmax.f32 %v1674_v3, %v1675_v29  ;;  %v1730_v41 = vmax.f32 %v1728_v43, %v1729_v28  ;;  %v1700_v4 = vsel %vm424_vm7, %v6594_v44, -inf }
 0x514   :  { %v1701_v33 = vrot.slane %v1700_v4, 4  ;;  %v1286_v34 = vsel %vm1249_vm4, %v1242_v18, -inf  ;;  %v1686_v45 = vsel %vm424_vm7, %v1624_v11, -inf  ;;  %v1680_v16 = vrot.slane %v1679_v20, 4 }
 0x515   :  { %1284 = vmax.xlane.f32.xlu0 %v1283_v15  ;;  %v1649_v10 = vrot.slane %v1648_v38, 1  ;;  %v1677_v7 = vrot.slane %v1676_v46, 1  ;;  %v1731_v5 = vrot.slane %v1730_v41, 2  ;;  %v1687_v23 = vrot.slane %v1686_v45, 4 }
 0x516   :  { %v1702_v6 = vmax.f32 %v1700_v4, %v1701_v33  ;;  %v1627_v9 = vrot.slane %v6594_v44, 4  ;;  %v1628_v49 = vrot.slane %v6594_v44, 6  ;;  %v1681_v32 = vmax.f32 %v1679_v20, %v1680_v16 }
 0x517   :  { %1260 = vmax.xlane.f32.xlu2 %v1259_v52  ;;  %v6601_v27 = vmax.f32 %v1648_v38, %v1649_v10  ;;  %v6603_v22 = vmax.f32 %v1676_v46, %v1677_v7  ;;  %v1732_v24 = vmax.f32 %v1730_v41, %v1731_v5  ;;  %v1688_v56 = vmax.f32 %v1686_v45, %v1687_v23 }
 0x518   :  { %1290 = vmax.xlane.f32.xlu1 %v1289_v31  ;;  %v1703_v61 = vrot.slane %v1702_v6, 2  ;;  %v1714_v15 = vsel %vm424_vm7, %v1627_v9, -inf  ;;  %v1721_v8 = vsel %vm424_vm7, %v1628_v49, -inf  ;;  %v1682_v35 = vrot.slane %v1681_v32, 2 }
 0x519   :  { %v1733_v51 = vrot.slane %v1732_v24, 1  ;;  %v1689_v52 = vrot.slane %v1688_v56, 2  ;;  %v1715_v50 = vrot.slane %v1714_v15, 4  ;;  %v1722_v31 = vrot.slane %v1721_v8, 4 }
 0x51a   :  { %v1704_v40 = vmax.f32 %v1702_v6, %v1703_v61  ;;  %v1629_v57 = vrot.slane %v6586_v12, 2  ;;  %v1630_v60 = vrot.slane %v6586_v12, 4  ;;  %v1683_v63 = vmax.f32 %v1681_v32, %v1682_v35 }
 0x51b   :  { %v6609_v13 = vmax.f32 %v1732_v24, %v1733_v51  ;;  %v1690_v14 = vmax.f32 %v1688_v56, %v1689_v52  ;;  %v1716_v36 = vmax.f32 %v1714_v15, %v1715_v50  ;;  %v1723_v21 = vmax.f32 %v1721_v8, %v1722_v31 }
 0x51c   :  { %v1705_v17 = vrot.slane %v1704_v40, 1  ;;  %v1735_v30 = vsel %vm424_vm7, %v1629_v57, -inf  ;;  %v1742_v0 = vsel %vm424_vm7, %v1630_v60, -inf  ;;  %v1620_v42 = vrot.slane %v6564_v19, 2 }
 0x51d   :  { %1293 = vmax.xlane.f32.xlu0 %v1292_v59  ;;  %v1622_v59 = vrot.slane %v6564_v19, 6  ;;  %v1684_v37 = vrot.slane %v1683_v63, 1  ;;  %v1717_v3 = vrot.slane %v1716_v36, 2  ;;  %v1724_v2 = vrot.slane %v1723_v21, 2 }
 0x51e   :  { %v6615_v62 = vmax.f32 %v1704_v40, %v1705_v17  ;;  %v1736_v43 = vrot.slane %v1735_v30, 4  ;;  %v1743_v47 = vrot.slane %v1742_v0, 4  ;;  %v1651_v39 = vsel %vm424_vm7, %v1620_v42, -inf }
 0x51f   :  { %1269 = vmax.xlane.f32.xlu2 %v1268_v1  ;;  %v1691_v1 = vrot.slane %v1690_v14, 1  ;;  %v1665_v29 = vsel %vm424_vm7, %v1622_v59, -inf  ;;  %v6667_v28 = vmax.f32 %v1683_v63, %v1684_v37  ;;  %v1718_v38 = vmax.f32 %v1716_v36, %v1717_v3 }
 0x520   :  { %v1737_v46 = vmax.f32 %v1735_v30, %v1736_v43  ;;  %v1744_v41 = vmax.f32 %v1742_v0, %v1743_v47  ;;  %v1625_v48 = vrot.slane %v6569_v54, 6  ;;  %v1652_v4 = vrot.slane %v1651_v39, 4 }
 0x521   :  { %v6669_v25 = vmax.f32 %v1690_v14, %v1691_v1  ;;  %v1666_v10 = vrot.slane %v1665_v29, 4  ;;  %v1719_v7 = vrot.slane %v1718_v38, 1  ;;  %v1626_v49 = vrot.slane %v6594_v44, 2 }
 0x522   :  { %v1738_v5 = vrot.slane %v1737_v46, 2  ;;  %v1745_v18 = vrot.slane %v1744_v41, 2  ;;  %v1653_v24 = vmax.f32 %v1651_v39, %v1652_v4  ;;  %v1693_v51 = vsel %vm424_vm7, %v1625_v48, -inf }
 0x523   :  { %v1667_v61 = vmax.f32 %v1665_v29, %v1666_v10  ;;  %v6681_v40 = vmax.f32 %v1718_v38, %v1719_v7  ;;  %v1694_v54 = vrot.slane %v1693_v51, 4  ;;  %v1707_v31 = vsel %vm424_vm7, %v1626_v49, -inf }
 0x524   :  { %v1739_v26 = vmax.f32 %v1737_v46, %v1738_v5  ;;  %v1746_v11 = vmax.f32 %v1744_v41, %v1745_v18  ;;  %v1654_v45 = vrot.slane %v1653_v24, 2  ;;  %v1314_v57 = vlaneseq }
 0x525   :  { %v1668_v16 = vrot.slane %v1667_v61, 2  ;;  %v1695_v15 = vmax.f32 %v1693_v51, %v1694_v54  ;;  %v1708_v36 = vrot.slane %v1707_v31, 4  ;;  %v1621_v48 = vrot.slane %v6564_v19, 4 }
 0x526   :  { %v1740_v23 = vrot.slane %v1739_v26, 1  ;;  %v1747_v9 = vrot.slane %v1746_v11, 1  ;;  %v1655_v8 = vmax.f32 %v1653_v24, %v1654_v45  ;;  %v6706_v30 = vand.u32 127, %v1314_v57 }
 0x527   :  { %1278 = vmax.xlane.f32.xlu2 %v1277_v58  ;;  %v1725_v58 = vmax.f32 %v1723_v21, %v1724_v2  ;;  %v1669_v35 = vmax.f32 %v1667_v61, %v1668_v16  ;;  %v1696_v44 = vrot.slane %v1695_v15, 2  ;;  %v1631_v21 = vrot.slane %v6586_v12, 6 }
 0x528   :  { %v6694_v52 = vmax.f32 %v1739_v26, %v1740_v23  ;;  %v6696_v50 = vmax.f32 %v1746_v11, %v1747_v9  ;;  %v1656_v63 = vrot.slane %v1655_v8, 1  ;;  %9618 = vst [vmem:[#allocation47_spill] sm:$0xff] %v6706_v30  ;;  %v1709_v1 = vmax.f32 %v1707_v31, %v1708_v36 }
 0x529   :  { %v1726_v33 = vrot.slane %v1725_v58, 1  ;;  %v1670_v14 = vrot.slane %v1669_v35, 1  ;;  %v1697_v0 = vmax.f32 %v1695_v15, %v1696_v44  ;;  %v1749_v43 = vsel %vm424_vm7, %v1631_v21, -inf }
 0x52a   :  { %v6709_v59 = vmax.f32 %v1655_v8, %v1656_v63  ;;  %v1710_v38 = vrot.slane %v1709_v1, 2  ;;  %v1658_v24 = vsel %vm424_vm7, %v1621_v48, -inf }
 0x52b   :  { %v6683_v17 = vmax.f32 %v1725_v58, %v1726_v33  ;;  %v6711_v37 = vmax.f32 %v1669_v35, %v1670_v14  ;;  %v1698_v12 = vrot.slane %v1697_v0, 1  ;;  %v1750_v58 = vrot.slane %v1749_v43, 4 }
 0x52c   :  { %v1711_v33 = vmax.f32 %v1709_v1, %v1710_v38  ;;  %v1659_v11 = vrot.slane %v1658_v24, 4 }
 0x52d   :  { %v6727_v7 = vmax.f32 %v1697_v0, %v1698_v12  ;;  %v1751_v5 = vmax.f32 %v1749_v43, %v1750_v58 }
 0x52e   :  { %v1712_v54 = vrot.slane %v1711_v33, 1  ;;  %v1660_v15 = vmax.f32 %v1658_v24, %v1659_v11 }
 0x52f   :  { %1287 = vmax.xlane.f32.xlu2 %v1286_v34  ;;  %v1752_v45 = vrot.slane %v1751_v5, 2 }
 0x530   :  { %v6745_v8 = vmax.f32 %v1711_v33, %v1712_v54  ;;  %v1661_v35 = vrot.slane %v1660_v15, 2 }
 0x531   :  { %1812 = vrot.lane.b32.xlu1 %v6603_v22, %s5222_s3  ;;  %1804 = vrot.lane.b32.xlu0 %v6601_v27, %s5222_s3 }
 0x532   :  { %v1662_v36 = vmax.f32 %v1660_v15, %v1661_v35 }
 0x539   :  { %1836 = vrot.lane.b32.xlu1 %v6601_v27, %s5223_s30  ;;  %1828 = vrot.lane.b32.xlu0 %v6609_v13, %s5222_s3 }
 0x541   :  { %1860 = vrot.lane.b32.xlu1 %v6609_v13, %s5223_s30  ;;  %1852 = vrot.lane.b32.xlu0 %v6615_v62, %s5223_s30 }
 0x547   :  { %1772 = vrot.lane.b32.xlu2 %v6601_v27, %s5221_s16 }
 0x549   :  { %1884 = vrot.lane.b32.xlu1 %v6615_v62, %s5224_s6  ;;  %1876 = vrot.lane.b32.xlu0 %v6603_v22, %s5224_s6 }
 0x54f   :  { %1780 = vrot.lane.b32.xlu2 %v6603_v22, %s5221_s16 }
 0x551   :  { %1908 = vrot.lane.b32.xlu1 %v6603_v22, %s5225_s7  ;;  %1900 = vrot.lane.b32.xlu0 %v6601_v27, %s5225_s7 }
 0x557   :  { %1788 = vrot.lane.b32.xlu2 %v6615_v62, %s5221_s16 }
 0x559   :  { %1932 = vrot.lane.b32.xlu1 %v6601_v27, %s5226_s0  ;;  %1924 = vrot.lane.b32.xlu0 %v6609_v13, %s5225_s7 }
 0x55f   :  { %1796 = vrot.lane.b32.xlu2 %v6609_v13, %s5221_s16 }
 0x561   :  { %1956 = vrot.lane.b32.xlu1 %v6609_v13, %s5226_s0  ;;  %1948 = vrot.lane.b32.xlu0 %v6615_v62, %s5226_s0 }
 0x567   :  { %1820 = vrot.lane.b32.xlu2 %v6615_v62, %s5222_s3 }
 0x569   :  { %1980 = vrot.lane.b32.xlu1 %v6615_v62, %s5227_s8  ;;  %1972 = vrot.lane.b32.xlu0 %v6603_v22, %s5227_s8 }
 0x56b   :  { %v6678_v34 = vpop.xlane.xlu1 %1272 }
 0x56c   :  { %v1323_v23 = vperm.slane %v6678_v34, %v6706_v30 }
 0x56f   :  { %1844 = vrot.lane.b32.xlu2 %v6603_v22, %s5223_s30  ;;  %v1258_v6 = vpop.xlane.xlu0 %1257 }
 0x570   :  { %v1318_v46 = vperm.slane %v1258_v6, %v6706_v30 }
 0x571   :  { %1784 = vrot.lane.b32.xlu1 %v6669_v25, %s5221_s16  ;;  %1782 = vrot.lane.b32.xlu0 %v6667_v28, %s5221_s16 }
 0x573   :  { %v1255_v32 = vpop.xlane.xlu1 %1254 }
 0x574   :  { %v1317_v47 = vperm.slane %v1255_v32, %v6706_v30 }
 0x577   :  { %1868 = vrot.lane.b32.xlu2 %v6601_v27, %s5224_s6  ;;  %v1267_v56 = vpop.xlane.xlu0 %1266 }
 0x578   :  { %v1321_v19 = vperm.slane %v1267_v56, %v6706_v30  ;;  %v1753_v56 = vmax.f32 %v1751_v5, %v1752_v45 }
 0x579   :  { %1794 = vrot.lane.b32.xlu1 %v6683_v17, %s5221_s16  ;;  %1792 = vrot.lane.b32.xlu0 %v6681_v40, %s5221_s16 }
 0x57a   :  { %v6691_v20 = vpop.xlane.xlu2 %1296  ;;  %v1754_v31 = vrot.slane %v1753_v56, 1 }
 0x57b   :  { %v1264_v3 = vpop.xlane.xlu1 %1263 }
 0x57c   :  { %v1320_v18 = vperm.slane %v1264_v3, %v6706_v30  ;;  %v6757_v21 = vmax.f32 %v1753_v56, %v1754_v31 }
 0x57f   :  { %1892 = vrot.lane.b32.xlu2 %v6609_v13, %s5224_s6 }
 0x580   :  { %v1276_v2 = vpop.xlane.xlu0 %1275 }
 0x581   :  { %1800 = vrot.lane.b32.xlu1 %v6696_v50, %s5221_s16  ;;  %1798 = vrot.lane.b32.xlu0 %v6694_v52, %s5221_s16  ;;  %v1324_v63 = vperm.slane %v1276_v2, %v6706_v30  ;;  %v1663_v2 = vrot.slane %v1662_v36, 1 }
 0x582   :  { %v1252_v60 = vpop.xlane.xlu2 %1251 }
 0x583   :  { %v1316_v42 = vperm.slane %v1252_v60, %v6706_v30  ;;  %v1282_v6 = vpop.xlane.xlu1 %1281  ;;  %v6780_v48 = vmax.f32 %v1662_v36, %v1663_v2 }
 0x584   :  { %v1326_v0 = vperm.slane %v1282_v6, %v6706_v30 }
 0x585   :  { %v1332_v39 = vsel %vm778_vm11, %v1317_v47, %v1316_v42 }
 0x586   :  { %v1333_v4 = vsel %vm781_vm12, %v1318_v46, %v1332_v39  ;;  %v1331_v46 = vperm.slane %v6691_v20, %v6706_v30 }
 0x587   :  { %1916 = vrot.lane.b32.xlu2 %v6615_v62, %s5225_s7 }
 0x588   :  { %v1285_v61 = vpop.xlane.xlu0 %1284 }
 0x589   :  { %1806 = vrot.lane.b32.xlu1 %v6709_v59, %s5222_s3  ;;  %1810 = vrot.lane.b32.xlu0 %v6711_v37, %s5222_s3  ;;  %v1327_v1 = vperm.slane %v1285_v61, %v6706_v30 }
 0x58a   :  { %v1261_v29 = vpop.xlane.xlu2 %1260 }
 0x58b   :  { %v1319_v41 = vperm.slane %v1261_v29, %v6706_v30  ;;  %v1291_v57 = vpop.xlane.xlu1 %1290 }
 0x58c   :  { %v1329_v39 = vperm.slane %v1291_v57, %v6706_v30 }
 0x58d   :  { %v1334_v10 = vsel %vm784_vm13, %v1319_v41, %v1333_v4 }
 0x58e   :  { %v1335_v51 = vsel %vm787_vm14, %v1320_v18, %v1334_v10 }
 0x58f   :  { %1940 = vrot.lane.b32.xlu2 %v6603_v22, %s5226_s0  ;;  %v1336_v9 = vsel %vm790_vm15, %v1321_v19, %v1335_v51 }
 0x590   :  { %v1294_v44 = vpop.xlane.xlu0 %1293 }
 0x591   :  { %1818 = vrot.lane.b32.xlu1 %v6727_v7, %s5222_s3  ;;  %1816 = vrot.lane.b32.xlu0 %v6669_v25, %s5222_s3  ;;  %v1330_v38 = vperm.slane %v1294_v44, %v6706_v30 }
 0x592   :  { %v1270_v26 = vpop.xlane.xlu2 %1269 }
 0x593   :  { %v1322_v16 = vperm.slane %v1270_v26, %v6706_v30 }
 0x595   :  { %v1337_v49 = vsel %vm793_vm0, %v1322_v16, %v1336_v9 }
 0x596   :  { %v1338_v32 = vsel %vm796_vm1, %v1323_v23, %v1337_v49 }
 0x597   :  { %1349 = vst.msk [vmem:[#allocation13] sm:$0xff] %vm1348_vm5, %v1338_v32  ;;  %1964 = vrot.lane.b32.xlu2 %v6601_v27, %s5227_s8 }
 0x599   :  { %1824 = vrot.lane.b32.xlu1 %v6681_v40, %s5222_s3  ;;  %1822 = vrot.lane.b32.xlu0 %v6745_v8, %s5222_s3 }
 0x59a   :  { %v1279_v34 = vpop.xlane.xlu2 %1278 }
 0x59b   :  { %v1325_v60 = vperm.slane %v1279_v34, %v6706_v30 }
 0x59d   :  { %v1339_v14 = vsel %vm778_vm11, %v1325_v60, %v1324_v63 }
 0x59e   :  { %v1340_v42 = vsel %vm781_vm12, %v1326_v0, %v1339_v14 }
 0x59f   :  { %1988 = vrot.lane.b32.xlu2 %v6609_v13, %s5227_s8  ;;  %v1341_v29 = vsel %vm784_vm13, %v1327_v1, %v1340_v42 }
 0x5a1   :  { %1830 = vrot.lane.b32.xlu1 %v6694_v52, %s5222_s3  ;;  %1834 = vrot.lane.b32.xlu0 %v6757_v21, %s5222_s3 }
 0x5a2   :  { %v1288_v3 = vpop.xlane.xlu2 %1287 }
 0x5a3   :  { %v1328_v43 = vperm.slane %v1288_v3, %v6706_v30  ;;  %v6769_v47 = vpop.permute.xlu0 %1804  ;;  %v6771_v12 = vpop.permute.xlu1 %1812 }
 0x5a5   :  { %v1342_v58 = vsel %vm787_vm14, %v1328_v43, %v1341_v29 }
 0x5a6   :  { %v1343_v41 = vsel %vm790_vm15, %v1329_v39, %v1342_v58 }
 0x5a7   :  { %v1344_v4 = vsel %vm793_vm0, %v1330_v38, %v1343_v41  ;;  %1774 = vrot.lane.b32.xlu2 %v6709_v59, %s5221_s16 }
 0x5a8   :  { %v1345_v10 = vsel %vm796_vm1, %v1331_v46, %v1344_v4 }
 0x5a9   :  { %1350 = vst.msk [vmem:[#allocation13 + $0x20] sm:$0xff] %vm1348_vm5, %v1345_v10  ;;  %1842 = vrot.lane.b32.xlu1 %v6711_v37, %s5223_s30  ;;  %1840 = vrot.lane.b32.xlu0 %v6780_v48, %s5223_s30 }
 0x5aa   :  { %v6791_v20 = vpop.permute.xlu2 %1772 }
 0x5ab   :  { %v6793_v33 = vpop.permute.xlu0 %1828  ;;  %v6795_v5 = vpop.permute.xlu1 %1836 }
 0x5af   :  { %1776 = vrot.lane.b32.xlu2 %v6780_v48, %s5221_s16 }
 0x5b1   :  { %1848 = vrot.lane.b32.xlu1 %v6669_v25, %s5223_s30  ;;  %1846 = vrot.lane.b32.xlu0 %v6667_v28, %s5223_s30 }
 0x5b2   :  { %v6803_v18 = vpop.permute.xlu2 %1780 }
 0x5b3   :  { %v6805_v24 = vpop.permute.xlu0 %1852  ;;  %v6807_v6 = vpop.permute.xlu1 %1860 }
 0x5b4   :  { %9619 = vst [vmem:[#allocation48_spill] sm:$0xff] %v6805_v24 }
 0x5b7   :  { %1778 = vrot.lane.b32.xlu2 %v6711_v37, %s5221_s16 }
 0x5b9   :  { %1854 = vrot.lane.b32.xlu1 %v6745_v8, %s5223_s30  ;;  %1858 = vrot.lane.b32.xlu0 %v6683_v17, %s5223_s30 }
 0x5ba   :  { %v6815_v61 = vpop.permute.xlu2 %1788 }
 0x5bb   :  { %v6817_v51 = vpop.permute.xlu0 %1876  ;;  %v6819_v19 = vpop.permute.xlu1 %1884 }
 0x5bc   :  { %9620 = vst [vmem:[#allocation50_spill] sm:$0xff] %v6819_v19 }
 0x5bf   :  { %1786 = vrot.lane.b32.xlu2 %v6727_v7, %s5221_s16 }
 0x5c1   :  { %1866 = vrot.lane.b32.xlu1 %v6757_v21, %s5223_s30  ;;  %1864 = vrot.lane.b32.xlu0 %v6696_v50, %s5223_s30 }
 0x5c2   :  { %v6827_v26 = vpop.permute.xlu2 %1796 }
 0x5c3   :  { %v6829_v11 = vpop.permute.xlu0 %1900  ;;  %v6831_v54 = vpop.permute.xlu1 %1908 }
 0x5c4   :  { %9621 = vst [vmem:[#allocation59_spill] sm:$0xff] %v6829_v11 }
 0x5c7   :  { %1790 = vrot.lane.b32.xlu2 %v6745_v8, %s5221_s16 }
 0x5c9   :  { %1872 = vrot.lane.b32.xlu1 %v6780_v48, %s5224_s6  ;;  %1870 = vrot.lane.b32.xlu0 %v6709_v59, %s5224_s6 }
 0x5ca   :  { %v6839_v45 = vpop.permute.xlu2 %1820 }
 0x5cb   :  { %v6841_v16 = vpop.permute.xlu0 %1924  ;;  %v6843_v23 = vpop.permute.xlu1 %1932 }
 0x5cc   :  { %9622 = vst [vmem:[#allocation53_spill] sm:$0xff] %v6843_v23 }
 0x5cf   :  { %1802 = vrot.lane.b32.xlu2 %v6757_v21, %s5221_s16 }
 0x5d1   :  { %1878 = vrot.lane.b32.xlu1 %v6667_v28, %s5224_s6  ;;  %1882 = vrot.lane.b32.xlu0 %v6727_v7, %s5224_s6 }
 0x5d2   :  { %v6851_v9 = vpop.permute.xlu2 %1844 }
 0x5d3   :  { %v6853_v49 = vpop.permute.xlu0 %1948  ;;  %v6855_v32 = vpop.permute.xlu1 %1956 }
 0x5d4   :  { %9623 = vst [vmem:[#allocation62_spill] sm:$0xff] %v6853_v49 }
 0x5d7   :  { %1808 = vrot.lane.b32.xlu2 %v6780_v48, %s5222_s3 }
 0x5d9   :  { %1890 = vrot.lane.b32.xlu1 %v6683_v17, %s5224_s6  ;;  %1888 = vrot.lane.b32.xlu0 %v6681_v40, %s5224_s6 }
 0x5da   :  { %v6863_v15 = vpop.permute.xlu2 %1868 }
 0x5db   :  { %9624 = vst [vmem:[#allocation58_spill] sm:$0xff] %v6863_v15  ;;  %v6865_v56 = vpop.permute.xlu0 %1972  ;;  %v6869_v34 = vpop.permute.xlu1 %1980 }
 0x5dc   :  { %9625 = vst [vmem:[#allocation43_spill] sm:$0xff] %v6865_v56 }
 0x5dd   :  { %9626 = vst [vmem:[#allocation51_spill] sm:$0xff] %v6869_v34 }
 0x5df   :  { %1814 = vrot.lane.b32.xlu2 %v6667_v28, %s5222_s3 }
 0x5e1   :  { %1896 = vrot.lane.b32.xlu1 %v6696_v50, %s5224_s6  ;;  %1894 = vrot.lane.b32.xlu0 %v6694_v52, %s5224_s6 }
 0x5e2   :  { %v6875_v35 = vpop.permute.xlu2 %1892 }
 0x5e3   :  { %9627 = vst [vmem:[#allocation49_spill] sm:$0xff] %v6875_v35  ;;  %v6877_v31 = vpop.permute.xlu0 %1782  ;;  %v6887_v44 = vpop.permute.xlu1 %1784  ;;  %v9665_v35 = vld [vmem:[#allocation27_spill] sm:$0xff] }
 0x5e4   :  { %9628 = vst [vmem:[#allocation54_spill] sm:$0xff] %v6877_v31 }
 0x5e5   :  { %9630 = vst [vmem:[#allocation37_spill] sm:$0xff] %v6887_v44 }
 0x5e7   :  { %1826 = vrot.lane.b32.xlu2 %v6683_v17, %s5222_s3 }
 0x5e9   :  { %1902 = vrot.lane.b32.xlu1 %v6709_v59, %s5225_s7  ;;  %1906 = vrot.lane.b32.xlu0 %v6711_v37, %s5225_s7 }
 0x5ea   :  { %v6885_v57 = vpop.permute.xlu2 %1916 }
 0x5eb   :  { %9629 = vst [vmem:[#allocation56_spill] sm:$0xff] %v6885_v57  ;;  %v6889_v60 = vpop.permute.xlu0 %1792  ;;  %v6901_v36 = vpop.permute.xlu1 %1794 }
 0x5ef   :  { %1832 = vrot.lane.b32.xlu2 %v6696_v50, %s5222_s3 }
 0x5f1   :  { %1914 = vrot.lane.b32.xlu1 %v6727_v7, %s5225_s7  ;;  %1912 = vrot.lane.b32.xlu0 %v6669_v25, %s5225_s7 }
 0x5f2   :  { %v6897_v63 = vpop.permute.xlu2 %1940 }
 0x5f3   :  { %9631 = vst [vmem:[#allocation61_spill] sm:$0xff] %v6897_v63  ;;  %v6899_v14 = vpop.permute.xlu0 %1798  ;;  %v6913_v1 = vpop.permute.xlu1 %1800 }
 0x5f4   :  { %9632 = vst [vmem:[#allocation64_spill] sm:$0xff] %v6899_v14 }
 0x5f5   :  { %9634 = vst [vmem:[#allocation65_spill] sm:$0xff] %v6913_v1  ;;  %v9659_v1 = vld [vmem:[#allocation20_spill] sm:$0xff] }
 0x5f7   :  { %1838 = vrot.lane.b32.xlu2 %v6709_v59, %s5223_s30 }
 0x5f9   :  { %1920 = vrot.lane.b32.xlu1 %v6681_v40, %s5225_s7  ;;  %1918 = vrot.lane.b32.xlu0 %v6745_v8, %s5225_s7 }
 0x5fa   :  { %v6909_v0 = vpop.permute.xlu2 %1964 }
 0x5fb   :  { %9633 = vst [vmem:[#allocation55_spill] sm:$0xff] %v6909_v0  ;;  %v6911_v42 = vpop.permute.xlu0 %1810  ;;  %v6927_v43 = vpop.permute.xlu1 %1806 }
 0x5ff   :  { %1850 = vrot.lane.b32.xlu2 %v6727_v7, %s5223_s30 }
 0x601   :  { %1926 = vrot.lane.b32.xlu1 %v6694_v52, %s5225_s7  ;;  %1930 = vrot.lane.b32.xlu0 %v6757_v21, %s5225_s7 }
 0x602   :  { %v6921_v3 = vpop.permute.xlu2 %1988 }
 0x603   :  { %9635 = vst [vmem:[#allocation68_spill] sm:$0xff] %v6921_v3  ;;  %v6923_v2 = vpop.permute.xlu0 %1816  ;;  %v6945_v58 = vpop.permute.xlu1 %1818 }
 0x604   :  { %9636 = vst [vmem:[#allocation60_spill] sm:$0xff] %v6923_v2 }
 0x605   :  { %9637 = vst [vmem:[#allocation57_spill] sm:$0xff] %v6945_v58  ;;  %v9656_v58 = vld [vmem:[#allocation21_spill] sm:$0xff] }
 0x607   :  { %1856 = vrot.lane.b32.xlu2 %v6681_v40, %s5223_s30 }
 0x609   :  { %1938 = vrot.lane.b32.xlu1 %v6711_v37, %s5226_s0  ;;  %1936 = vrot.lane.b32.xlu0 %v6780_v48, %s5226_s0 }
 0x60a   :  { %v6933_v39 = vpop.permute.xlu2 %1774 }
 0x60b   :  { %v6935_v29 = vpop.permute.xlu0 %1822  ;;  %v6959_v10 = vpop.permute.xlu1 %1824 }
 0x60f   :  { %1862 = vrot.lane.b32.xlu2 %v6694_v52, %s5223_s30 }
 0x611   :  { %1944 = vrot.lane.b32.xlu1 %v6669_v25, %s5226_s0  ;;  %1942 = vrot.lane.b32.xlu0 %v6667_v28, %s5226_s0 }
 0x612   :  { %v6943_v38 = vpop.permute.xlu2 %1776 }
 0x613   :  { %v6947_v46 = vpop.permute.xlu0 %1834  ;;  %v6971_v49 = vpop.permute.xlu1 %1830 }
 0x614   :  { %9638 = vst [vmem:[#allocation35_spill] sm:$0xff] %v6947_v46  ;;  %v9654_v46 = vld [vmem:[#allocation19_spill] sm:$0xff] }
 0x615   :  { %9642 = vst [vmem:[#allocation39_spill] sm:$0xff] %v6971_v49 }
 0x617   :  { %1874 = vrot.lane.b32.xlu2 %v6711_v37, %s5224_s6 }
 0x619   :  { %1950 = vrot.lane.b32.xlu1 %v6745_v8, %s5226_s0  ;;  %1954 = vrot.lane.b32.xlu0 %v6683_v17, %s5226_s0 }
 0x61a   :  { %v6955_v41 = vpop.permute.xlu2 %1778 }
 0x61b   :  { %v6957_v4 = vpop.permute.xlu0 %1840  ;;  %v6985_v57 = vpop.permute.xlu1 %1842 }
 0x61c   :  { %9639 = vst [vmem:[#allocation73_spill] sm:$0xff] %v6957_v4 }
 0x61d   :  { %9644 = vst [vmem:[#allocation67_spill] sm:$0xff] %v6985_v57  ;;  %v9660_v57 = vld [vmem:[#allocation28_spill] sm:$0xff] }
 0x61e   :  { %v2717_v14 = vadd.f32 %v9660_v57, %v9659_v1 }
 0x61f   :  { %1880 = vrot.lane.b32.xlu2 %v6669_v25, %s5224_s6 }
 0x620   :  { %v2743_v56 = vadd.f32 %v9665_v35, %v2717_v14 }
 0x621   :  { %1962 = vrot.lane.b32.xlu1 %v6757_v21, %s5226_s0  ;;  %1960 = vrot.lane.b32.xlu0 %v6696_v50, %s5226_s0 }
 0x622   :  { %v6967_v30 = vpop.permute.xlu2 %1786 }
 0x623   :  { %9640 = vst [vmem:[#allocation70_spill] sm:$0xff] %v6967_v30  ;;  %v6969_v34 = vpop.permute.xlu0 %1846  ;;  %v7003_v53 = vpop.permute.xlu1 %1848  ;;  %v9658_v30 = vld [vmem:[#allocation29_spill] sm:$0xff] }
 0x624   :  { %9641 = vst [vmem:[#allocation41_spill] sm:$0xff] %v6969_v34 }
 0x625   :  { %9647 = vst [vmem:[#allocation74_spill] sm:$0xff] %v7003_v53 }
 0x627   :  { %1886 = vrot.lane.b32.xlu2 %v6745_v8, %s5224_s6 }
 0x629   :  { %1968 = vrot.lane.b32.xlu1 %v6780_v48, %s5227_s8  ;;  %1966 = vrot.lane.b32.xlu0 %v6709_v59, %s5227_s8 }
 0x62a   :  { %v6979_v55 = vpop.permute.xlu2 %1790 }
 0x62b   :  { %v6981_v0 = vpop.permute.xlu0 %1858 }
 0x62c   :  { %9643 = vst [vmem:[#allocation63_spill] sm:$0xff] %v6981_v0  ;;  %v7015_v0 = vpop.permute.xlu1 %1854 }
 0x62d   :  { %9649 = vst [vmem:[#allocation66_spill] sm:$0xff] %v7015_v0 }
 0x62f   :  { %1898 = vrot.lane.b32.xlu2 %v6757_v21, %s5224_s6 }
 0x631   :  { %1974 = vrot.lane.b32.xlu1 %v6667_v28, %s5227_s8  ;;  %1978 = vrot.lane.b32.xlu0 %v6727_v7, %s5227_s8 }
 0x632   :  { %v6991_v19 = vpop.permute.xlu2 %1802 }
 0x633   :  { %9645 = vst [vmem:[#allocation71_spill] sm:$0xff] %v6991_v19  ;;  %v6993_v11 = vpop.permute.xlu0 %1864  ;;  %v9655_v19 = vld [vmem:[#allocation23_spill] sm:$0xff] }
 0x634   :  { %9646 = vst [vmem:[#allocation78_spill] sm:$0xff] %v6993_v11  ;;  %v7023_v34 = vpop.permute.xlu1 %1866  ;;  %v2716_v0 = vadd.f32 %v9655_v19, %v9654_v46  ;;  %v9663_v19 = vld [vmem:[#allocation22_spill] sm:$0xff] }
 0x635   :  { %9651 = vst [vmem:[#allocation40_spill] sm:$0xff] %v7023_v34  ;;  %v9664_v46 = vld [vmem:[#allocation26_spill] sm:$0xff] }
 0x636   :  { %v2742_v2 = vadd.f32 %v9658_v30, %v2716_v0  ;;  %v2718_v4 = vadd.f32 %v9664_v46, %v9663_v19  ;;  %v9667_v30 = vld [vmem:[#allocation34_spill] sm:$0xff] }
 0x637   :  { %1904 = vrot.lane.b32.xlu2 %v6780_v48, %s5225_s7 }
 0x638   :  { %v2744_v0 = vadd.f32 %v9667_v30, %v2718_v4 }
 0x639   :  { %1986 = vrot.lane.b32.xlu1 %v6683_v17, %s5227_s8  ;;  %1984 = vrot.lane.b32.xlu0 %v6681_v40, %s5227_s8 }
 0x63a   :  { %v7001_v23 = vpop.permute.xlu2 %1808 }
 0x63b   :  { %v7007_v24 = vpop.permute.xlu0 %1870 }
 0x63c   :  { %9648 = vst [vmem:[#allocation72_spill] sm:$0xff] %v7007_v24  ;;  %v7038_v34 = vpop.permute.xlu1 %1872 }
 0x63f   :  { %1910 = vrot.lane.b32.xlu2 %v6667_v28, %s5225_s7 }
 0x641   :  { %1992 = vrot.lane.b32.xlu1 %v6696_v50, %s5227_s8  ;;  %1990 = vrot.lane.b32.xlu0 %v6694_v52, %s5227_s8 }
 0x642   :  { %v7013_v11 = vpop.permute.xlu2 %1814 }
 0x643   :  { %v7019_v15 = vpop.permute.xlu0 %1882 }
 0x644   :  { %9650 = vst [vmem:[#allocation36_spill] sm:$0xff] %v7019_v15  ;;  %v9657_v15 = vld [vmem:[#allocation25_spill] sm:$0xff]  ;;  %v7067_v14 = vpop.permute.xlu1 %1878 }
 0x645   :  { %v2715_v3 = vadd.f32 %v9657_v15, %v9656_v58 }
 0x647   :  { %1922 = vrot.lane.b32.xlu2 %v6683_v17, %s5225_s7 }
 0x64a   :  { %v7021_v53 = vpop.permute.xlu2 %1826 }
 0x64b   :  { %v7029_v49 = vpop.permute.xlu0 %1888 }
 0x64c   :  { %9653 = vst [vmem:[#allocation42_spill] sm:$0xff] %v7029_v49  ;;  %v2746_v49 = vstv %s5026_s4  ;;  %v7079_v30 = vpop.permute.xlu1 %1890 }
 0x64d   :  { %v7045_v31 = vadd.f32 %v2746_v49, %v2742_v2  ;;  %v7059_v57 = vadd.f32 %v2746_v49, %v2743_v56 }
 0x64f   :  { %1928 = vrot.lane.b32.xlu2 %v6696_v50, %s5225_s7  ;;  %9662 = vst [vmem:[#allocation38_spill] sm:$0xff] %v7045_v31  ;;  %v2754_v2 = vsel %vm322_vm3, %v7059_v57, 0.0 }
 0x650   :  { %9668 = vst [vmem:[#allocation75_spill] sm:$0xff] %v7059_v57 }
 0x652   :  { %v7027_v24 = vpop.permute.xlu2 %1832 }
 0x653   :  { %9652 = vst [vmem:[#allocation69_spill] sm:$0xff] %v7027_v24  ;;  %v9661_v24 = vld [vmem:[#allocation24_spill] sm:$0xff]  ;;  %v7053_v58 = vpop.permute.xlu0 %1894 }
 0x654   :  { %v2741_v63 = vadd.f32 %v9661_v24, %v2715_v3  ;;  %v2752_v24 = vsel %vm322_vm3, %v7045_v31, 0.0  ;;  %v7063_v3 = vadd.f32 %v2746_v49, %v2744_v0 }
 0x656   :  { %v7050_v15 = vadd.f32 %v2746_v49, %v2741_v63  ;;  %9669 = vst [vmem:[#allocation76_spill] sm:$0xff] %v7063_v3  ;;  %v2756_v4 = vsel %vm322_vm3, %v7063_v3, 0.0 }
 0x657   :  { %1934 = vrot.lane.b32.xlu2 %v6709_v59, %s5226_s0 }
 0x658   :  { %9666 = vst [vmem:[#allocation77_spill] sm:$0xff] %v7050_v15  ;;  %v2751_v1 = vsel %vm322_vm3, %v7050_v15, 0.0 }
 0x659   :  { %v2753_v63 = vadd.f32 %v2752_v24, %v2751_v1  ;;  %v7087_v1 = vpop.permute.xlu1 %1896 }
 0x65a   :  { %v7043_v44 = vpop.permute.xlu2 %1838 }
 0x65b   :  { %v2755_v56 = vadd.f32 %v2754_v2, %v2753_v63  ;;  %v7075_v19 = vpop.permute.xlu0 %1906 }
 0x65c   :  { %9670 = vst [vmem:[#allocation45_spill] sm:$0xff] %v7075_v19 }
 0x65d   :  { %v2757_v46 = vadd.f32 %v2756_v4, %v2755_v56 }
 0x65f   :  { %1946 = vrot.lane.b32.xlu2 %v6727_v7, %s5226_s0 }
 0x661   :  { %v7097_v4 = vpop.permute.xlu1 %1902 }
 0x662   :  { %v7065_v35 = vpop.permute.xlu2 %1850  ;;  %9673 = vst [vmem:[#allocation30_spill] sm:$0xff] %v7097_v4 }
 0x663   :  { %v7083_v0 = vpop.permute.xlu0 %1912 }
 0x664   :  { %9671 = vst [vmem:[#allocation79_spill] sm:$0xff] %v7083_v0 }
 0x667   :  { %1952 = vrot.lane.b32.xlu2 %v6681_v40, %s5226_s0 }
 0x669   :  { %v7107_v57 = vpop.permute.xlu1 %1914 }
 0x66a   :  { %v7077_v49 = vpop.permute.xlu2 %1856  ;;  %9677 = vst [vmem:[#allocation19_spill] sm:$0xff] %v7107_v57  ;;  %v2110_v57 = vrot.slane %v6681_v40, 6 }
 0x66b   :  { %2758 = vadd.xlane.f32.xlu0 %v2757_v46  ;;  %v7093_v2 = vpop.permute.xlu0 %1918 }
 0x66c   :  { %9672 = vst [vmem:[#allocation52_spill] sm:$0xff] %v7093_v2 }
 0x66f   :  { %1958 = vrot.lane.b32.xlu2 %v6694_v52, %s5226_s0 }
 0x671   :  { %v7115_v2 = vpop.permute.xlu1 %1920 }
 0x672   :  { %v7085_v24 = vpop.permute.xlu2 %1862  ;;  %9680 = vst [vmem:[#allocation25_spill] sm:$0xff] %v7115_v2  ;;  %v2112_v2 = vrot.slane %v6683_v17, 5  ;;  %v2116_v17 = vrot.slane %v6694_v52, 3  ;;  %v2120_v52 = vrot.slane %v6757_v21, 1 }
 0x673   :  { %v7101_v46 = vpop.permute.xlu0 %1930 }
 0x674   :  { %9675 = vst [vmem:[#allocation33_spill] sm:$0xff] %v7101_v46  ;;  %v2108_v46 = vrot.slane %v6745_v8, 7 }
 0x677   :  { %1970 = vrot.lane.b32.xlu2 %v6711_v37, %s5227_s8 }
 0x67a   :  { %v7091_v63 = vpop.permute.xlu2 %1874 }
 0x67b   :  { %v7111_v31 = vpop.permute.xlu0 %1936 }
 0x67c   :  { %9678 = vst [vmem:[#allocation23_spill] sm:$0xff] %v7111_v31  ;;  %v7129_v31 = vpop.permute.xlu1 %1926 }
 0x67f   :  { %1976 = vrot.lane.b32.xlu2 %v6669_v25, %s5227_s8 }
 0x682   :  { %v7099_v56 = vpop.permute.xlu2 %1880 }
 0x683   :  { %9674 = vst [vmem:[#allocation31_spill] sm:$0xff] %v7099_v56  ;;  %v1996_v56 = vrot.slane %v6709_v59, 7  ;;  %v7119_v0 = vpop.permute.xlu0 %1942 }
 0x684   :  { %9681 = vst [vmem:[#allocation29_spill] sm:$0xff] %v7119_v0  ;;  %v2000_v0 = vrot.slane %v6711_v37, 5  ;;  %v2004_v37 = vrot.slane %v6667_v28, 3  ;;  %v2008_v28 = vrot.slane %v6727_v7, 1 }
 0x685   :  { %v1997_v4 = vsel %vm778_vm11, %v1996_v56, %v6601_v27  ;;  %v2114_v56 = vrot.slane %v6609_v13, 4  ;;  %v2118_v13 = vrot.slane %v6696_v50, 2  ;;  %v2024_v50 = vrot.slane %v6927_v43, 7 }
 0x686   :  { %v2124_v43 = vrot.slane %v6889_v60, 6 }
 0x687   :  { %1982 = vrot.lane.b32.xlu2 %v6745_v8, %s5227_s8 }
 0x68a   :  { %v7105_v3 = vpop.permute.xlu2 %1886 }
 0x68b   :  { %9676 = vst [vmem:[#allocation32_spill] sm:$0xff] %v7105_v3  ;;  %v1998_v3 = vrot.slane %v6780_v48, 6  ;;  %v7139_v27 = vpop.permute.xlu0 %1954 }
 0x68d   :  { %v1999_v59 = vsel %vm781_vm12, %v1998_v3, %v1997_v4 }
 0x68e   :  { %v2001_v40 = vsel %vm784_vm13, %v2000_v0, %v1999_v59 }
 0x68f   :  { %1994 = vrot.lane.b32.xlu2 %v6757_v21, %s5227_s8  ;;  %v2030_v21 = vrot.slane %v6771_v12, 4  ;;  %v2136_v12 = vrot.slane %v6935_v29, 7 }
 0x692   :  { %v7113_v15 = vpop.permute.xlu2 %1898 }
 0x693   :  { %9679 = vst [vmem:[#allocation21_spill] sm:$0xff] %v7113_v15  ;;  %v2109_v15 = vsel %vm778_vm11, %v2108_v46, %v6615_v62  ;;  %v2002_v62 = vrot.slane %v6603_v22, 4  ;;  %v2006_v22 = vrot.slane %v6669_v25, 2 }
 0x694   :  { %v2111_v8 = vsel %vm781_vm12, %v2110_v57, %v2109_v15  ;;  %v7147_v57 = vpop.permute.xlu1 %1938 }
 0x695   :  { %v2113_v48 = vsel %vm784_vm13, %v2112_v2, %v2111_v8  ;;  %v2003_v3 = vsel %vm787_vm14, %v2002_v62, %v2001_v40  ;;  %v7159_v8 = vpop.permute.xlu0 %1960  ;;  %v2122_v40 = vrot.slane %v6979_v55, 7  ;;  %v2010_v55 = vrot.slane %v6933_v39, 7 }
 0x696   :  { %v2115_v15 = vsel %vm787_vm14, %v2114_v56, %v2113_v48  ;;  %v2005_v0 = vsel %vm790_vm15, %v2004_v37, %v2003_v3  ;;  %v2026_v37 = vrot.slane %v7001_v23, 6  ;;  %v2014_v39 = vrot.slane %v6955_v41, 5 }
 0x697   :  { %v2117_v2 = vsel %vm790_vm15, %v2116_v17, %v2115_v15  ;;  %v2007_v46 = vsel %vm793_vm0, %v2006_v22, %v2005_v0  ;;  %v2123_v15 = vsel %vm778_vm11, %v2122_v40, %v6815_v61  ;;  %v2142_v17 = vrot.slane %v6793_v33, 4 }
 0x698   :  { %v2119_v59 = vsel %vm793_vm0, %v2118_v13, %v2117_v2  ;;  %v7163_v48 = vsel %vm796_vm1, %v2008_v28, %v2007_v46  ;;  %v2016_v0 = vrot.slane %v6803_v18, 4  ;;  %v2012_v2 = vrot.slane %v6943_v38, 6 }
 0x699   :  { %v7166_v62 = vsel %vm796_vm1, %v2120_v52, %v2119_v59  ;;  %v2238_v56 = vrot.slane %v7163_v48, 4  ;;  %v2156_v22 = vrot.slane %v6807_v6, 4  ;;  %v2128_v61 = vrot.slane %v6827_v26, 4  ;;  %v9689_v26 = vld [vmem:[#allocation64_spill] sm:$0xff] }
 0x69a   :  { %v7121_v19 = vpop.permute.xlu2 %1904  ;;  %v2350_v7 = vrot.slane %v7166_v62, 4  ;;  %v2025_v23 = vsel %vm778_vm11, %v2024_v50, %v6769_v47  ;;  %v2125_v33 = vsel %vm781_vm12, %v2124_v43, %v2123_v15  ;;  %v2038_v18 = vrot.slane %v7043_v44, 7  ;;  %v9690_v15 = vld [vmem:[#allocation67_spill] sm:$0xff]  ;;  %v9691_v43 = vld [vmem:[#allocation65_spill] sm:$0xff] }
 0x69b   :  { %9682 = vst [vmem:[#allocation20_spill] sm:$0xff] %v7121_v19  ;;  %v2126_v38 = vrot.slane %v6901_v36, 5  ;;  %v2011_v46 = vsel %vm778_vm11, %v2010_v55, %v6791_v20  ;;  %v2027_v29 = vsel %vm781_vm12, %v2026_v37, %v2025_v23  ;;  %v2044_v41 = vrot.slane %v6851_v9, 4 }
 0x69c   :  { %v7173_v3 = vpop.permute.xlu1 %1944  ;;  %v2028_v47 = vrot.slane %v6911_v42, 5  ;;  %v2013_v28 = vsel %vm781_vm12, %v2012_v2, %v2011_v46  ;;  %v2137_v44 = vsel %vm778_vm11, %v2136_v12, %v6839_v45  ;;  %v2138_v36 = vrot.slane %v6959_v10, 6  ;;  %v9683_v45 = vld [vmem:[#allocation43_spill] sm:$0xff]  ;;  %v9684_v10 = vld [vmem:[#allocation49_spill] sm:$0xff] }
 0x69d   :  { %v7198_v59 = vpop.permute.xlu0 %1966  ;;  %v2015_v52 = vsel %vm784_vm13, %v2014_v39, %v2013_v28  ;;  %v2127_v20 = vsel %vm784_vm13, %v2126_v38, %v2125_v33  ;;  %v2032_v55 = vrot.slane %v7013_v11, 3  ;;  %v2140_v9 = vrot.slane %v7021_v53, 5  ;;  %v9685_v2 = vld [vmem:[#allocation73_spill] sm:$0xff]  ;;  %v9686_v39 = vld [vmem:[#allocation54_spill] sm:$0xff] }
 0x69e   :  { %v2029_v50 = vsel %vm784_vm13, %v2028_v47, %v2027_v29  ;;  %v2039_v42 = vsel %vm778_vm11, %v2038_v18, %v6795_v5  ;;  %v2040_v12 = vrot.slane %v9685_v2, 6  ;;  %v2018_v23 = vrot.slane %v9686_v39, 3  ;;  %v9687_v33 = vld [vmem:[#allocation37_spill] sm:$0xff] }
 0x69f   :  { %v2020_v38 = vrot.slane %v9687_v33, 2  ;;  %v9688_v46 = vld [vmem:[#allocation61_spill] sm:$0xff]  ;;  %v2017_v11 = vsel %vm787_vm14, %v2016_v0, %v2015_v52  ;;  %v2139_v5 = vsel %vm781_vm12, %v2138_v36, %v2137_v44  ;;  %v2129_v18 = vsel %vm787_vm14, %v2128_v61, %v2127_v20  ;;  %v9692_v52 = vld [vmem:[#allocation60_spill] sm:$0xff]  ;;  %v9693_v36 = vld [vmem:[#allocation70_spill] sm:$0xff] }
 0x6a0   :  { %v2031_v47 = vsel %vm787_vm14, %v2030_v21, %v2029_v50  ;;  %v2041_v28 = vsel %vm781_vm12, %v2040_v12, %v2039_v42  ;;  %v2130_v2 = vrot.slane %v9689_v26, 3  ;;  %v2042_v39 = vrot.slane %v9690_v15, 5  ;;  %v9694_v20 = vld [vmem:[#allocation68_spill] sm:$0xff]  ;;  %v9695_v50 = vld [vmem:[#allocation57_spill] sm:$0xff]  ;;  %v9696_v12 = vld [vmem:[#allocation71_spill] sm:$0xff] }
 0x6a1   :  { %v2033_v33 = vsel %vm790_vm15, %v2032_v55, %v2031_v47  ;;  %v2141_v37 = vsel %vm784_vm13, %v2140_v9, %v2139_v5  ;;  %v2132_v0 = vrot.slane %v9691_v43, 2  ;;  %v2034_v60 = vrot.slane %v9692_v52, 2  ;;  %v9697_v5 = vld [vmem:[#allocation69_spill] sm:$0xff]  ;;  %v9699_v21 = vld [vmem:[#allocation39_spill] sm:$0xff] }
 0x6a2   :  { %v7135_v19 = vpop.permute.xlu2 %1910  ;;  %v2019_v44 = vsel %vm790_vm15, %v2018_v23, %v2017_v11  ;;  %v2022_v61 = vrot.slane %v9693_v36, 1  ;;  %v2036_v42 = vrot.slane %v9695_v50, 1  ;;  %v2131_v26 = vsel %vm790_vm15, %v2130_v2, %v2129_v18  ;;  %v9698_v11 = vld [vmem:[#allocation35_spill] sm:$0xff]  ;;  %v9700_v2 = vld [vmem:[#allocation72_spill] sm:$0xff] }
 0x6a3   :  { %v2043_v15 = vsel %vm784_vm13, %v2042_v39, %v2041_v28  ;;  %v2134_v55 = vrot.slane %v9696_v12, 1  ;;  %v2035_v9 = vsel %vm793_vm0, %v2034_v60, %v2033_v33  ;;  %v2143_v43 = vsel %vm787_vm14, %v2142_v17, %v2141_v37  ;;  %v9701_v12 = vld [vmem:[#allocation41_spill] sm:$0xff]  ;;  %v9702_v33 = vld [vmem:[#allocation66_spill] sm:$0xff] }
 0x6a4   :  { %v7224_v53 = vpop.permute.xlu1 %1950  ;;  %v2146_v47 = vrot.slane %v9697_v5, 2  ;;  %v2148_v36 = vrot.slane %v9698_v11, 1  ;;  %v2144_v50 = vrot.slane %v9699_v21, 3  ;;  %v2021_v18 = vsel %vm793_vm0, %v2020_v38, %v2019_v44  ;;  %v9703_v5 = vld [vmem:[#allocation74_spill] sm:$0xff] }
 0x6a5   :  { %v7246_v52 = vpop.permute.xlu0 %1978  ;;  %v2052_v28 = vrot.slane %v9700_v2, 7  ;;  %v2023_v39 = vsel %vm796_vm1, %v2022_v61, %v2021_v18  ;;  %v2046_v60 = vrot.slane %v9701_v12, 3  ;;  %v2150_v17 = vrot.slane %v9702_v33, 7  ;;  %v9704_v12 = vld [vmem:[#allocation58_spill] sm:$0xff] }
 0x6a6   :  { %v2045_v37 = vsel %vm787_vm14, %v2044_v41, %v2043_v15  ;;  %v2048_v29 = vrot.slane %v9703_v5, 2  ;;  %v2133_v13 = vsel %vm793_vm0, %v2132_v0, %v2131_v26  ;;  %v2037_v11 = vsel %vm796_vm1, %v2036_v42, %v2035_v9  ;;  %v9705_v26 = vld [vmem:[#allocation63_spill] sm:$0xff] }
 0x6a7   :  { %v2145_v21 = vsel %vm790_vm15, %v2144_v50, %v2143_v43  ;;  %v7263_v38 = vsel %vm796_vm1, %v2134_v55, %v2133_v13  ;;  %v2054_v44 = vrot.slane %v7038_v34, 6  ;;  %v2152_v18 = vrot.slane %v7077_v49, 6  ;;  %v9706_v13 = vld [vmem:[#allocation48_spill] sm:$0xff]  ;;  %v9707_v34 = vld [vmem:[#allocation78_spill] sm:$0xff] }
 0x6a8   :  { %v2147_v61 = vsel %vm793_vm0, %v2146_v47, %v2145_v21  ;;  %v2250_v2 = vrot.slane %v2023_v39, 4  ;;  %v2053_v41 = vsel %vm778_vm11, %v2052_v28, %v9704_v12  ;;  %v2047_v15 = vsel %vm790_vm15, %v2046_v60, %v2045_v37  ;;  %v9708_v50 = vld [vmem:[#allocation40_spill] sm:$0xff] }
 0x6a9   :  { %v2050_v0 = vrot.slane %v7065_v35, 1  ;;  %v2154_v9 = vrot.slane %v9705_v26, 5  ;;  %v2151_v55 = vsel %vm778_vm11, %v2150_v17, %v9706_v13  ;;  %v2160_v43 = vrot.slane %v9707_v34, 2  ;;  %v9710_v37 = vld [vmem:[#allocation36_spill] sm:$0xff] }
 0x6aa   :  { %v7151_v4 = vpop.permute.xlu2 %1922  ;;  %v2239_v49 = vsel %vm1025_vm2, %v2037_v11, %v2238_v56  ;;  %v2162_v28 = vrot.slane %v9708_v50, 1  ;;  %v7284_v60 = vsel %vm796_vm1, %v2148_v36, %v2147_v61  ;;  %v2055_v33 = vsel %vm781_vm12, %v2054_v44, %v2053_v41  ;;  %v9711_v26 = vld [vmem:[#allocation44_spill] sm:$0xff]  ;;  %v9712_v61 = vld [vmem:[#allocation42_spill] sm:$0xff]  ;;  %v9715_v44 = vld [vmem:[#allocation23_spill] sm:$0xff] }
 0x6ab   :  { %9709 = vst [vmem:[#allocation28_spill] sm:$0xff] %v7284_v60  ;;  %v2049_v17 = vsel %vm793_vm0, %v2048_v29, %v2047_v15  ;;  %v2153_v21 = vsel %vm781_vm12, %v2152_v18, %v2151_v55  ;;  %v2236_v56 = vrot.slane %v2037_v11, 4  ;;  %v7294_v13 = vperm.slane %v2239_v49, %v9711_v26  ;;  %v9714_v50 = vld [vmem:[#allocation30_spill] sm:$0xff] }
 0x6ac   :  { %v7272_v42 = vpop.permute.xlu1 %1962  ;;  %v2060_v34 = vrot.slane %v7067_v14, 3  ;;  %v2051_v36 = vsel %vm796_vm1, %v2050_v0, %v2049_v17  ;;  %v2351_v29 = vsel %vm1025_vm2, %v7284_v60, %v2350_v7  ;;  %v2155_v11 = vsel %vm784_vm13, %v2154_v9, %v2153_v21  ;;  %v9713_v0 = vld [vmem:[#allocation53_spill] sm:$0xff]  ;;  %v9716_v9 = vld [vmem:[#allocation20_spill] sm:$0xff] }
 0x6ad   :  { %v7305_v41 = vpop.permute.xlu0 %1984  ;;  %v2158_v15 = vrot.slane %v7085_v24, 3  ;;  %v2056_v14 = vrot.slane %v7091_v63, 5  ;;  %v2066_v17 = vrot.slane %v9714_v50, 7  ;;  %v2082_v7 = vrot.slane %v9715_v44, 6  ;;  %v9717_v63 = vld [vmem:[#allocation45_spill] sm:$0xff] }
 0x6ae   :  { %v7317_v47 = vperm.slane %v2351_v29, %v9711_v26  ;;  %v2068_v21 = vrot.slane %v9716_v9, 6  ;;  %v2237_v24 = vsel %vm1025_vm2, %v2236_v56, %v7163_v48  ;;  %v2070_v5 = vrot.slane %v9717_v63, 5  ;;  %v9718_v9 = vld [vmem:[#allocation32_spill] sm:$0xff]  ;;  %v9719_v48 = vld [vmem:[#allocation59_spill] sm:$0xff] }
 0x6af   :  { %v2057_v29 = vsel %vm784_vm13, %v2056_v14, %v2055_v33  ;;  %v2084_v18 = vrot.slane %v7147_v57, 5  ;;  %v2164_v49 = vrot.slane %v9718_v9, 7  ;;  %v2067_v56 = vsel %vm778_vm11, %v2066_v17, %v9719_v48  ;;  %v9721_v33 = vld [vmem:[#allocation52_spill] sm:$0xff]  ;;  %v9723_v63 = vld [vmem:[#allocation31_spill] sm:$0xff] }
 0x6b0   :  { %v2298_v6 = vrot.slane %v7294_v13, 4  ;;  %v2178_v14 = vrot.slane %v9721_v33, 7  ;;  %v2069_v57 = vsel %vm781_vm12, %v2068_v21, %v2067_v56  ;;  %v9722_v17 = vrot.slane %v6817_v51, 4  ;;  %v9724_v9 = vld [vmem:[#allocation19_spill] sm:$0xff]  ;;  %v9726_v56 = vld [vmem:[#allocation50_spill] sm:$0xff] }
 0x6b1   :  { %v2078_v48 = vrot.slane %v9724_v9, 1  ;;  %v2074_v51 = vrot.slane %v7135_v19, 3  ;;  %v9730_v9 = vrot.slane %v6831_v54, 4  ;;  %v2186_v54 = vrot.slane %v7129_v31, 3 }
 0x6b2   :  { %v7168_v25 = vpop.permute.xlu2 %1928 }
 0x6b4   :  { %v1969_v60 = vpop.permute.xlu1 %1968 }
 0x6ba   :  { %v7209_v40 = vpop.permute.xlu2 %1934 }
 0x6bb   :  { %v2080_v35 = vrot.slane %v7209_v40, 7  ;;  %v2166_v40 = vrot.slane %v9712_v61, 6  ;;  %v2248_v61 = vrot.slane %v2051_v36, 4 }
 0x6bd   :  { %v2081_v55 = vsel %vm778_vm11, %v2080_v35, %v9713_v0  ;;  %v2251_v35 = vsel %vm1025_vm2, %v2051_v36, %v2250_v2  ;;  %v2157_v0 = vsel %vm787_vm14, %v2156_v22, %v2155_v11  ;;  %v2249_v2 = vsel %vm1025_vm2, %v2248_v61, %v2023_v39  ;;  %v9720_v11 = vld [vmem:[#allocation79_spill] sm:$0xff] }
 0x6be   :  { %v2083_v44 = vsel %vm781_vm12, %v2082_v7, %v2081_v55  ;;  %v2159_v50 = vsel %vm790_vm15, %v2158_v15, %v2157_v0  ;;  %v7339_v22 = vperm.slane %v2237_v24, %v9711_v26  ;;  %v2076_v15 = vrot.slane %v9720_v11, 2  ;;  %v9725_v11 = vld [vmem:[#allocation25_spill] sm:$0xff] }
 0x6bf   :  { %v2085_v55 = vsel %vm784_vm13, %v2084_v18, %v2083_v44  ;;  %v7346_v7 = vperm.slane %v2251_v35, %v9711_v26  ;;  %v2161_v39 = vsel %vm793_vm0, %v2160_v43, %v2159_v50  ;;  %v2059_v61 = vsel %vm787_vm14, %v9722_v17, %v2057_v29  ;;  %v7363_v44 = vpop.permute.xlu0 %1990 }
 0x6c0   :  { %v2062_v24 = vrot.slane %v9723_v63, 2  ;;  %v7354_v0 = vperm.slane %v2249_v2, %v9711_v26  ;;  %v2180_v21 = vrot.slane %v9725_v11, 6  ;;  %v2165_v18 = vsel %vm778_vm11, %v2164_v49, %v9726_v56  ;;  %v9728_v2 = vld [vmem:[#allocation56_spill] sm:$0xff]  ;;  %v9729_v63 = vld [vmem:[#allocation29_spill] sm:$0xff] }
 0x6c1   :  { %v2071_v35 = vsel %vm784_vm13, %v2070_v5, %v2069_v57  ;;  %v2094_v43 = vrot.slane %v7198_v59, 7  ;;  %v9727_v50 = vrot.slane %v9688_v46, 4  ;;  %v2179_v33 = vsel %vm778_vm11, %v2178_v14, %v9728_v2 }
 0x6c2   :  { %v7248_v23 = vpop.permute.xlu2 %1946  ;;  %v7371_v17 = vsel %vm796_vm1, %v2162_v28, %v2161_v39  ;;  %v2061_v49 = vsel %vm790_vm15, %v2060_v34, %v2059_v61  ;;  %v2088_v5 = vrot.slane %v9729_v63, 3  ;;  %v2167_v19 = vsel %vm781_vm12, %v2166_v40, %v2165_v18  ;;  %v9731_v61 = vld [vmem:[#allocation55_spill] sm:$0xff]  ;;  %v1975_v18 = vpop.permute.xlu1 %1974 }
 0x6c3   :  { %v2087_v29 = vsel %vm787_vm14, %v9727_v50, %v2085_v55  ;;  %v2063_v59 = vsel %vm793_vm0, %v2062_v24, %v2061_v49  ;;  %v2192_v57 = vrot.slane %v7224_v53, 7  ;;  %v2299_v46 = vsel %vm1025_vm2, %v7346_v7, %v2298_v6 }
 0x6c4   :  { %v2096_v55 = vrot.slane %v1969_v60, 6  ;;  %v2073_v14 = vsel %vm787_vm14, %v9730_v9, %v2071_v35  ;;  %v2089_v28 = vsel %vm790_vm15, %v2088_v5, %v2087_v29  ;;  %v2092_v34 = vrot.slane %v7248_v23, 1  ;;  %v9736_v29 = vld [vmem:[#allocation62_spill] sm:$0xff] }
 0x6c5   :  { %v2090_v39 = vrot.slane %v7173_v3, 2  ;;  %v2095_v24 = vsel %vm778_vm11, %v2094_v43, %v9731_v61  ;;  %v2075_v40 = vsel %vm790_vm15, %v2074_v51, %v2073_v14  ;;  %v2181_v60 = vsel %vm781_vm12, %v2180_v21, %v2179_v33  ;;  %v9735_v21 = vld [vmem:[#allocation46_spill] sm:$0xff] }
 0x6c6   :  { %v9732_v6 = vrot.slane %v9710_v37, 1  ;;  %v9733_v3 = vrot.slane %v7263_v38, 4  ;;  %v9734_v43 = vrot.slane %v7079_v30, 5  ;;  %v7404_v50 = vperm.slane %v2299_v46, %v9735_v21 }
 0x6c7   :  { %v2091_v51 = vsel %vm793_vm0, %v2090_v39, %v2089_v28  ;;  %v2193_v37 = vsel %vm778_vm11, %v2192_v57, %v9736_v29  ;;  %v2097_v2 = vsel %vm781_vm12, %v2096_v55, %v2095_v24  ;;  %v2077_v33 = vsel %vm793_vm0, %v2076_v15, %v2075_v40 }
 0x6c8   :  { %v2065_v56 = vsel %vm796_vm1, %v9732_v6, %v2063_v59  ;;  %v2363_v35 = vsel %vm1025_vm2, %v7371_v17, %v9733_v3  ;;  %v2093_v49 = vsel %vm796_vm1, %v2092_v34, %v2091_v51  ;;  %v2196_v9 = vrot.slane %v7139_v27, 5 }
 0x6c9   :  { %v2262_v63 = vrot.slane %v2065_v56, 4  ;;  %v7415_v46 = vperm.slane %v2363_v35, %v9711_v26  ;;  %v9737_v57 = vrot.slane %v9684_v10, 4  ;;  %v2079_v14 = vsel %vm796_vm1, %v2078_v48, %v2077_v33  ;;  %v9740_v48 = vld [vmem:[#allocation21_spill] sm:$0xff] }
 0x6ca   :  { %v7291_v12 = vpop.permute.xlu2 %1952  ;;  %v2182_v28 = vrot.slane %v7151_v4, 5  ;;  %v2346_v39 = vrot.slane %v7404_v50, 4  ;;  %v9738_v40 = vrot.slane %v9683_v45, 4  ;;  %v2176_v6 = vrot.slane %v9740_v48, 1 }
 0x6cb   :  { %v2194_v53 = vrot.slane %v7291_v12, 6  ;;  %v2169_v12 = vsel %vm784_vm13, %v9734_v43, %v2167_v19  ;;  %v2284_v19 = vrot.slane %v7354_v0, 4  ;;  %v2263_v34 = vsel %vm1025_vm2, %v2093_v49, %v2262_v63 }
 0x6cc   :  { %v2171_v55 = vsel %vm787_vm14, %v9737_v57, %v2169_v12  ;;  %v2102_v4 = vrot.slane %v1975_v18, 3  ;;  %v2274_v35 = vrot.slane %v2079_v14, 4  ;;  %v2106_v43 = vrot.slane %v7246_v52, 1  ;;  %v1987_v18 = vpop.permute.xlu1 %1986 }
 0x6cd   :  { %v2195_v5 = vsel %vm781_vm12, %v2194_v53, %v2193_v37  ;;  %v9739_v53 = vrot.slane %v7053_v58, 3  ;;  %v2285_v3 = vsel %vm1025_vm2, %v2284_v19, %v7339_v22  ;;  %v2183_v45 = vsel %vm784_vm13, %v2182_v28, %v2181_v60 }
 0x6ce   :  { %v2197_v61 = vsel %vm784_vm13, %v2196_v9, %v2195_v5  ;;  %v2271_v51 = vperm.slane %v2263_v34, %v9711_v26  ;;  %v9741_v58 = vrot.slane %v6855_v32, 4  ;;  %v9742_v52 = vrot.slane %v7087_v1, 2 }
 0x6cf   :  { %v2202_v60 = vrot.slane %v7159_v8, 2  ;;  %v2188_v8 = vrot.slane %v7168_v25, 2 }
 0x6d0   :  { %v2199_v29 = vsel %vm787_vm14, %v9741_v58, %v2197_v61  ;;  %v2322_v28 = vrot.slane %v2271_v51, 4  ;;  %v9745_v58 = vld [vmem:[#allocation33_spill] sm:$0xff] }
 0x6d2   :  { %v7335_v36 = vpop.permute.xlu2 %1958 }
 0x6d3   :  { %v2200_v24 = vrot.slane %v7335_v36, 3 }
 0x6d5   :  { %v2201_v33 = vsel %vm790_vm15, %v2200_v24, %v2199_v29  ;;  %v2190_v29 = vrot.slane %v9745_v58, 1 }
 0x6d6   :  { %v2203_v1 = vsel %vm793_vm0, %v2202_v60, %v2201_v33  ;;  %v2296_v60 = vrot.slane %v7346_v7, 4 }
 0x6da   :  { %v1971_v11 = vpop.permute.xlu2 %1970 }
 0x6db   :  { %v2098_v23 = vrot.slane %v1971_v11, 5  ;;  %v2173_v11 = vsel %vm790_vm15, %v9739_v53, %v2171_v55  ;;  %v9743_v55 = vrot.slane %v6841_v16, 4  ;;  %v7466_v53 = vperm.slane %v2285_v3, %v9735_v21 }
 0x6dc   :  { %v2210_v3 = vrot.slane %v1987_v18, 5  ;;  %v1993_v18 = vpop.permute.xlu1 %1992 }
 0x6dd   :  { %v2099_v30 = vsel %vm784_vm13, %v2098_v23, %v2097_v2  ;;  %v2260_v2 = vrot.slane %v2093_v49, 4 }
 0x6de   :  { %v2759_v59 = vpop.xlane.xlu0 %2758  ;;  %v2101_v27 = vsel %vm787_vm14, %v9738_v40, %v2099_v30  ;;  %v2175_v30 = vsel %vm793_vm0, %v9742_v52, %v2173_v11  ;;  %v2208_v11 = vrot.slane %v7305_v41, 6 }
 0x6df   :  { %v2760_v15 = vrot.slane %v2759_v59, 4  ;;  %v2103_v37 = vsel %vm790_vm15, %v2102_v4, %v2101_v27  ;;  %v2177_v19 = vsel %vm796_vm1, %v2176_v6, %v2175_v30 }
 0x6e0   :  { %v2374_v40 = vrot.slane %v2177_v19, 4 }
 0x6e1   :  { %v2761_v10 = vadd.f32 %v2760_v15, %v2759_v59  ;;  %v2204_v59 = vrot.slane %v7272_v42, 1  ;;  %v2185_v15 = vsel %vm787_vm14, %v9743_v55, %v2183_v45  ;;  %v2261_v42 = vsel %vm1025_vm2, %v2260_v2, %v2065_v56 }
 0x6e2   :  { %v1977_v23 = vpop.permute.xlu2 %1976  ;;  %v7477_v4 = vperm.slane %v2261_v42, %v9711_v26 }
 0x6e3   :  { %v2104_v36 = vrot.slane %v1977_v23, 2  ;;  %v2762_v12 = vrot.slane %v2761_v10, 2  ;;  %v2205_v48 = vsel %vm796_vm1, %v2204_v59, %v2203_v1 }
 0x6e5   :  { %v2105_v63 = vsel %vm793_vm0, %v2104_v36, %v2103_v37  ;;  %v2763_v5 = vadd.f32 %v2762_v12, %v2761_v10  ;;  %v2372_v12 = vrot.slane %v2205_v48, 4  ;;  %v2214_v37 = vrot.slane %v7363_v44, 3 }
 0x6e6   :  { %v2107_v32 = vsel %vm796_vm1, %v2106_v43, %v2105_v63  ;;  %v2375_v63 = vsel %vm1025_vm2, %v2205_v48, %v2374_v40 }
 0x6e7   :  { %v2272_v9 = vrot.slane %v2107_v32, 4  ;;  %v2275_v49 = vsel %vm1025_vm2, %v2107_v32, %v2274_v35  ;;  %v2764_v57 = vrot.slane %v2763_v5, 1  ;;  %v9744_v35 = vld [vmem:[#allocation51_spill] sm:$0xff]  ;;  %v2334_v32 = vrot.slane %v7466_v53, 4 }
 0x6e8   :  { %v2283_v34 = vperm.slane %v2275_v49, %v9711_v26  ;;  %v2216_v49 = vrot.slane %v1993_v18, 2 }
 0x6e9   :  { %v2273_v61 = vsel %vm1025_vm2, %v2272_v9, %v2079_v14  ;;  %v2765_v24 = vadd.f32 %v2764_v57, %v2763_v5  ;;  %v2187_v14 = vsel %vm790_vm15, %v2186_v54, %v2185_v15  ;;  %v9746_v5 = vrot.slane %v9694_v20, 4 }
 0x6ea   :  { %v1983_v27 = vpop.permute.xlu2 %1982  ;;  %v2323_v10 = vsel %vm1025_vm2, %v2283_v34, %v2322_v28  ;;  %v7463_v16 = vperm.slane %v2273_v61, %v9711_v26  ;;  %v2320_v6 = vrot.slane %v2283_v34, 4  ;;  %v2189_v41 = vsel %vm793_vm0, %v2188_v8, %v2187_v14 }
 0x6eb   :  { %v2206_v25 = vrot.slane %v1983_v27, 7  ;;  %5053 = vpush %v2765_v24  ;;  %v7471_v56 = vperm.slane %v2323_v10, %v9735_v21  ;;  %v2191_v44 = vsel %vm796_vm1, %v2190_v29, %v2189_v41  ;;  %v2360_v9 = vrot.slane %v7371_v17, 4  ;;  %v9747_v17 = vld [vmem:[#allocation28_spill] sm:$0xff] }
 0x6ec   :  { %v2308_v23 = vrot.slane %v7463_v16, 4  ;;  %v2321_v30 = vsel %vm1025_vm2, %v2320_v6, %v2271_v51  ;;  %v2373_v57 = vsel %vm1025_vm2, %v2372_v12, %v2177_v19  ;;  %v2383_v15 = vperm.slane %v2375_v63, %v9711_v26 }
 0x6ed   :  { %v2207_v43 = vsel %vm778_vm11, %v2206_v25, %v9744_v35  ;;  %v2347_v36 = vsel %vm1025_vm2, %v7471_v56, %v2346_v39  ;;  %v2410_v39 = vrot.slane %v7317_v47, 4  ;;  %v7510_v28 = vperm.slane %v2321_v30, %v9735_v21 }
 0x6ee   :  { %v2209_v31 = vsel %vm781_vm12, %v2208_v11, %v2207_v43  ;;  %v2481_v54 = vsel %vm1249_vm4, %v2347_v36, -inf  ;;  %v2309_v45 = vsel %vm1025_vm2, %v2308_v23, %v7477_v4  ;;  %v2386_v1 = vrot.slane %v2191_v44, 4 }
 0x6ef   :  { %v2211_v2 = vsel %vm784_vm13, %v2210_v3, %v2209_v31  ;;  %2482 = vmax.xlane.f32.xlu1 %v2481_v54  ;;  %v2315_v33 = vperm.slane %v2309_v45, %v9735_v21  ;;  %v2411_v20 = vsel %vm1025_vm2, %v7415_v46, %v2410_v39  ;;  %v9748_v8 = vrot.slane %v9747_v17, 4 }
 0x6f0   :  { %v2213_v52 = vsel %vm787_vm14, %v9746_v5, %v2211_v2  ;;  %v2297_v61 = vsel %vm1025_vm2, %v2296_v60, %v7294_v13  ;;  %v7521_v24 = vperm.slane %v2373_v57, %v9711_v26  ;;  %v7526_v11 = vperm.slane %v2411_v20, %v9735_v21 }
 0x6f1   :  { %v2215_v59 = vsel %vm790_vm15, %v2214_v37, %v2213_v52  ;;  %v2335_v7 = vsel %vm1025_vm2, %v2315_v33, %v2334_v32  ;;  %v2349_v19 = vsel %vm1025_vm2, %v9748_v8, %v7166_v62  ;;  %v2434_v62 = vrot.slane %v2383_v15, 4 }
 0x6f2   :  { %v1995_v55 = vpop.permute.xlu2 %1994  ;;  %v2217_v34 = vsel %vm793_vm0, %v2216_v49, %v2215_v59  ;;  %v2463_v10 = vsel %vm1249_vm4, %v2335_v7, -inf  ;;  %v2340_v25 = vrot.slane %v7510_v28, 4  ;;  %v2361_v13 = vsel %vm1025_vm2, %v2360_v9, %v7263_v38 }
 0x6f3   :  { %v2218_v51 = vrot.slane %v1995_v55, 1  ;;  %v2355_v6 = vperm.slane %v2349_v19, %v9711_v26  ;;  %v7537_v41 = vperm.slane %v2297_v61, %v9735_v21  ;;  %v2422_v35 = vrot.slane %v7521_v24, 4 }
 0x6f4   :  { %v2458_v36 = vrot.slane %v7526_v11, 4  ;;  %v2367_v38 = vperm.slane %v2361_v13, %v9711_v26  ;;  %v2332_v18 = vrot.slane %v2315_v33, 4  ;;  %v2408_v39 = vrot.slane %v7415_v46, 4 }
 0x6f5   :  { %v2219_v42 = vsel %vm796_vm1, %v2218_v51, %v2217_v34  ;;  %v2341_v12 = vsel %vm1025_vm2, %v2340_v25, %v7537_v41  ;;  %v2398_v45 = vrot.slane %v2355_v6, 4  ;;  %v2286_v5 = vrot.slane %v7339_v22, 4 }
 0x6f6   :  { %v2384_v40 = vrot.slane %v2219_v42, 4  ;;  %v2387_v27 = vsel %vm1025_vm2, %v2219_v42, %v2386_v1  ;;  %v2472_v37 = vsel %vm1249_vm4, %v2341_v12, -inf  ;;  %v2333_v33 = vsel %vm1025_vm2, %v2332_v18, %v7466_v53 }
 0x6f7   :  { %v2395_v48 = vperm.slane %v2387_v27, %v9711_v26  ;;  %2464 = vmax.xlane.f32.xlu1 %v2463_v10  ;;  %v2399_v2 = vsel %vm1025_vm2, %v2367_v38, %v2398_v45  ;;  %v2287_v60 = vsel %vm1025_vm2, %v7354_v0, %v2286_v5  ;;  %v2409_v46 = vsel %vm1025_vm2, %v2408_v39, %v7317_v47 }
 0x6f8   :  { %v2385_v14 = vsel %vm1025_vm2, %v2384_v40, %v2191_v44  ;;  %v7560_v30 = vperm.slane %v2399_v2, %v9735_v21  ;;  %v2310_v44 = vrot.slane %v7477_v4, 4  ;;  %v2295_v32 = vperm.slane %v2287_v60, %v9735_v21 }
 0x6f9   :  { %v2391_v23 = vperm.slane %v2385_v14, %v9711_v26  ;;  %v2435_v3 = vsel %vm1025_vm2, %v2395_v48, %v2434_v62  ;;  %v2432_v52 = vrot.slane %v2395_v48, 4  ;;  %v2460_v0 = vsel %vm1249_vm4, %v2333_v33, -inf  ;;  %v9749_v62 = vld [vmem:[#allocation77_spill] sm:$0xff]  ;;  %v9751_v14 = vld [vmem:[#allocation75_spill] sm:$0xff] }
 0x6fa   :  { %v7541_v43 = vperm.slane %v2435_v3, %v9735_v21  ;;  %v2311_v22 = vsel %vm1025_vm2, %v7463_v16, %v2310_v44  ;;  %v2415_v4 = vperm.slane %v2409_v46, %v9735_v21  ;;  %v2338_v57 = vrot.slane %v2295_v32, 4 }
 0x6fb   :  { %v2423_v31 = vsel %vm1025_vm2, %v2391_v23, %v2422_v35  ;;  %v2433_v9 = vsel %vm1025_vm2, %v2432_v52, %v2383_v15  ;;  %v2319_v49 = vperm.slane %v2311_v22, %v9735_v21  ;;  %v2396_v51 = vrot.slane %v2367_v38, 4 }
 0x6fc   :  { %v2459_v54 = vsel %vm1025_vm2, %v7541_v43, %v2458_v36  ;;  %v7551_v58 = vperm.slane %v2423_v31, %v9735_v21  ;;  %v2439_v47 = vperm.slane %v2433_v9, %v9735_v21  ;;  %v2454_v55 = vrot.slane %v2415_v4, 4 }
 0x6fd   :  { %v2505_v29 = vsel %vm1249_vm4, %v2459_v54, -inf  ;;  %v2339_v16 = vsel %vm1025_vm2, %v2319_v49, %v2338_v57  ;;  %v2344_v1 = vrot.slane %v7471_v56, 4  ;;  %v2420_v34 = vrot.slane %v2391_v23, 4  ;;  %v9752_v23 = vld [vmem:[#allocation76_spill] sm:$0xff] }
 0x6fe   :  { %2506 = vmax.xlane.f32.xlu0 %v2505_v29  ;;  %v2448_v63 = vrot.slane %v7551_v58, 4  ;;  %v2455_v20 = vsel %vm1025_vm2, %v2439_v47, %v2454_v55  ;;  %v2469_v15 = vsel %vm1249_vm4, %v2339_v16, -inf  ;;  %v2397_v17 = vsel %vm1025_vm2, %v2396_v51, %v2355_v6  ;;  %v9753_v51 = vld [vmem:[#allocation47_spill] sm:$0xff] }
 0x6ff   :  { %2473 = vmax.xlane.f32.xlu1 %v2472_v37  ;;  %v2499_v7 = vsel %vm1249_vm4, %v2455_v20, -inf  ;;  %v2345_v8 = vsel %vm1025_vm2, %v2344_v1, %v7404_v50  ;;  %v2421_v19 = vsel %vm1025_vm2, %v2420_v34, %v7521_v24  ;;  %v2403_v42 = vperm.slane %v2397_v17, %v9735_v21  ;;  %v9750_v24 = vld [vmem:[#allocation38_spill] sm:$0xff] }
 0x700   :  { %v2449_v59 = vsel %vm1025_vm2, %v2448_v63, %v7560_v30  ;;  %v2478_v61 = vsel %vm1249_vm4, %v2345_v8, -inf  ;;  %v2427_v40 = vperm.slane %v2421_v19, %v9735_v21  ;;  %v2452_v48 = vrot.slane %v2439_v47, 4 }
 0x701   :  { %v2490_v53 = vsel %vm1249_vm4, %v2449_v59, -inf  ;;  %v2446_v27 = vrot.slane %v2403_v42, 4  ;;  %v2336_v5 = vrot.slane %v2319_v49, 4  ;;  %v2342_v44 = vrot.slane %v7537_v41, 4 }
 0x702   :  { %v2453_v12 = vsel %vm1025_vm2, %v2452_v48, %v2415_v4  ;;  %v2444_v59 = vrot.slane %v2427_v40, 4  ;;  %v2456_v41 = vrot.slane %v7541_v43, 4 }
 0x703   :  { %v2447_v56 = vsel %vm1025_vm2, %v2427_v40, %v2446_v27  ;;  %v2496_v29 = vsel %vm1249_vm4, %v2453_v12, -inf  ;;  %v2337_v52 = vsel %vm1025_vm2, %v2336_v5, %v2295_v32  ;;  %v2343_v33 = vsel %vm1025_vm2, %v7510_v28, %v2342_v44 }
 0x704   :  { %v2487_v10 = vsel %vm1249_vm4, %v2447_v56, -inf  ;;  %v2466_v60 = vsel %vm1249_vm4, %v2337_v52, -inf  ;;  %v2475_v46 = vsel %vm1249_vm4, %v2343_v33, -inf  ;;  %v2445_v22 = vsel %vm1025_vm2, %v2444_v59, %v2403_v42 }
 0x705   :  { %v2484_v9 = vsel %vm1249_vm4, %v2445_v22, -inf  ;;  %v2457_v28 = vsel %vm1025_vm2, %v2456_v41, %v7526_v11 }
 0x706   :  { %2461 = vmax.xlane.f32.xlu0 %v2460_v0  ;;  %v2450_v0 = vrot.slane %v7560_v30, 4 }
 0x707   :  { %2491 = vmax.xlane.f32.xlu1 %v2490_v53  ;;  %v2502_v53 = vsel %vm1249_vm4, %v2457_v28, -inf }
 0x708   :  { %v2451_v32 = vsel %vm1025_vm2, %v7551_v58, %v2450_v0 }
 0x709   :  { %v2493_v4 = vsel %vm1249_vm4, %v2451_v32, -inf }
 0x70e   :  { %2470 = vmax.xlane.f32.xlu0 %v2469_v15 }
 0x70f   :  { %2500 = vmax.xlane.f32.xlu1 %v2499_v7 }
 0x716   :  { %2479 = vmax.xlane.f32.xlu0 %v2478_v61 }
 0x71c   :  { %s5054_s15 = spop %5053 }
 0x71d   :  { %s2767_s17 = smul.f32 0.001953125, %s5054_s15 }
 0x71e   :  { %2488 = vmax.xlane.f32.xlu0 %v2487_v10 }
 0x71f   :  { %v2768_v50 = vstv %s2767_s17 }
 0x720   :  { %v7596_v25 = vsub.f32 %v9749_v62, %v2768_v50  ;;  %v7599_v13 = vsub.f32 %v9750_v24, %v2768_v50  ;;  %v7602_v6 = vsub.f32 %v9751_v14, %v2768_v50  ;;  %v7605_v3 = vsub.f32 %v9752_v23, %v2768_v50 }
 0x722   :  { %v2773_v35 = vmul.f32 %v7596_v25, %v7596_v25  ;;  %v2774_v36 = vmul.f32 %v7599_v13, %v7599_v13  ;;  %v2775_v38 = vmul.f32 %v7602_v6, %v7602_v6  ;;  %v2776_v31 = vmul.f32 %v7605_v3, %v7605_v3 }
 0x724   :  { %v2777_v54 = vsel %vm322_vm3, %v2773_v35, 0.0  ;;  %v2778_v45 = vsel %vm322_vm3, %v2774_v36, 0.0  ;;  %v2780_v18 = vsel %vm322_vm3, %v2775_v38, 0.0  ;;  %v2782_v39 = vsel %vm322_vm3, %v2776_v31, 0.0 }
 0x725   :  { %v2779_v37 = vadd.f32 %v2778_v45, %v2777_v54 }
 0x726   :  { %2497 = vmax.xlane.f32.xlu0 %v2496_v29 }
 0x727   :  { %v2781_v2 = vadd.f32 %v2780_v18, %v2779_v37 }
 0x729   :  { %v2783_v63 = vadd.f32 %v2782_v39, %v2781_v2 }
 0x72b   :  { %2784 = vadd.xlane.f32.xlu2 %v2783_v63 }
 0x733   :  { %2467 = vmax.xlane.f32.xlu2 %v2466_v60 }
 0x73b   :  { %2476 = vmax.xlane.f32.xlu2 %v2475_v46 }
 0x743   :  { %2485 = vmax.xlane.f32.xlu2 %v2484_v9 }
 0x74b   :  { %2494 = vmax.xlane.f32.xlu2 %v2493_v4 }
 0x753   :  { %2503 = vmax.xlane.f32.xlu2 %v2502_v53 }
 0x762   :  { %v2483_v47 = vpop.xlane.xlu1 %2482 }
 0x763   :  { %v2531_v14 = vperm.slane %v2483_v47, %v9753_v51 }
 0x76a   :  { %v2465_v30 = vpop.xlane.xlu1 %2464 }
 0x76b   :  { %v2525_v43 = vperm.slane %v2465_v30, %v9753_v51  ;;  %v2815_v30 = vstv %s5028_s22 }
 0x771   :  { %v2507_v49 = vpop.xlane.xlu0 %2506 }
 0x772   :  { %v2474_v61 = vpop.xlane.xlu1 %2473  ;;  %v2539_v22 = vperm.slane %v2507_v49, %v9753_v51 }
 0x773   :  { %v2528_v10 = vperm.slane %v2474_v61, %v9753_v51 }
 0x779   :  { %v2462_v57 = vpop.xlane.xlu0 %2461 }
 0x77a   :  { %v2524_v7 = vperm.slane %v2462_v57, %v9753_v51  ;;  %v2492_v31 = vpop.xlane.xlu1 %2491 }
 0x77b   :  { %v2534_v18 = vperm.slane %v2492_v31, %v9753_v51 }
 0x77c   :  { %v2540_v8 = vsel %vm778_vm11, %v2525_v43, %v2524_v7 }
 0x781   :  { %v2471_v15 = vpop.xlane.xlu0 %2470 }
 0x782   :  { %v2527_v40 = vperm.slane %v2471_v15, %v9753_v51  ;;  %v2501_v52 = vpop.xlane.xlu1 %2500 }
 0x783   :  { %v2537_v33 = vperm.slane %v2501_v52, %v9753_v51 }
 0x789   :  { %v2480_v27 = vpop.xlane.xlu0 %2479 }
 0x78a   :  { %v2530_v62 = vperm.slane %v2480_v27, %v9753_v51 }
 0x791   :  { %v2489_v38 = vpop.xlane.xlu0 %2488 }
 0x792   :  { %v2533_v45 = vperm.slane %v2489_v38, %v9753_v51 }
 0x799   :  { %v2498_v39 = vpop.xlane.xlu0 %2497 }
 0x79a   :  { %v2536_v60 = vperm.slane %v2498_v39, %v9753_v51 }
 0x79e   :  { %v2785_v55 = vpop.xlane.xlu2 %2784 }
 0x79f   :  { %v2786_v16 = vrot.slane %v2785_v55, 4 }
 0x7a1   :  { %v2787_v20 = vadd.f32 %v2786_v16, %v2785_v55 }
 0x7a3   :  { %v2788_v58 = vrot.slane %v2787_v20, 2 }
 0x7a5   :  { %v2789_v1 = vadd.f32 %v2788_v58, %v2787_v20 }
 0x7a6   :  { %v2468_v34 = vpop.xlane.xlu2 %2467 }
 0x7a7   :  { %v2526_v11 = vperm.slane %v2468_v34, %v9753_v51  ;;  %v2790_v17 = vrot.slane %v2789_v1, 1 }
 0x7a9   :  { %v2791_v19 = vadd.f32 %v2790_v17, %v2789_v1  ;;  %v2541_v42 = vsel %vm781_vm12, %v2526_v11, %v2540_v8 }
 0x7aa   :  { %v2542_v56 = vsel %vm784_vm13, %v2527_v40, %v2541_v42 }
 0x7ab   :  { %5055 = vpush %v2791_v19  ;;  %v2543_v24 = vsel %vm787_vm14, %v2528_v10, %v2542_v56 }
 0x7ae   :  { %v2477_v48 = vpop.xlane.xlu2 %2476 }
 0x7af   :  { %v2529_v50 = vperm.slane %v2477_v48, %v9753_v51 }
 0x7b1   :  { %v2544_v23 = vsel %vm790_vm15, %v2529_v50, %v2543_v24 }
 0x7b2   :  { %v2545_v35 = vsel %vm793_vm0, %v2530_v62, %v2544_v23 }
 0x7b3   :  { %v2546_v36 = vsel %vm796_vm1, %v2531_v14, %v2545_v35 }
 0x7b4   :  { %2557 = vst.msk [vmem:[#allocation13 + $0x8] sm:$0xff] %vm1348_vm5, %v2546_v36 }
 0x7b6   :  { %v2486_v12 = vpop.xlane.xlu2 %2485 }
 0x7b7   :  { %v2532_v54 = vperm.slane %v2486_v12, %v9753_v51 }
 0x7b9   :  { %v2547_v29 = vsel %vm778_vm11, %v2533_v45, %v2532_v54 }
 0x7ba   :  { %v2548_v63 = vsel %vm781_vm12, %v2534_v18, %v2547_v29 }
 0x7be   :  { %v2495_v37 = vpop.xlane.xlu2 %2494 }
 0x7bf   :  { %v2535_v2 = vperm.slane %v2495_v37, %v9753_v51 }
 0x7c1   :  { %v2549_v5 = vsel %vm784_vm13, %v2535_v2, %v2548_v63 }
 0x7c2   :  { %v2550_v44 = vsel %vm787_vm14, %v2536_v60, %v2549_v5 }
 0x7c3   :  { %v2551_v9 = vsel %vm790_vm15, %v2537_v33, %v2550_v44 }
 0x7c6   :  { %v2504_v46 = vpop.xlane.xlu2 %2503 }
 0x7c7   :  { %v2538_v59 = vperm.slane %v2504_v46, %v9753_v51 }
 0x7c9   :  { %v2552_v0 = vsel %vm793_vm0, %v2538_v59, %v2551_v9 }
 0x7ca   :  { %v2553_v32 = vsel %vm796_vm1, %v2539_v22, %v2552_v0 }
 0x7cb   :  { %2558 = vst.msk [vmem:[#allocation13 + $0x28] sm:$0xff] %vm1348_vm5, %v2553_v32 }
 0x7dc   :  { %s5056_s18 = spop %5055 }
 0x7dd   :  { %s2793_s19 = smul.f32 0.001953125, %s5056_s18 }
 0x7df   :  { %s2795_s20 = sadd.f32 1e-05, %s2793_s19 }
 0x7e0   :  { %s5039_s19 = sld [smem:[#allocation10 + $0x3]] }
 0x7e1   :  { %v2796_v4 = vstv %s2795_s20  ;;  %s5040_s20 = sld [smem:[#allocation12 + $0x3]] }
 0x7e2   :  { %5089 = vrsqrt.f32 %v2796_v4  ;;  %vm2803_vm8 = vweird.f32 %v2796_v4 }
 0x7e8   :  { %v5090_v41 = vpop.eup %5089 }
 0x7e9   :  { %v2798_v28 = vmul.f32 %v5090_v41, %v2796_v4  ;;  %vm2804_vm6 = vweird.f32 %v5090_v41 }
 0x7ea   :  { %vm2805_vm9 = vmor %vm2803_vm8, %vm2804_vm6 }
 0x7eb   :  { %v2799_v53 = vmul.f32 %v5090_v41, %v2798_v28 }
 0x7ed   :  { %v2800_v47 = vmul.f32 0.5, %v2799_v53 }
 0x7ef   :  { %v2801_v57 = vsub.f32 1.5, %v2800_v47 }
 0x7f1   :  { %v2802_v49 = vmul.f32 %v5090_v41, %v2801_v57 }
 0x7f3   :  { %v2806_v55 = vsel %vm2805_vm9, %v5090_v41, %v2802_v49 }
 0x7f4   :  { %5057 = vpush %v2806_v55 }
 0x825   :  { %s5058_s23 = spop %5057 }
 0x826   :  { %s2808_s24 = smul.f32 %s5058_s23, %s5027_s21 }
 0x828   :  { %v2809_v16 = vstv %s2808_s24 }
 0x829   :  { %v2810_v20 = vmul.f32 %v2809_v16, %v7596_v25  ;;  %v2811_v15 = vmul.f32 %v2809_v16, %v7599_v13  ;;  %v2812_v11 = vmul.f32 %v2809_v16, %v7602_v6  ;;  %v2813_v25 = vmul.f32 %v2809_v16, %v7605_v3 }
 0x82b   :  { %v2816_v58 = vadd.f32 %v2815_v30, %v2810_v20  ;;  %v2817_v7 = vadd.f32 %v2815_v30, %v2811_v15  ;;  %v2818_v13 = vadd.f32 %v2815_v30, %v2812_v11  ;;  %v2819_v56 = vadd.f32 %v2815_v30, %v2813_v25 }
 0x82d   :  { %v7671_v1 = vmax.f32 %v2816_v58, 0.0  ;;  %v7673_v34 = vmax.f32 %v2817_v7, 0.0  ;;  %v7681_v48 = vmax.f32 %v2818_v13, 0.0  ;;  %v7685_v24 = vmax.f32 %v2819_v56, 0.0 }
 0x82f   :  { %v2852_v43 = vsel %vm424_vm7, %v7671_v1, -inf  ;;  %v2880_v8 = vsel %vm424_vm7, %v7673_v34, -inf  ;;  %v2908_v14 = vsel %vm424_vm7, %v7681_v48, -inf  ;;  %v2936_v35 = vsel %vm424_vm7, %v7685_v24, -inf }
 0x830   :  { %v2853_v17 = vrot.slane %v2852_v43, 4  ;;  %v2881_v42 = vrot.slane %v2880_v8, 4  ;;  %v2909_v23 = vrot.slane %v2908_v14, 4  ;;  %v2937_v38 = vrot.slane %v2936_v35, 4 }
 0x831   :  { %v2831_v2 = vrot.slane %v7673_v34, 2  ;;  %v2835_v44 = vrot.slane %v7681_v48, 4  ;;  %v2828_v59 = vrot.slane %v7671_v1, 2  ;;  %v2833_v0 = vrot.slane %v7673_v34, 6 }
 0x832   :  { %v2854_v19 = vmax.f32 %v2852_v43, %v2853_v17  ;;  %v2882_v40 = vmax.f32 %v2880_v8, %v2881_v42  ;;  %v2910_v36 = vmax.f32 %v2908_v14, %v2909_v23  ;;  %v2938_v54 = vmax.f32 %v2936_v35, %v2937_v38 }
 0x833   :  { %v2887_v52 = vsel %vm424_vm7, %v2831_v2, -inf  ;;  %v2922_v46 = vsel %vm424_vm7, %v2835_v44, -inf  ;;  %v2837_v32 = vrot.slane %v7685_v24, 2  ;;  %v2859_v4 = vsel %vm424_vm7, %v2828_v59, -inf }
 0x834   :  { %v2855_v61 = vrot.slane %v2854_v19, 2  ;;  %v2883_v10 = vrot.slane %v2882_v40, 2  ;;  %v2911_v31 = vrot.slane %v2910_v36, 2  ;;  %v2939_v29 = vrot.slane %v2938_v54, 2 }
 0x835   :  { %v2888_v60 = vrot.slane %v2887_v52, 4  ;;  %v2923_v9 = vrot.slane %v2922_v46, 4  ;;  %v2901_v53 = vsel %vm424_vm7, %v2833_v0, -inf  ;;  %v2943_v47 = vsel %vm424_vm7, %v2837_v32, -inf }
 0x836   :  { %v2856_v27 = vmax.f32 %v2854_v19, %v2855_v61  ;;  %v2884_v6 = vmax.f32 %v2882_v40, %v2883_v10  ;;  %v2912_v45 = vmax.f32 %v2910_v36, %v2911_v31  ;;  %v2940_v18 = vmax.f32 %v2938_v54, %v2939_v29 }
 0x837   :  { %v2889_v33 = vmax.f32 %v2887_v52, %v2888_v60  ;;  %v2924_v28 = vmax.f32 %v2922_v46, %v2923_v9  ;;  %v2829_v57 = vrot.slane %v7671_v1, 4  ;;  %v2830_v49 = vrot.slane %v7671_v1, 6 }
 0x838   :  { %v2857_v50 = vrot.slane %v2856_v27, 1  ;;  %v2885_v3 = vrot.slane %v2884_v6, 1  ;;  %v2913_v37 = vrot.slane %v2912_v45, 1  ;;  %v2941_v39 = vrot.slane %v2940_v18, 1 }
 0x839   :  { %v2890_v22 = vrot.slane %v2889_v33, 2  ;;  %v2860_v55 = vrot.slane %v2859_v4, 4  ;;  %v2902_v30 = vrot.slane %v2901_v53, 4  ;;  %v2925_v20 = vrot.slane %v2924_v28, 2 }
 0x83a   :  { %v7683_v62 = vmax.f32 %v2856_v27, %v2857_v50  ;;  %v7695_v12 = vmax.f32 %v2884_v6, %v2885_v3  ;;  %v7700_v63 = vmax.f32 %v2912_v45, %v2913_v37  ;;  %v7702_v5 = vmax.f32 %v2940_v18, %v2941_v39 }
 0x83b   :  { %v2891_v41 = vmax.f32 %v2889_v33, %v2890_v22  ;;  %v2944_v15 = vrot.slane %v2943_v47, 4  ;;  %v2839_v58 = vrot.slane %v7685_v24, 6  ;;  %v2861_v7 = vmax.f32 %v2859_v4, %v2860_v55 }
 0x83c   :  { %2980 = vrot.lane.b32.xlu1 %v7683_v62, %s5221_s16  ;;  %3012 = vrot.lane.b32.xlu0 %v7683_v62, %s5222_s3  ;;  %v2866_v43 = vsel %vm424_vm7, %v2829_v57, -inf  ;;  %v2873_v11 = vsel %vm424_vm7, %v2830_v49, -inf  ;;  %v2903_v8 = vmax.f32 %v2901_v53, %v2902_v30  ;;  %v2926_v19 = vmax.f32 %v2924_v28, %v2925_v20 }
 0x83d   :  { %3004 = vrot.lane.b32.xlu2 %v7702_v5, %s5221_s16  ;;  %v2892_v16 = vrot.slane %v2891_v41, 1  ;;  %v2945_v25 = vmax.f32 %v2943_v47, %v2944_v15  ;;  %v2957_v42 = vsel %vm424_vm7, %v2839_v58, -inf  ;;  %v2832_v1 = vrot.slane %v7673_v34, 4 }
 0x83e   :  { %v2862_v13 = vrot.slane %v2861_v7, 2  ;;  %v2867_v61 = vrot.slane %v2866_v43, 4  ;;  %v2874_v40 = vrot.slane %v2873_v11, 4  ;;  %v2904_v27 = vrot.slane %v2903_v8, 2 }
 0x83f   :  { %v7736_v17 = vmax.f32 %v2891_v41, %v2892_v16  ;;  %v2927_v56 = vrot.slane %v2926_v19, 1  ;;  %v2946_v10 = vrot.slane %v2945_v25, 2  ;;  %v2958_v50 = vrot.slane %v2957_v42, 4 }
 0x840   :  { %v2863_v6 = vmax.f32 %v2861_v7, %v2862_v13  ;;  %v2868_v14 = vmax.f32 %v2866_v43, %v2867_v61  ;;  %v2875_v3 = vmax.f32 %v2873_v11, %v2874_v40  ;;  %v2894_v23 = vsel %vm424_vm7, %v2832_v1, -inf }
 0x841   :  { %v2905_v35 = vmax.f32 %v2903_v8, %v2904_v27  ;;  %v7747_v36 = vmax.f32 %v2926_v19, %v2927_v56  ;;  %v2947_v38 = vmax.f32 %v2945_v25, %v2946_v10  ;;  %v2959_v31 = vmax.f32 %v2957_v42, %v2958_v50 }
 0x842   :  { %v2864_v34 = vrot.slane %v2863_v6, 1  ;;  %v2869_v54 = vrot.slane %v2868_v14, 2  ;;  %v2895_v45 = vrot.slane %v2894_v23, 4  ;;  %v2876_v29 = vrot.slane %v2875_v3, 2 }
 0x843   :  { %v2906_v37 = vrot.slane %v2905_v35, 1  ;;  %v2948_v18 = vrot.slane %v2947_v38, 1  ;;  %v2960_v2 = vrot.slane %v2959_v31, 2  ;;  %v2834_v39 = vrot.slane %v7681_v48, 2 }
 0x844   :  { %2988 = vrot.lane.b32.xlu1 %v7695_v12, %s5221_s16  ;;  %3036 = vrot.lane.b32.xlu0 %v7702_v5, %s5222_s3  ;;  %v7756_v52 = vmax.f32 %v2863_v6, %v2864_v34  ;;  %v2870_v60 = vmax.f32 %v2868_v14, %v2869_v54  ;;  %v2896_v44 = vmax.f32 %v2894_v23, %v2895_v45  ;;  %v2836_v53 = vrot.slane %v7681_v48, 6 }
 0x845   :  { %3028 = vrot.lane.b32.xlu2 %v7700_v63, %s5222_s3  ;;  %v2877_v33 = vmax.f32 %v2875_v3, %v2876_v29  ;;  %v7758_v46 = vmax.f32 %v2905_v35, %v2906_v37  ;;  %v7760_v59 = vmax.f32 %v2947_v38, %v2948_v18  ;;  %v2961_v22 = vmax.f32 %v2959_v31, %v2960_v2 }
 0x846   :  { %v2915_v9 = vsel %vm424_vm7, %v2834_v39, -inf  ;;  %v2871_v0 = vrot.slane %v2870_v60, 1  ;;  %v2897_v4 = vrot.slane %v2896_v44, 2  ;;  %v2929_v30 = vsel %vm424_vm7, %v2836_v53, -inf }
 0x847   :  { %v2878_v32 = vrot.slane %v2877_v33, 1  ;;  %v2916_v41 = vrot.slane %v2915_v9, 4  ;;  %v2962_v28 = vrot.slane %v2961_v22, 1  ;;  %v2930_v15 = vrot.slane %v2929_v30, 4 }
 0x848   :  { %v7770_v47 = vmax.f32 %v2870_v60, %v2871_v0  ;;  %v2898_v49 = vmax.f32 %v2896_v44, %v2897_v4  ;;  %v2838_v58 = vrot.slane %v7685_v24, 4 }
 0x849   :  { %v7772_v57 = vmax.f32 %v2877_v33, %v2878_v32  ;;  %v2917_v55 = vmax.f32 %v2915_v9, %v2916_v41  ;;  %v7774_v16 = vmax.f32 %v2961_v22, %v2962_v28  ;;  %v2931_v11 = vmax.f32 %v2929_v30, %v2930_v15 }
 0x84a   :  { %v2899_v48 = vrot.slane %v2898_v49, 1  ;;  %v2950_v8 = vsel %vm424_vm7, %v2838_v58, -inf }
 0x84b   :  { %v2918_v20 = vrot.slane %v2917_v55, 2  ;;  %v2932_v25 = vrot.slane %v2931_v11, 2  ;;  %v2951_v42 = vrot.slane %v2950_v8, 4 }
 0x84c   :  { %2996 = vrot.lane.b32.xlu1 %v7700_v63, %s5221_s16  ;;  %3060 = vrot.lane.b32.xlu0 %v7700_v63, %s5223_s30  ;;  %v7784_v7 = vmax.f32 %v2898_v49, %v2899_v48 }
 0x84d   :  { %3052 = vrot.lane.b32.xlu2 %v7695_v12, %s5223_s30  ;;  %v2919_v43 = vmax.f32 %v2917_v55, %v2918_v20  ;;  %v2933_v24 = vmax.f32 %v2931_v11, %v2932_v25  ;;  %v2952_v13 = vmax.f32 %v2950_v8, %v2951_v42 }
 0x84f   :  { %v2920_v19 = vrot.slane %v2919_v43, 1  ;;  %v2934_v61 = vrot.slane %v2933_v24, 1  ;;  %v2953_v40 = vrot.slane %v2952_v13, 2 }
 0x851   :  { %v7793_v1 = vmax.f32 %v2919_v43, %v2920_v19  ;;  %v7801_v27 = vmax.f32 %v2933_v24, %v2934_v61  ;;  %v2954_v56 = vmax.f32 %v2952_v13, %v2953_v40 }
 0x853   :  { %v2955_v10 = vrot.slane %v2954_v56, 1 }
 0x854   :  { %3020 = vrot.lane.b32.xlu1 %v7695_v12, %s5222_s3  ;;  %3084 = vrot.lane.b32.xlu0 %v7695_v12, %s5224_s6 }
 0x855   :  { %3076 = vrot.lane.b32.xlu2 %v7683_v62, %s5224_s6  ;;  %v7809_v50 = vmax.f32 %v2954_v56, %v2955_v10 }
 0x85c   :  { %3044 = vrot.lane.b32.xlu1 %v7683_v62, %s5223_s30  ;;  %2990 = vrot.lane.b32.xlu0 %v7736_v17, %s5221_s16 }
 0x85d   :  { %3100 = vrot.lane.b32.xlu2 %v7702_v5, %s5224_s6 }
 0x864   :  { %3068 = vrot.lane.b32.xlu1 %v7702_v5, %s5223_s30  ;;  %3000 = vrot.lane.b32.xlu0 %v7747_v36, %s5221_s16 }
 0x865   :  { %2994 = vrot.lane.b32.xlu2 %v7758_v46, %s5221_s16 }
 0x86c   :  { %3092 = vrot.lane.b32.xlu1 %v7700_v63, %s5224_s6  ;;  %3006 = vrot.lane.b32.xlu0 %v7760_v59, %s5221_s16 }
 0x86d   :  { %3010 = vrot.lane.b32.xlu2 %v7774_v16, %s5221_s16 }
 0x874   :  { %2982 = vrot.lane.b32.xlu1 %v7756_v52, %s5221_s16  ;;  %3018 = vrot.lane.b32.xlu0 %v7772_v57, %s5222_s3 }
 0x875   :  { %3016 = vrot.lane.b32.xlu2 %v7770_v47, %s5222_s3 }
 0x87c   :  { %2984 = vrot.lane.b32.xlu1 %v7770_v47, %s5221_s16  ;;  %3024 = vrot.lane.b32.xlu0 %v7784_v7, %s5222_s3 }
 0x87d   :  { %3022 = vrot.lane.b32.xlu2 %v7736_v17, %s5222_s3 }
 0x884   :  { %2986 = vrot.lane.b32.xlu1 %v7772_v57, %s5221_s16  ;;  %3030 = vrot.lane.b32.xlu0 %v7793_v1, %s5222_s3 }
 0x885   :  { %3034 = vrot.lane.b32.xlu2 %v7801_v27, %s5222_s3 }
 0x88c   :  { %2992 = vrot.lane.b32.xlu1 %v7784_v7, %s5221_s16  ;;  %3042 = vrot.lane.b32.xlu0 %v7774_v16, %s5222_s3 }
 0x88d   :  { %3040 = vrot.lane.b32.xlu2 %v7809_v50, %s5222_s3 }
 0x894   :  { %2998 = vrot.lane.b32.xlu1 %v7793_v1, %s5221_s16  ;;  %3048 = vrot.lane.b32.xlu0 %v7770_v47, %s5223_s30 }
 0x895   :  { %3046 = vrot.lane.b32.xlu2 %v7756_v52, %s5223_s30 }
 0x897   :  { %v7823_v6 = vpop.permute.xlu2 %3004 }
 0x89c   :  { %3002 = vrot.lane.b32.xlu1 %v7801_v27, %s5221_s16  ;;  %3054 = vrot.lane.b32.xlu0 %v7736_v17, %s5223_s30 }
 0x89d   :  { %3058 = vrot.lane.b32.xlu2 %v7758_v46, %s5223_s30 }
 0x89f   :  { %v7833_v3 = vpop.permute.xlu2 %3028 }
 0x8a4   :  { %3008 = vrot.lane.b32.xlu1 %v7809_v50, %s5221_s16  ;;  %3066 = vrot.lane.b32.xlu0 %v7801_v27, %s5223_s30 }
 0x8a5   :  { %3064 = vrot.lane.b32.xlu2 %v7747_v36, %s5223_s30 }
 0x8a7   :  { %v7845_v38 = vpop.permute.xlu2 %3052 }
 0x8ac   :  { %3014 = vrot.lane.b32.xlu1 %v7756_v52, %s5222_s3  ;;  %3072 = vrot.lane.b32.xlu0 %v7809_v50, %s5223_s30 }
 0x8ad   :  { %3070 = vrot.lane.b32.xlu2 %v7760_v59, %s5223_s30 }
 0x8ae   :  { %v7831_v14 = vpop.permute.xlu1 %2980  ;;  %v7841_v23 = vpop.permute.xlu0 %3012 }
 0x8af   :  { %v7855_v34 = vpop.permute.xlu2 %3076 }
 0x8b0   :  { %9754 = vst [vmem:[#allocation24_spill] sm:$0xff] %v7855_v34 }
 0x8b4   :  { %3026 = vrot.lane.b32.xlu1 %v7758_v46, %s5222_s3  ;;  %3078 = vrot.lane.b32.xlu0 %v7756_v52, %s5224_s6 }
 0x8b5   :  { %3082 = vrot.lane.b32.xlu2 %v7772_v57, %s5224_s6 }
 0x8b6   :  { %v7843_v35 = vpop.permute.xlu1 %2988  ;;  %v7857_v54 = vpop.permute.xlu0 %3036 }
 0x8b7   :  { %v7869_v37 = vpop.permute.xlu2 %3100 }
 0x8bc   :  { %3032 = vrot.lane.b32.xlu1 %v7747_v36, %s5222_s3  ;;  %3090 = vrot.lane.b32.xlu0 %v7758_v46, %s5224_s6 }
 0x8bd   :  { %3088 = vrot.lane.b32.xlu2 %v7784_v7, %s5224_s6 }
 0x8be   :  { %v7853_v31 = vpop.permute.xlu1 %2996  ;;  %v7867_v29 = vpop.permute.xlu0 %3060 }
 0x8bf   :  { %9755 = vst [vmem:[#allocation22_spill] sm:$0xff] %v7867_v29  ;;  %v7881_v39 = vpop.permute.xlu2 %2994 }
 0x8c4   :  { %3038 = vrot.lane.b32.xlu1 %v7760_v59, %s5222_s3  ;;  %3096 = vrot.lane.b32.xlu0 %v7747_v36, %s5224_s6 }
 0x8c5   :  { %3094 = vrot.lane.b32.xlu2 %v7793_v1, %s5224_s6 }
 0x8c6   :  { %v7865_v45 = vpop.permute.xlu1 %3020  ;;  %v7879_v2 = vpop.permute.xlu0 %3084 }
 0x8c7   :  { %v7895_v33 = vpop.permute.xlu2 %3010 }
 0x8cc   :  { %3050 = vrot.lane.b32.xlu1 %v7772_v57, %s5223_s30  ;;  %3102 = vrot.lane.b32.xlu0 %v7760_v59, %s5224_s6 }
 0x8cd   :  { %3106 = vrot.lane.b32.xlu2 %v7774_v16, %s5224_s6 }
 0x8ce   :  { %v7877_v18 = vpop.permute.xlu1 %3044  ;;  %v7891_v44 = vpop.permute.xlu0 %2990 }
 0x8cf   :  { %v7913_v32 = vpop.permute.xlu2 %3016 }
 0x8d4   :  { %3056 = vrot.lane.b32.xlu1 %v7784_v7, %s5223_s30  ;;  %3108 = vrot.lane.b32.xlu0 %v7683_v62, %s5225_s7 }
 0x8d5   :  { %3112 = vrot.lane.b32.xlu2 %v7770_v47, %s5225_s7 }
 0x8d6   :  { %v7889_v60 = vpop.permute.xlu1 %3068  ;;  %v7903_v9 = vpop.permute.xlu0 %3000 }
 0x8d7   :  { %9756 = vst [vmem:[#allocation26_spill] sm:$0xff] %v7889_v60  ;;  %v7927_v53 = vpop.permute.xlu2 %3022 }
 0x8dc   :  { %3062 = vrot.lane.b32.xlu1 %v7793_v1, %s5223_s30  ;;  %3114 = vrot.lane.b32.xlu0 %v7772_v57, %s5225_s7 }
 0x8dd   :  { %3118 = vrot.lane.b32.xlu2 %v7736_v17, %s5225_s7 }
 0x8de   :  { %v7901_v22 = vpop.permute.xlu1 %3092  ;;  %v7915_v4 = vpop.permute.xlu0 %3006 }
 0x8df   :  { %9757 = vst [vmem:[#allocation27_spill] sm:$0xff] %v7901_v22  ;;  %v7939_v30 = vpop.permute.xlu2 %3034 }
 0x8e4   :  { %3074 = vrot.lane.b32.xlu1 %v7774_v16, %s5223_s30  ;;  %3120 = vrot.lane.b32.xlu0 %v7784_v7, %s5225_s7 }
 0x8e5   :  { %3124 = vrot.lane.b32.xlu2 %v7700_v63, %s5225_s7 }
 0x8e6   :  { %v7911_v0 = vpop.permute.xlu1 %2982  ;;  %v7925_v28 = vpop.permute.xlu0 %3018 }
 0x8e7   :  { %v7953_v15 = vpop.permute.xlu2 %3040 }
 0x8e8   :  { %9758 = vst [vmem:[#allocation34_spill] sm:$0xff] %v7953_v15  ;;  %v3204_v15 = vrot.slane %v7756_v52, 7 }
 0x8ec   :  { %3080 = vrot.lane.b32.xlu1 %v7770_v47, %s5224_s6  ;;  %3126 = vrot.lane.b32.xlu0 %v7793_v1, %s5225_s7 }
 0x8ed   :  { %3130 = vrot.lane.b32.xlu2 %v7801_v27, %s5225_s7 }
 0x8ee   :  { %v7923_v41 = vpop.permute.xlu1 %2984  ;;  %v7937_v55 = vpop.permute.xlu0 %3024 }
 0x8ef   :  { %v7971_v8 = vpop.permute.xlu2 %3046 }
 0x8f4   :  { %3086 = vrot.lane.b32.xlu1 %v7736_v17, %s5224_s6  ;;  %3132 = vrot.lane.b32.xlu0 %v7702_v5, %s5225_s7 }
 0x8f5   :  { %3136 = vrot.lane.b32.xlu2 %v7809_v50, %s5225_s7 }
 0x8f6   :  { %v7935_v49 = vpop.permute.xlu1 %2986  ;;  %v7949_v20 = vpop.permute.xlu0 %3030 }
 0x8f7   :  { %v7985_v24 = vpop.permute.xlu2 %3058 }
 0x8f8   :  { %9761 = vst [vmem:[#allocation73_spill] sm:$0xff] %v7985_v24 }
 0x8fc   :  { %3098 = vrot.lane.b32.xlu1 %v7801_v27, %s5224_s6  ;;  %3138 = vrot.lane.b32.xlu0 %v7774_v16, %s5225_s7 }
 0x8fd   :  { %3142 = vrot.lane.b32.xlu2 %v7756_v52, %s5226_s0 }
 0x8fe   :  { %v7947_v48 = vpop.permute.xlu1 %2992  ;;  %v7961_v43 = vpop.permute.xlu0 %3042 }
 0x8ff   :  { %9759 = vst [vmem:[#allocation43_spill] sm:$0xff] %v7961_v43  ;;  %v7997_v40 = vpop.permute.xlu2 %3064 }
 0x900   :  { %9763 = vst [vmem:[#allocation37_spill] sm:$0xff] %v7997_v40 }
 0x904   :  { %3104 = vrot.lane.b32.xlu1 %v7809_v50, %s5224_s6  ;;  %3144 = vrot.lane.b32.xlu0 %v7770_v47, %s5226_s0 }
 0x905   :  { %3148 = vrot.lane.b32.xlu2 %v7695_v12, %s5226_s0 }
 0x906   :  { %v7959_v58 = vpop.permute.xlu1 %2998  ;;  %v7973_v19 = vpop.permute.xlu0 %3048 }
 0x907   :  { %v8011_v51 = vpop.permute.xlu2 %3070 }
 0x908   :  { %9765 = vst [vmem:[#allocation64_spill] sm:$0xff] %v8011_v51 }
 0x90c   :  { %3110 = vrot.lane.b32.xlu1 %v7756_v52, %s5225_s7  ;;  %3150 = vrot.lane.b32.xlu0 %v7736_v17, %s5226_s0 }
 0x90d   :  { %3154 = vrot.lane.b32.xlu2 %v7758_v46, %s5226_s0 }
 0x90e   :  { %v7969_v11 = vpop.permute.xlu1 %3002  ;;  %v7983_v42 = vpop.permute.xlu0 %3054 }
 0x90f   :  { %9760 = vst [vmem:[#allocation49_spill] sm:$0xff] %v7983_v42 }
 0x914   :  { %3116 = vrot.lane.b32.xlu1 %v7695_v12, %s5225_s7  ;;  %3156 = vrot.lane.b32.xlu0 %v7700_v63, %s5226_s0 }
 0x915   :  { %3160 = vrot.lane.b32.xlu2 %v7747_v36, %s5226_s0 }
 0x916   :  { %v7981_v25 = vpop.permute.xlu1 %3008  ;;  %v7995_v61 = vpop.permute.xlu0 %3066 }
 0x917   :  { %9762 = vst [vmem:[#allocation54_spill] sm:$0xff] %v7995_v61 }
 0x91c   :  { %3122 = vrot.lane.b32.xlu1 %v7758_v46, %s5225_s7  ;;  %3162 = vrot.lane.b32.xlu0 %v7801_v27, %s5226_s0 }
 0x91d   :  { %3166 = vrot.lane.b32.xlu2 %v7760_v59, %s5226_s0 }
 0x91e   :  { %v7993_v13 = vpop.permute.xlu1 %3014  ;;  %v8007_v10 = vpop.permute.xlu0 %3072 }
 0x91f   :  { %9764 = vst [vmem:[#allocation61_spill] sm:$0xff] %v8007_v10  ;;  %v8029_v10 = vpop.permute.xlu2 %3082 }
 0x920   :  { %9768 = vst [vmem:[#allocation60_spill] sm:$0xff] %v8029_v10 }
 0x924   :  { %3128 = vrot.lane.b32.xlu1 %v7747_v36, %s5225_s7  ;;  %3168 = vrot.lane.b32.xlu0 %v7809_v50, %s5226_s0 }
 0x925   :  { %3172 = vrot.lane.b32.xlu2 %v7683_v62, %s5227_s8 }
 0x926   :  { %v8005_v56 = vpop.permute.xlu1 %3026  ;;  %v8019_v34 = vpop.permute.xlu0 %3078 }
 0x927   :  { %9766 = vst [vmem:[#allocation67_spill] sm:$0xff] %v8019_v34  ;;  %v8041_v61 = vpop.permute.xlu2 %3088 }
 0x928   :  { %9770 = vst [vmem:[#allocation68_spill] sm:$0xff] %v8041_v61 }
 0x92c   :  { %3134 = vrot.lane.b32.xlu1 %v7760_v59, %s5225_s7  ;;  %3174 = vrot.lane.b32.xlu0 %v7756_v52, %s5227_s8  ;;  %v3208_v52 = vrot.slane %v7772_v57, 5 }
 0x92d   :  { %3178 = vrot.lane.b32.xlu2 %v7772_v57, %s5227_s8 }
 0x92e   :  { %v8017_v21 = vpop.permute.xlu1 %3032  ;;  %v8037_v34 = vpop.permute.xlu0 %3090 }
 0x92f   :  { %9769 = vst [vmem:[#allocation70_spill] sm:$0xff] %v8037_v34  ;;  %v8053_v40 = vpop.permute.xlu2 %3094 }
 0x930   :  { %9773 = vst [vmem:[#allocation69_spill] sm:$0xff] %v8053_v40 }
 0x934   :  { %3140 = vrot.lane.b32.xlu1 %v7683_v62, %s5226_s0  ;;  %3180 = vrot.lane.b32.xlu0 %v7695_v12, %s5227_s8 }
 0x935   :  { %3184 = vrot.lane.b32.xlu2 %v7784_v7, %s5227_s8 }
 0x936   :  { %v8027_v22 = vpop.permute.xlu1 %3038  ;;  %v8051_v51 = vpop.permute.xlu0 %3096 }
 0x937   :  { %9767 = vst [vmem:[#allocation65_spill] sm:$0xff] %v8027_v22  ;;  %v8067_v43 = vpop.permute.xlu2 %3106 }
 0x938   :  { %9772 = vst [vmem:[#allocation71_spill] sm:$0xff] %v8051_v51 }
 0x939   :  { %9775 = vst [vmem:[#allocation39_spill] sm:$0xff] %v8067_v43 }
 0x93c   :  { %3146 = vrot.lane.b32.xlu1 %v7772_v57, %s5226_s0  ;;  %3186 = vrot.lane.b32.xlu0 %v7758_v46, %s5227_s8 }
 0x93d   :  { %3190 = vrot.lane.b32.xlu2 %v7793_v1, %s5227_s8 }
 0x93e   :  { %v8039_v26 = vpop.permute.xlu1 %3050  ;;  %v8063_v61 = vpop.permute.xlu0 %3102 }
 0x93f   :  { %9774 = vst [vmem:[#allocation35_spill] sm:$0xff] %v8063_v61  ;;  %v8083_v29 = vpop.permute.xlu2 %3112 }
 0x940   :  { %9779 = vst [vmem:[#allocation74_spill] sm:$0xff] %v8083_v29 }
 0x944   :  { %3152 = vrot.lane.b32.xlu1 %v7784_v7, %s5226_s0  ;;  %3192 = vrot.lane.b32.xlu0 %v7747_v36, %s5227_s8 }
 0x945   :  { %3196 = vrot.lane.b32.xlu2 %v7702_v5, %s5227_s8 }
 0x946   :  { %v8049_v10 = vpop.permute.xlu1 %3056  ;;  %v8075_v40 = vpop.permute.xlu0 %3108 }
 0x947   :  { %9771 = vst [vmem:[#allocation57_spill] sm:$0xff] %v8049_v10 }
 0x948   :  { %9777 = vst [vmem:[#allocation41_spill] sm:$0xff] %v8075_v40 }
 0x94c   :  { %3158 = vrot.lane.b32.xlu1 %v7793_v1, %s5226_s0  ;;  %3198 = vrot.lane.b32.xlu0 %v7760_v59, %s5227_s8 }
 0x94d   :  { %3202 = vrot.lane.b32.xlu2 %v7774_v16, %s5227_s8 }
 0x94e   :  { %v8061_v34 = vpop.permute.xlu1 %3062  ;;  %v8087_v43 = vpop.permute.xlu0 %3114 }
 0x94f   :  { %9780 = vst [vmem:[#allocation58_spill] sm:$0xff] %v8087_v43 }
 0x954   :  { %3164 = vrot.lane.b32.xlu1 %v7702_v5, %s5226_s0 }
 0x956   :  { %v8073_v51 = vpop.permute.xlu1 %3074  ;;  %v8097_v24 = vpop.permute.xlu0 %3120 }
 0x957   :  { %9776 = vst [vmem:[#allocation72_spill] sm:$0xff] %v8073_v51  ;;  %v8091_v51 = vpop.permute.xlu2 %3118 }
 0x958   :  { %9782 = vst [vmem:[#allocation48_spill] sm:$0xff] %v8091_v51 }
 0x959   :  { %9784 = vst [vmem:[#allocation40_spill] sm:$0xff] %v8097_v24 }
 0x95c   :  { %3170 = vrot.lane.b32.xlu1 %v7774_v16, %s5226_s0 }
 0x95e   :  { %v8081_v61 = vpop.permute.xlu1 %3080 }
 0x95f   :  { %9778 = vst [vmem:[#allocation66_spill] sm:$0xff] %v8081_v61  ;;  %v8099_v10 = vpop.permute.xlu2 %3124  ;;  %v8105_v61 = vpop.permute.xlu0 %3126 }
 0x960   :  { %9785 = vst [vmem:[#allocation36_spill] sm:$0xff] %v8099_v10 }
 0x961   :  { %9787 = vst [vmem:[#allocation53_spill] sm:$0xff] %v8105_v61 }
 0x964   :  { %3176 = vrot.lane.b32.xlu1 %v7770_v47, %s5227_s8 }
 0x966   :  { %v8089_v42 = vpop.permute.xlu1 %3086 }
 0x967   :  { %9781 = vst [vmem:[#allocation63_spill] sm:$0xff] %v8089_v42  ;;  %v8109_v51 = vpop.permute.xlu2 %3130  ;;  %v8113_v42 = vpop.permute.xlu0 %3132 }
 0x968   :  { %9788 = vst [vmem:[#allocation30_spill] sm:$0xff] %v8109_v51 }
 0x969   :  { %9790 = vst [vmem:[#allocation20_spill] sm:$0xff] %v8113_v42 }
 0x96c   :  { %3182 = vrot.lane.b32.xlu1 %v7736_v17, %s5227_s8 }
 0x96e   :  { %v8095_v40 = vpop.permute.xlu1 %3098 }
 0x96f   :  { %9783 = vst [vmem:[#allocation78_spill] sm:$0xff] %v8095_v40  ;;  %v8119_v40 = vpop.permute.xlu2 %3136  ;;  %v8121_v24 = vpop.permute.xlu0 %3138 }
 0x970   :  { %9792 = vst [vmem:[#allocation32_spill] sm:$0xff] %v8119_v40  ;;  %v3206_v40 = vrot.slane %v7770_v47, 6 }
 0x971   :  { %9793 = vst [vmem:[#allocation59_spill] sm:$0xff] %v8121_v24  ;;  %v3205_v24 = vsel %vm778_vm11, %v3204_v15, %v7683_v62  ;;  %v3210_v62 = vrot.slane %v7695_v12, 4 }
 0x974   :  { %3188 = vrot.lane.b32.xlu1 %v7700_v63, %s5227_s8 }
 0x976   :  { %v8103_v29 = vpop.permute.xlu1 %3104 }
 0x977   :  { %9786 = vst [vmem:[#allocation42_spill] sm:$0xff] %v8103_v29  ;;  %v8125_v61 = vpop.permute.xlu2 %3142  ;;  %v8129_v51 = vpop.permute.xlu0 %3144 }
 0x978   :  { %9796 = vst [vmem:[#allocation31_spill] sm:$0xff] %v8129_v51 }
 0x97c   :  { %3194 = vrot.lane.b32.xlu1 %v7801_v27, %s5227_s8 }
 0x97e   :  { %v8111_v43 = vpop.permute.xlu1 %3110 }
 0x97f   :  { %9789 = vst [vmem:[#allocation23_spill] sm:$0xff] %v8111_v43  ;;  %v8131_v43 = vpop.permute.xlu2 %3148  ;;  %v8138_v60 = vpop.permute.xlu0 %3150 }
 0x980   :  { %9797 = vst [vmem:[#allocation19_spill] sm:$0xff] %v8131_v43 }
 0x981   :  { %9799 = vst [vmem:[#allocation50_spill] sm:$0xff] %v8138_v60 }
 0x984   :  { %3200 = vrot.lane.b32.xlu1 %v7809_v50, %s5227_s8 }
 0x986   :  { %v8117_v10 = vpop.permute.xlu1 %3116 }
 0x987   :  { %9791 = vst [vmem:[#allocation45_spill] sm:$0xff] %v8117_v10  ;;  %v3316_v10 = vrot.slane %v7793_v1, 7  ;;  %v8145_v51 = vpop.permute.xlu2 %3154  ;;  %v3320_v1 = vrot.slane %v7801_v27, 5  ;;  %v3232_v27 = vrot.slane %v7993_v13, 7  ;;  %v3330_v13 = vrot.slane %v7959_v58, 7 }
 0x98e   :  { %v8123_v29 = vpop.permute.xlu1 %3122 }
 0x98f   :  { %9794 = vst [vmem:[#allocation79_spill] sm:$0xff] %v8123_v29  ;;  %v3318_v29 = vrot.slane %v7747_v36, 6 }
 0x996   :  { %v8127_v22 = vpop.permute.xlu1 %3128 }
 0x997   :  { %9795 = vst [vmem:[#allocation52_spill] sm:$0xff] %v8127_v22  ;;  %v3317_v22 = vsel %vm778_vm11, %v3316_v10, %v7700_v63  ;;  %v3322_v63 = vrot.slane %v7702_v5, 4  ;;  %v8158_v10 = vpop.permute.xlu0 %3156  ;;  %v3214_v5 = vrot.slane %v7784_v7, 2  ;;  %v3234_v7 = vrot.slane %v7913_v32, 6 }
 0x998   :  { %v3319_v47 = vsel %vm781_vm12, %v3318_v29, %v3317_v22  ;;  %v3324_v29 = vrot.slane %v7760_v59, 3 }
 0x999   :  { %v3321_v36 = vsel %vm784_vm13, %v3320_v1, %v3319_v47  ;;  %v3222_v47 = vrot.slane %v7935_v49, 5  ;;  %v3233_v1 = vsel %vm778_vm11, %v3232_v27, %v7841_v23 }
 0x99a   :  { %v3323_v57 = vsel %vm787_vm14, %v3322_v63, %v3321_v36  ;;  %v3216_v36 = vrot.slane %v7758_v46, 1  ;;  %v3235_v49 = vsel %vm781_vm12, %v3234_v7, %v3233_v1  ;;  %v3236_v46 = vrot.slane %v7925_v28, 5 }
 0x99b   :  { %v3238_v28 = vrot.slane %v7865_v45, 4  ;;  %v3344_v45 = vrot.slane %v7949_v20, 7  ;;  %v3230_v20 = vrot.slane %v7881_v39, 1 }
 0x99e   :  { %v8133_v42 = vpop.permute.xlu1 %3134 }
 0x99f   :  { %9798 = vst [vmem:[#allocation25_spill] sm:$0xff] %v8133_v42  ;;  %v3207_v42 = vsel %vm781_vm12, %v3206_v40, %v3205_v24  ;;  %v3212_v24 = vrot.slane %v7736_v17, 3  ;;  %v3218_v40 = vrot.slane %v7911_v0, 7  ;;  %v3326_v17 = vrot.slane %v7809_v50, 2  ;;  %v8193_v63 = vpop.permute.xlu0 %3162 }
 0x9a0   :  { %v3209_v60 = vsel %vm784_vm13, %v3208_v52, %v3207_v42  ;;  %v8167_v42 = vpop.permute.xlu2 %3160  ;;  %v3220_v52 = vrot.slane %v7923_v41, 6  ;;  %v3328_v0 = vrot.slane %v7774_v16, 1 }
 0x9a1   :  { %v3211_v15 = vsel %vm787_vm14, %v3210_v62, %v3209_v60  ;;  %v3325_v60 = vsel %vm790_vm15, %v3324_v29, %v3323_v57  ;;  %v3219_v50 = vsel %vm778_vm11, %v3218_v40, %v7831_v14  ;;  %v3331_v14 = vsel %vm778_vm11, %v3330_v13, %v7853_v31 }
 0x9a2   :  { %v3213_v12 = vsel %vm790_vm15, %v3212_v24, %v3211_v15  ;;  %v3327_v62 = vsel %vm793_vm0, %v3326_v17, %v3325_v60  ;;  %v3221_v41 = vsel %vm781_vm12, %v3220_v52, %v3219_v50  ;;  %v3334_v15 = vrot.slane %v7969_v11, 5 }
 0x9a3   :  { %v3215_v59 = vsel %vm793_vm0, %v3214_v5, %v3213_v12  ;;  %v8191_v23 = vsel %vm796_vm1, %v3328_v0, %v3327_v62  ;;  %v3223_v16 = vsel %vm784_vm13, %v3222_v47, %v3221_v41  ;;  %v3224_v24 = vrot.slane %v7843_v35, 4 }
 0x9a4   :  { %v8188_v58 = vsel %vm796_vm1, %v3216_v36, %v3215_v59  ;;  %v3332_v57 = vrot.slane %v7903_v9, 6  ;;  %v3237_v29 = vsel %vm784_vm13, %v3236_v46, %v3235_v49  ;;  %v3558_v12 = vrot.slane %v8191_v23, 4 }
 0x9a5   :  { %v3446_v27 = vrot.slane %v8188_v58, 4  ;;  %v3225_v60 = vsel %vm787_vm14, %v3224_v24, %v3223_v16  ;;  %v3228_v31 = vrot.slane %v7947_v48, 2  ;;  %v3336_v35 = vrot.slane %v7823_v6, 4 }
 0x9a6   :  { %v8148_v43 = vpop.permute.xlu1 %3140  ;;  %v3333_v11 = vsel %vm781_vm12, %v3332_v57, %v3331_v14  ;;  %v3252_v9 = vrot.slane %v7845_v38, 4  ;;  %v3226_v40 = vrot.slane %v7891_v44, 3  ;;  %v3350_v52 = vrot.slane %v7857_v54, 4  ;;  %v9801_v57 = vld [vmem:[#allocation34_spill] sm:$0xff] }
 0x9a7   :  { %v3335_v17 = vsel %vm784_vm13, %v3334_v15, %v3333_v11  ;;  %v3246_v59 = vrot.slane %v7971_v8, 7  ;;  %v3239_v47 = vsel %vm787_vm14, %v3238_v28, %v3237_v29  ;;  %v3240_v48 = vrot.slane %v7927_v53, 3  ;;  %v9800_v15 = vld [vmem:[#allocation26_spill] sm:$0xff] }
 0x9a8   :  { %v8207_v5 = vpop.permute.xlu2 %3166  ;;  %v3227_v13 = vsel %vm790_vm15, %v3226_v40, %v3225_v60  ;;  %v3248_v6 = vrot.slane %v7973_v19, 6  ;;  %v3346_v38 = vrot.slane %v8017_v21, 6  ;;  %v3337_v1 = vsel %vm787_vm14, %v3336_v35, %v3335_v17  ;;  %v9802_v60 = vld [vmem:[#allocation65_spill] sm:$0xff] }
 0x9a9   :  { %v3229_v44 = vsel %vm793_vm0, %v3228_v31, %v3227_v13  ;;  %v3340_v54 = vrot.slane %v7981_v25, 2  ;;  %v3250_v8 = vrot.slane %v8039_v26, 5  ;;  %v3338_v53 = vrot.slane %v7915_v4, 3  ;;  %v8241_v25 = vpop.permute.xlu0 %3168  ;;  %v9804_v17 = vld [vmem:[#allocation73_spill] sm:$0xff]  ;;  %v9806_v13 = vld [vmem:[#allocation22_spill] sm:$0xff] }
 0x9aa   :  { %v3241_v7 = vsel %vm790_vm15, %v3240_v48, %v3239_v47  ;;  %v3244_v19 = vrot.slane %v8005_v56, 1  ;;  %v3348_v21 = vrot.slane %v7939_v30, 5  ;;  %v3242_v36 = vrot.slane %v7937_v55, 2 }
 0x9ab   :  { %v3247_v0 = vsel %vm778_vm11, %v3246_v59, %v7877_v18  ;;  %v3345_v26 = vsel %vm778_vm11, %v3344_v45, %v7833_v3  ;;  %v8244_v39 = vsel %vm796_vm1, %v3230_v20, %v3229_v44  ;;  %v3339_v50 = vsel %vm790_vm15, %v3338_v53, %v3337_v1  ;;  %v9805_v45 = vld [vmem:[#allocation49_spill] sm:$0xff]  ;;  %v9807_v44 = vld [vmem:[#allocation43_spill] sm:$0xff]  ;;  %v9809_v53 = vld [vmem:[#allocation64_spill] sm:$0xff] }
 0x9ac   :  { %v3249_v4 = vsel %vm781_vm12, %v3248_v6, %v3247_v0  ;;  %v3347_v56 = vsel %vm781_vm12, %v3346_v38, %v3345_v26  ;;  %v3341_v30 = vsel %vm793_vm0, %v3340_v54, %v3339_v50  ;;  %v3243_v55 = vsel %vm793_vm0, %v3242_v36, %v3241_v7  ;;  %v9808_v54 = vld [vmem:[#allocation37_spill] sm:$0xff]  ;;  %v9810_v0 = vld [vmem:[#allocation60_spill] sm:$0xff] }
 0x9ad   :  { %v3251_v18 = vsel %vm784_vm13, %v3250_v8, %v3249_v4  ;;  %v3358_v41 = vrot.slane %v8061_v34, 7  ;;  %v3378_v3 = vrot.slane %v7869_v37, 4  ;;  %v3266_v49 = vrot.slane %v7879_v2, 4 }
 0x9ae   :  { %v8163_v22 = vpop.permute.xlu1 %3146  ;;  %v3342_v46 = vrot.slane %v7895_v33, 1  ;;  %v3245_v16 = vsel %vm796_vm1, %v3244_v19, %v3243_v55  ;;  %v3364_v24 = vrot.slane %v9800_v15, 4  ;;  %v3354_v29 = vrot.slane %v9801_v57, 2  ;;  %v9803_v33 = vld [vmem:[#allocation57_spill] sm:$0xff]  ;;  %v9814_v15 = vld [vmem:[#allocation67_spill] sm:$0xff] }
 0x9af   :  { %v3349_v28 = vsel %vm784_vm13, %v3348_v21, %v3347_v56  ;;  %v3352_v31 = vrot.slane %v9802_v60, 3  ;;  %v3458_v34 = vrot.slane %v8244_v39, 4  ;;  %v3253_v35 = vsel %vm787_vm14, %v3252_v9, %v3251_v18  ;;  %v9812_v55 = vld [vmem:[#allocation69_spill] sm:$0xff] }
 0x9b0   :  { %v8257_v14 = vpop.permute.xlu2 %3172  ;;  %v8265_v11 = vsel %vm796_vm1, %v3342_v46, %v3341_v30  ;;  %v3256_v40 = vrot.slane %v9803_v33, 2  ;;  %v3258_v59 = vrot.slane %v9804_v17, 1  ;;  %v3254_v47 = vrot.slane %v9805_v45, 3  ;;  %v9811_v30 = vld [vmem:[#allocation54_spill] sm:$0xff]  ;;  %v9817_v45 = vld [vmem:[#allocation68_spill] sm:$0xff] }
 0x9b1   :  { %v3444_v48 = vrot.slane %v3245_v16, 4  ;;  %v3359_v6 = vsel %vm778_vm11, %v3358_v41, %v9806_v13  ;;  %v3356_v1 = vrot.slane %v9807_v44, 1  ;;  %v3360_v8 = vrot.slane %v9808_v54, 6  ;;  %v9813_v41 = vld [vmem:[#allocation44_spill] sm:$0xff]  ;;  %v9815_v33 = vld [vmem:[#allocation66_spill] sm:$0xff] }
 0x9b2   :  { %v3447_v20 = vsel %vm1025_vm2, %v3245_v16, %v3446_v27  ;;  %v3351_v9 = vsel %vm787_vm14, %v3350_v52, %v3349_v28  ;;  %v3366_v7 = vrot.slane %v9809_v53, 3  ;;  %v3570_v19 = vrot.slane %v8265_v11, 4  ;;  %v8294_v16 = vpop.permute.xlu0 %3174  ;;  %v9821_v53 = vld [vmem:[#allocation24_spill] sm:$0xff] }
 0x9b3   :  { %v3353_v21 = vsel %vm790_vm15, %v3352_v31, %v3351_v9  ;;  %v3255_v36 = vsel %vm790_vm15, %v3254_v47, %v3253_v35  ;;  %v3264_v26 = vrot.slane %v9810_v0, 5  ;;  %v3361_v50 = vsel %vm781_vm12, %v3360_v8, %v3359_v6 }
 0x9b4   :  { %v3257_v4 = vsel %vm793_vm0, %v3256_v40, %v3255_v36  ;;  %v3288_v56 = vrot.slane %v8125_v61, 7  ;;  %v3362_v27 = vrot.slane %v9811_v30, 5  ;;  %v3372_v52 = vrot.slane %v9812_v55, 7  ;;  %v9816_v40 = vld [vmem:[#allocation31_spill] sm:$0xff]  ;;  %v9823_v30 = vld [vmem:[#allocation70_spill] sm:$0xff] }
 0x9b5   :  { %v3445_v18 = vsel %vm1025_vm2, %v3444_v48, %v8188_v58  ;;  %v8292_v46 = vperm.slane %v3447_v20, %v9813_v41  ;;  %v3260_v57 = vrot.slane %v9814_v15, 7  ;;  %v3355_v28 = vsel %vm793_vm0, %v3354_v29, %v3353_v21  ;;  %v9818_v48 = vld [vmem:[#allocation61_spill] sm:$0xff]  ;;  %v9819_v29 = vld [vmem:[#allocation23_spill] sm:$0xff] }
 0x9b6   :  { %v8195_v32 = vpop.permute.xlu1 %3152  ;;  %v3289_v60 = vsel %vm778_vm11, %v3288_v56, %v8148_v43  ;;  %v3292_v61 = vrot.slane %v8163_v22, 5  ;;  %v3259_v31 = vsel %vm796_vm1, %v3258_v59, %v3257_v4  ;;  %v3363_v35 = vsel %vm784_vm13, %v3362_v27, %v3361_v50  ;;  %v9820_v22 = vld [vmem:[#allocation27_spill] sm:$0xff] }
 0x9b7   :  { %v3262_v58 = vrot.slane %v9815_v33, 6  ;;  %v3290_v17 = vrot.slane %v9816_v40, 6  ;;  %v3270_v47 = vrot.slane %v9817_v45, 2  ;;  %v3368_v13 = vrot.slane %v9818_v48, 2  ;;  %v9822_v50 = vld [vmem:[#allocation39_spill] sm:$0xff] }
 0x9b8   :  { %v8308_v6 = vperm.slane %v3445_v18, %v9813_v41  ;;  %v3274_v44 = vrot.slane %v9819_v29, 7  ;;  %v8311_v43 = vpop.permute.xlu2 %3178  ;;  %v3373_v59 = vsel %vm778_vm11, %v3372_v52, %v9820_v22  ;;  %v3506_v54 = vrot.slane %v8292_v46, 4  ;;  %v9824_v55 = vld [vmem:[#allocation19_spill] sm:$0xff]  ;;  %v9825_v18 = vld [vmem:[#allocation74_spill] sm:$0xff] }
 0x9b9   :  { %v8317_v8 = vsel %vm796_vm1, %v3356_v1, %v3355_v28  ;;  %v3291_v20 = vsel %vm781_vm12, %v3290_v17, %v3289_v60  ;;  %v3261_v21 = vsel %vm778_vm11, %v3260_v57, %v9821_v53  ;;  %v3456_v36 = vrot.slane %v3259_v31, 4  ;;  %v9826_v57 = vld [vmem:[#allocation41_spill] sm:$0xff]  ;;  %v9829_v29 = vld [vmem:[#allocation50_spill] sm:$0xff] }
 0x9ba   :  { %v3365_v0 = vsel %vm787_vm14, %v3364_v24, %v3363_v35  ;;  %v3293_v4 = vsel %vm784_vm13, %v3292_v61, %v3291_v20  ;;  %v3384_v56 = vrot.slane %v9822_v50, 1  ;;  %v3272_v27 = vrot.slane %v9823_v30, 1  ;;  %v9827_v61 = vld [vmem:[#allocation72_spill] sm:$0xff]  ;;  %v9831_v53 = vld [vmem:[#allocation45_spill] sm:$0xff] }
 0x9bb   :  { %v3294_v52 = vrot.slane %v9824_v55, 4  ;;  %v3263_v1 = vsel %vm781_vm12, %v3262_v58, %v3261_v21  ;;  %v3276_v15 = vrot.slane %v9825_v18, 6  ;;  %v3556_v28 = vrot.slane %v8317_v8, 4  ;;  %v9828_v58 = vld [vmem:[#allocation63_spill] sm:$0xff] }
 0x9bc   :  { %v3459_v60 = vsel %vm1025_vm2, %v3259_v31, %v3458_v34  ;;  %v3275_v33 = vsel %vm778_vm11, %v3274_v44, %v9826_v57  ;;  %v3367_v24 = vsel %vm790_vm15, %v3366_v7, %v3365_v0  ;;  %v3370_v35 = vrot.slane %v9827_v61, 1  ;;  %v9830_v31 = vld [vmem:[#allocation71_spill] sm:$0xff]  ;;  %v3181_v0 = vpop.permute.xlu0 %3180 }
 0x9bd   :  { %v3295_v40 = vsel %vm787_vm14, %v3294_v52, %v3293_v4  ;;  %v3298_v17 = vrot.slane %v8195_v32, 2  ;;  %v3265_v45 = vsel %vm784_vm13, %v3264_v26, %v3263_v1  ;;  %v3268_v48 = vrot.slane %v9828_v58, 3  ;;  %v9832_v32 = vld [vmem:[#allocation58_spill] sm:$0xff] }
 0x9be   :  { %v8229_v62 = vpop.permute.xlu1 %3158  ;;  %v3296_v22 = vrot.slane %v9829_v29, 3  ;;  %v3457_v34 = vsel %vm1025_vm2, %v3456_v36, %v8244_v39  ;;  %v3374_v20 = vrot.slane %v9830_v31, 6  ;;  %v8346_v44 = vperm.slane %v3459_v60, %v9813_v41  ;;  %v9835_v31 = vld [vmem:[#allocation79_spill] sm:$0xff] }
 0x9bf   :  { %v3277_v7 = vsel %vm781_vm12, %v3276_v15, %v3275_v33  ;;  %v3280_v21 = vrot.slane %v9831_v53, 4  ;;  %v3278_v4 = vrot.slane %v9832_v32, 5  ;;  %v3369_v26 = vsel %vm793_vm0, %v3368_v13, %v3367_v24  ;;  %v9833_v24 = vld [vmem:[#allocation48_spill] sm:$0xff] }
 0x9c0   :  { %v3302_v30 = vrot.slane %v8294_v16, 7  ;;  %v3297_v55 = vsel %vm790_vm15, %v3296_v22, %v3295_v40  ;;  %v3371_v39 = vsel %vm796_vm1, %v3370_v35, %v3369_v26  ;;  %v3267_v36 = vsel %vm787_vm14, %v3266_v49, %v3265_v45  ;;  %v3185_v16 = vpop.permute.xlu2 %3184  ;;  %v9834_v35 = vld [vmem:[#allocation35_spill] sm:$0xff] }
 0x9c1   :  { %v3299_v52 = vsel %vm793_vm0, %v3298_v17, %v3297_v55  ;;  %v3463_v18 = vperm.slane %v3457_v34, %v9813_v41  ;;  %v3300_v15 = vrot.slane %v8145_v51, 1  ;;  %v3269_v60 = vsel %vm790_vm15, %v3268_v48, %v3267_v36 }
 0x9c2   :  { %v3279_v13 = vsel %vm784_vm13, %v3278_v4, %v3277_v7  ;;  %v3375_v33 = vsel %vm781_vm12, %v3374_v20, %v3373_v59  ;;  %v3282_v61 = vrot.slane %v9833_v24, 3  ;;  %v3494_v49 = vrot.slane %v8308_v6, 4 }
 0x9c3   :  { %v3281_v2 = vsel %vm787_vm14, %v3280_v21, %v3279_v13  ;;  %v3380_v40 = vrot.slane %v9834_v35, 3  ;;  %v3568_v17 = vrot.slane %v3371_v39, 4  ;;  %v3303_v51 = vsel %vm778_vm11, %v3302_v30, %v8257_v14  ;;  %v9836_v14 = vld [vmem:[#allocation30_spill] sm:$0xff]  ;;  %v9837_v21 = vld [vmem:[#allocation40_spill] sm:$0xff] }
 0x9c4   :  { %v3301_v45 = vsel %vm796_vm1, %v3300_v15, %v3299_v52  ;;  %v3271_v58 = vsel %vm793_vm0, %v3270_v47, %v3269_v60  ;;  %v3504_v59 = vrot.slane %v8346_v44, 4  ;;  %v8376_v29 = vsel %vm1025_vm2, %v3556_v28, %v8191_v23  ;;  %v3187_v52 = vpop.permute.xlu0 %3186 }
 0x9c5   :  { %v3306_v22 = vrot.slane %v8311_v43, 5  ;;  %v3283_v34 = vsel %vm790_vm15, %v3282_v61, %v3281_v2  ;;  %v3286_v20 = vrot.slane %v9835_v31, 1  ;;  %v3492_v7 = vrot.slane %v3463_v18, 4  ;;  %v9839_v61 = vld [vmem:[#allocation78_spill] sm:$0xff] }
 0x9c6   :  { %v8273_v38 = vpop.permute.xlu1 %3164  ;;  %v3390_v53 = vrot.slane %v9836_v14, 5  ;;  %v3284_v32 = vrot.slane %v9837_v21, 2  ;;  %v8386_v47 = vsel %vm1025_vm2, %v3371_v39, %v3570_v19  ;;  %v3468_v4 = vrot.slane %v3301_v45, 4  ;;  %v9838_v39 = vld [vmem:[#allocation53_spill] sm:$0xff]  ;;  %v9846_v14 = vld [vmem:[#allocation42_spill] sm:$0xff] }
 0x9c7   :  { %v8390_v28 = vsel %vm1025_vm2, %v3568_v17, %v8265_v11  ;;  %v3273_v43 = vsel %vm796_vm1, %v3272_v27, %v3271_v58  ;;  %v3400_v26 = vrot.slane %v8229_v62, 7  ;;  %v3308_v36 = vrot.slane %v3181_v0, 4 }
 0x9c8   :  { %v3285_v55 = vsel %vm793_vm0, %v3284_v32, %v3283_v34  ;;  %v3495_v15 = vsel %vm1025_vm2, %v3463_v18, %v3494_v49  ;;  %v3505_v19 = vsel %vm1025_vm2, %v3504_v59, %v8292_v46  ;;  %v3386_v60 = vrot.slane %v9838_v39, 7  ;;  %v3191_v18 = vpop.permute.xlu2 %3190  ;;  %v9840_v59 = vld [vmem:[#allocation52_spill] sm:$0xff] }
 0x9c9   :  { %v3287_v11 = vsel %vm796_vm1, %v3286_v20, %v3285_v55  ;;  %v3493_v62 = vsel %vm1025_vm2, %v3492_v7, %v8308_v6  ;;  %v3470_v27 = vrot.slane %v3273_v43, 4  ;;  %v3469_v24 = vsel %vm1025_vm2, %v3468_v4, %v3273_v43  ;;  %v9841_v20 = vld [vmem:[#allocation46_spill] sm:$0xff]  ;;  %v9842_v4 = vld [vmem:[#allocation32_spill] sm:$0xff] }
 0x9ca   :  { %v3376_v2 = vrot.slane %v9839_v61, 5  ;;  %v3314_v49 = vrot.slane %v3187_v52, 1  ;;  %v3401_v17 = vsel %vm778_vm11, %v3400_v26, %v8158_v10  ;;  %v3402_v58 = vrot.slane %v8167_v42, 6  ;;  %v9843_v26 = vld [vmem:[#allocation36_spill] sm:$0xff] }
 0x9cb   :  { %v3388_v6 = vrot.slane %v9840_v59, 6  ;;  %v3475_v34 = vperm.slane %v3469_v24, %v9813_v41  ;;  %v3499_v7 = vperm.slane %v3493_v62, %v9841_v20  ;;  %v3406_v10 = vrot.slane %v8273_v38, 4  ;;  %v9845_v59 = vld [vmem:[#allocation25_spill] sm:$0xff] }
 0x9cc   :  { %v3403_v21 = vsel %vm781_vm12, %v3402_v58, %v3401_v17  ;;  %v3396_v43 = vrot.slane %v9842_v4, 2  ;;  %v3511_v24 = vperm.slane %v3505_v19, %v9841_v20  ;;  %v3193_v61 = vpop.permute.xlu0 %3192  ;;  %v9844_v17 = vld [vmem:[#allocation20_spill] sm:$0xff] }
 0x9ce   :  { %v8320_v9 = vpop.permute.xlu1 %3170 }
 0x9d6   :  { %v3177_v1 = vpop.permute.xlu1 %3176 }
 0x9d7   :  { %v3304_v57 = vrot.slane %v3177_v1, 6 }
 0x9d9   :  { %v3305_v48 = vsel %vm781_vm12, %v3304_v57, %v3303_v51  ;;  %v3312_v57 = vrot.slane %v3185_v16, 2 }
 0x9da   :  { %v3307_v30 = vsel %vm784_vm13, %v3306_v22, %v3305_v48  ;;  %v3482_v48 = vrot.slane %v3287_v11, 4  ;;  %v3471_v22 = vsel %vm1025_vm2, %v3301_v45, %v3470_v27  ;;  %v3404_v45 = vrot.slane %v8193_v63, 5 }
 0x9db   :  { %v3309_v0 = vsel %vm787_vm14, %v3308_v36, %v3307_v30  ;;  %v3387_v30 = vsel %vm778_vm11, %v3386_v60, %v9843_v26  ;;  %v3377_v36 = vsel %vm784_vm13, %v3376_v2, %v3375_v33  ;;  %v3518_v60 = vrot.slane %v3475_v34, 4 }
 0x9dc   :  { %v3389_v52 = vsel %vm781_vm12, %v3388_v6, %v3387_v30  ;;  %v3542_v33 = vrot.slane %v3499_v7, 4  ;;  %v3379_v58 = vsel %vm787_vm14, %v3378_v3, %v3377_v36  ;;  %v3394_v6 = vrot.slane %v9845_v59, 3 }
 0x9de   :  { %v3183_v1 = vpop.permute.xlu1 %3182 }
 0x9df   :  { %v3310_v13 = vrot.slane %v3183_v1, 3  ;;  %v8429_v1 = vperm.slane %v3471_v22, %v9813_v41 }
 0x9e1   :  { %v3311_v51 = vsel %vm790_vm15, %v3310_v13, %v3309_v0  ;;  %v3405_v13 = vsel %vm784_vm13, %v3404_v45, %v3403_v21  ;;  %v3408_v0 = vrot.slane %v8207_v5, 3  ;;  %v3414_v5 = vrot.slane %v3191_v18, 7 }
 0x9e2   :  { %v3313_v16 = vsel %vm793_vm0, %v3312_v57, %v3311_v51  ;;  %v3407_v27 = vsel %vm787_vm14, %v3406_v10, %v3405_v13  ;;  %v8437_v57 = vperm.slane %v3495_v15, %v9841_v20  ;;  %v3392_v51 = vrot.slane %v9844_v17, 4  ;;  %v9847_v17 = vld [vmem:[#allocation59_spill] sm:$0xff] }
 0x9e3   :  { %v3315_v31 = vsel %vm796_vm1, %v3314_v49, %v3313_v16  ;;  %v3391_v15 = vsel %vm784_vm13, %v3390_v53, %v3389_v52  ;;  %v3409_v16 = vsel %vm790_vm15, %v3408_v0, %v3407_v27  ;;  %v3382_v10 = vrot.slane %v9846_v14, 2 }
 0x9e4   :  { %v3480_v32 = vrot.slane %v3315_v31, 4  ;;  %v3483_v42 = vsel %vm1025_vm2, %v3315_v31, %v3482_v48  ;;  %v3197_v48 = vpop.permute.xlu2 %3196  ;;  %v3412_v31 = vrot.slane %v8320_v9, 1  ;;  %v3410_v53 = vrot.slane %v8241_v25, 2 }
 0x9e5   :  { %v8424_v55 = vperm.slane %v3483_v42, %v9813_v41  ;;  %v3393_v18 = vsel %vm787_vm14, %v3392_v51, %v3391_v15  ;;  %v3420_v35 = vrot.slane %v3197_v48, 4  ;;  %v3398_v51 = vrot.slane %v9847_v17, 1 }
 0x9e6   :  { %v3189_v38 = vpop.permute.xlu1 %3188  ;;  %v3481_v39 = vsel %vm1025_vm2, %v3480_v32, %v3287_v11  ;;  %v3416_v32 = vrot.slane %v3193_v61, 6  ;;  %v3411_v45 = vsel %vm793_vm0, %v3410_v53, %v3409_v16  ;;  %v3395_v25 = vsel %vm790_vm15, %v3394_v6, %v3393_v18 }
 0x9e7   :  { %v3487_v62 = vperm.slane %v3481_v39, %v9813_v41  ;;  %v3528_v63 = vrot.slane %v8424_v55, 4  ;;  %v3415_v42 = vsel %vm778_vm11, %v3414_v5, %v3189_v38  ;;  %v8470_v13 = vsel %vm796_vm1, %v3412_v31, %v3411_v45 }
 0x9e8   :  { %v3546_v15 = vrot.slane %v8437_v57, 4 }
 0x9e9   :  { %v3519_v11 = vsel %vm1025_vm2, %v3487_v62, %v3518_v60  ;;  %v3516_v2 = vrot.slane %v3487_v62, 4  ;;  %v3529_v49 = vsel %vm1025_vm2, %v3528_v63, %v8429_v1  ;;  %v3381_v60 = vsel %vm790_vm15, %v3380_v40, %v3379_v58 }
 0x9ea   :  { %v3527_v19 = vperm.slane %v3519_v11, %v9841_v20  ;;  %v3535_v3 = vperm.slane %v3529_v49, %v9841_v20  ;;  %v3417_v63 = vsel %vm781_vm12, %v3416_v32, %v3415_v42  ;;  %v3383_v0 = vsel %vm793_vm0, %v3382_v10, %v3381_v60 }
 0x9eb   :  { %v3517_v22 = vsel %vm1025_vm2, %v3516_v2, %v3475_v34  ;;  %v3550_v11 = vrot.slane %v3511_v24, 4  ;;  %v3397_v40 = vsel %vm793_vm0, %v3396_v43, %v3395_v25  ;;  %v3199_v2 = vpop.permute.xlu0 %3198  ;;  %v3580_v49 = vrot.slane %v8470_v13, 4 }
 0x9ec   :  { %v3544_v21 = vrot.slane %v3527_v19, 4  ;;  %v3523_v37 = vperm.slane %v3517_v22, %v9841_v20  ;;  %v3548_v62 = vrot.slane %v3535_v3, 4  ;;  %v3399_v5 = vsel %vm796_vm1, %v3398_v51, %v3397_v40 }
 0x9ed   :  { %v3551_v46 = vsel %vm1025_vm2, %v3535_v3, %v3550_v11  ;;  %v3422_v48 = vrot.slane %v3199_v2, 3  ;;  %v3547_v59 = vsel %vm1025_vm2, %v3527_v19, %v3546_v15  ;;  %v8510_v22 = vperm.slane %v8386_v47, %v9813_v41 }
 0x9ee   :  { %v3195_v26 = vpop.permute.xlu1 %3194  ;;  %v3545_v34 = vsel %vm1025_vm2, %v3544_v21, %v8437_v57  ;;  %v3543_v9 = vsel %vm1025_vm2, %v3523_v37, %v3542_v33  ;;  %v3540_v30 = vrot.slane %v3523_v37, 4  ;;  %v3530_v33 = vrot.slane %v8429_v1, 4 }
 0x9ef   :  { %v3418_v36 = vrot.slane %v3195_v26, 5  ;;  %v3674_v52 = vsel %vm1249_vm4, %v3545_v34, -inf  ;;  %v3671_v39 = vsel %vm1249_vm4, %v3543_v9, -inf  ;;  %v3549_v58 = vsel %vm1025_vm2, %v3548_v62, %v3511_v24 }
 0x9f0   :  { %3675 = vmax.xlane.f32.xlu2 %v3674_v52  ;;  %3672 = vmax.xlane.f32.xlu1 %v3671_v39  ;;  %v3541_v38 = vsel %vm1025_vm2, %v3540_v30, %v3499_v7  ;;  %v3507_v7 = vsel %vm1025_vm2, %v8346_v44, %v3506_v54  ;;  %v3531_v1 = vsel %vm1025_vm2, %v8424_v55, %v3530_v33  ;;  %v3203_v44 = vpop.permute.xlu2 %3202  ;;  %v3683_v16 = vsel %vm1249_vm4, %v3551_v46, -inf }
 0x9f1   :  { %v3668_v27 = vsel %vm1249_vm4, %v3541_v38, -inf  ;;  %v3419_v61 = vsel %vm784_vm13, %v3418_v36, %v3417_v63  ;;  %v3385_v54 = vsel %vm796_vm1, %v3384_v56, %v3383_v0  ;;  %v3515_v43 = vperm.slane %v3507_v7, %v9841_v20 }
 0x9f2   :  { %3669 = vmax.xlane.f32.xlu0 %v3668_v27  ;;  %v3421_v4 = vsel %vm787_vm14, %v3420_v35, %v3419_v61  ;;  %v3575_v55 = vperm.slane %v8390_v28, %v9813_v41  ;;  %v3539_v57 = vperm.slane %v3531_v1, %v9841_v20  ;;  %v3581_v50 = vsel %vm1025_vm2, %v3580_v49, %v3385_v54 }
 0x9f3   :  { %v3680_v56 = vsel %vm1249_vm4, %v3549_v58, -inf  ;;  %v3426_v28 = vrot.slane %v3203_v44, 1  ;;  %v3423_v31 = vsel %vm790_vm15, %v3422_v48, %v3421_v4  ;;  %v3563_v19 = vperm.slane %v8376_v29, %v9813_v41 }
 0x9f4   :  { %v3594_v21 = vrot.slane %v3399_v5, 4  ;;  %v3677_v3 = vsel %vm1249_vm4, %v3547_v59, -inf  ;;  %v3604_v14 = vrot.slane %v3575_v55, 4  ;;  %v3587_v10 = vperm.slane %v3581_v50, %v9813_v41 }
 0x9f5   :  { %v3554_v47 = vrot.slane %v3515_v43, 4  ;;  %v3552_v18 = vrot.slane %v3539_v57, 4  ;;  %v3559_v29 = vsel %vm1025_vm2, %v8317_v8, %v3558_v12  ;;  %v3582_v26 = vrot.slane %v3385_v54, 4 }
 0x9f6   :  { %v3201_v24 = vpop.permute.xlu1 %3200  ;;  %v3616_v30 = vrot.slane %v8510_v22, 4  ;;  %v3606_v36 = vrot.slane %v3563_v19, 4  ;;  %v3605_v52 = vsel %vm1025_vm2, %v3604_v14, %v3563_v19  ;;  %v3630_v12 = vrot.slane %v3587_v10, 4 }
 0x9f7   :  { %v3424_v6 = vrot.slane %v3201_v24, 2  ;;  %v3555_v9 = vsel %vm1025_vm2, %v3539_v57, %v3554_v47  ;;  %v3583_v39 = vsel %vm1025_vm2, %v8470_v13, %v3582_v26  ;;  %v3553_v23 = vsel %vm1025_vm2, %v3552_v18, %v3515_v43 }
 0x9f8   :  { %3681 = vmax.xlane.f32.xlu2 %v3680_v56  ;;  %3684 = vmax.xlane.f32.xlu1 %v3683_v16  ;;  %v3567_v8 = vperm.slane %v3559_v29, %v9813_v41  ;;  %v3689_v38 = vsel %vm1249_vm4, %v3555_v9, -inf  ;;  %v3607_v60 = vsel %vm1025_vm2, %v3575_v55, %v3606_v36  ;;  %v3611_v27 = vperm.slane %v3605_v52, %v9841_v20  ;;  %v8573_v29 = vld [vmem:[#allocation2 + $0x18] sm:$0xff] }
 0x9f9   :  { %v3425_v37 = vsel %vm793_vm0, %v3424_v6, %v3423_v31  ;;  %v3591_v13 = vperm.slane %v3583_v39, %v9813_v41  ;;  %v3686_v0 = vsel %vm1249_vm4, %v3553_v23, -inf  ;;  %v3615_v35 = vperm.slane %v3607_v60, %v9841_v20  ;;  %v8587_v39 = vld [vmem:[#allocation2 + $0x20] sm:$0xff] }
 0x9fa   :  { %v3427_v53 = vsel %vm796_vm1, %v3426_v28, %v3425_v37  ;;  %3678 = vmax.xlane.f32.xlu0 %v3677_v3  ;;  %v3617_v7 = vsel %vm1025_vm2, %v3616_v30, %v3567_v8  ;;  %v3654_v1 = vrot.slane %v3611_v27, 4  ;;  %v3618_v57 = vrot.slane %v3567_v8, 4  ;;  %v8579_v30 = vld [vmem:[#allocation2 + $0x8] sm:$0xff] }
 0x9fb   :  { %v3592_v32 = vrot.slane %v3427_v53, 4  ;;  %v3595_v42 = vsel %vm1025_vm2, %v3427_v53, %v3594_v21  ;;  %v3623_v15 = vperm.slane %v3617_v7, %v9841_v20  ;;  %v3642_v4 = vrot.slane %v3591_v13, 4  ;;  %v8593_v8 = vld [vmem:[#allocation2 + $0x9] sm:$0xff] }
 0x9fc   :  { %v3603_v34 = vperm.slane %v3595_v42, %v9813_v41  ;;  %v3658_v59 = vrot.slane %v3615_v35, 4  ;;  %v3619_v56 = vsel %vm1025_vm2, %v8510_v22, %v3618_v57  ;;  %v3778_v18 = vstv %s5030_s25 }
 0x9fd   :  { %v3593_v45 = vsel %vm1025_vm2, %v3592_v32, %v3399_v5  ;;  %v3662_v5 = vrot.slane %v3623_v15, 4  ;;  %v3627_v21 = vperm.slane %v3619_v56, %v9841_v20  ;;  %v8569_v32 = vld [vmem:[#allocation2] sm:$0xff]  ;;  %v3781_v26 = vmul.f32 %v8573_v29, %v3778_v18 }
 0x9fe   :  { %v3599_v25 = vperm.slane %v3593_v45, %v9813_v41  ;;  %v3640_v62 = vrot.slane %v3603_v34, 4  ;;  %v3643_v24 = vsel %vm1025_vm2, %v3603_v34, %v3642_v4  ;;  %v3779_v42 = vmul.f32 %v8569_v32, %v3778_v18 }
 0x9ff   :  { %v3651_v16 = vperm.slane %v3643_v24, %v9841_v20  ;;  %v3666_v14 = vrot.slane %v3627_v21, 4  ;;  %v3804_v34 = vstv %s5031_s26  ;;  %v3780_v45 = vmul.f32 %v8579_v30, %v3778_v18 }
 0xa00   :  { %3690 = vmax.xlane.f32.xlu2 %v3689_v38  ;;  %v3631_v63 = vsel %vm1025_vm2, %v3599_v25, %v3630_v12  ;;  %v3628_v33 = vrot.slane %v3599_v25, 4  ;;  %v3641_v49 = vsel %vm1025_vm2, %v3640_v62, %v3591_v13  ;;  %v3805_v9 = vmul.f32 %v8569_v32, %v3804_v34  ;;  %v8597_v62 = vld [vmem:[#allocation2 + $0x1] sm:$0xff] }
 0xa01   :  { %v3639_v61 = vperm.slane %v3631_v63, %v9841_v20  ;;  %v3647_v54 = vperm.slane %v3641_v49, %v9841_v20  ;;  %v3664_v3 = vrot.slane %v3651_v16, 4  ;;  %v3667_v22 = vsel %vm1025_vm2, %v3651_v16, %v3666_v14  ;;  %v8601_v63 = vld [vmem:[#allocation2 + $0x19] sm:$0xff] }
 0xa02   :  { %3687 = vmax.xlane.f32.xlu0 %v3686_v0  ;;  %v3629_v11 = vsel %vm1025_vm2, %v3628_v33, %v3587_v10  ;;  %v3713_v47 = vsel %vm1249_vm4, %v3667_v22, -inf  ;;  %v3806_v36 = vmul.f32 %v8579_v30, %v3804_v34  ;;  %v3807_v52 = vmul.f32 %v8573_v29, %v3804_v34 }
 0xa03   :  { %v3656_v40 = vrot.slane %v3639_v61, 4  ;;  %v3635_v2 = vperm.slane %v3629_v11, %v9841_v20  ;;  %v3660_v48 = vrot.slane %v3647_v54, 4  ;;  %v3663_v50 = vsel %vm1025_vm2, %v3647_v54, %v3662_v5  ;;  %v8631_v54 = vld [vmem:[#allocation2 + $0x22] sm:$0xff] }
 0xa04   :  { %v3659_v6 = vsel %vm1025_vm2, %v3639_v61, %v3658_v59  ;;  %v3707_v31 = vsel %vm1249_vm4, %v3663_v50, -inf  ;;  %v3665_v10 = vsel %vm1025_vm2, %v3664_v3, %v3627_v21  ;;  %v3782_v23 = vmul.f32 %v8587_v39, %v3778_v18  ;;  %v8609_v61 = vld [vmem:[#allocation2 + $0x21] sm:$0xff]  ;;  %v9848_v59 = vld [vmem:[#allocation47_spill] sm:$0xff] }
 0xa05   :  { %v3657_v17 = vsel %vm1025_vm2, %v3656_v40, %v3615_v35  ;;  %v3652_v51 = vrot.slane %v3635_v2, 4  ;;  %v3655_v46 = vsel %vm1025_vm2, %v3635_v2, %v3654_v1  ;;  %v3661_v28 = vsel %vm1025_vm2, %v3660_v48, %v3623_v15  ;;  %v8617_v2 = vld [vmem:[#allocation2 + $0x2] sm:$0xff]  ;;  %v8621_v1 = vld [vmem:[#allocation2 + $0x1a] sm:$0xff] }
 0xa06   :  { %v3698_v58 = vsel %vm1249_vm4, %v3657_v17, -inf  ;;  %v3695_v55 = vsel %vm1249_vm4, %v3655_v46, -inf  ;;  %v3701_v19 = vsel %vm1249_vm4, %v3659_v6, -inf  ;;  %v3704_v37 = vsel %vm1249_vm4, %v3661_v28, -inf }
 0xa07   :  { %v3653_v44 = vsel %vm1025_vm2, %v3652_v51, %v3611_v27  ;;  %v3710_v53 = vsel %vm1249_vm4, %v3665_v10, -inf  ;;  %v3808_v25 = vmul.f32 %v8587_v39, %v3804_v34  ;;  %v3840_v12 = vstv %s5033_s29  ;;  %v8625_v51 = vld [vmem:[#allocation2 + $0xa] sm:$0xff] }
 0xa08   :  { %3699 = vmax.xlane.f32.xlu2 %v3698_v58  ;;  %v3692_v43 = vsel %vm1249_vm4, %v3653_v44, -inf  ;;  %v3842_v38 = vmul.f32 %v8593_v8, %v3840_v12  ;;  %v3841_v60 = vmul.f32 %v8597_v62, %v3840_v12  ;;  %v3843_v27 = vmul.f32 %v8601_v63, %v3840_v12 }
 0xa09   :  { %3693 = vmax.xlane.f32.xlu1 %v3692_v43  ;;  %v3866_v33 = vstv %s5034_s9  ;;  %v3844_v11 = vmul.f32 %v8609_v61, %v3840_v12  ;;  %v3902_v40 = vstv %s5036_s10  ;;  %v3928_v46 = vstv %s5037_s11 }
 0xa0a   :  { %3696 = vmax.xlane.f32.xlu0 %v3695_v55  ;;  %v3868_v13 = vmul.f32 %v8593_v8, %v3866_v33  ;;  %v3867_v0 = vmul.f32 %v8597_v62, %v3866_v33  ;;  %v3870_v7 = vmul.f32 %v8609_v61, %v3866_v33  ;;  %v3869_v35 = vmul.f32 %v8601_v63, %v3866_v33 }
 0xa0b   :  { %v3903_v49 = vmul.f32 %v8617_v2, %v3902_v40  ;;  %v3905_v17 = vmul.f32 %v8621_v1, %v3902_v40  ;;  %v3904_v58 = vmul.f32 %v8625_v51, %v3902_v40  ;;  %v3929_v15 = vmul.f32 %v8617_v2, %v3928_v46 }
 0xa0c   :  { %v3906_v44 = vmul.f32 %v8631_v54, %v3902_v40  ;;  %v3930_v4 = vmul.f32 %v8625_v51, %v3928_v46  ;;  %v3931_v55 = vmul.f32 %v8621_v1, %v3928_v46  ;;  %v3932_v24 = vmul.f32 %v8631_v54, %v3928_v46 }
 0xa10   :  { %3708 = vmax.xlane.f32.xlu2 %v3707_v31 }
 0xa11   :  { %3702 = vmax.xlane.f32.xlu1 %v3701_v19 }
 0xa12   :  { %3705 = vmax.xlane.f32.xlu0 %v3704_v37 }
 0xa19   :  { %3711 = vmax.xlane.f32.xlu1 %v3710_v53 }
 0xa1a   :  { %3714 = vmax.xlane.f32.xlu0 %v3713_v47 }
 0xa28   :  { %3787 = vrot.lane.b32.xlu2 %v3779_v42, %s5220_s14 }
 0xa2e   :  { %3791 = vrot.lane.b32.xlu0 %v3781_v26, %s5220_s14 }
 0xa30   :  { %3813 = vrot.lane.b32.xlu2 %v3805_v9, %s5221_s16 }
 0xa32   :  { %3789 = vrot.lane.b32.xlu1 %v3780_v45, %s5220_s14 }
 0xa36   :  { %3815 = vrot.lane.b32.xlu0 %v3806_v36, %s5221_s16 }
 0xa38   :  { %3817 = vrot.lane.b32.xlu2 %v3807_v52, %s5221_s16 }
 0xa3a   :  { %3793 = vrot.lane.b32.xlu1 %v3782_v23, %s5220_s14 }
 0xa3e   :  { %3819 = vrot.lane.b32.xlu0 %v3808_v25, %s5221_s16 }
 0xa40   :  { %3851 = vrot.lane.b32.xlu2 %v3842_v38, %s5220_s14 }
 0xa42   :  { %3849 = vrot.lane.b32.xlu1 %v3841_v60, %s5220_s14 }
 0xa46   :  { %3853 = vrot.lane.b32.xlu0 %v3843_v27, %s5220_s14 }
 0xa48   :  { %3877 = vrot.lane.b32.xlu2 %v3868_v13, %s5221_s16 }
 0xa4a   :  { %3875 = vrot.lane.b32.xlu1 %v3867_v0, %s5221_s16 }
 0xa4e   :  { %3855 = vrot.lane.b32.xlu0 %v3844_v11, %s5220_s14 }
 0xa50   :  { %3881 = vrot.lane.b32.xlu2 %v3870_v7, %s5221_s16 }
 0xa52   :  { %3879 = vrot.lane.b32.xlu1 %v3869_v35, %s5221_s16 }
 0xa56   :  { %3911 = vrot.lane.b32.xlu0 %v3903_v49, %s5220_s14 }
 0xa58   :  { %3915 = vrot.lane.b32.xlu2 %v3905_v17, %s5220_s14 }
 0xa5a   :  { %3913 = vrot.lane.b32.xlu1 %v3904_v58, %s5220_s14 }
 0xa5e   :  { %3937 = vrot.lane.b32.xlu0 %v3929_v15, %s5221_s16 }
 0xa60   :  { %3917 = vrot.lane.b32.xlu2 %v3906_v44, %s5220_s14  ;;  %s5029_s14 = sld [smem:[#allocation8 + $0x1b]] }
 0xa62   :  { %3939 = vrot.lane.b32.xlu1 %v3930_v4, %s5221_s16 }
 0xa63   :  { %v3676_v43 = vpop.xlane.xlu2 %3675  ;;  %v3673_v48 = vpop.xlane.xlu1 %3672 }
 0xa64   :  { %v3733_v50 = vperm.slane %v3673_v48, %v9848_v59  ;;  %v3734_v28 = vperm.slane %v3676_v43, %v9848_v59  ;;  %v3830_v48 = vstv %s5032_s12 }
 0xa65   :  { %v3670_v5 = vpop.xlane.xlu0 %3669 }
 0xa66   :  { %3941 = vrot.lane.b32.xlu0 %v3931_v55, %s5221_s16  ;;  %v3732_v57 = vperm.slane %v3670_v5, %v9848_v59  ;;  %v3768_v44 = vstv %s5029_s14 }
 0xa67   :  { %v3769_v43 = vmul.f32 %v8569_v32, %v3768_v44 }
 0xa68   :  { %v3748_v56 = vsel %vm778_vm11, %v3733_v50, %v3732_v57  ;;  %v3831_v57 = vmul.f32 %v8597_v62, %v3830_v48  ;;  %v3832_v62 = vmul.f32 %v8593_v8, %v3830_v48 }
 0xa69   :  { %v3749_v19 = vsel %vm781_vm12, %v3734_v28, %v3748_v56 }
 0xa6a   :  { %3943 = vrot.lane.b32.xlu1 %v3932_v24, %s5221_s16 }
 0xa6b   :  { %v3682_v6 = vpop.xlane.xlu2 %3681  ;;  %v3685_v3 = vpop.xlane.xlu1 %3684 }
 0xa6c   :  { %v3736_v37 = vperm.slane %v3682_v6, %v9848_v59  ;;  %v3737_v22 = vperm.slane %v3685_v3, %v9848_v59  ;;  %v3770_v3 = vmul.f32 %v8579_v30, %v3768_v44 }
 0xa6d   :  { %v3679_v16 = vpop.xlane.xlu0 %3678 }
 0xa6e   :  { %v3735_v31 = vperm.slane %v3679_v16, %v9848_v59  ;;  %v3771_v16 = vmul.f32 %v8573_v29, %v3768_v44  ;;  %v3772_v29 = vmul.f32 %v8587_v39, %v3768_v44 }
 0xa70   :  { %v3750_v21 = vsel %vm784_vm13, %v3735_v31, %v3749_v19 }
 0xa71   :  { %v3751_v10 = vsel %vm787_vm14, %v3736_v37, %v3750_v21  ;;  %v3833_v21 = vmul.f32 %v8601_v63, %v3830_v48 }
 0xa72   :  { %v3752_v42 = vsel %vm790_vm15, %v3737_v22, %v3751_v10 }
 0xa73   :  { %v3691_v14 = vpop.xlane.xlu2 %3690 }
 0xa74   :  { %v3739_v18 = vperm.slane %v3691_v14, %v9848_v59 }
 0xa75   :  { %v3688_v53 = vpop.xlane.xlu0 %3687 }
 0xa76   :  { %v3738_v47 = vperm.slane %v3688_v53, %v9848_v59 }
 0xa78   :  { %v3753_v26 = vsel %vm793_vm0, %v3738_v47, %v3752_v42 }
 0xa79   :  { %v3754_v34 = vsel %vm796_vm1, %v3739_v18, %v3753_v26  ;;  %v3892_v26 = vstv %s5035_s13 }
 0xa7a   :  { %3765 = vst.msk [vmem:[#allocation13 + $0x10] sm:$0xff] %vm1348_vm5, %v3754_v34  ;;  %v3894_v63 = vmul.f32 %v8625_v51, %v3892_v26 }
 0xa7b   :  { %v3700_v9 = vpop.xlane.xlu2 %3699 }
 0xa7c   :  { %v3694_v45 = vpop.xlane.xlu1 %3693  ;;  %v3742_v60 = vperm.slane %v3700_v9, %v9848_v59 }
 0xa7d   :  { %v3697_v36 = vpop.xlane.xlu0 %3696  ;;  %v3740_v52 = vperm.slane %v3694_v45, %v9848_v59 }
 0xa7e   :  { %v3741_v23 = vperm.slane %v3697_v36, %v9848_v59 }
 0xa80   :  { %v3755_v12 = vsel %vm778_vm11, %v3741_v23, %v3740_v52  ;;  %v3834_v23 = vmul.f32 %v8609_v61, %v3830_v48  ;;  %v3895_v61 = vmul.f32 %v8621_v1, %v3892_v26 }
 0xa81   :  { %v3756_v13 = vsel %vm781_vm12, %v3742_v60, %v3755_v12 }
 0xa83   :  { %v3709_v25 = vpop.xlane.xlu2 %3708 }
 0xa84   :  { %v3703_v38 = vpop.xlane.xlu1 %3702  ;;  %v3745_v40 = vperm.slane %v3709_v25, %v9848_v59 }
 0xa85   :  { %v3743_v27 = vperm.slane %v3703_v38, %v9848_v59  ;;  %v3706_v33 = vpop.xlane.xlu0 %3705 }
 0xa86   :  { %v3744_v0 = vperm.slane %v3706_v33, %v9848_v59  ;;  %v3893_v33 = vmul.f32 %v8617_v2, %v3892_v26 }
 0xa87   :  { %v3757_v11 = vsel %vm784_vm13, %v3743_v27, %v3756_v13 }
 0xa88   :  { %v3758_v7 = vsel %vm787_vm14, %v3744_v0, %v3757_v11 }
 0xa89   :  { %v3759_v46 = vsel %vm790_vm15, %v3745_v40, %v3758_v7 }
 0xa8b   :  { %v3788_v35 = vpop.permute.xlu2 %3787 }
 0xa8c   :  { %v3712_v49 = vpop.xlane.xlu1 %3711  ;;  %v3799_v5 = vadd.f32 %v3788_v35, %v3769_v43  ;;  %v3896_v35 = vmul.f32 %v8631_v54, %v3892_v26 }
 0xa8d   :  { %v3746_v17 = vperm.slane %v3712_v49, %v9848_v59  ;;  %v3715_v58 = vpop.xlane.xlu0 %3714 }
 0xa8e   :  { %v3747_v15 = vperm.slane %v3715_v58, %v9848_v59 }
 0xa8f   :  { %v3760_v4 = vsel %vm793_vm0, %v3746_v17, %v3759_v46 }
 0xa90   :  { %v3761_v55 = vsel %vm796_vm1, %v3747_v15, %v3760_v4 }
 0xa91   :  { %3766 = vst.msk [vmem:[#allocation13 + $0x30] sm:$0xff] %vm1348_vm5, %v3761_v55 }
 0xa93   :  { %v3814_v24 = vpop.permute.xlu2 %3813 }
 0xa94   :  { %v3825_v50 = vadd.f32 %v3814_v24, %v3799_v5  ;;  %v3954_v24 = vstv %s5038_s1 }
 0xa96   :  { %v3835_v6 = vadd.f32 %v3831_v57, %v3825_v50 }
 0xa9b   :  { %v3818_v56 = vpop.permute.xlu2 %3817 }
 0xaa0   :  { %v3792_v28 = vpop.permute.xlu0 %3791 }
 0xaa1   :  { %v3801_v31 = vadd.f32 %v3792_v28, %v3771_v16 }
 0xaa3   :  { %v3827_v19 = vadd.f32 %v3818_v56, %v3801_v31  ;;  %v3852_v32 = vpop.permute.xlu2 %3851 }
 0xaa4   :  { %v3790_v37 = vpop.permute.xlu1 %3789 }
 0xaa5   :  { %v3837_v14 = vadd.f32 %v3833_v21, %v3827_v19  ;;  %v3800_v10 = vadd.f32 %v3790_v37, %v3770_v3 }
 0xaa8   :  { %v3816_v22 = vpop.permute.xlu0 %3815 }
 0xaa9   :  { %v3826_v53 = vadd.f32 %v3816_v22, %v3800_v10 }
 0xaab   :  { %v3836_v47 = vadd.f32 %v3832_v62, %v3826_v53  ;;  %v3878_v34 = vpop.permute.xlu2 %3877 }
 0xaac   :  { %v3794_v18 = vpop.permute.xlu1 %3793 }
 0xaad   :  { %v3862_v42 = vadd.f32 %v3852_v32, %v3836_v47  ;;  %v3802_v45 = vadd.f32 %v3794_v18, %v3772_v29 }
 0xaaf   :  { %v3888_v9 = vadd.f32 %v3878_v34, %v3862_v42 }
 0xab0   :  { %v3820_v36 = vpop.permute.xlu0 %3819 }
 0xab1   :  { %v3898_v30 = vadd.f32 %v3894_v63, %v3888_v9  ;;  %v3828_v52 = vadd.f32 %v3820_v36, %v3802_v45 }
 0xab3   :  { %v3838_v25 = vadd.f32 %v3834_v23, %v3828_v52  ;;  %v3882_v11 = vpop.permute.xlu2 %3881 }
 0xab4   :  { %v3850_v12 = vpop.permute.xlu1 %3849 }
 0xab5   :  { %v3861_v38 = vadd.f32 %v3850_v12, %v3835_v6 }
 0xab8   :  { %v3854_v8 = vpop.permute.xlu0 %3853 }
 0xab9   :  { %v3863_v51 = vadd.f32 %v3854_v8, %v3837_v14 }
 0xabb   :  { %v3916_v44 = vpop.permute.xlu2 %3915 }
 0xabc   :  { %v3876_v60 = vpop.permute.xlu1 %3875 }
 0xabd   :  { %v3887_v27 = vadd.f32 %v3876_v60, %v3861_v38 }
 0xabf   :  { %v3897_v39 = vadd.f32 %v3893_v33, %v3887_v27 }
 0xac0   :  { %v3856_v13 = vpop.permute.xlu0 %3855 }
 0xac1   :  { %v3864_v0 = vadd.f32 %v3856_v13, %v3838_v25 }
 0xac3   :  { %v3890_v7 = vadd.f32 %v3882_v11, %v3864_v0  ;;  %v3918_v16 = vpop.permute.xlu2 %3917 }
 0xac4   :  { %v3880_v40 = vpop.permute.xlu1 %3879 }
 0xac5   :  { %v3900_v49 = vadd.f32 %v3896_v35, %v3890_v7  ;;  %v3889_v17 = vadd.f32 %v3880_v40, %v3863_v51 }
 0xac7   :  { %v3899_v58 = vadd.f32 %v3895_v61, %v3889_v17  ;;  %v3926_v1 = vadd.f32 %v3918_v16, %v3900_v49 }
 0xac8   :  { %v3912_v46 = vpop.permute.xlu0 %3911 }
 0xac9   :  { %v3923_v2 = vadd.f32 %v3912_v46, %v3897_v39  ;;  %v3925_v50 = vadd.f32 %v3916_v44, %v3899_v58 }
 0xacc   :  { %v3914_v15 = vpop.permute.xlu1 %3913 }
 0xacd   :  { %v3924_v43 = vadd.f32 %v3914_v15, %v3898_v30 }
 0xad0   :  { %v3938_v4 = vpop.permute.xlu0 %3937 }
 0xad1   :  { %v3949_v5 = vadd.f32 %v3938_v4, %v3923_v2 }
 0xad3   :  { %v3955_v6 = vadd.f32 %v3954_v24, %v3949_v5 }
 0xad4   :  { %v3940_v55 = vpop.permute.xlu1 %3939 }
 0xad5   :  { %v3950_v48 = vadd.f32 %v3940_v55, %v3924_v43  ;;  %v3959_v21 = vsel %vm322_vm3, %v3955_v6, 0.0  ;;  %v4023_v55 = vstv %s5040_s20 }
 0xad7   :  { %v3956_v57 = vadd.f32 %v3954_v24, %v3950_v48 }
 0xad8   :  { %v3942_v54 = vpop.permute.xlu0 %3941 }
 0xad9   :  { %v3951_v56 = vadd.f32 %v3942_v54, %v3925_v50  ;;  %v3960_v28 = vsel %vm322_vm3, %v3956_v57, 0.0 }
 0xada   :  { %v3961_v3 = vadd.f32 %v3960_v28, %v3959_v21 }
 0xadb   :  { %v3957_v31 = vadd.f32 %v3954_v24, %v3951_v56 }
 0xadc   :  { %v3944_v19 = vpop.permute.xlu1 %3943 }
 0xadd   :  { %v3962_v32 = vsel %vm322_vm3, %v3957_v31, 0.0  ;;  %v3952_v37 = vadd.f32 %v3944_v19, %v3926_v1 }
 0xade   :  { %v3963_v10 = vadd.f32 %v3962_v32, %v3961_v3 }
 0xadf   :  { %v3958_v14 = vadd.f32 %v3954_v24, %v3952_v37 }
 0xae1   :  { %v3964_v22 = vsel %vm322_vm3, %v3958_v14, 0.0 }
 0xae2   :  { %v3965_v62 = vadd.f32 %v3964_v22, %v3963_v10 }
 0xae4   :  { %3966 = vadd.xlane.f32.xlu2 %v3965_v62 }
 0xb57   :  { %v3967_v53 = vpop.xlane.xlu2 %3966 }
 0xb58   :  { %v3968_v47 = vrot.slane %v3967_v53, 4 }
 0xb5a   :  { %v3969_v18 = vadd.f32 %v3968_v47, %v3967_v53 }
 0xb5c   :  { %v3970_v42 = vrot.slane %v3969_v18, 2 }
 0xb5e   :  { %v3971_v29 = vadd.f32 %v3970_v42, %v3969_v18 }
 0xb60   :  { %v3972_v26 = vrot.slane %v3971_v29, 1 }
 0xb62   :  { %v3973_v34 = vadd.f32 %v3972_v26, %v3971_v29 }
 0xb64   :  { %5059 = vpush %v3973_v34 }
 0xb95   :  { %s5060_s2 = spop %5059 }
 0xb96   :  { %s3975_s4 = smul.f32 0.001953125, %s5060_s2 }
 0xb98   :  { %v3976_v63 = vstv %s3975_s4 }
 0xb99   :  { %v3977_v9 = vsub.f32 %v3955_v6, %v3976_v63  ;;  %v3978_v45 = vsub.f32 %v3956_v57, %v3976_v63  ;;  %v3979_v36 = vsub.f32 %v3957_v31, %v3976_v63  ;;  %v3980_v30 = vsub.f32 %v3958_v14, %v3976_v63 }
 0xb9b   :  { %v3981_v52 = vmul.f32 %v3977_v9, %v3977_v9  ;;  %v3982_v23 = vmul.f32 %v3978_v45, %v3978_v45  ;;  %v3983_v25 = vmul.f32 %v3979_v36, %v3979_v36  ;;  %v3984_v12 = vmul.f32 %v3980_v30, %v3980_v30 }
 0xb9d   :  { %v3985_v8 = vsel %vm322_vm3, %v3981_v52, 0.0  ;;  %v3986_v38 = vsel %vm322_vm3, %v3982_v23, 0.0  ;;  %v3988_v27 = vsel %vm322_vm3, %v3983_v25, 0.0  ;;  %v3990_v39 = vsel %vm322_vm3, %v3984_v12, 0.0 }
 0xb9e   :  { %v3987_v60 = vadd.f32 %v3986_v38, %v3985_v8 }
 0xba0   :  { %v3989_v33 = vadd.f32 %v3988_v27, %v3987_v60 }
 0xba2   :  { %v3991_v13 = vadd.f32 %v3990_v39, %v3989_v33 }
 0xba4   :  { %3992 = vadd.xlane.f32.xlu0 %v3991_v13 }
 0xc17   :  { %v3993_v0 = vpop.xlane.xlu0 %3992 }
 0xc18   :  { %v3994_v11 = vrot.slane %v3993_v0, 4 }
 0xc1a   :  { %v3995_v51 = vadd.f32 %v3994_v11, %v3993_v0 }
 0xc1c   :  { %v3996_v7 = vrot.slane %v3995_v51, 2 }
 0xc1e   :  { %v3997_v35 = vadd.f32 %v3996_v7, %v3995_v51 }
 0xc20   :  { %v3998_v40 = vrot.slane %v3997_v35, 1 }
 0xc22   :  { %v3999_v49 = vadd.f32 %v3998_v40, %v3997_v35 }
 0xc24   :  { %5061 = vpush %v3999_v49 }
 0xc55   :  { %s5062_s15 = spop %5061 }
 0xc56   :  { %s4001_s17 = smul.f32 0.001953125, %s5062_s15 }
 0xc58   :  { %s4003_s18 = sadd.f32 1e-05, %s4001_s17 }
 0xc5a   :  { %v4004_v61 = vstv %s4003_s18 }
 0xc5b   :  { %5091 = vrsqrt.f32 %v4004_v61  ;;  %vm4011_vm10 = vweird.f32 %v4004_v61 }
 0xc61   :  { %v5092_v17 = vpop.eup %5091 }
 0xc62   :  { %v4006_v58 = vmul.f32 %v5092_v17, %v4004_v61  ;;  %vm4012_vm3 = vweird.f32 %v5092_v17 }
 0xc63   :  { %vm4013_vm6 = vmor %vm4011_vm10, %vm4012_vm3 }
 0xc64   :  { %v4007_v46 = vmul.f32 %v5092_v17, %v4006_v58 }
 0xc66   :  { %v4008_v15 = vmul.f32 0.5, %v4007_v46 }
 0xc68   :  { %v4009_v44 = vsub.f32 1.5, %v4008_v15 }
 0xc6a   :  { %v4010_v4 = vmul.f32 %v5092_v17, %v4009_v44 }
 0xc6c   :  { %v4014_v2 = vsel %vm4013_vm6, %v5092_v17, %v4010_v4 }
 0xc6d   :  { %5063 = vpush %v4014_v2 }
 0xc9e   :  { %s5064_s21 = spop %5063 }
 0xc9f   :  { %s4016_s22 = smul.f32 %s5064_s21, %s5039_s19 }
 0xca1   :  { %v4017_v43 = vstv %s4016_s22 }
 0xca2   :  { %v4018_v5 = vmul.f32 %v4017_v43, %v3977_v9  ;;  %v4019_v48 = vmul.f32 %v4017_v43, %v3978_v45  ;;  %v4020_v6 = vmul.f32 %v4017_v43, %v3979_v36  ;;  %v4021_v28 = vmul.f32 %v4017_v43, %v3980_v30 }
 0xca4   :  { %v4024_v24 = vadd.f32 %v4023_v55, %v4018_v5  ;;  %v4025_v57 = vadd.f32 %v4023_v55, %v4019_v48  ;;  %v4026_v32 = vadd.f32 %v4023_v55, %v4020_v6  ;;  %v4027_v53 = vadd.f32 %v4023_v55, %v4021_v28 }
 0xca6   :  { %v4028_v50 = vmax.f32 %v4024_v24, 0.0  ;;  %v8693_v54 = vmax.f32 %v4025_v57, 0.0  ;;  %v8702_v29 = vmax.f32 %v4026_v32, 0.0  ;;  %v8704_v52 = vmax.f32 %v4027_v53, 0.0 }
 0xca8   :  { %v4036_v56 = vrot.slane %v4028_v50, 2  ;;  %v4039_v16 = vrot.slane %v8693_v54, 2  ;;  %v4041_v1 = vrot.slane %v8693_v54, 6  ;;  %v4037_v31 = vrot.slane %v4028_v50, 4 }
 0xca9   :  { %v4060_v19 = vsel %vm424_vm7, %v4028_v50, -inf  ;;  %v4038_v9 = vrot.slane %v4028_v50, 6  ;;  %v4043_v12 = vrot.slane %v8702_v29, 4  ;;  %v4044_v8 = vrot.slane %v8702_v29, 6 }
 0xcaa   :  { %v4067_v21 = vsel %vm424_vm7, %v4036_v56, -inf  ;;  %v4061_v37 = vrot.slane %v4060_v19, 4  ;;  %v4095_v14 = vsel %vm424_vm7, %v4039_v16, -inf  ;;  %v4109_v10 = vsel %vm424_vm7, %v4041_v1, -inf }
 0xcab   :  { %v4068_v3 = vrot.slane %v4067_v21, 4  ;;  %v4074_v47 = vsel %vm424_vm7, %v4037_v31, -inf  ;;  %v4096_v18 = vrot.slane %v4095_v14, 4  ;;  %v4110_v42 = vrot.slane %v4109_v10, 4 }
 0xcac   :  { %v4062_v22 = vmax.f32 %v4060_v19, %v4061_v37  ;;  %v4075_v30 = vrot.slane %v4074_v47, 4  ;;  %v4081_v0 = vsel %vm424_vm7, %v4038_v9, -inf  ;;  %v4045_v11 = vrot.slane %v8704_v52, 2 }
 0xcad   :  { %v4069_v62 = vmax.f32 %v4067_v21, %v4068_v3  ;;  %v4097_v34 = vmax.f32 %v4095_v14, %v4096_v18  ;;  %v4111_v63 = vmax.f32 %v4109_v10, %v4110_v42  ;;  %v4046_v51 = vrot.slane %v8704_v52, 4 }
 0xcae   :  { %v4063_v26 = vrot.slane %v4062_v22, 2  ;;  %v4076_v13 = vmax.f32 %v4074_v47, %v4075_v30  ;;  %v4130_v40 = vsel %vm424_vm7, %v4043_v12, -inf  ;;  %v4137_v49 = vsel %vm424_vm7, %v4044_v8, -inf }
 0xcaf   :  { %v4070_v36 = vrot.slane %v4069_v62, 2  ;;  %v4098_v23 = vrot.slane %v4097_v34, 2  ;;  %v4112_v25 = vrot.slane %v4111_v63, 2  ;;  %v4082_v61 = vrot.slane %v4081_v0, 4 }
 0xcb0   :  { %v4064_v45 = vmax.f32 %v4062_v22, %v4063_v26  ;;  %v4077_v15 = vrot.slane %v4076_v13, 2  ;;  %v4131_v44 = vrot.slane %v4130_v40, 4  ;;  %v4138_v4 = vrot.slane %v4137_v49, 4 }
 0xcb1   :  { %v4099_v60 = vmax.f32 %v4097_v34, %v4098_v23  ;;  %v4113_v27 = vmax.f32 %v4111_v63, %v4112_v25  ;;  %v4071_v39 = vmax.f32 %v4069_v62, %v4070_v36  ;;  %v4151_v2 = vsel %vm424_vm7, %v4045_v11, -inf }
 0xcb2   :  { %v4065_v38 = vrot.slane %v4064_v45, 1  ;;  %v4158_v43 = vsel %vm424_vm7, %v4046_v51, -inf  ;;  %v4132_v55 = vmax.f32 %v4130_v40, %v4131_v44  ;;  %v4139_v5 = vmax.f32 %v4137_v49, %v4138_v4 }
 0xcb3   :  { %v4100_v7 = vrot.slane %v4099_v60, 1  ;;  %v4114_v35 = vrot.slane %v4113_v27, 1  ;;  %v4072_v46 = vrot.slane %v4071_v39, 1  ;;  %v4083_v48 = vmax.f32 %v4081_v0, %v4082_v61 }
 0xcb4   :  { %v8708_v33 = vmax.f32 %v4064_v45, %v4065_v38  ;;  %v4088_v24 = vsel %vm424_vm7, %v8693_v54, -inf  ;;  %v4152_v57 = vrot.slane %v4151_v2, 4  ;;  %v4159_v50 = vrot.slane %v4158_v43, 4 }
 0xcb5   :  { %v8717_v17 = vmax.f32 %v4099_v60, %v4100_v7  ;;  %v8719_v58 = vmax.f32 %v4113_v27, %v4114_v35  ;;  %v8729_v6 = vmax.f32 %v4071_v39, %v4072_v46  ;;  %v4078_v56 = vmax.f32 %v4076_v13, %v4077_v15 }
 0xcb6   :  { %4188 = vrot.lane.b32.xlu1 %v8708_v33, %s5221_s16  ;;  %v4133_v16 = vrot.slane %v4132_v55, 2  ;;  %v4140_v1 = vrot.slane %v4139_v5, 2  ;;  %v4153_v28 = vmax.f32 %v4151_v2, %v4152_v57  ;;  %v4160_v31 = vmax.f32 %v4158_v43, %v4159_v50 }
 0xcb7   :  { %4202 = vrot.lane.b32.xlu0 %v8719_v58, %s5221_s16  ;;  %4198 = vrot.lane.b32.xlu2 %v8717_v17, %s5221_s16  ;;  %v4089_v32 = vrot.slane %v4088_v24, 4  ;;  %v4079_v14 = vrot.slane %v4078_v56, 1  ;;  %v4084_v10 = vrot.slane %v4083_v48, 2  ;;  %v4040_v53 = vrot.slane %v8693_v54, 4 }
 0xcb8   :  { %v4134_v19 = vmax.f32 %v4132_v55, %v4133_v16  ;;  %v4141_v21 = vmax.f32 %v4139_v5, %v4140_v1  ;;  %v4154_v37 = vrot.slane %v4153_v28, 2  ;;  %v4161_v3 = vrot.slane %v4160_v31, 2 }
 0xcb9   :  { %v8738_v34 = vmax.f32 %v4078_v56, %v4079_v14  ;;  %v4085_v63 = vmax.f32 %v4083_v48, %v4084_v10  ;;  %v4090_v9 = vmax.f32 %v4088_v24, %v4089_v32  ;;  %v4102_v45 = vsel %vm424_vm7, %v4040_v53, -inf }
 0xcba   :  { %v4135_v22 = vrot.slane %v4134_v19, 1  ;;  %v4142_v62 = vrot.slane %v4141_v21, 1  ;;  %v4155_v42 = vmax.f32 %v4153_v28, %v4154_v37  ;;  %v4162_v26 = vmax.f32 %v4160_v31, %v4161_v3 }
 0xcbb   :  { %v4086_v30 = vrot.slane %v4085_v63, 1  ;;  %v4091_v23 = vrot.slane %v4090_v9, 2  ;;  %v4103_v25 = vrot.slane %v4102_v45, 4  ;;  %v4116_v39 = vsel %vm424_vm7, %v8702_v29, -inf }
 0xcbc   :  { %v8734_v47 = vmax.f32 %v4134_v19, %v4135_v22  ;;  %v8736_v18 = vmax.f32 %v4141_v21, %v4142_v62  ;;  %v4156_v36 = vrot.slane %v4155_v42, 1  ;;  %v4163_v54 = vrot.slane %v4162_v26, 1 }
 0xcbd   :  { %v8751_v38 = vmax.f32 %v4085_v63, %v4086_v30  ;;  %v4092_v60 = vmax.f32 %v4090_v9, %v4091_v23  ;;  %v4104_v27 = vmax.f32 %v4102_v45, %v4103_v25  ;;  %v4042_v13 = vrot.slane %v8702_v29, 2 }
 0xcbe   :  { %4190 = vrot.lane.b32.xlu1 %v8729_v6, %s5221_s16  ;;  %v8747_v12 = vmax.f32 %v4155_v42, %v4156_v36  ;;  %v8749_v8 = vmax.f32 %v4162_v26, %v4163_v54  ;;  %v4117_v51 = vrot.slane %v4116_v39, 4  ;;  %v4144_v44 = vsel %vm424_vm7, %v8704_v52, -inf }
 0xcbf   :  { %4208 = vrot.lane.b32.xlu0 %v8734_v47, %s5221_s16  ;;  %4210 = vrot.lane.b32.xlu2 %v8736_v18, %s5221_s16  ;;  %v4093_v0 = vrot.slane %v4092_v60, 1  ;;  %v4105_v11 = vrot.slane %v4104_v27, 2  ;;  %v4123_v7 = vsel %vm424_vm7, %v4042_v13, -inf  ;;  %v4145_v55 = vrot.slane %v4144_v44, 4 }
 0xcc0   :  { %v4118_v49 = vmax.f32 %v4116_v39, %v4117_v51  ;;  %v4124_v61 = vrot.slane %v4123_v7, 4  ;;  %v4047_v5 = vrot.slane %v8704_v52, 6 }
 0xcc1   :  { %v8763_v35 = vmax.f32 %v4092_v60, %v4093_v0  ;;  %v4106_v40 = vmax.f32 %v4104_v27, %v4105_v11  ;;  %v4146_v57 = vmax.f32 %v4144_v44, %v4145_v55 }
 0xcc2   :  { %v4119_v46 = vrot.slane %v4118_v49, 2  ;;  %v4125_v15 = vmax.f32 %v4123_v7, %v4124_v61  ;;  %v4165_v50 = vsel %vm424_vm7, %v4047_v5, -inf }
 0xcc3   :  { %v4107_v29 = vrot.slane %v4106_v40, 1  ;;  %v4147_v1 = vrot.slane %v4146_v57, 2  ;;  %v4166_v28 = vrot.slane %v4165_v50, 4 }
 0xcc4   :  { %v4120_v2 = vmax.f32 %v4118_v49, %v4119_v46  ;;  %v4126_v43 = vrot.slane %v4125_v15, 2 }
 0xcc5   :  { %v8773_v4 = vmax.f32 %v4106_v40, %v4107_v29  ;;  %v4148_v31 = vmax.f32 %v4146_v57, %v4147_v1  ;;  %v4167_v19 = vmax.f32 %v4165_v50, %v4166_v28 }
 0xcc6   :  { %4192 = vrot.lane.b32.xlu1 %v8738_v34, %s5221_s16  ;;  %v4121_v48 = vrot.slane %v4120_v2, 1  ;;  %v4127_v24 = vmax.f32 %v4125_v15, %v4126_v43 }
 0xcc7   :  { %4214 = vrot.lane.b32.xlu0 %v8747_v12, %s5221_s16  ;;  %4216 = vrot.lane.b32.xlu2 %v8749_v8, %s5221_s16  ;;  %v4149_v21 = vrot.slane %v4148_v31, 1  ;;  %v4168_v32 = vrot.slane %v4167_v19, 2 }
 0xcc8   :  { %v8783_v56 = vmax.f32 %v4120_v2, %v4121_v48  ;;  %v4128_v16 = vrot.slane %v4127_v24, 1 }
 0xcc9   :  { %v8799_v37 = vmax.f32 %v4148_v31, %v4149_v21  ;;  %v4169_v3 = vmax.f32 %v4167_v19, %v4168_v32 }
 0xcca   :  { %v8791_v52 = vmax.f32 %v4127_v24, %v4128_v16 }
 0xccb   :  { %v4170_v14 = vrot.slane %v4169_v3, 1 }
 0xccd   :  { %v8807_v10 = vmax.f32 %v4169_v3, %v4170_v14 }
 0xcce   :  { %4194 = vrot.lane.b32.xlu1 %v8751_v38, %s5221_s16 }
 0xccf   :  { %4220 = vrot.lane.b32.xlu0 %v8708_v33, %s5222_s3  ;;  %4222 = vrot.lane.b32.xlu2 %v8729_v6, %s5222_s3 }
 0xcd6   :  { %4196 = vrot.lane.b32.xlu1 %v8763_v35, %s5221_s16 }
 0xcd7   :  { %4226 = vrot.lane.b32.xlu0 %v8751_v38, %s5222_s3  ;;  %4228 = vrot.lane.b32.xlu2 %v8763_v35, %s5222_s3 }
 0xcde   :  { %4200 = vrot.lane.b32.xlu1 %v8773_v4, %s5221_s16 }
 0xcdf   :  { %4232 = vrot.lane.b32.xlu0 %v8773_v4, %s5222_s3  ;;  %4234 = vrot.lane.b32.xlu2 %v8719_v58, %s5222_s3 }
 0xce6   :  { %4204 = vrot.lane.b32.xlu1 %v8783_v56, %s5221_s16 }
 0xce7   :  { %4238 = vrot.lane.b32.xlu0 %v8791_v52, %s5222_s3  ;;  %4240 = vrot.lane.b32.xlu2 %v8734_v47, %s5222_s3 }
 0xcee   :  { %4206 = vrot.lane.b32.xlu1 %v8791_v52, %s5221_s16 }
 0xcef   :  { %4244 = vrot.lane.b32.xlu0 %v8799_v37, %s5222_s3  ;;  %4246 = vrot.lane.b32.xlu2 %v8747_v12, %s5222_s3 }
 0xcf6   :  { %4212 = vrot.lane.b32.xlu1 %v8799_v37, %s5221_s16 }
 0xcf7   :  { %4250 = vrot.lane.b32.xlu0 %v8807_v10, %s5222_s3  ;;  %4252 = vrot.lane.b32.xlu2 %v8708_v33, %s5223_s30 }
 0xcfe   :  { %4218 = vrot.lane.b32.xlu1 %v8807_v10, %s5221_s16  ;;  %s5230_s16 = smov [#allocation13]  }
 0xcff   :  { %4256 = vrot.lane.b32.xlu0 %v8738_v34, %s5223_s30  ;;  %4258 = vrot.lane.b32.xlu2 %v8751_v38, %s5223_s30 }
 0xd06   :  { %4224 = vrot.lane.b32.xlu1 %v8738_v34, %s5222_s3 }
 0xd07   :  { %4262 = vrot.lane.b32.xlu0 %v8717_v17, %s5223_s30  ;;  %4264 = vrot.lane.b32.xlu2 %v8773_v4, %s5223_s30 }
 0xd0e   :  { %4230 = vrot.lane.b32.xlu1 %v8717_v17, %s5222_s3 }
 0xd0f   :  { %4268 = vrot.lane.b32.xlu0 %v8783_v56, %s5223_s30  ;;  %4270 = vrot.lane.b32.xlu2 %v8791_v52, %s5223_s30 }
 0xd11   :  { %v4199_v22 = vpop.permute.xlu2 %4198 }
 0xd12   :  { %v4434_v46 = vrot.slane %v4199_v22, 3 }
 0xd16   :  { %4236 = vrot.lane.b32.xlu1 %v8783_v56, %s5222_s3 }
 0xd17   :  { %4274 = vrot.lane.b32.xlu0 %v8736_v18, %s5223_s30  ;;  %4276 = vrot.lane.b32.xlu2 %v8799_v37, %s5223_s30 }
 0xd19   :  { %v8837_v62 = vpop.permute.xlu2 %4210 }
 0xd1a   :  { %v4542_v3 = vrot.slane %v8837_v62, 5 }
 0xd1e   :  { %4242 = vrot.lane.b32.xlu1 %v8736_v18, %s5222_s3 }
 0xd1f   :  { %4280 = vrot.lane.b32.xlu0 %v8749_v8, %s5223_s30  ;;  %4282 = vrot.lane.b32.xlu2 %v8807_v10, %s5223_s30 }
 0xd21   :  { %v8845_v53 = vpop.permute.xlu2 %4216 }
 0xd26   :  { %4248 = vrot.lane.b32.xlu1 %v8749_v8, %s5222_s3  ;;  %s4979_s3 = sshll.u32 %s5230_s16, 4  ;;  %s4980_s3 = int_to_ptr.vmem [resolvable:$true] %s4979_s3 }
 0xd27   :  { %4286 = vrot.lane.b32.xlu0 %v8729_v6, %s5224_s6  ;;  %4288 = vrot.lane.b32.xlu2 %v8738_v34, %s5224_s6 }
 0xd28   :  { %v4189_v42 = vpop.permute.xlu1 %4188 }
 0xd29   :  { %v4203_v26 = vpop.permute.xlu0 %4202  ;;  %v4223_v63 = vpop.permute.xlu2 %4222 }
 0xd2a   :  { %v4440_v51 = vrot.slane %v4223_v63, 7  ;;  %v4438_v48 = vrot.slane %v4203_v26, 1 }
 0xd2e   :  { %4254 = vrot.lane.b32.xlu1 %v8729_v6, %s5223_s30 }
 0xd2f   :  { %4292 = vrot.lane.b32.xlu0 %v8763_v35, %s5224_s6  ;;  %4294 = vrot.lane.b32.xlu2 %v8717_v17, %s5224_s6 }
 0xd30   :  { %v4191_v9 = vpop.permute.xlu1 %4190 }
 0xd31   :  { %v4426_v45 = vrot.slane %v4191_v9, 7  ;;  %v4209_v54 = vpop.permute.xlu0 %4208  ;;  %v8860_v30 = vpop.permute.xlu2 %4228 }
 0xd32   :  { %v4540_v32 = vrot.slane %v4209_v54, 6 }
 0xd33   :  { %v4427_v36 = vsel %vm778_vm11, %v4426_v45, %v4189_v42 }
 0xd36   :  { %4260 = vrot.lane.b32.xlu1 %v8763_v35, %s5223_s30 }
 0xd37   :  { %4298 = vrot.lane.b32.xlu0 %v8719_v58, %s5224_s6  ;;  %4300 = vrot.lane.b32.xlu2 %v8783_v56, %s5224_s6 }
 0xd38   :  { %v4193_v23 = vpop.permute.xlu1 %4192 }
 0xd39   :  { %v4428_v25 = vrot.slane %v4193_v23, 6  ;;  %v4215_v27 = vpop.permute.xlu0 %4214  ;;  %v8869_v39 = vpop.permute.xlu2 %4234 }
 0xd3a   :  { %v4546_v45 = vrot.slane %v4215_v27, 3 }
 0xd3b   :  { %v4429_v60 = vsel %vm781_vm12, %v4428_v25, %v4427_v36  ;;  %v4548_v36 = vrot.slane %v8845_v53, 2 }
 0xd3e   :  { %4266 = vrot.lane.b32.xlu1 %v8719_v58, %s5223_s30 }
 0xd3f   :  { %4304 = vrot.lane.b32.xlu0 %v8734_v47, %s5224_s6  ;;  %4306 = vrot.lane.b32.xlu2 %v8736_v18, %s5224_s6 }
 0xd40   :  { %v4195_v13 = vpop.permute.xlu1 %4194 }
 0xd41   :  { %v4430_v0 = vrot.slane %v4195_v13, 5  ;;  %v4221_v7 = vpop.permute.xlu0 %4220  ;;  %v8878_v40 = vpop.permute.xlu2 %4240 }
 0xd42   :  { %v8883_v49 = vsel %vm778_vm11, %v4440_v51, %v4221_v7 }
 0xd43   :  { %v4431_v11 = vsel %vm784_vm13, %v4430_v0, %v4429_v60 }
 0xd46   :  { %4272 = vrot.lane.b32.xlu1 %v8734_v47, %s5223_s30 }
 0xd47   :  { %4310 = vrot.lane.b32.xlu0 %v8747_v12, %s5224_s6  ;;  %4312 = vrot.lane.b32.xlu2 %v8749_v8, %s5224_s6 }
 0xd48   :  { %v4197_v61 = vpop.permute.xlu1 %4196 }
 0xd49   :  { %v4432_v29 = vrot.slane %v4197_v61, 4  ;;  %v4227_v2 = vpop.permute.xlu0 %4226  ;;  %v8891_v43 = vpop.permute.xlu2 %4246 }
 0xd4a   :  { %v4444_v61 = vrot.slane %v4227_v2, 5 }
 0xd4b   :  { %v4433_v15 = vsel %vm787_vm14, %v4432_v29, %v4431_v11  ;;  %v4446_v29 = vrot.slane %v8860_v30, 4 }
 0xd4c   :  { %v4435_v44 = vsel %vm790_vm15, %v4434_v46, %v4433_v15 }
 0xd4e   :  { %4278 = vrot.lane.b32.xlu1 %v8747_v12, %s5223_s30 }
 0xd4f   :  { %4316 = vrot.lane.b32.xlu0 %v8708_v33, %s5225_s7  ;;  %4318 = vrot.lane.b32.xlu2 %v8729_v6, %s5225_s7 }
 0xd50   :  { %v4201_v55 = vpop.permute.xlu1 %4200 }
 0xd51   :  { %v4436_v5 = vrot.slane %v4201_v55, 2  ;;  %v4233_v50 = vpop.permute.xlu0 %4232  ;;  %v8903_v16 = vpop.permute.xlu2 %4252 }
 0xd53   :  { %v4437_v24 = vsel %vm793_vm0, %v4436_v5, %v4435_v44 }
 0xd54   :  { %v8901_v57 = vsel %vm796_vm1, %v4438_v48, %v4437_v24  ;;  %v4452_v48 = vrot.slane %v8869_v39, 1 }
 0xd56   :  { %4284 = vrot.lane.b32.xlu1 %v8708_v33, %s5224_s6 }
 0xd57   :  { %4322 = vrot.lane.b32.xlu0 %v8751_v38, %s5225_s7  ;;  %4324 = vrot.lane.b32.xlu2 %v8763_v35, %s5225_s7 }
 0xd58   :  { %v4205_v1 = vpop.permute.xlu1 %4204 }
 0xd59   :  { %v8911_v28 = vpop.permute.xlu0 %4238  ;;  %v8913_v31 = vpop.permute.xlu2 %4258 }
 0xd5a   :  { %v4552_v39 = vrot.slane %v8911_v28, 7 }
 0xd5e   :  { %4290 = vrot.lane.b32.xlu1 %v8751_v38, %s5224_s6 }
 0xd5f   :  { %4328 = vrot.lane.b32.xlu0 %v8773_v4, %s5225_s7  ;;  %4330 = vrot.lane.b32.xlu2 %v8719_v58, %s5225_s7 }
 0xd60   :  { %v4207_v19 = vpop.permute.xlu1 %4206 }
 0xd61   :  { %v4538_v21 = vrot.slane %v4207_v19, 7  ;;  %v8925_v26 = vpop.permute.xlu0 %4244  ;;  %v8929_v63 = vpop.permute.xlu2 %4264 }
 0xd63   :  { %v4539_v14 = vsel %vm778_vm11, %v4538_v21, %v4205_v1 }
 0xd64   :  { %v4541_v22 = vsel %vm781_vm12, %v4540_v32, %v4539_v14  ;;  %v4554_v14 = vrot.slane %v8878_v40, 6 }
 0xd65   :  { %v4543_v42 = vsel %vm784_vm13, %v4542_v3, %v4541_v22 }
 0xd66   :  { %4296 = vrot.lane.b32.xlu1 %v8773_v4, %s5224_s6 }
 0xd67   :  { %4334 = vrot.lane.b32.xlu0 %v8791_v52, %s5225_s7  ;;  %4336 = vrot.lane.b32.xlu2 %v8734_v47, %s5225_s7 }
 0xd68   :  { %v4213_v62 = vpop.permute.xlu1 %4212 }
 0xd69   :  { %v4544_v9 = vrot.slane %v4213_v62, 4  ;;  %v8939_v60 = vpop.permute.xlu0 %4250  ;;  %v4271_v53 = vpop.permute.xlu2 %4270 }
 0xd6a   :  { %v4566_v19 = vrot.slane %v4271_v53, 7 }
 0xd6b   :  { %v4545_v54 = vsel %vm787_vm14, %v4544_v9, %v4543_v42 }
 0xd6c   :  { %v4547_v23 = vsel %vm790_vm15, %v4546_v45, %v4545_v54  ;;  %v4560_v54 = vrot.slane %v8891_v43, 3  ;;  %v4564_v43 = vrot.slane %v8939_v60, 1  ;;  %v4412_v60 = vrot.slane %v8729_v6, 7 }
 0xd6d   :  { %v4549_v25 = vsel %vm793_vm0, %v4548_v36, %v4547_v23  ;;  %v4558_v36 = vrot.slane %v8925_v26, 4 }
 0xd6e   :  { %4302 = vrot.lane.b32.xlu1 %v8791_v52, %s5224_s6 }
 0xd6f   :  { %4340 = vrot.lane.b32.xlu0 %v8799_v37, %s5225_s7  ;;  %4342 = vrot.lane.b32.xlu2 %v8747_v12, %s5225_s7 }
 0xd70   :  { %v4219_v27 = vpop.permute.xlu1 %4218 }
 0xd71   :  { %v4550_v13 = vrot.slane %v4219_v27, 1  ;;  %v8950_v11 = vpop.permute.xlu0 %4256  ;;  %v8957_v15 = vpop.permute.xlu2 %4276 }
 0xd73   :  { %v8944_v0 = vsel %vm796_vm1, %v4550_v13, %v4549_v25 }
 0xd76   :  { %4308 = vrot.lane.b32.xlu1 %v8799_v37, %s5224_s6 }
 0xd77   :  { %4346 = vrot.lane.b32.xlu0 %v8807_v10, %s5225_s7  ;;  %4348 = vrot.lane.b32.xlu2 %v8708_v33, %s5226_s0 }
 0xd78   :  { %v4225_v51 = vpop.permute.xlu1 %4224 }
 0xd79   :  { %v4442_v7 = vrot.slane %v4225_v51, 6  ;;  %v8965_v5 = vpop.permute.xlu0 %4262  ;;  %v8979_v32 = vpop.permute.xlu2 %4282 }
 0xd7b   :  { %v4443_v46 = vsel %vm781_vm12, %v4442_v7, %v8883_v49  ;;  %v4450_v49 = vrot.slane %v4233_v50, 2 }
 0xd7c   :  { %v4445_v44 = vsel %vm784_vm13, %v4444_v61, %v4443_v46 }
 0xd7d   :  { %v4447_v55 = vsel %vm787_vm14, %v4446_v29, %v4445_v44 }
 0xd7e   :  { %4314 = vrot.lane.b32.xlu1 %v8807_v10, %s5224_s6 }
 0xd7f   :  { %4352 = vrot.lane.b32.xlu0 %v8738_v34, %s5226_s0  ;;  %4354 = vrot.lane.b32.xlu2 %v8751_v38, %s5226_s0 }
 0xd80   :  { %v4231_v30 = vpop.permute.xlu1 %4230 }
 0xd81   :  { %v4448_v2 = vrot.slane %v4231_v30, 3  ;;  %v4269_v3 = vpop.permute.xlu0 %4268  ;;  %v8998_v28 = vpop.permute.xlu2 %4288  ;;  %v4414_v30 = vrot.slane %v8738_v34, 6 }
 0xd82   :  { %v8985_v50 = vsel %vm778_vm11, %v4566_v19, %v4269_v3 }
 0xd83   :  { %v4449_v24 = vsel %vm790_vm15, %v4448_v2, %v4447_v55  ;;  %v4456_v55 = vrot.slane %v8950_v11, 6  ;;  %v4458_v2 = vrot.slane %v8913_v31, 5 }
 0xd84   :  { %v4451_v1 = vsel %vm793_vm0, %v4450_v49, %v4449_v24  ;;  %v4413_v49 = vsel %vm778_vm11, %v4412_v60, %v8708_v33  ;;  %v4424_v60 = vrot.slane %v8719_v58, 1 }
 0xd85   :  { %v8977_v21 = vsel %vm796_vm1, %v4452_v48, %v4451_v1  ;;  %v4415_v31 = vsel %vm781_vm12, %v4414_v30, %v4413_v49 }
 0xd86   :  { %4320 = vrot.lane.b32.xlu1 %v8738_v34, %s5225_s7 }
 0xd87   :  { %4358 = vrot.lane.b32.xlu0 %v8717_v17, %s5226_s0  ;;  %4360 = vrot.lane.b32.xlu2 %v8773_v4, %s5226_s0 }
 0xd88   :  { %v4237_v22 = vpop.permute.xlu1 %4236 }
 0xd89   :  { %v4553_v42 = vsel %vm778_vm11, %v4552_v39, %v4237_v22  ;;  %v8994_v9 = vpop.permute.xlu0 %4274  ;;  %v9014_v51 = vpop.permute.xlu2 %4294  ;;  %v4462_v22 = vrot.slane %v8965_v5, 3 }
 0xd8a   :  { %v4555_v62 = vsel %vm781_vm12, %v4554_v14, %v4553_v42  ;;  %v4418_v42 = vrot.slane %v8763_v35, 4 }
 0xd8e   :  { %4326 = vrot.lane.b32.xlu1 %v8717_v17, %s5225_s7 }
 0xd8f   :  { %4364 = vrot.lane.b32.xlu0 %v8783_v56, %s5226_s0  ;;  %4366 = vrot.lane.b32.xlu2 %v8791_v52, %s5226_s0 }
 0xd90   :  { %v4243_v45 = vpop.permute.xlu1 %4242 }
 0xd91   :  { %v4556_v40 = vrot.slane %v4243_v45, 5  ;;  %v9009_v13 = vpop.permute.xlu0 %4280  ;;  %v9036_v24 = vpop.permute.xlu2 %4300 }
 0xd93   :  { %v4557_v23 = vsel %vm784_vm13, %v4556_v40, %v4555_v62  ;;  %v4464_v62 = vrot.slane %v8929_v63, 2 }
 0xd94   :  { %v4559_v25 = vsel %vm787_vm14, %v4558_v36, %v4557_v23 }
 0xd95   :  { %v4561_v27 = vsel %vm790_vm15, %v4560_v54, %v4559_v25  ;;  %v4420_v54 = vrot.slane %v8717_v17, 3 }
 0xd96   :  { %4332 = vrot.lane.b32.xlu1 %v8783_v56, %s5225_s7 }
 0xd97   :  { %4370 = vrot.lane.b32.xlu0 %v8736_v18, %s5226_s0  ;;  %4372 = vrot.lane.b32.xlu2 %v8799_v37, %s5226_s0 }
 0xd98   :  { %v4249_v26 = vpop.permute.xlu1 %4248 }
 0xd99   :  { %v4562_v53 = vrot.slane %v4249_v26, 2  ;;  %v9024_v29 = vpop.permute.xlu0 %4286  ;;  %v9063_v23 = vpop.permute.xlu2 %4306  ;;  %v4524_v26 = vrot.slane %v8791_v52, 7 }
 0xd9b   :  { %v4563_v7 = vsel %vm793_vm0, %v4562_v53, %v4561_v27 }
 0xd9c   :  { %v9022_v61 = vsel %vm796_vm1, %v4564_v43, %v4563_v7  ;;  %v4666_v43 = vrot.slane %v8901_v57, 4 }
 0xd9e   :  { %4338 = vrot.lane.b32.xlu1 %v8736_v18, %s5225_s7 }
 0xd9f   :  { %4376 = vrot.lane.b32.xlu0 %v8749_v8, %s5226_s0  ;;  %4382 = vrot.lane.b32.xlu2 %v8729_v6, %s5227_s8 }
 0xda0   :  { %v4255_v46 = vpop.permute.xlu1 %4254 }
 0xda1   :  { %v4454_v44 = vrot.slane %v4255_v46, 7  ;;  %v9045_v19 = vpop.permute.xlu0 %4292 }
 0xda3   :  { %v4455_v48 = vsel %vm778_vm11, %v4454_v44, %v8903_v16  ;;  %v4416_v16 = vrot.slane %v8751_v38, 5  ;;  %v4526_v44 = vrot.slane %v8734_v47, 6 }
 0xda4   :  { %v4457_v11 = vsel %vm781_vm12, %v4456_v55, %v4455_v48 }
 0xda5   :  { %v4459_v1 = vsel %vm784_vm13, %v4458_v2, %v4457_v11  ;;  %v4417_v39 = vsel %vm784_vm13, %v4416_v16, %v4415_v31  ;;  %v4525_v2 = vsel %vm778_vm11, %v4524_v26, %v8783_v56  ;;  %v9093_v31 = vpop.permute.xlu2 %4312 }
 0xda6   :  { %4344 = vrot.lane.b32.xlu1 %v8749_v8, %s5225_s7  ;;  %v4419_v40 = vsel %vm787_vm14, %v4418_v42, %v4417_v39  ;;  %s4981_s7 = sshll.u32 %s9446_s5, 4  ;;  %s4982_s7 = int_to_ptr.hbm [resolvable:$true] %s4981_s7 }
 0xda7   :  { %4384 = vrot.lane.b32.xlu0 %v8738_v34, %s5227_s8  ;;  %4400 = vrot.lane.b32.xlu2 %v8734_v47, %s5227_s8  ;;  %v4421_v63 = vsel %vm790_vm15, %v4420_v54, %v4419_v40  ;;  %v4422_v34 = vrot.slane %v8773_v4, 2 }
 0xda8   :  { %v4261_v3 = vpop.permute.xlu1 %4260 }
 0xda9   :  { %v4460_v14 = vrot.slane %v4261_v3, 4  ;;  %v9065_v25 = vpop.permute.xlu0 %4298  ;;  %v4423_v7 = vsel %vm793_vm0, %v4422_v34, %v4421_v63  ;;  %v4528_v3 = vrot.slane %v8736_v18, 5 }
 0xdaa   :  { %v4425_v30 = vsel %vm796_vm1, %v4424_v60, %v4423_v7  ;;  %v4534_v7 = vrot.slane %v8749_v8, 2 }
 0xdab   :  { %v4461_v45 = vsel %vm787_vm14, %v4460_v14, %v4459_v1  ;;  %v4654_v11 = vrot.slane %v4425_v30, 4  ;;  %v4527_v1 = vsel %vm781_vm12, %v4526_v44, %v4525_v2  ;;  %v4572_v14 = vrot.slane %v8957_v15, 4 }
 0xdac   :  { %v4463_v36 = vsel %vm790_vm15, %v4462_v22, %v4461_v45  ;;  %v4529_v22 = vsel %vm784_vm13, %v4528_v3, %v4527_v1  ;;  %v4530_v45 = vrot.slane %v8799_v37, 4 }
 0xdad   :  { %v4465_v5 = vsel %vm793_vm0, %v4464_v62, %v4463_v36  ;;  %v4319_v60 = vpop.permute.xlu2 %4318 }
 0xdae   :  { %4350 = vrot.lane.b32.xlu1 %v8729_v6, %s5226_s0 }
 0xdaf   :  { %4386 = vrot.lane.b32.xlu0 %v8751_v38, %s5227_s8  ;;  %4396 = vrot.lane.b32.xlu2 %v8783_v56, %s5227_s8  ;;  %v4652_v38 = vrot.slane %v8977_v21, 4  ;;  %v4655_v56 = vsel %vm1025_vm2, %v8977_v21, %v4654_v11 }
 0xdb0   :  { %v4267_v27 = vpop.permute.xlu1 %4266 }
 0xdb1   :  { %v4466_v53 = vrot.slane %v4267_v27, 1  ;;  %v9087_v48 = vpop.permute.xlu0 %4304  ;;  %v4653_v62 = vsel %vm1025_vm2, %v4652_v38, %v4425_v30  ;;  %v4778_v30 = vrot.slane %v8944_v0, 4 }
 0xdb3   :  { %v4467_v46 = vsel %vm796_vm1, %v4466_v53, %v4465_v5  ;;  %v4578_v53 = vrot.slane %v8979_v32, 1 }
 0xdb4   :  { %v4664_v6 = vrot.slane %v4467_v46, 4  ;;  %v4667_v55 = vsel %vm1025_vm2, %v4467_v46, %v4666_v43  ;;  %v4576_v43 = vrot.slane %v9009_v13, 2  ;;  %v4482_v13 = vrot.slane %v4319_v60, 7 }
 0xdb5   :  { %v4675_v15 = vperm.slane %v4667_v55, %v9813_v41 }
 0xdb6   :  { %v4665_v49 = vsel %vm1025_vm2, %v4664_v6, %v8901_v57  ;;  %4356 = vrot.lane.b32.xlu1 %v8763_v35, %s5226_s0  ;;  %v4570_v57 = vrot.slane %v8994_v9, 5  ;;  %v4663_v9 = vperm.slane %v4655_v56, %v9813_v41  ;;  %v4468_v56 = vrot.slane %v9024_v29, 7 }
 0xdb7   :  { %4388 = vrot.lane.b32.xlu0 %v8763_v35, %s5227_s8  ;;  %4404 = vrot.lane.b32.xlu2 %v8799_v37, %s5227_s8  ;;  %v4532_v35 = vrot.slane %v8747_v12, 3  ;;  %v4671_v54 = vperm.slane %v4665_v49, %v9813_v41  ;;  %v4659_v37 = vperm.slane %v4653_v62, %v9813_v41  ;;  %v4712_v34 = vrot.slane %v4675_v15, 4 }
 0xdb8   :  { %v4273_v16 = vpop.permute.xlu1 %4272  ;;  %v4714_v26 = vrot.slane %v4663_v9, 4  ;;  %v4536_v49 = vrot.slane %v8807_v10, 1 }
 0xdb9   :  { %v4568_v39 = vrot.slane %v4273_v16, 6  ;;  %v9114_v36 = vpop.permute.xlu0 %4310  ;;  %v4700_v46 = vrot.slane %v4671_v54, 4  ;;  %v4702_v6 = vrot.slane %v4659_v37, 4  ;;  %v9142_v1 = vsel %vm1025_vm2, %v4712_v34, %v4663_v9 }
 0xdba   :  { %v9127_v55 = vsel %vm1025_vm2, %v4675_v15, %v4714_v26 }
 0xdbb   :  { %v4569_v42 = vsel %vm781_vm12, %v4568_v39, %v8985_v50  ;;  %v4531_v50 = vsel %vm787_vm14, %v4530_v45, %v4529_v22  ;;  %v9139_v11 = vsel %vm1025_vm2, %v4671_v54, %v4702_v6  ;;  %v4470_v22 = vrot.slane %v8998_v28, 6  ;;  %v4325_v6 = vpop.permute.xlu2 %4324 }
 0xdbc   :  { %v4571_v21 = vsel %vm784_vm13, %v4570_v57, %v4569_v42  ;;  %v4533_v63 = vsel %vm790_vm15, %v4532_v35, %v4531_v50 }
 0xdbd   :  { %v4573_v40 = vsel %vm787_vm14, %v4572_v14, %v4571_v21  ;;  %v4535_v2 = vsel %vm793_vm0, %v4534_v7, %v4533_v63  ;;  %v9153_v14 = vsel %vm1025_vm2, %v4700_v46, %v4659_v37 }
 0xdbe   :  { %4362 = vrot.lane.b32.xlu1 %v8719_v58, %s5226_s0 }
 0xdbf   :  { %4406 = vrot.lane.b32.xlu0 %v8747_v12, %s5227_s8  ;;  %4392 = vrot.lane.b32.xlu2 %v8773_v4, %s5227_s8  ;;  %v4537_v4 = vsel %vm796_vm1, %v4536_v49, %v4535_v2 }
 0xdc0   :  { %v4279_v5 = vpop.permute.xlu1 %4278  ;;  %v4766_v21 = vrot.slane %v4537_v4, 4 }
 0xdc1   :  { %v4574_v27 = vrot.slane %v4279_v5, 3  ;;  %v4317_v39 = vpop.permute.xlu0 %4316 }
 0xdc2   :  { %v9150_v57 = vsel %vm778_vm11, %v4482_v13, %v4317_v39  ;;  %v4767_v29 = vsel %vm1025_vm2, %v9022_v61, %v4766_v21  ;;  %v4582_v13 = vrot.slane %v9087_v48, 6  ;;  %v4590_v48 = vrot.slane %v9093_v31, 2 }
 0xdc3   :  { %v4575_v44 = vsel %vm790_vm15, %v4574_v27, %v4573_v40 }
 0xdc4   :  { %v4577_v32 = vsel %vm793_vm0, %v4576_v43, %v4575_v44  ;;  %v4480_v44 = vrot.slane %v9065_v25, 1 }
 0xdc5   :  { %v4579_v38 = vsel %vm796_vm1, %v4578_v53, %v4577_v32 }
 0xdc6   :  { %v4776_v16 = vrot.slane %v4579_v38, 4  ;;  %v4779_v3 = vsel %vm1025_vm2, %v4579_v38, %v4778_v30  ;;  %4368 = vrot.lane.b32.xlu1 %v8734_v47, %s5226_s0  ;;  %v4764_v47 = vrot.slane %v9022_v61, 4  ;;  %v4474_v61 = vrot.slane %v9045_v19, 4 }
 0xdc7   :  { %4394 = vrot.lane.b32.xlu0 %v8719_v58, %s5227_s8  ;;  %4410 = vrot.lane.b32.xlu2 %v8807_v10, %s5227_s8  ;;  %v4787_v50 = vperm.slane %v4779_v3, %v9813_v41  ;;  %v4476_v58 = vrot.slane %v9014_v51, 3  ;;  %v4584_v38 = vrot.slane %v9063_v23, 5  ;;  %v4331_v3 = vpop.permute.xlu2 %4330 }
 0xdc8   :  { %v4777_v42 = vsel %vm1025_vm2, %v4776_v16, %v8944_v0  ;;  %v4285_v62 = vpop.permute.xlu1 %4284  ;;  %v4765_v28 = vsel %vm1025_vm2, %v4764_v47, %v4537_v4  ;;  %v4775_v0 = vperm.slane %v4767_v29, %v9813_v41 }
 0xdc9   :  { %v4469_v45 = vsel %vm778_vm11, %v4468_v56, %v4285_v62  ;;  %v4771_v40 = vperm.slane %v4765_v28, %v9813_v41  ;;  %v4783_v37 = vperm.slane %v4777_v42, %v9813_v41  ;;  %v4323_v63 = vpop.permute.xlu0 %4322  ;;  %v4824_v26 = vrot.slane %v4787_v50, 4 }
 0xdca   :  { %v4471_v9 = vsel %vm781_vm12, %v4470_v22, %v4469_v45  ;;  %v4826_v54 = vrot.slane %v4775_v0, 4  ;;  %v4588_v22 = vrot.slane %v9114_v36, 3  ;;  %v4486_v29 = vrot.slane %v4323_v63, 5 }
 0xdcb   :  { %v4814_v27 = vrot.slane %v4771_v40, 4  ;;  %v4812_v19 = vrot.slane %v4783_v37, 4  ;;  %v9188_v43 = vsel %vm1025_vm2, %v4824_v26, %v4775_v0  ;;  %v4488_v28 = vrot.slane %v4325_v6, 4 }
 0xdcc   :  { %v9180_v53 = vsel %vm1025_vm2, %v4787_v50, %v4826_v54 }
 0xdcd   :  { %v9185_v51 = vsel %vm1025_vm2, %v4783_v37, %v4814_v27  ;;  %v9191_v46 = vsel %vm1025_vm2, %v4812_v19, %v4771_v40 }
 0xdce   :  { %4374 = vrot.lane.b32.xlu1 %v8747_v12, %s5226_s0 }
 0xdcf   :  { %v4337_v62 = vpop.permute.xlu2 %4336 }
 0xdd0   :  { %v4291_v15 = vpop.permute.xlu1 %4290 }
 0xdd1   :  { %v4472_v35 = vrot.slane %v4291_v15, 5 }
 0xdd3   :  { %v4473_v5 = vsel %vm784_vm13, %v4472_v35, %v4471_v9 }
 0xdd4   :  { %v4475_v12 = vsel %vm787_vm14, %v4474_v61, %v4473_v5 }
 0xdd5   :  { %v4477_v34 = vsel %vm790_vm15, %v4476_v58, %v4475_v12  ;;  %v4596_v12 = vrot.slane %v4337_v62, 6 }
 0xdd6   :  { %4398 = vrot.lane.b32.xlu1 %v8791_v52, %s5227_s8  ;;  %v4329_v52 = vpop.permute.xlu0 %4328 }
 0xdd7   :  { %v4343_v36 = vpop.permute.xlu2 %4342  ;;  %v4492_v61 = vrot.slane %v4329_v52, 2 }
 0xdd8   :  { %v4297_v7 = vpop.permute.xlu1 %4296  ;;  %v4602_v6 = vrot.slane %v4343_v36, 3 }
 0xdd9   :  { %v4478_v60 = vrot.slane %v4297_v7, 2 }
 0xddb   :  { %v4479_v30 = vsel %vm793_vm0, %v4478_v60, %v4477_v34 }
 0xddc   :  { %v9196_v2 = vsel %vm796_vm1, %v4480_v44, %v4479_v30 }
 0xdde   :  { %4380 = vrot.lane.b32.xlu1 %v8708_v33, %s5227_s8  ;;  %v4335_v4 = vpop.permute.xlu0 %4334 }
 0xddf   :  { %v4349_v58 = vpop.permute.xlu2 %4348  ;;  %v4594_v63 = vrot.slane %v4335_v4, 7 }
 0xde0   :  { %v4303_v49 = vpop.permute.xlu1 %4302 }
 0xde1   :  { %v4580_v32 = vrot.slane %v4303_v49, 7 }
 0xde3   :  { %v4581_v16 = vsel %vm778_vm11, %v4580_v32, %v9036_v24 }
 0xde4   :  { %v4583_v25 = vsel %vm781_vm12, %v4582_v13, %v4581_v16 }
 0xde5   :  { %v4585_v39 = vsel %vm784_vm13, %v4584_v38, %v4583_v25 }
 0xde6   :  { %4402 = vrot.lane.b32.xlu1 %v8736_v18, %s5227_s8  ;;  %v4341_v18 = vpop.permute.xlu0 %4340 }
 0xde7   :  { %v4355_v26 = vpop.permute.xlu2 %4354  ;;  %v4600_v44 = vrot.slane %v4341_v18, 4 }
 0xde8   :  { %v4309_v56 = vpop.permute.xlu1 %4308 }
 0xde9   :  { %v4586_v33 = vrot.slane %v4309_v56, 4 }
 0xdeb   :  { %v4587_v23 = vsel %vm787_vm14, %v4586_v33, %v4585_v39 }
 0xdec   :  { %v4589_v42 = vsel %vm790_vm15, %v4588_v22, %v4587_v23 }
 0xded   :  { %v4591_v24 = vsel %vm793_vm0, %v4590_v48, %v4589_v42 }
 0xdee   :  { %4390 = vrot.lane.b32.xlu1 %v8717_v17, %s5227_s8  ;;  %v4347_v15 = vpop.permute.xlu0 %4346 }
 0xdef   :  { %v4361_v32 = vpop.permute.xlu2 %4360  ;;  %v4606_v16 = vrot.slane %v4347_v15, 1 }
 0xdf0   :  { %v4315_v45 = vpop.permute.xlu1 %4314 }
 0xdf1   :  { %v4592_v21 = vrot.slane %v4315_v45, 1 }
 0xdf3   :  { %v9216_v47 = vsel %vm796_vm1, %v4592_v21, %v4591_v24  ;;  %v4500_v24 = vrot.slane %v4355_v26, 5 }
 0xdf6   :  { %4408 = vrot.lane.b32.xlu1 %v8749_v8, %s5227_s8  ;;  %v4494_v8 = vrot.slane %v4331_v3, 1 }
 0xdf7   :  { %v9242_v56 = vpop.permute.xlu2 %4366 }
 0xdf8   :  { %v4321_v31 = vpop.permute.xlu1 %4320 }
 0xdf9   :  { %v4484_v9 = vrot.slane %v4321_v31, 6 }
 0xdfb   :  { %v4485_v0 = vsel %vm781_vm12, %v4484_v9, %v9150_v57  ;;  %v4353_v57 = vpop.permute.xlu0 %4352 }
 0xdfc   :  { %v4487_v17 = vsel %vm784_vm13, %v4486_v29, %v4485_v0  ;;  %v4498_v22 = vrot.slane %v4353_v57, 6 }
 0xdfd   :  { %v4489_v40 = vsel %vm787_vm14, %v4488_v28, %v4487_v17  ;;  %v4506_v28 = vrot.slane %v4361_v32, 2  ;;  %v4678_v17 = vrot.slane %v9196_v2, 4 }
 0xdfe   :  { %4378 = vrot.lane.b32.xlu1 %v8807_v10, %s5226_s0 }
 0xdff   :  { %v9249_v31 = vpop.permute.xlu2 %4372 }
 0xe00   :  { %v4327_v50 = vpop.permute.xlu1 %4326 }
 0xe01   :  { %v4490_v35 = vrot.slane %v4327_v50, 3 }
 0xe03   :  { %v4491_v54 = vsel %vm790_vm15, %v4490_v35, %v4489_v40  ;;  %v4359_v19 = vpop.permute.xlu0 %4358 }
 0xe04   :  { %v4493_v37 = vsel %vm793_vm0, %v4492_v61, %v4491_v54  ;;  %v4504_v21 = vrot.slane %v4359_v19, 3 }
 0xe05   :  { %v9229_v5 = vsel %vm796_vm1, %v4494_v8, %v4493_v37 }
 0xe07   :  { %v4383_v8 = vpop.permute.xlu2 %4382 }
 0xe08   :  { %v4333_v34 = vpop.permute.xlu1 %4332 }
 0xe09   :  { %v4595_v27 = vsel %vm778_vm11, %v4594_v63, %v4333_v34 }
 0xe0a   :  { %v4597_v10 = vsel %vm781_vm12, %v4596_v12, %v4595_v27 }
 0xe0b   :  { %v9236_v25 = vpop.permute.xlu0 %4364 }
 0xe0f   :  { %v4401_v57 = vpop.permute.xlu2 %4400 }
 0xe10   :  { %v4339_v7 = vpop.permute.xlu1 %4338 }
 0xe11   :  { %v4598_v60 = vrot.slane %v4339_v7, 5 }
 0xe13   :  { %v4599_v30 = vsel %vm784_vm13, %v4598_v60, %v4597_v10  ;;  %v9245_v23 = vpop.permute.xlu0 %4370  ;;  %v4510_v60 = vrot.slane %v4383_v8, 7 }
 0xe14   :  { %v4601_v52 = vsel %vm787_vm14, %v4600_v44, %v4599_v30 }
 0xe15   :  { %v4603_v49 = vsel %vm790_vm15, %v4602_v6, %v4601_v52 }
 0xe17   :  { %v4397_v27 = vpop.permute.xlu2 %4396 }
 0xe18   :  { %v4345_v13 = vpop.permute.xlu1 %4344 }
 0xe19   :  { %v4604_v38 = vrot.slane %v4345_v13, 2  ;;  %v9267_v13 = vperm.slane %v9139_v11, %v9841_v20 }
 0xe1b   :  { %v4605_v3 = vsel %vm793_vm0, %v4604_v38, %v4603_v49  ;;  %v9253_v29 = vpop.permute.xlu0 %4376 }
 0xe1c   :  { %v9240_v39 = vsel %vm796_vm1, %v4606_v16, %v4605_v3 }
 0xe1f   :  { %v4405_v19 = vpop.permute.xlu2 %4404 }
 0xe20   :  { %v4351_v4 = vpop.permute.xlu1 %4350 }
 0xe21   :  { %v4496_v33 = vrot.slane %v4351_v4, 7 }
 0xe23   :  { %v4497_v48 = vsel %vm778_vm11, %v4496_v33, %v4349_v58  ;;  %v4385_v54 = vpop.permute.xlu0 %4384 }
 0xe24   :  { %v4499_v42 = vsel %vm781_vm12, %v4498_v22, %v4497_v48  ;;  %v4512_v30 = vrot.slane %v4385_v54, 6  ;;  %v4624_v48 = vrot.slane %v4401_v57, 6  ;;  %v4614_v57 = vrot.slane %v9249_v31, 4 }
 0xe25   :  { %v4501_v18 = vsel %vm784_vm13, %v4500_v24, %v4499_v42  ;;  %v9273_v24 = vperm.slane %v9142_v1, %v9841_v20 }
 0xe27   :  { %v4393_v49 = vpop.permute.xlu2 %4392 }
 0xe28   :  { %v4357_v62 = vpop.permute.xlu1 %4356  ;;  %v4520_v11 = vrot.slane %v4393_v49, 2 }
 0xe29   :  { %v4502_v45 = vrot.slane %v4357_v62, 4  ;;  %v9277_v62 = vperm.slane %v9127_v55, %v9841_v20  ;;  %v4690_v55 = vrot.slane %v9229_v5, 4 }
 0xe2b   :  { %v4503_v36 = vsel %vm787_vm14, %v4502_v45, %v4501_v18  ;;  %v4387_v12 = vpop.permute.xlu0 %4386  ;;  %v4754_v18 = vrot.slane %v9267_v13, 4 }
 0xe2c   :  { %v4505_v9 = vsel %vm790_vm15, %v4504_v21, %v4503_v36  ;;  %v4514_v32 = vrot.slane %v4387_v12, 5  ;;  %v9282_v21 = vperm.slane %v9153_v14, %v9841_v20 }
 0xe2d   :  { %v4507_v40 = vsel %vm793_vm0, %v4506_v28, %v4505_v9 }
 0xe2f   :  { %v4411_v12 = vpop.permute.xlu2 %4410 }
 0xe30   :  { %v4363_v0 = vpop.permute.xlu1 %4362 }
 0xe31   :  { %v4508_v15 = vrot.slane %v4363_v0, 1  ;;  %v4608_v0 = vrot.slane %v9242_v56, 7  ;;  %v4750_v56 = vrot.slane %v9282_v21, 4 }
 0xe33   :  { %v4509_v50 = vsel %vm796_vm1, %v4508_v15, %v4507_v40  ;;  %v4389_v10 = vpop.permute.xlu0 %4388  ;;  %v4628_v40 = vrot.slane %v4405_v19, 4  ;;  %v4609_v8 = vsel %vm778_vm11, %v4608_v0, %v9236_v25 }
 0xe34   :  { %v4676_v35 = vrot.slane %v4509_v50, 4  ;;  %v4679_v61 = vsel %vm1025_vm2, %v4509_v50, %v4678_v17  ;;  %v4516_v16 = vrot.slane %v4389_v10, 4  ;;  %v4612_v10 = vrot.slane %v9245_v23, 5 }
 0xe36   :  { %v4677_v58 = vsel %vm1025_vm2, %v4676_v35, %v9196_v2  ;;  %v4758_v35 = vrot.slane %v9273_v24, 4 }
 0xe37   :  { %v4683_v14 = vperm.slane %v4677_v58, %v9813_v41 }
 0xe38   :  { %v4369_v37 = vpop.permute.xlu1 %4368 }
 0xe39   :  { %v4610_v36 = vrot.slane %v4369_v37, 6 }
 0xe3b   :  { %v4407_v7 = vpop.permute.xlu0 %4406 }
 0xe3c   :  { %v4630_v19 = vrot.slane %v4407_v7, 3 }
 0xe40   :  { %v9261_v63 = vpop.permute.xlu1 %4374 }
 0xe41   :  { %v4616_v49 = vrot.slane %v9261_v63, 3 }
 0xe43   :  { %v4395_v3 = vpop.permute.xlu0 %4394 }
 0xe44   :  { %v4522_v9 = vrot.slane %v4395_v3, 1 }
 0xe48   :  { %v4399_v34 = vpop.permute.xlu1 %4398 }
 0xe49   :  { %v4622_v52 = vrot.slane %v4399_v34, 7  ;;  %v4611_v34 = vsel %vm781_vm12, %v4610_v36, %v4609_v8 }
 0xe4b   :  { %v4623_v4 = vsel %vm778_vm11, %v4622_v52, %v4397_v27  ;;  %v4634_v52 = vrot.slane %v4411_v12, 1 }
 0xe4c   :  { %v4625_v28 = vsel %vm781_vm12, %v4624_v48, %v4623_v4  ;;  %v9321_v48 = vperm.slane %v9188_v43, %v9841_v20 }
 0xe50   :  { %v4381_v26 = vpop.permute.xlu1 %4380 }
 0xe51   :  { %v4511_v6 = vsel %vm778_vm11, %v4510_v60, %v4381_v26  ;;  %v4687_v26 = vperm.slane %v4679_v61, %v9813_v41 }
 0xe52   :  { %v4513_v2 = vsel %vm781_vm12, %v4512_v30, %v4511_v6 }
 0xe53   :  { %v4515_v38 = vsel %vm784_vm13, %v4514_v32, %v4513_v2  ;;  %v4613_v2 = vsel %vm784_vm13, %v4612_v10, %v4611_v34 }
 0xe54   :  { %v4517_v45 = vsel %vm787_vm14, %v4516_v16, %v4515_v38  ;;  %v4802_v38 = vrot.slane %v9240_v39, 4 }
 0xe58   :  { %v4403_v44 = vpop.permute.xlu1 %4402 }
 0xe59   :  { %v4626_v33 = vrot.slane %v4403_v44, 5  ;;  %v4726_v44 = vrot.slane %v4683_v14, 4 }
 0xe5b   :  { %v4627_v15 = vsel %vm784_vm13, %v4626_v33, %v4625_v28  ;;  %v4615_v33 = vsel %vm787_vm14, %v4614_v57, %v4613_v2 }
 0xe5c   :  { %v4629_v27 = vsel %vm787_vm14, %v4628_v40, %v4627_v15  ;;  %v4617_v28 = vsel %vm790_vm15, %v4616_v49, %v4615_v33 }
 0xe5d   :  { %v4631_v32 = vsel %vm790_vm15, %v4630_v19, %v4629_v27  ;;  %v4819_v27 = vperm.slane %v9191_v46, %v9841_v20  ;;  %v4762_v19 = vrot.slane %v9277_v62, 4 }
 0xe60   :  { %v4391_v22 = vpop.permute.xlu1 %4390 }
 0xe61   :  { %v4518_v42 = vrot.slane %v4391_v22, 3 }
 0xe63   :  { %v4519_v1 = vsel %vm790_vm15, %v4518_v42, %v4517_v45 }
 0xe64   :  { %v4521_v17 = vsel %vm793_vm0, %v4520_v11, %v4519_v1 }
 0xe65   :  { %v4523_v50 = vsel %vm796_vm1, %v4522_v9, %v4521_v17  ;;  %v4618_v9 = vrot.slane %v9253_v29, 2 }
 0xe66   :  { %v4688_v54 = vrot.slane %v4523_v50, 4  ;;  %v4691_v37 = vsel %vm1025_vm2, %v4523_v50, %v4690_v55  ;;  %v4738_v55 = vrot.slane %v4687_v26, 4 }
 0xe67   :  { %v4699_v58 = vperm.slane %v4691_v37, %v9813_v41  ;;  %v4619_v8 = vsel %vm793_vm0, %v4618_v9, %v4617_v28 }
 0xe68   :  { %v4689_v25 = vsel %vm1025_vm2, %v4688_v54, %v9229_v5  ;;  %v4409_v60 = vpop.permute.xlu1 %4408 }
 0xe69   :  { %v4632_v6 = vrot.slane %v4409_v60, 2  ;;  %v4695_v31 = vperm.slane %v4689_v25, %v9813_v41  ;;  %v4736_v30 = vrot.slane %v4699_v58, 4  ;;  %v4823_v25 = vperm.slane %v9185_v51, %v9841_v20 }
 0xe6b   :  { %v4633_v23 = vsel %vm793_vm0, %v4632_v6, %v4631_v32  ;;  %v4724_v61 = vrot.slane %v4695_v31, 4  ;;  %v4727_v7 = vsel %vm1025_vm2, %v4695_v31, %v4726_v44  ;;  %v4737_v5 = vsel %vm1025_vm2, %v4736_v30, %v4687_v26 }
 0xe6c   :  { %v4635_v16 = vsel %vm796_vm1, %v4634_v52, %v4633_v23  ;;  %v4735_v3 = vperm.slane %v4727_v7, %v9841_v20  ;;  %v4743_v4 = vperm.slane %v4737_v5, %v9841_v20  ;;  %v4835_v26 = vperm.slane %v9180_v53, %v9841_v20 }
 0xe6d   :  { %v4800_v63 = vrot.slane %v4635_v16, 4  ;;  %v4725_v22 = vsel %vm1025_vm2, %v4724_v61, %v4683_v14  ;;  %v4803_v42 = vsel %vm1025_vm2, %v4635_v16, %v4802_v38  ;;  %v4870_v44 = vrot.slane %v9321_v48, 4 }
 0xe6e   :  { %v4731_v11 = vperm.slane %v4725_v22, %v9841_v20  ;;  %v4752_v45 = vrot.slane %v4735_v3, 4  ;;  %v9326_v36 = vsel %vm1025_vm2, %v4735_v3, %v4754_v18  ;;  %v9331_v1 = vsel %vm1025_vm2, %v4743_v4, %v4758_v35 }
 0xe6f   :  { %v4756_v0 = vrot.slane %v4743_v4, 4  ;;  %v4801_v43 = vsel %vm1025_vm2, %v4800_v63, %v9240_v39  ;;  %v4811_v14 = vperm.slane %v4803_v42, %v9813_v41  ;;  %v4790_v35 = vrot.slane %v9216_v47, 4 }
 0xe70   :  { %v4379_v15 = vpop.permute.xlu1 %4378  ;;  %v4751_v17 = vsel %vm1025_vm2, %v4731_v11, %v4750_v56  ;;  %v4748_v40 = vrot.slane %v4731_v11, 4  ;;  %v4753_v29 = vsel %vm1025_vm2, %v4752_v45, %v9267_v13  ;;  %v4807_v37 = vperm.slane %v4801_v43, %v9813_v41 }
 0xe71   :  { %v4620_v18 = vrot.slane %v4379_v15, 1  ;;  %v4879_v50 = vsel %vm1249_vm4, %v4751_v17, -inf  ;;  %v9346_v54 = vsel %vm1025_vm2, %v4756_v0, %v9273_v24  ;;  %v4739_v13 = vsel %vm1025_vm2, %v4699_v58, %v4738_v55 }
 0xe72   :  { %4880 = vmax.xlane.f32.xlu2 %v4879_v50  ;;  %v4749_v39 = vsel %vm1025_vm2, %v4748_v40, %v9282_v21  ;;  %v4747_v21 = vperm.slane %v4739_v13, %v9841_v20  ;;  %v4848_v10 = vrot.slane %v4811_v14, 4  ;;  %v4836_v31 = vrot.slane %v4807_v37, 4 }
 0xe73   :  { %v4621_v56 = vsel %vm796_vm1, %v4620_v18, %v4619_v8  ;;  %v4876_v57 = vsel %vm1249_vm4, %v4749_v39, -inf  ;;  %v4862_v52 = vrot.slane %v4819_v27, 4  ;;  %v4882_v49 = vsel %vm1249_vm4, %v4753_v29, -inf }
 0xe74   :  { %v4788_v12 = vrot.slane %v4621_v56, 4  ;;  %v4791_v34 = vsel %vm1025_vm2, %v4621_v56, %v4790_v35  ;;  %4877 = vmax.xlane.f32.xlu0 %v4876_v57  ;;  %v4760_v60 = vrot.slane %v4747_v21, 4  ;;  %v4874_v16 = vrot.slane %v4835_v26, 4 }
 0xe75   :  { %v4799_v24 = vperm.slane %v4791_v34, %v9813_v41  ;;  %v4885_v43 = vsel %vm1249_vm4, %v9326_v36, -inf  ;;  %v4891_v17 = vsel %vm1249_vm4, %v9331_v1, -inf }
 0xe76   :  { %v4789_v58 = vsel %vm1025_vm2, %v4788_v12, %v9216_v47  ;;  %v4761_v2 = vsel %vm1025_vm2, %v4760_v60, %v9277_v62  ;;  %v4763_v47 = vsel %vm1025_vm2, %v4747_v21, %v4762_v19  ;;  %v4866_v62 = vrot.slane %v4823_v25, 4 }
 0xe77   :  { %v4795_v46 = vperm.slane %v4789_v58, %v9813_v41  ;;  %v4850_v6 = vrot.slane %v4799_v24, 4  ;;  %v4849_v30 = vsel %vm1025_vm2, %v4848_v10, %v4799_v24  ;;  %v4894_v36 = vsel %vm1249_vm4, %v4761_v2, -inf }
 0xe78   :  { %v4855_v53 = vperm.slane %v4849_v30, %v9841_v20  ;;  %v4897_v1 = vsel %vm1249_vm4, %v4763_v47, -inf }
 0xe79   :  { %v4837_v51 = vsel %vm1025_vm2, %v4836_v31, %v4795_v46  ;;  %v4838_v32 = vrot.slane %v4795_v46, 4  ;;  %v4851_v23 = vsel %vm1025_vm2, %v4811_v14, %v4850_v6  ;;  %v4888_v14 = vsel %vm1249_vm4, %v9346_v54, -inf }
 0xe7a   :  { %4883 = vmax.xlane.f32.xlu2 %v4882_v49  ;;  %v4843_v41 = vperm.slane %v4837_v51, %v9841_v20  ;;  %v4868_v61 = vrot.slane %v4855_v53, 4  ;;  %v4859_v7 = vperm.slane %v4851_v23, %v9841_v20  ;;  %v4871_v5 = vsel %vm1025_vm2, %v4855_v53, %v4870_v44 }
 0xe7b   :  { %v4839_v38 = vsel %vm1025_vm2, %v4807_v37, %v4838_v32  ;;  %v4915_v50 = vsel %vm1249_vm4, %v4871_v5, -inf }
 0xe7c   :  { %v4863_v3 = vsel %vm1025_vm2, %v4843_v41, %v4862_v52  ;;  %v4860_v4 = vrot.slane %v4843_v41, 4  ;;  %v4847_v33 = vperm.slane %v4839_v38, %v9841_v20  ;;  %v4869_v63 = vsel %vm1025_vm2, %v4868_v61, %v9321_v48 }
 0xe7d   :  { %v4903_v22 = vsel %vm1249_vm4, %v4863_v3, -inf  ;;  %v4872_v42 = vrot.slane %v4859_v7, 4  ;;  %v4875_v11 = vsel %vm1025_vm2, %v4859_v7, %v4874_v16  ;;  %v4912_v40 = vsel %vm1249_vm4, %v4869_v63, -inf }
 0xe7e   :  { %4904 = vmax.xlane.f32.xlu0 %v4903_v22  ;;  %v4861_v45 = vsel %vm1025_vm2, %v4860_v4, %v4819_v27  ;;  %v4867_v9 = vsel %vm1025_vm2, %v4847_v33, %v4866_v62  ;;  %v4864_v28 = vrot.slane %v4847_v33, 4  ;;  %v4921_v29 = vsel %vm1249_vm4, %v4875_v11, -inf }
 0xe7f   :  { %v4900_v0 = vsel %vm1249_vm4, %v4861_v45, -inf  ;;  %v4873_v55 = vsel %vm1025_vm2, %v4872_v42, %v4835_v26  ;;  %v4909_v48 = vsel %vm1249_vm4, %v4867_v9, -inf }
 0xe80   :  { %4901 = vmax.xlane.f32.xlu1 %v4900_v0  ;;  %v4865_v20 = vsel %vm1025_vm2, %v4864_v28, %v4823_v25  ;;  %v4918_v18 = vsel %vm1249_vm4, %v4873_v55, -inf }
 0xe81   :  { %v4906_v15 = vsel %vm1249_vm4, %v4865_v20, -inf }
 0xe82   :  { %4910 = vmax.xlane.f32.xlu2 %v4909_v48 }
 0xe86   :  { %4886 = vmax.xlane.f32.xlu0 %v4885_v43 }
 0xe88   :  { %4907 = vmax.xlane.f32.xlu1 %v4906_v15 }
 0xe8a   :  { %4892 = vmax.xlane.f32.xlu2 %v4891_v17 }
 0xe8e   :  { %4913 = vmax.xlane.f32.xlu0 %v4912_v40 }
 0xe90   :  { %4889 = vmax.xlane.f32.xlu1 %v4888_v14 }
 0xe92   :  { %4919 = vmax.xlane.f32.xlu2 %v4918_v18 }
 0xe96   :  { %4895 = vmax.xlane.f32.xlu0 %v4894_v36 }
 0xe98   :  { %4916 = vmax.xlane.f32.xlu1 %v4915_v50 }
 0xe9e   :  { %4922 = vmax.xlane.f32.xlu0 %v4921_v29 }
 0xea0   :  { %4898 = vmax.xlane.f32.xlu1 %v4897_v1 }
 0xee5   :  { %v4881_v35 = vpop.xlane.xlu2 %4880 }
 0xee6   :  { %v4941_v6 = vperm.slane %v4881_v35, %v9848_v59 }
 0xee7   :  { %v4878_v8 = vpop.xlane.xlu0 %4877 }
 0xee8   :  { %v4940_v19 = vperm.slane %v4878_v8, %v9848_v59 }
 0xeea   :  { %v4956_v2 = vsel %vm778_vm11, %v4941_v6, %v4940_v19 }
 0xeed   :  { %v4884_v39 = vpop.xlane.xlu2 %4883 }
 0xeee   :  { %v4942_v25 = vperm.slane %v4884_v39, %v9848_v59 }
 0xef0   :  { %v4957_v51 = vsel %vm781_vm12, %v4942_v25, %v4956_v2 }
 0xef1   :  { %v4905_v54 = vpop.xlane.xlu0 %4904 }
 0xef2   :  { %v4949_v24 = vperm.slane %v4905_v54, %v9848_v59 }
 0xef3   :  { %v4902_v37 = vpop.xlane.xlu1 %4901 }
 0xef4   :  { %v4948_v21 = vperm.slane %v4902_v37, %v9848_v59 }
 0xef5   :  { %v4911_v57 = vpop.xlane.xlu2 %4910 }
 0xef6   :  { %v4963_v58 = vsel %vm778_vm11, %v4949_v24, %v4948_v21  ;;  %v4951_v31 = vperm.slane %v4911_v57, %v9848_v59 }
 0xef9   :  { %v4887_v56 = vpop.xlane.xlu0 %4886 }
 0xefa   :  { %v4943_v30 = vperm.slane %v4887_v56, %v9848_v59 }
 0xefb   :  { %v4908_v13 = vpop.xlane.xlu1 %4907 }
 0xefc   :  { %v4950_v10 = vperm.slane %v4908_v13, %v9848_v59  ;;  %v4958_v23 = vsel %vm784_vm13, %v4943_v30, %v4957_v51 }
 0xefd   :  { %v4893_v27 = vpop.xlane.xlu2 %4892 }
 0xefe   :  { %v4964_v60 = vsel %vm781_vm12, %v4950_v10, %v4963_v58  ;;  %v4945_v62 = vperm.slane %v4893_v27, %v9848_v59 }
 0xeff   :  { %v4965_v47 = vsel %vm784_vm13, %v4951_v31, %v4964_v60 }
 0xf01   :  { %v4914_v12 = vpop.xlane.xlu0 %4913 }
 0xf02   :  { %v4952_v44 = vperm.slane %v4914_v12, %v9848_v59 }
 0xf03   :  { %v4890_v34 = vpop.xlane.xlu1 %4889 }
 0xf04   :  { %v4944_v53 = vperm.slane %v4890_v34, %v9848_v59  ;;  %v4966_v32 = vsel %vm787_vm14, %v4952_v44, %v4965_v47 }
 0xf05   :  { %v4920_v49 = vpop.xlane.xlu2 %4919 }
 0xf06   :  { %v4959_v61 = vsel %vm787_vm14, %v4944_v53, %v4958_v23  ;;  %v4954_v7 = vperm.slane %v4920_v49, %v9848_v59 }
 0xf07   :  { %v4960_v33 = vsel %vm790_vm15, %v4945_v62, %v4959_v61 }
 0xf09   :  { %v4896_v26 = vpop.xlane.xlu0 %4895 }
 0xf0a   :  { %v4946_v5 = vperm.slane %v4896_v26, %v9848_v59 }
 0xf0b   :  { %v4917_v46 = vpop.xlane.xlu1 %4916 }
 0xf0c   :  { %v4953_v52 = vperm.slane %v4917_v46, %v9848_v59  ;;  %v4961_v42 = vsel %vm793_vm0, %v4946_v5, %v4960_v33 }
 0xf0e   :  { %v4967_v41 = vsel %vm790_vm15, %v4953_v52, %v4966_v32 }
 0xf0f   :  { %v4968_v3 = vsel %vm793_vm0, %v4954_v7, %v4967_v41 }
 0xf11   :  { %v4923_v38 = vpop.xlane.xlu0 %4922 }
 0xf12   :  { %v4955_v16 = vperm.slane %v4923_v38, %v9848_v59 }
 0xf13   :  { %v4899_v4 = vpop.xlane.xlu1 %4898 }
 0xf14   :  { %v4969_v63 = vsel %vm796_vm1, %v4955_v16, %v4968_v3  ;;  %v4947_v22 = vperm.slane %v4899_v4, %v9848_v59 }
 0xf15   :  { %4974 = vst.msk [vmem:[#allocation13 + $0x38] sm:$0xff] %vm1348_vm5, %v4969_v63 }
 0xf16   :  { %v4962_v11 = vsel %vm796_vm1, %v4947_v22, %v4961_v42 }
 0xf17   :  { %4973 = vst.msk [vmem:[#allocation13 + $0x18] sm:$0xff] %vm1348_vm5, %v4962_v11 }
 0xf18   :  { %4987 = dma.vmem_to_hbm [thread:$0]  %s4980_s3, 1024, %s4982_s7, [#allocation5], %s5213_s27, %s5213_s27, %s5214_s28  }
 0xf19   :  { %5209 = dma.done.wait [#allocation5], 1024  }
 0xf1a   :  { %5210 = vsyncadd [#allocation5], 4294966272 }
 0xf1b   :  { %4992 = vsyncpa [#allocation4], 1 }
 0xf1c   :  { %4993 = vsyncpa [#allocation5], 1 }
 0xf1d   :  { %4994 = vsyncpa [#allocation6], 1 }
 0xf1e   :  { %4995 = vsyncpa [#allocation7], 1 }
 0xf1f   :  { %4996 = vsyncpa [#allocation11], 1 }

</bundles_post_ra>
